<compile_context>
chip_gen: v6e
topology: v6e:2x2x1
jax: 0.10.0
libtpu: 0.0.40
codegen_flags: <defaults>
</compile_context>

<pallas_src>
import functools
import math

import jax
import jax.numpy as jnp
from jax.experimental import pallas as pl
from jax.experimental.pallas import tpu as pltpu

# ----------------------------- model config (small, synthetic) ---------------
EMBED_DIM = 32          # shared CLIP embedding dim
TEXT_WIDTH = 32         # ctx_dim (text transformer width)
VIS_WIDTH = 32          # vision transformer width
N_HEADS = 4
HEAD_DIM = TEXT_WIDTH // N_HEADS
N_LAYERS = 2
N_CLS = 4               # number of classnames
N_CTX = 2               # learnable text context tokens
TEXT_SEQ = 8            # tokenized prompt length
IMG_SIZE = 16
PATCH = 8
GRID = IMG_SIZE // PATCH
VIS_SEQ = GRID * GRID + 1   # patches + CLS token
BATCH = 2

NEG_INF = -1e9

_LAYER_KEYS = ("ln1_g", "ln1_b", "wqkv", "bqkv", "wo", "bo",
               "ln2_g", "ln2_b", "wfc", "bfc", "wpr", "bpr")


# ----------------------------- in-kernel helpers ------------------------------
def _mm(a, b):
    """MXU matmul: bf16 operands, f32 accumulate."""
    return jnp.dot(a.astype(jnp.bfloat16), b.astype(jnp.bfloat16),
                   preferred_element_type=jnp.float32)


def _mm_nt(a, b):
    """a @ b.T without materializing a transpose (contract last dims)."""
    return jax.lax.dot_general(
        a.astype(jnp.bfloat16), b.astype(jnp.bfloat16),
        (((1,), (1,)), ((), ())), preferred_element_type=jnp.float32)


def _layernorm(x, g, b):
    """f32 LayerNorm (biased variance, eps=1e-5), g/b shaped (1, D)."""
    mean = jnp.mean(x, axis=-1, keepdims=True)
    var = jnp.mean((x - mean) ** 2, axis=-1, keepdims=True)
    return (x - mean) * jax.lax.rsqrt(var + 1e-5) * g + b


def _res_block(x, mask, ln1_g, ln1_b, wqkv, bqkv, wo, bo,
               ln2_g, ln2_b, wfc, bfc, wpr, bpr, *, d, heads):
    """CLIP ResidualAttentionBlock on a (rows, d) activation kept in vregs.

    `mask` is an additive (rows, rows) mask that is block-diagonal per batch
    element (and causal within a block for the text encoder), so batch can be
    folded into rows with no cross-batch attention leakage.
    """
    dh = d // heads
    scale = 1.0 / math.sqrt(dh)

    # ---- attention ----
    h = _layernorm(x, ln1_g, ln1_b)
    qkv = _mm(h, wqkv) + bqkv                               # (R, 3D)
    acc = None
    for hd in range(heads):                                 # static unroll, H=4
        lo = hd * dh
        q = qkv[:, lo:lo + dh]                              # (R, dh)
        k = qkv[:, d + lo:d + lo + dh]
        v = qkv[:, 2 * d + lo:2 * d + lo + dh]
        s = _mm_nt(q, k) * scale + mask                     # (R, R) f32
        s = s - jnp.max(s, axis=-1, keepdims=True)
        p = jnp.exp(s)
        p = p * pl.reciprocal(jnp.sum(p, axis=-1, keepdims=True), approx=True)
        oh = _mm(p, v)                                      # (R, dh)
        contrib = _mm(oh, wo[lo:lo + dh, :])                # (R, D) per-head out-proj
        acc = contrib if acc is None else acc + contrib
    x = x + acc + bo

    # ---- MLP (QuickGELU) ----
    h = _layernorm(x, ln2_g, ln2_b)
    h = _mm(h, wfc) + bfc
    h = h * jax.nn.sigmoid(1.702 * h)                       # QuickGELU
    x = x + _mm(h, wpr) + bpr
    return x


# ----------------------------- fused encoder kernels --------------------------
def _text_encoder_kernel(*refs, n_layers, d, heads):
    (x0_ref, mask_ref, gather_ref,
     ln1_g, ln1_b, wqkv, bqkv, wo, bo, ln2_g, ln2_b, wfc, bfc, wpr, bpr,
     lnf_g, lnf_b, proj_ref, out_ref) = refs

    x = x0_ref[...]                                         # (C*S, D) f32
    mask = mask_ref[...]
    for l in range(n_layers):                               # static unroll (2 layers)
        x = _res_block(x, mask,
                       ln1_g[l], ln1_b[l], wqkv[l], bqkv[l], wo[l], bo[l],
                       ln2_g[l], ln2_b[l], wfc[l], bfc[l], wpr[l], bpr[l],
                       d=d, heads=heads)
    x = _layernorm(x, lnf_g[...], lnf_b[...])
    pooled = _mm(gather_ref[...], x)                        # EOT gather as one-hot matmul
    out_ref[...] = _mm(pooled, proj_ref[...]).astype(out_ref.dtype)


def _vision_encoder_kernel(*refs, n_layers, d, heads):
    (patches_ref, convw_ref, base_ref, scat_ref, mask_ref, lnpre_g, lnpre_b,
     ln1_g, ln1_b, wqkv, bqkv, wo, bo, ln2_g, ln2_b, wfc, bfc, wpr, bpr,
     lnpost_g, lnpost_b, clsg_ref, proj_ref, out_ref) = refs

    pe = _mm(patches_ref[...], convw_ref[...])              # patch "conv" (B*GG, W)
    # base = tiled pos-emb (+ class emb at CLS rows); scatter places patch embeds.
    x = base_ref[...] + _mm(scat_ref[...], pe)              # (B*VIS_SEQ, W)
    x = _layernorm(x, lnpre_g[...], lnpre_b[...])
    mask = mask_ref[...]
    for l in range(n_layers):
        x = _res_block(x, mask,
                       ln1_g[l], ln1_b[l], wqkv[l], bqkv[l], wo[l], bo[l],
                       ln2_g[l], ln2_b[l], wfc[l], bfc[l], wpr[l], bpr[l],
                       d=d, heads=heads)
    pooled = _mm(clsg_ref[...], x)                          # CLS rows (B, W)
    pooled = _layernorm(pooled, lnpost_g[...], lnpost_b[...])
    out_ref[...] = _mm(pooled, proj_ref[...]).astype(out_ref.dtype)


def _clip_logits_kernel(img_ref, txt_ref, scale_ref, imgn_ref, txtn_ref, logit_ref):
    img = img_ref[...]
    txt = txt_ref[...]
    img_n = img * jax.lax.rsqrt(jnp.sum(img * img, axis=-1, keepdims=True))
    txt_n = txt * jax.lax.rsqrt(jnp.sum(txt * txt, axis=-1, keepdims=True))
    scale = jnp.exp(scale_ref[0, 0])
    imgn_ref[...] = img_n
    txtn_ref[...] = txt_n
    logit_ref[...] = (scale * jax.lax.dot_general(
        img_n, txt_n, (((1,), (1,)), ((), ())),
        preferred_element_type=jnp.float32)).astype(logit_ref.dtype)


# ----------------------------- pallas_call wrappers ---------------------------
def _spec(shape):
    nd = len(shape)
    return pl.BlockSpec(shape, lambda i, _nd=nd: (0,) * _nd)


def pallas_text_encoder(x0, mask, gather, tparams, proj):
    ins = ([x0, mask, gather]
           + [tparams[k] for k in _LAYER_KEYS]
           + [tparams["lnf_g"], tparams["lnf_b"], proj])
    kernel = functools.partial(_text_encoder_kernel, n_layers=N_LAYERS,
                               d=TEXT_WIDTH, heads=N_HEADS)
    return pl.pallas_call(
        kernel,
        out_shape=jax.ShapeDtypeStruct((N_CLS, EMBED_DIM), jnp.float32),
        grid=(1,),
        in_specs=[_spec(a.shape) for a in ins],
        out_specs=_spec((N_CLS, EMBED_DIM)),
        compiler_params=pltpu.CompilerParams(dimension_semantics=("arbitrary",)),
    )(*ins)


def pallas_vision_encoder(patches, base, scatter, mask, cls_gather, params):
    vp = params["vis_layers"]
    ins = ([patches, params["vis_conv_w"], base, scatter, mask,
            params["vis_ln_pre_g"], params["vis_ln_pre_b"]]
           + [vp[k] for k in _LAYER_KEYS]
           + [vp["lnf_g"], vp["lnf_b"], cls_gather, params["vis_proj"]])
    kernel = functools.partial(_vision_encoder_kernel, n_layers=N_LAYERS,
                               d=VIS_WIDTH, heads=N_HEADS)
    B = cls_gather.shape[0]
    return pl.pallas_call(
        kernel,
        out_shape=jax.ShapeDtypeStruct((B, EMBED_DIM), jnp.float32),
        grid=(1,),
        in_specs=[_spec(a.shape) for a in ins],
        out_specs=_spec((B, EMBED_DIM)),
        compiler_params=pltpu.CompilerParams(dimension_semantics=("arbitrary",)),
    )(*ins)


def pallas_clip_logits(img, txt, logit_scale):
    B, D = img.shape
    C = txt.shape[0]
    scale_arr = jnp.asarray(logit_scale, jnp.float32).reshape(1, 1)
    return pl.pallas_call(
        _clip_logits_kernel,
        out_shape=(jax.ShapeDtypeStruct((B, D), jnp.float32),
                   jax.ShapeDtypeStruct((C, D), jnp.float32),
                   jax.ShapeDtypeStruct((B, C), jnp.float32)),
        grid=(1,),
        in_specs=[_spec((B, D)), _spec((C, D)),
                  pl.BlockSpec((1, 1), lambda i: (0, 0),
                               memory_space=pltpu.MemorySpace.SMEM)],
        out_specs=(_spec((B, D)), _spec((C, D)), _spec((B, C))),
        compiler_params=pltpu.CompilerParams(dimension_semantics=("arbitrary",)),
    )(img, txt, scale_arr)


# ----------------------------- full CustomCLIP_teacher forward ---------------
def custom_clip_teacher_forward(params, image, tokenized_prompts):
    # --- VLPromptLearner.forward: cat([prefix, ctx, suffix], dim=1) (JAX glue) ---
    ctx = jnp.broadcast_to(params["ctx"][None], (N_CLS, N_CTX, TEXT_WIDTH))
    prompts = jnp.concatenate(
        [params["token_prefix"], ctx, params["token_suffix"]], axis=1)    # (C,S,D)

    # --- TextEncoder: one fused Pallas kernel ---
    txt_x0 = (prompts + params["text_pos_emb"][None]).reshape(
        N_CLS * TEXT_SEQ, TEXT_WIDTH)
    # classes folded into rows -> block-diagonal causal mask (CLIP causal per class)
    causal01 = jnp.tril(jnp.ones((TEXT_SEQ, TEXT_SEQ), jnp.float32))
    txt_mask = jnp.where(
        jnp.kron(jnp.eye(N_CLS, dtype=jnp.float32), causal01) > 0.0, 0.0, NEG_INF)
    eot = jnp.argmax(tokenized_prompts, axis=-1)                          # EOT position
    gather = jax.nn.one_hot(jnp.arange(N_CLS) * TEXT_SEQ + eot,
                            N_CLS * TEXT_SEQ, dtype=jnp.float32)          # (C, C*S)
    text_features = pallas_text_encoder(txt_x0, txt_mask, gather,
                                        params["text_layers"],
                                        params["text_projection"])        # (C, EMBED)

    # --- image encoder (CLIP VisionTransformer): one fused Pallas kernel ---
    # image is NCHW; stride-8 patch conv == patch matmul (done inside the kernel).
    B = image.shape[0]
    patches = image.reshape(B, 3, GRID, PATCH, GRID, PATCH)
    patches = patches.transpose(0, 2, 4, 1, 3, 5).reshape(
        B * GRID * GRID, 3 * PATCH * PATCH)
    rows = B * VIS_SEQ
    # base[row] = pos_emb (+ class embedding on CLS rows); patch embeds scattered in-kernel
    base = jnp.tile(params["vis_pos_emb"], (B, 1))                        # (rows, W)
    cls_rows = jnp.arange(B) * VIS_SEQ
    base = base.at[cls_rows].add(params["vis_class_emb"][None, :])
    row_is_patch = (jnp.arange(rows) % VIS_SEQ) != 0
    patch_idx = jnp.cumsum(row_is_patch.astype(jnp.int32)) - 1
    scatter = jnp.where(row_is_patch[:, None],
                        jax.nn.one_hot(patch_idx, B * GRID * GRID,
                                       dtype=jnp.float32),
                        0.0)                                              # (rows, B*GG)
    vis_mask = jnp.where(
        jnp.kron(jnp.eye(B, dtype=jnp.float32),
                 jnp.ones((VIS_SEQ, VIS_SEQ), jnp.float32)) > 0.0, 0.0, NEG_INF)
    cls_gather = jax.nn.one_hot(cls_rows, rows, dtype=jnp.float32)        # (B, rows)
    image_features = pallas_vision_encoder(patches, base, scatter, vis_mask,
                                           cls_gather, params)            # (B, EMBED)

    # --- normalize + logit_scale.exp() * img @ txt.T, fused in one kernel ---
    img_n, txt_n, logits = pallas_clip_logits(image_features, text_features,
                                              params["logit_scale"])
    return img_n, txt_n, logits


# ----------------------------- deterministic parameter init ------------------
def init_encoder_layers(key, width, n_layers):
    hidden = width * 4

    def one(k):
        k0, k1, k2, k3 = jax.random.split(k, 4)
        return dict(
            ln1_g=jnp.ones((1, width), jnp.float32),
            ln1_b=jnp.zeros((1, width), jnp.float32),
            wqkv=0.02 * jax.random.normal(k0, (width, 3 * width), jnp.float32),
            bqkv=jnp.zeros((1, 3 * width), jnp.float32),
            wo=0.02 * jax.random.normal(k1, (width, width), jnp.float32),
            bo=jnp.zeros((1, width), jnp.float32),
            ln2_g=jnp.ones((1, width), jnp.float32),
            ln2_b=jnp.zeros((1, width), jnp.float32),
            wfc=0.02 * jax.random.normal(k2, (width, hidden), jnp.float32),
            bfc=jnp.zeros((1, hidden), jnp.float32),
            wpr=0.02 * jax.random.normal(k3, (hidden, width), jnp.float32),
            bpr=jnp.zeros((1, width), jnp.float32),
        )

    layers = [one(k) for k in jax.random.split(key, n_layers)]
    return {k: jnp.stack([lyr[k] for lyr in layers], axis=0) for k in layers[0]}


def init_params(key):
    keys = jax.random.split(key, 12)
    n_suffix = TEXT_SEQ - 1 - N_CTX

    text_layers = init_encoder_layers(keys[4], TEXT_WIDTH, N_LAYERS)
    text_layers["lnf_g"] = jnp.ones((1, TEXT_WIDTH), jnp.float32)
    text_layers["lnf_b"] = jnp.zeros((1, TEXT_WIDTH), jnp.float32)

    vis_layers = init_encoder_layers(keys[9], VIS_WIDTH, N_LAYERS)
    vis_layers["lnf_g"] = jnp.ones((1, VIS_WIDTH), jnp.float32)   # ln_post
    vis_layers["lnf_b"] = jnp.zeros((1, VIS_WIDTH), jnp.float32)

    params = dict(
        # prompt learner (ctx learnable; prefix/suffix frozen token-embedding buffers
        # -> synthetic deterministic values here)
        ctx=0.02 * jax.random.normal(keys[0], (N_CTX, TEXT_WIDTH), jnp.float32),
        token_prefix=0.02 * jax.random.normal(keys[1], (N_CLS, 1, TEXT_WIDTH), jnp.float32),
        token_suffix=0.02 * jax.random.normal(keys[2], (N_CLS, n_suffix, TEXT_WIDTH), jnp.float32),
        # text encoder
        text_pos_emb=0.01 * jax.random.normal(keys[3], (TEXT_SEQ, TEXT_WIDTH), jnp.float32),
        text_layers=text_layers,
        text_projection=0.02 * jax.random.normal(keys[5], (TEXT_WIDTH, EMBED_DIM), jnp.float32),
        # vision encoder
        vis_conv_w=0.02 * jax.random.normal(keys[6], (3 * PATCH * PATCH, VIS_WIDTH), jnp.float32),
        vis_class_emb=0.02 * jax.random.normal(keys[7], (VIS_WIDTH,), jnp.float32),
        vis_pos_emb=0.01 * jax.random.normal(keys[8], (VIS_SEQ, VIS_WIDTH), jnp.float32),
        vis_ln_pre_g=jnp.ones((1, VIS_WIDTH), jnp.float32),
        vis_ln_pre_b=jnp.zeros((1, VIS_WIDTH), jnp.float32),
        vis_layers=vis_layers,
        vis_proj=0.02 * jax.random.normal(keys[10], (VIS_WIDTH, EMBED_DIM), jnp.float32),
        # CLIP logit scale (log(1/0.07), as in CLIP init)
        logit_scale=jnp.asarray(math.log(1.0 / 0.07), jnp.float32),
    )
    return params


def build_tokenized_prompts():
    # [SOT, ctx..., classname_tok, '.', EOT, pad...]  (argmax -> EOT position)
    # TODO(synk): real clip.tokenize / token_embedding replaced by deterministic
    # synthetic tokens + embeddings (no tokenizer on-device).
    rows = []
    for i in range(N_CLS):
        row = [49406] + [343] * N_CTX + [100 + i, 269, 49407]
        row = row + [0] * (TEXT_SEQ - len(row))
        rows.append(row)
    return jnp.asarray(rows, jnp.int32)


# ----------------------------- main -------------------------------------------
if __name__ == "__main__":
    key = jax.random.PRNGKey(0)
    k_params, k_img = jax.random.split(key)
    params = init_params(k_params)
    image = jax.random.normal(k_img, (BATCH, 3, IMG_SIZE, IMG_SIZE), jnp.float32)
    tokenized_prompts = build_tokenized_prompts()

    fwd = jax.jit(custom_clip_teacher_forward)
    img_f, txt_f, logits = fwd(params, image, tokenized_prompts)
    jax.block_until_ready((img_f, txt_f, logits))

    assert img_f.shape == (BATCH, EMBED_DIM)
    assert txt_f.shape == (N_CLS, EMBED_DIM)
    assert logits.shape == (BATCH, N_CLS)
    assert bool(jnp.all(jnp.isfinite(logits)))
    # features returned by the fused kernel are L2-normalized
    assert bool(jnp.allclose(jnp.linalg.norm(img_f, axis=-1), 1.0, atol=1e-4))
    assert bool(jnp.allclose(jnp.linalg.norm(txt_f, axis=-1), 1.0, atol=1e-4))

    print("KERNEL_OK")
</pallas_src>

<mosaic_0001>
module attributes {stable_mosaic.version = 11 : i64} {
  func.func @_vision_encoder_kernel(%arg0: i32, %arg1: memref<8x192xf32, #tpu.memory_space<vmem>>, %arg2: memref<192x32xf32, #tpu.memory_space<vmem>>, %arg3: memref<10x32xf32, #tpu.memory_space<vmem>>, %arg4: memref<10x8xf32, #tpu.memory_space<vmem>>, %arg5: memref<10x10xf32, #tpu.memory_space<vmem>>, %arg6: memref<1x32xf32, #tpu.memory_space<vmem>>, %arg7: memref<1x32xf32, #tpu.memory_space<vmem>>, %arg8: memref<2x1x32xf32, #tpu.memory_space<vmem>>, %arg9: memref<2x1x32xf32, #tpu.memory_space<vmem>>, %arg10: memref<2x32x96xf32, #tpu.memory_space<vmem>>, %arg11: memref<2x1x96xf32, #tpu.memory_space<vmem>>, %arg12: memref<2x32x32xf32, #tpu.memory_space<vmem>>, %arg13: memref<2x1x32xf32, #tpu.memory_space<vmem>>, %arg14: memref<2x1x32xf32, #tpu.memory_space<vmem>>, %arg15: memref<2x1x32xf32, #tpu.memory_space<vmem>>, %arg16: memref<2x32x128xf32, #tpu.memory_space<vmem>>, %arg17: memref<2x1x128xf32, #tpu.memory_space<vmem>>, %arg18: memref<2x128x32xf32, #tpu.memory_space<vmem>>, %arg19: memref<2x1x32xf32, #tpu.memory_space<vmem>>, %arg20: memref<1x32xf32, #tpu.memory_space<vmem>>, %arg21: memref<1x32xf32, #tpu.memory_space<vmem>>, %arg22: memref<2x10xf32, #tpu.memory_space<vmem>>, %arg23: memref<32x32xf32, #tpu.memory_space<vmem>>, %arg24: memref<2x32xf32, #tpu.memory_space<vmem>>) attributes {dimension_semantics = [#tpu.dimension_semantics<arbitrary>], iteration_bounds = array<i64: 1>, scalar_prefetch = 0 : i64, scratch_operands = 0 : i64, tpu.core_type = #tpu.core_type<tc>, window_params = [{pipeline_mode = #tpu.pipeline_mode<synchronous>, transform_indices = @transform_0, window_bounds = array<i64: 8, 192>}, {pipeline_mode = #tpu.pipeline_mode<synchronous>, transform_indices = @transform_1, window_bounds = array<i64: 192, 32>}, {pipeline_mode = #tpu.pipeline_mode<synchronous>, transform_indices = @transform_2, window_bounds = array<i64: 10, 32>}, {pipeline_mode = #tpu.pipeline_mode<synchronous>, transform_indices = @transform_3, window_bounds = array<i64: 10, 8>}, {pipeline_mode = #tpu.pipeline_mode<synchronous>, transform_indices = @transform_4, window_bounds = array<i64: 10, 10>}, {pipeline_mode = #tpu.pipeline_mode<synchronous>, transform_indices = @transform_5, window_bounds = array<i64: 1, 32>}, {pipeline_mode = #tpu.pipeline_mode<synchronous>, transform_indices = @transform_6, window_bounds = array<i64: 1, 32>}, {pipeline_mode = #tpu.pipeline_mode<synchronous>, transform_indices = @transform_7, window_bounds = array<i64: 2, 1, 32>}, {pipeline_mode = #tpu.pipeline_mode<synchronous>, transform_indices = @transform_8, window_bounds = array<i64: 2, 1, 32>}, {pipeline_mode = #tpu.pipeline_mode<synchronous>, transform_indices = @transform_9, window_bounds = array<i64: 2, 32, 96>}, {pipeline_mode = #tpu.pipeline_mode<synchronous>, transform_indices = @transform_10, window_bounds = array<i64: 2, 1, 96>}, {pipeline_mode = #tpu.pipeline_mode<synchronous>, transform_indices = @transform_11, window_bounds = array<i64: 2, 32, 32>}, {pipeline_mode = #tpu.pipeline_mode<synchronous>, transform_indices = @transform_12, window_bounds = array<i64: 2, 1, 32>}, {pipeline_mode = #tpu.pipeline_mode<synchronous>, transform_indices = @transform_13, window_bounds = array<i64: 2, 1, 32>}, {pipeline_mode = #tpu.pipeline_mode<synchronous>, transform_indices = @transform_14, window_bounds = array<i64: 2, 1, 32>}, {pipeline_mode = #tpu.pipeline_mode<synchronous>, transform_indices = @transform_15, window_bounds = array<i64: 2, 32, 128>}, {pipeline_mode = #tpu.pipeline_mode<synchronous>, transform_indices = @transform_16, window_bounds = array<i64: 2, 1, 128>}, {pipeline_mode = #tpu.pipeline_mode<synchronous>, transform_indices = @transform_17, window_bounds = array<i64: 2, 128, 32>}, {pipeline_mode = #tpu.pipeline_mode<synchronous>, transform_indices = @transform_18, window_bounds = array<i64: 2, 1, 32>}, {pipeline_mode = #tpu.pipeline_mode<synchronous>, transform_indices = @transform_19, window_bounds = array<i64: 1, 32>}, {pipeline_mode = #tpu.pipeline_mode<synchronous>, transform_indices = @transform_20, window_bounds = array<i64: 1, 32>}, {pipeline_mode = #tpu.pipeline_mode<synchronous>, transform_indices = @transform_21, window_bounds = array<i64: 2, 10>}, {pipeline_mode = #tpu.pipeline_mode<synchronous>, transform_indices = @transform_22, window_bounds = array<i64: 32, 32>}, {pipeline_mode = #tpu.pipeline_mode<synchronous>, transform_indices = @transform_23, window_bounds = array<i64: 2, 32>}]} {
    %c0 = arith.constant 0 : index
    %c0_0 = arith.constant 0 : index
    %0 = vector.load %arg1[%c0, %c0_0] : memref<8x192xf32, #tpu.memory_space<vmem>>, vector<8x192xf32>
    %c0_1 = arith.constant 0 : index
    %c0_2 = arith.constant 0 : index
    %1 = vector.load %arg2[%c0_1, %c0_2] : memref<192x32xf32, #tpu.memory_space<vmem>>, vector<192x32xf32>
    %2 = arith.truncf %0 : vector<8x192xf32> to vector<8x192xbf16>
    %3 = arith.truncf %1 : vector<192x32xf32> to vector<192x32xbf16>
    %cst = arith.constant dense<0.000000e+00> : vector<8x32xf32>
    %4 = tpu.matmul %2, %3, %cst {dimension_numbers = #tpu.dot_dimension_numbers<[1], [0], [0], [1], [0, 0, 1, 1], [], []>} : vector<8x192xbf16>, vector<192x32xbf16>, vector<8x32xf32> -> vector<8x32xf32>
    %c0_3 = arith.constant 0 : index
    %c0_4 = arith.constant 0 : index
    %5 = vector.load %arg3[%c0_3, %c0_4] : memref<10x32xf32, #tpu.memory_space<vmem>>, vector<10x32xf32>
    %c0_5 = arith.constant 0 : index
    %c0_6 = arith.constant 0 : index
    %6 = vector.load %arg4[%c0_5, %c0_6] : memref<10x8xf32, #tpu.memory_space<vmem>>, vector<10x8xf32>
    %7 = arith.truncf %6 : vector<10x8xf32> to vector<10x8xbf16>
    %8 = arith.truncf %4 : vector<8x32xf32> to vector<8x32xbf16>
    %cst_7 = arith.constant dense<0.000000e+00> : vector<10x32xf32>
    %9 = tpu.matmul %7, %8, %cst_7 {dimension_numbers = #tpu.dot_dimension_numbers<[1], [0], [0], [1], [0, 0, 1, 1], [], []>} : vector<10x8xbf16>, vector<8x32xbf16>, vector<10x32xf32> -> vector<10x32xf32>
    %10 = arith.addf %5, %9 : vector<10x32xf32>
    %c0_8 = arith.constant 0 : index
    %c0_9 = arith.constant 0 : index
    %11 = vector.load %arg6[%c0_8, %c0_9] : memref<1x32xf32, #tpu.memory_space<vmem>>, vector<1x32xf32>
    %c0_10 = arith.constant 0 : index
    %c0_11 = arith.constant 0 : index
    %12 = vector.load %arg7[%c0_10, %c0_11] : memref<1x32xf32, #tpu.memory_space<vmem>>, vector<1x32xf32>
    %cst_12 = arith.constant dense<0.000000e+00> : vector<10xf32>
    %13 = vector.multi_reduction <add>, %10, %cst_12 [1] : vector<10x32xf32> to vector<10xf32>
    %14 = vector.shape_cast %13 : vector<10xf32> to vector<10x1xf32>
    %cst_13 = arith.constant 3.200000e+01 : f32
    %15 = vector.broadcast %cst_13 : f32 to vector<10x1xf32>
    %16 = arith.divf %14, %15 : vector<10x1xf32>
    %17 = vector.broadcast %16 : vector<10x1xf32> to vector<10x32xf32>
    %18 = arith.subf %10, %17 : vector<10x32xf32>
    %19 = arith.mulf %18, %18 : vector<10x32xf32>
    %cst_14 = arith.constant dense<0.000000e+00> : vector<10xf32>
    %20 = vector.multi_reduction <add>, %19, %cst_14 [1] : vector<10x32xf32> to vector<10xf32>
    %21 = vector.shape_cast %20 : vector<10xf32> to vector<10x1xf32>
    %cst_15 = arith.constant 3.200000e+01 : f32
    %22 = vector.broadcast %cst_15 : f32 to vector<10x1xf32>
    %23 = arith.divf %21, %22 : vector<10x1xf32>
    %24 = vector.broadcast %16 : vector<10x1xf32> to vector<10x32xf32>
    %25 = arith.subf %10, %24 : vector<10x32xf32>
    %cst_16 = arith.constant 9.99999974E-6 : f32
    %26 = vector.broadcast %cst_16 : f32 to vector<10x1xf32>
    %27 = arith.addf %23, %26 : vector<10x1xf32>
    %28 = math.rsqrt %27 : vector<10x1xf32>
    %29 = vector.broadcast %28 : vector<10x1xf32> to vector<10x32xf32>
    %30 = arith.mulf %25, %29 : vector<10x32xf32>
    %31 = vector.broadcast %11 : vector<1x32xf32> to vector<10x32xf32>
    %32 = arith.mulf %30, %31 : vector<10x32xf32>
    %33 = vector.broadcast %12 : vector<1x32xf32> to vector<10x32xf32>
    %34 = arith.addf %32, %33 : vector<10x32xf32>
    %c0_17 = arith.constant 0 : index
    %c0_18 = arith.constant 0 : index
    %35 = vector.load %arg5[%c0_17, %c0_18] : memref<10x10xf32, #tpu.memory_space<vmem>>, vector<10x10xf32>
    %36 = vector.shape_cast %35 : vector<10x10xf32> to vector<10x10xf32>
    %c0_19 = arith.constant 0 : index
    %c0_20 = arith.constant 0 : index
    %c0_21 = arith.constant 0 : index
    %37 = vector.load %arg8[%c0_19, %c0_20, %c0_21] : memref<2x1x32xf32, #tpu.memory_space<vmem>>, vector<1x1x32xf32>
    %38 = vector.shape_cast %37 : vector<1x1x32xf32> to vector<1x32xf32>
    %c0_22 = arith.constant 0 : index
    %c0_23 = arith.constant 0 : index
    %c0_24 = arith.constant 0 : index
    %39 = vector.load %arg9[%c0_22, %c0_23, %c0_24] : memref<2x1x32xf32, #tpu.memory_space<vmem>>, vector<1x1x32xf32>
    %40 = vector.shape_cast %39 : vector<1x1x32xf32> to vector<1x32xf32>
    %c0_25 = arith.constant 0 : index
    %c0_26 = arith.constant 0 : index
    %c0_27 = arith.constant 0 : index
    %41 = vector.load %arg10[%c0_25, %c0_26, %c0_27] : memref<2x32x96xf32, #tpu.memory_space<vmem>>, vector<1x32x96xf32>
    %42 = vector.shape_cast %41 : vector<1x32x96xf32> to vector<32x96xf32>
    %c0_28 = arith.constant 0 : index
    %c0_29 = arith.constant 0 : index
    %c0_30 = arith.constant 0 : index
    %43 = vector.load %arg11[%c0_28, %c0_29, %c0_30] : memref<2x1x96xf32, #tpu.memory_space<vmem>>, vector<1x1x96xf32>
    %44 = vector.shape_cast %43 : vector<1x1x96xf32> to vector<1x96xf32>
    %c0_31 = arith.constant 0 : index
    %c0_32 = arith.constant 0 : index
    %c0_33 = arith.constant 0 : index
    %45 = vector.load %arg12[%c0_31, %c0_32, %c0_33] : memref<2x32x32xf32, #tpu.memory_space<vmem>>, vector<1x32x32xf32>
    %46 = vector.shape_cast %45 : vector<1x32x32xf32> to vector<32x32xf32>
    %c0_34 = arith.constant 0 : index
    %c0_35 = arith.constant 0 : index
    %c0_36 = arith.constant 0 : index
    %47 = vector.load %arg13[%c0_34, %c0_35, %c0_36] : memref<2x1x32xf32, #tpu.memory_space<vmem>>, vector<1x1x32xf32>
    %48 = vector.shape_cast %47 : vector<1x1x32xf32> to vector<1x32xf32>
    %c0_37 = arith.constant 0 : index
    %c0_38 = arith.constant 0 : index
    %c0_39 = arith.constant 0 : index
    %49 = vector.load %arg14[%c0_37, %c0_38, %c0_39] : memref<2x1x32xf32, #tpu.memory_space<vmem>>, vector<1x1x32xf32>
    %50 = vector.shape_cast %49 : vector<1x1x32xf32> to vector<1x32xf32>
    %c0_40 = arith.constant 0 : index
    %c0_41 = arith.constant 0 : index
    %c0_42 = arith.constant 0 : index
    %51 = vector.load %arg15[%c0_40, %c0_41, %c0_42] : memref<2x1x32xf32, #tpu.memory_space<vmem>>, vector<1x1x32xf32>
    %52 = vector.shape_cast %51 : vector<1x1x32xf32> to vector<1x32xf32>
    %c0_43 = arith.constant 0 : index
    %c0_44 = arith.constant 0 : index
    %c0_45 = arith.constant 0 : index
    %53 = vector.load %arg16[%c0_43, %c0_44, %c0_45] : memref<2x32x128xf32, #tpu.memory_space<vmem>>, vector<1x32x128xf32>
    %54 = vector.shape_cast %53 : vector<1x32x128xf32> to vector<32x128xf32>
    %c0_46 = arith.constant 0 : index
    %c0_47 = arith.constant 0 : index
    %c0_48 = arith.constant 0 : index
    %55 = vector.load %arg17[%c0_46, %c0_47, %c0_48] : memref<2x1x128xf32, #tpu.memory_space<vmem>>, vector<1x1x128xf32>
    %56 = vector.shape_cast %55 : vector<1x1x128xf32> to vector<1x128xf32>
    %c0_49 = arith.constant 0 : index
    %c0_50 = arith.constant 0 : index
    %c0_51 = arith.constant 0 : index
    %57 = vector.load %arg18[%c0_49, %c0_50, %c0_51] : memref<2x128x32xf32, #tpu.memory_space<vmem>>, vector<1x128x32xf32>
    %58 = vector.shape_cast %57 : vector<1x128x32xf32> to vector<128x32xf32>
    %c0_52 = arith.constant 0 : index
    %c0_53 = arith.constant 0 : index
    %c0_54 = arith.constant 0 : index
    %59 = vector.load %arg19[%c0_52, %c0_53, %c0_54] : memref<2x1x32xf32, #tpu.memory_space<vmem>>, vector<1x1x32xf32>
    %60 = vector.shape_cast %59 : vector<1x1x32xf32> to vector<1x32xf32>
    %cst_55 = arith.constant dense<0.000000e+00> : vector<10xf32>
    %61 = vector.multi_reduction <add>, %34, %cst_55 [1] : vector<10x32xf32> to vector<10xf32>
    %62 = vector.shape_cast %61 : vector<10xf32> to vector<10x1xf32>
    %cst_56 = arith.constant 3.200000e+01 : f32
    %63 = vector.broadcast %cst_56 : f32 to vector<10x1xf32>
    %64 = arith.divf %62, %63 : vector<10x1xf32>
    %65 = vector.broadcast %64 : vector<10x1xf32> to vector<10x32xf32>
    %66 = arith.subf %34, %65 : vector<10x32xf32>
    %67 = arith.mulf %66, %66 : vector<10x32xf32>
    %cst_57 = arith.constant dense<0.000000e+00> : vector<10xf32>
    %68 = vector.multi_reduction <add>, %67, %cst_57 [1] : vector<10x32xf32> to vector<10xf32>
    %69 = vector.shape_cast %68 : vector<10xf32> to vector<10x1xf32>
    %cst_58 = arith.constant 3.200000e+01 : f32
    %70 = vector.broadcast %cst_58 : f32 to vector<10x1xf32>
    %71 = arith.divf %69, %70 : vector<10x1xf32>
    %72 = vector.broadcast %64 : vector<10x1xf32> to vector<10x32xf32>
    %73 = arith.subf %34, %72 : vector<10x32xf32>
    %cst_59 = arith.constant 9.99999974E-6 : f32
    %74 = vector.broadcast %cst_59 : f32 to vector<10x1xf32>
    %75 = arith.addf %71, %74 : vector<10x1xf32>
    %76 = math.rsqrt %75 : vector<10x1xf32>
    %77 = vector.broadcast %76 : vector<10x1xf32> to vector<10x32xf32>
    %78 = arith.mulf %73, %77 : vector<10x32xf32>
    %79 = vector.broadcast %38 : vector<1x32xf32> to vector<10x32xf32>
    %80 = arith.mulf %78, %79 : vector<10x32xf32>
    %81 = vector.broadcast %40 : vector<1x32xf32> to vector<10x32xf32>
    %82 = arith.addf %80, %81 : vector<10x32xf32>
    %83 = arith.truncf %82 : vector<10x32xf32> to vector<10x32xbf16>
    %84 = arith.truncf %42 : vector<32x96xf32> to vector<32x96xbf16>
    %cst_60 = arith.constant dense<0.000000e+00> : vector<10x96xf32>
    %85 = tpu.matmul %83, %84, %cst_60 {dimension_numbers = #tpu.dot_dimension_numbers<[1], [0], [0], [1], [0, 0, 1, 1], [], []>} : vector<10x32xbf16>, vector<32x96xbf16>, vector<10x96xf32> -> vector<10x96xf32>
    %86 = vector.broadcast %44 : vector<1x96xf32> to vector<10x96xf32>
    %87 = arith.addf %85, %86 : vector<10x96xf32>
    %88 = vector.extract_strided_slice %87 {offsets = [0, 0], sizes = [10, 8], strides = [1, 1]} : vector<10x96xf32> to vector<10x8xf32>
    %89 = vector.extract_strided_slice %87 {offsets = [0, 32], sizes = [10, 8], strides = [1, 1]} : vector<10x96xf32> to vector<10x8xf32>
    %90 = vector.extract_strided_slice %87 {offsets = [0, 64], sizes = [10, 8], strides = [1, 1]} : vector<10x96xf32> to vector<10x8xf32>
    %91 = arith.truncf %88 : vector<10x8xf32> to vector<10x8xbf16>
    %92 = arith.truncf %89 : vector<10x8xf32> to vector<10x8xbf16>
    %cst_61 = arith.constant dense<0.000000e+00> : vector<10x10xf32>
    %93 = tpu.matmul %91, %92, %cst_61 {dimension_numbers = #tpu.dot_dimension_numbers<[1], [1], [0], [0], [0, 0, 1, 0], [], []>} : vector<10x8xbf16>, vector<10x8xbf16>, vector<10x10xf32> -> vector<10x10xf32>
    %cst_62 = arith.constant 0.353553385 : f32
    %94 = vector.broadcast %cst_62 : f32 to vector<10x10xf32>
    %95 = arith.mulf %93, %94 : vector<10x10xf32>
    %96 = arith.addf %95, %36 : vector<10x10xf32>
    %cst_63 = arith.constant dense<0xFF800000> : vector<10xf32>
    %97 = vector.multi_reduction <maximumf>, %96, %cst_63 [1] : vector<10x10xf32> to vector<10xf32>
    %98 = vector.shape_cast %97 : vector<10xf32> to vector<10x1xf32>
    %99 = vector.broadcast %98 : vector<10x1xf32> to vector<10x10xf32>
    %100 = arith.subf %96, %99 : vector<10x10xf32>
    %101 = math.exp %100 : vector<10x10xf32>
    %cst_64 = arith.constant dense<0.000000e+00> : vector<10xf32>
    %102 = vector.multi_reduction <add>, %101, %cst_64 [1] : vector<10x10xf32> to vector<10xf32>
    %103 = vector.shape_cast %102 : vector<10xf32> to vector<10x1xf32>
    %104 = tpu.reciprocal %103 {approx = true} : vector<10x1xf32> -> vector<10x1xf32>
    %105 = vector.broadcast %104 : vector<10x1xf32> to vector<10x10xf32>
    %106 = arith.mulf %101, %105 : vector<10x10xf32>
    %107 = arith.truncf %106 : vector<10x10xf32> to vector<10x10xbf16>
    %108 = arith.truncf %90 : vector<10x8xf32> to vector<10x8xbf16>
    %cst_65 = arith.constant dense<0.000000e+00> : vector<10x8xf32>
    %109 = tpu.matmul %107, %108, %cst_65 {dimension_numbers = #tpu.dot_dimension_numbers<[1], [0], [0], [1], [0, 0, 1, 1], [], []>} : vector<10x10xbf16>, vector<10x8xbf16>, vector<10x8xf32> -> vector<10x8xf32>
    %110 = vector.extract_strided_slice %46 {offsets = [0, 0], sizes = [8, 32], strides = [1, 1]} : vector<32x32xf32> to vector<8x32xf32>
    %111 = arith.truncf %109 : vector<10x8xf32> to vector<10x8xbf16>
    %112 = arith.truncf %110 : vector<8x32xf32> to vector<8x32xbf16>
    %cst_66 = arith.constant dense<0.000000e+00> : vector<10x32xf32>
    %113 = tpu.matmul %111, %112, %cst_66 {dimension_numbers = #tpu.dot_dimension_numbers<[1], [0], [0], [1], [0, 0, 1, 1], [], []>} : vector<10x8xbf16>, vector<8x32xbf16>, vector<10x32xf32> -> vector<10x32xf32>
    %114 = vector.extract_strided_slice %87 {offsets = [0, 8], sizes = [10, 8], strides = [1, 1]} : vector<10x96xf32> to vector<10x8xf32>
    %115 = vector.extract_strided_slice %87 {offsets = [0, 40], sizes = [10, 8], strides = [1, 1]} : vector<10x96xf32> to vector<10x8xf32>
    %116 = vector.extract_strided_slice %87 {offsets = [0, 72], sizes = [10, 8], strides = [1, 1]} : vector<10x96xf32> to vector<10x8xf32>
    %117 = arith.truncf %114 : vector<10x8xf32> to vector<10x8xbf16>
    %118 = arith.truncf %115 : vector<10x8xf32> to vector<10x8xbf16>
    %cst_67 = arith.constant dense<0.000000e+00> : vector<10x10xf32>
    %119 = tpu.matmul %117, %118, %cst_67 {dimension_numbers = #tpu.dot_dimension_numbers<[1], [1], [0], [0], [0, 0, 1, 0], [], []>} : vector<10x8xbf16>, vector<10x8xbf16>, vector<10x10xf32> -> vector<10x10xf32>
    %cst_68 = arith.constant 0.353553385 : f32
    %120 = vector.broadcast %cst_68 : f32 to vector<10x10xf32>
    %121 = arith.mulf %119, %120 : vector<10x10xf32>
    %122 = arith.addf %121, %36 : vector<10x10xf32>
    %cst_69 = arith.constant dense<0xFF800000> : vector<10xf32>
    %123 = vector.multi_reduction <maximumf>, %122, %cst_69 [1] : vector<10x10xf32> to vector<10xf32>
    %124 = vector.shape_cast %123 : vector<10xf32> to vector<10x1xf32>
    %125 = vector.broadcast %124 : vector<10x1xf32> to vector<10x10xf32>
    %126 = arith.subf %122, %125 : vector<10x10xf32>
    %127 = math.exp %126 : vector<10x10xf32>
    %cst_70 = arith.constant dense<0.000000e+00> : vector<10xf32>
    %128 = vector.multi_reduction <add>, %127, %cst_70 [1] : vector<10x10xf32> to vector<10xf32>
    %129 = vector.shape_cast %128 : vector<10xf32> to vector<10x1xf32>
    %130 = tpu.reciprocal %129 {approx = true} : vector<10x1xf32> -> vector<10x1xf32>
    %131 = vector.broadcast %130 : vector<10x1xf32> to vector<10x10xf32>
    %132 = arith.mulf %127, %131 : vector<10x10xf32>
    %133 = arith.truncf %132 : vector<10x10xf32> to vector<10x10xbf16>
    %134 = arith.truncf %116 : vector<10x8xf32> to vector<10x8xbf16>
    %cst_71 = arith.constant dense<0.000000e+00> : vector<10x8xf32>
    %135 = tpu.matmul %133, %134, %cst_71 {dimension_numbers = #tpu.dot_dimension_numbers<[1], [0], [0], [1], [0, 0, 1, 1], [], []>} : vector<10x10xbf16>, vector<10x8xbf16>, vector<10x8xf32> -> vector<10x8xf32>
    %136 = vector.extract_strided_slice %46 {offsets = [8, 0], sizes = [8, 32], strides = [1, 1]} : vector<32x32xf32> to vector<8x32xf32>
    %137 = arith.truncf %135 : vector<10x8xf32> to vector<10x8xbf16>
    %138 = arith.truncf %136 : vector<8x32xf32> to vector<8x32xbf16>
    %cst_72 = arith.constant dense<0.000000e+00> : vector<10x32xf32>
    %139 = tpu.matmul %137, %138, %cst_72 {dimension_numbers = #tpu.dot_dimension_numbers<[1], [0], [0], [1], [0, 0, 1, 1], [], []>} : vector<10x8xbf16>, vector<8x32xbf16>, vector<10x32xf32> -> vector<10x32xf32>
    %140 = arith.addf %113, %139 : vector<10x32xf32>
    %141 = vector.extract_strided_slice %87 {offsets = [0, 16], sizes = [10, 8], strides = [1, 1]} : vector<10x96xf32> to vector<10x8xf32>
    %142 = vector.extract_strided_slice %87 {offsets = [0, 48], sizes = [10, 8], strides = [1, 1]} : vector<10x96xf32> to vector<10x8xf32>
    %143 = vector.extract_strided_slice %87 {offsets = [0, 80], sizes = [10, 8], strides = [1, 1]} : vector<10x96xf32> to vector<10x8xf32>
    %144 = arith.truncf %141 : vector<10x8xf32> to vector<10x8xbf16>
    %145 = arith.truncf %142 : vector<10x8xf32> to vector<10x8xbf16>
    %cst_73 = arith.constant dense<0.000000e+00> : vector<10x10xf32>
    %146 = tpu.matmul %144, %145, %cst_73 {dimension_numbers = #tpu.dot_dimension_numbers<[1], [1], [0], [0], [0, 0, 1, 0], [], []>} : vector<10x8xbf16>, vector<10x8xbf16>, vector<10x10xf32> -> vector<10x10xf32>
    %cst_74 = arith.constant 0.353553385 : f32
    %147 = vector.broadcast %cst_74 : f32 to vector<10x10xf32>
    %148 = arith.mulf %146, %147 : vector<10x10xf32>
    %149 = arith.addf %148, %36 : vector<10x10xf32>
    %cst_75 = arith.constant dense<0xFF800000> : vector<10xf32>
    %150 = vector.multi_reduction <maximumf>, %149, %cst_75 [1] : vector<10x10xf32> to vector<10xf32>
    %151 = vector.shape_cast %150 : vector<10xf32> to vector<10x1xf32>
    %152 = vector.broadcast %151 : vector<10x1xf32> to vector<10x10xf32>
    %153 = arith.subf %149, %152 : vector<10x10xf32>
    %154 = math.exp %153 : vector<10x10xf32>
    %cst_76 = arith.constant dense<0.000000e+00> : vector<10xf32>
    %155 = vector.multi_reduction <add>, %154, %cst_76 [1] : vector<10x10xf32> to vector<10xf32>
    %156 = vector.shape_cast %155 : vector<10xf32> to vector<10x1xf32>
    %157 = tpu.reciprocal %156 {approx = true} : vector<10x1xf32> -> vector<10x1xf32>
    %158 = vector.broadcast %157 : vector<10x1xf32> to vector<10x10xf32>
    %159 = arith.mulf %154, %158 : vector<10x10xf32>
    %160 = arith.truncf %159 : vector<10x10xf32> to vector<10x10xbf16>
    %161 = arith.truncf %143 : vector<10x8xf32> to vector<10x8xbf16>
    %cst_77 = arith.constant dense<0.000000e+00> : vector<10x8xf32>
    %162 = tpu.matmul %160, %161, %cst_77 {dimension_numbers = #tpu.dot_dimension_numbers<[1], [0], [0], [1], [0, 0, 1, 1], [], []>} : vector<10x10xbf16>, vector<10x8xbf16>, vector<10x8xf32> -> vector<10x8xf32>
    %163 = vector.extract_strided_slice %46 {offsets = [16, 0], sizes = [8, 32], strides = [1, 1]} : vector<32x32xf32> to vector<8x32xf32>
    %164 = arith.truncf %162 : vector<10x8xf32> to vector<10x8xbf16>
    %165 = arith.truncf %163 : vector<8x32xf32> to vector<8x32xbf16>
    %cst_78 = arith.constant dense<0.000000e+00> : vector<10x32xf32>
    %166 = tpu.matmul %164, %165, %cst_78 {dimension_numbers = #tpu.dot_dimension_numbers<[1], [0], [0], [1], [0, 0, 1, 1], [], []>} : vector<10x8xbf16>, vector<8x32xbf16>, vector<10x32xf32> -> vector<10x32xf32>
    %167 = arith.addf %140, %166 : vector<10x32xf32>
    %168 = vector.extract_strided_slice %87 {offsets = [0, 24], sizes = [10, 8], strides = [1, 1]} : vector<10x96xf32> to vector<10x8xf32>
    %169 = vector.extract_strided_slice %87 {offsets = [0, 56], sizes = [10, 8], strides = [1, 1]} : vector<10x96xf32> to vector<10x8xf32>
    %170 = vector.extract_strided_slice %87 {offsets = [0, 88], sizes = [10, 8], strides = [1, 1]} : vector<10x96xf32> to vector<10x8xf32>
    %171 = arith.truncf %168 : vector<10x8xf32> to vector<10x8xbf16>
    %172 = arith.truncf %169 : vector<10x8xf32> to vector<10x8xbf16>
    %cst_79 = arith.constant dense<0.000000e+00> : vector<10x10xf32>
    %173 = tpu.matmul %171, %172, %cst_79 {dimension_numbers = #tpu.dot_dimension_numbers<[1], [1], [0], [0], [0, 0, 1, 0], [], []>} : vector<10x8xbf16>, vector<10x8xbf16>, vector<10x10xf32> -> vector<10x10xf32>
    %cst_80 = arith.constant 0.353553385 : f32
    %174 = vector.broadcast %cst_80 : f32 to vector<10x10xf32>
    %175 = arith.mulf %173, %174 : vector<10x10xf32>
    %176 = arith.addf %175, %36 : vector<10x10xf32>
    %cst_81 = arith.constant dense<0xFF800000> : vector<10xf32>
    %177 = vector.multi_reduction <maximumf>, %176, %cst_81 [1] : vector<10x10xf32> to vector<10xf32>
    %178 = vector.shape_cast %177 : vector<10xf32> to vector<10x1xf32>
    %179 = vector.broadcast %178 : vector<10x1xf32> to vector<10x10xf32>
    %180 = arith.subf %176, %179 : vector<10x10xf32>
    %181 = math.exp %180 : vector<10x10xf32>
    %cst_82 = arith.constant dense<0.000000e+00> : vector<10xf32>
    %182 = vector.multi_reduction <add>, %181, %cst_82 [1] : vector<10x10xf32> to vector<10xf32>
    %183 = vector.shape_cast %182 : vector<10xf32> to vector<10x1xf32>
    %184 = tpu.reciprocal %183 {approx = true} : vector<10x1xf32> -> vector<10x1xf32>
    %185 = vector.broadcast %184 : vector<10x1xf32> to vector<10x10xf32>
    %186 = arith.mulf %181, %185 : vector<10x10xf32>
    %187 = arith.truncf %186 : vector<10x10xf32> to vector<10x10xbf16>
    %188 = arith.truncf %170 : vector<10x8xf32> to vector<10x8xbf16>
    %cst_83 = arith.constant dense<0.000000e+00> : vector<10x8xf32>
    %189 = tpu.matmul %187, %188, %cst_83 {dimension_numbers = #tpu.dot_dimension_numbers<[1], [0], [0], [1], [0, 0, 1, 1], [], []>} : vector<10x10xbf16>, vector<10x8xbf16>, vector<10x8xf32> -> vector<10x8xf32>
    %190 = vector.extract_strided_slice %46 {offsets = [24, 0], sizes = [8, 32], strides = [1, 1]} : vector<32x32xf32> to vector<8x32xf32>
    %191 = arith.truncf %189 : vector<10x8xf32> to vector<10x8xbf16>
    %192 = arith.truncf %190 : vector<8x32xf32> to vector<8x32xbf16>
    %cst_84 = arith.constant dense<0.000000e+00> : vector<10x32xf32>
    %193 = tpu.matmul %191, %192, %cst_84 {dimension_numbers = #tpu.dot_dimension_numbers<[1], [0], [0], [1], [0, 0, 1, 1], [], []>} : vector<10x8xbf16>, vector<8x32xbf16>, vector<10x32xf32> -> vector<10x32xf32>
    %194 = arith.addf %167, %193 : vector<10x32xf32>
    %195 = arith.addf %34, %194 : vector<10x32xf32>
    %196 = vector.broadcast %48 : vector<1x32xf32> to vector<10x32xf32>
    %197 = arith.addf %195, %196 : vector<10x32xf32>
    %cst_85 = arith.constant dense<0.000000e+00> : vector<10xf32>
    %198 = vector.multi_reduction <add>, %197, %cst_85 [1] : vector<10x32xf32> to vector<10xf32>
    %199 = vector.shape_cast %198 : vector<10xf32> to vector<10x1xf32>
    %cst_86 = arith.constant 3.200000e+01 : f32
    %200 = vector.broadcast %cst_86 : f32 to vector<10x1xf32>
    %201 = arith.divf %199, %200 : vector<10x1xf32>
    %202 = vector.broadcast %201 : vector<10x1xf32> to vector<10x32xf32>
    %203 = arith.subf %197, %202 : vector<10x32xf32>
    %204 = arith.mulf %203, %203 : vector<10x32xf32>
    %cst_87 = arith.constant dense<0.000000e+00> : vector<10xf32>
    %205 = vector.multi_reduction <add>, %204, %cst_87 [1] : vector<10x32xf32> to vector<10xf32>
    %206 = vector.shape_cast %205 : vector<10xf32> to vector<10x1xf32>
    %cst_88 = arith.constant 3.200000e+01 : f32
    %207 = vector.broadcast %cst_88 : f32 to vector<10x1xf32>
    %208 = arith.divf %206, %207 : vector<10x1xf32>
    %209 = vector.broadcast %201 : vector<10x1xf32> to vector<10x32xf32>
    %210 = arith.subf %197, %209 : vector<10x32xf32>
    %cst_89 = arith.constant 9.99999974E-6 : f32
    %211 = vector.broadcast %cst_89 : f32 to vector<10x1xf32>
    %212 = arith.addf %208, %211 : vector<10x1xf32>
    %213 = math.rsqrt %212 : vector<10x1xf32>
    %214 = vector.broadcast %213 : vector<10x1xf32> to vector<10x32xf32>
    %215 = arith.mulf %210, %214 : vector<10x32xf32>
    %216 = vector.broadcast %50 : vector<1x32xf32> to vector<10x32xf32>
    %217 = arith.mulf %215, %216 : vector<10x32xf32>
    %218 = vector.broadcast %52 : vector<1x32xf32> to vector<10x32xf32>
    %219 = arith.addf %217, %218 : vector<10x32xf32>
    %220 = arith.truncf %219 : vector<10x32xf32> to vector<10x32xbf16>
    %221 = arith.truncf %54 : vector<32x128xf32> to vector<32x128xbf16>
    %cst_90 = arith.constant dense<0.000000e+00> : vector<10x128xf32>
    %222 = tpu.matmul %220, %221, %cst_90 {dimension_numbers = #tpu.dot_dimension_numbers<[1], [0], [0], [1], [0, 0, 1, 1], [], []>} : vector<10x32xbf16>, vector<32x128xbf16>, vector<10x128xf32> -> vector<10x128xf32>
    %223 = vector.broadcast %56 : vector<1x128xf32> to vector<10x128xf32>
    %224 = arith.addf %222, %223 : vector<10x128xf32>
    %cst_91 = arith.constant 1.702000e+00 : f32
    %225 = vector.broadcast %cst_91 : f32 to vector<10x128xf32>
    %226 = arith.mulf %225, %224 : vector<10x128xf32>
    %227 = arith.negf %226 : vector<10x128xf32>
    %228 = math.exp %227 : vector<10x128xf32>
    %cst_92 = arith.constant 1.000000e+00 : f32
    %229 = vector.broadcast %cst_92 : f32 to vector<10x128xf32>
    %230 = arith.addf %229, %228 : vector<10x128xf32>
    %231 = arith.divf %229, %230 : vector<10x128xf32>
    %232 = arith.mulf %224, %231 : vector<10x128xf32>
    %233 = arith.truncf %232 : vector<10x128xf32> to vector<10x128xbf16>
    %234 = arith.truncf %58 : vector<128x32xf32> to vector<128x32xbf16>
    %cst_93 = arith.constant dense<0.000000e+00> : vector<10x32xf32>
    %235 = tpu.matmul %233, %234, %cst_93 {dimension_numbers = #tpu.dot_dimension_numbers<[1], [0], [0], [1], [0, 0, 1, 1], [], []>} : vector<10x128xbf16>, vector<128x32xbf16>, vector<10x32xf32> -> vector<10x32xf32>
    %236 = arith.addf %197, %235 : vector<10x32xf32>
    %237 = vector.broadcast %60 : vector<1x32xf32> to vector<10x32xf32>
    %238 = arith.addf %236, %237 : vector<10x32xf32>
    %c1 = arith.constant 1 : index
    %c0_94 = arith.constant 0 : index
    %c0_95 = arith.constant 0 : index
    %239 = vector.load %arg8[%c1, %c0_94, %c0_95] : memref<2x1x32xf32, #tpu.memory_space<vmem>>, vector<1x1x32xf32>
    %240 = vector.shape_cast %239 : vector<1x1x32xf32> to vector<1x32xf32>
    %c1_96 = arith.constant 1 : index
    %c0_97 = arith.constant 0 : index
    %c0_98 = arith.constant 0 : index
    %241 = vector.load %arg9[%c1_96, %c0_97, %c0_98] : memref<2x1x32xf32, #tpu.memory_space<vmem>>, vector<1x1x32xf32>
    %242 = vector.shape_cast %241 : vector<1x1x32xf32> to vector<1x32xf32>
    %c1_99 = arith.constant 1 : index
    %c0_100 = arith.constant 0 : index
    %c0_101 = arith.constant 0 : index
    %243 = vector.load %arg10[%c1_99, %c0_100, %c0_101] : memref<2x32x96xf32, #tpu.memory_space<vmem>>, vector<1x32x96xf32>
    %244 = vector.shape_cast %243 : vector<1x32x96xf32> to vector<32x96xf32>
    %c1_102 = arith.constant 1 : index
    %c0_103 = arith.constant 0 : index
    %c0_104 = arith.constant 0 : index
    %245 = vector.load %arg11[%c1_102, %c0_103, %c0_104] : memref<2x1x96xf32, #tpu.memory_space<vmem>>, vector<1x1x96xf32>
    %246 = vector.shape_cast %245 : vector<1x1x96xf32> to vector<1x96xf32>
    %c1_105 = arith.constant 1 : index
    %c0_106 = arith.constant 0 : index
    %c0_107 = arith.constant 0 : index
    %247 = vector.load %arg12[%c1_105, %c0_106, %c0_107] : memref<2x32x32xf32, #tpu.memory_space<vmem>>, vector<1x32x32xf32>
    %248 = vector.shape_cast %247 : vector<1x32x32xf32> to vector<32x32xf32>
    %c1_108 = arith.constant 1 : index
    %c0_109 = arith.constant 0 : index
    %c0_110 = arith.constant 0 : index
    %249 = vector.load %arg13[%c1_108, %c0_109, %c0_110] : memref<2x1x32xf32, #tpu.memory_space<vmem>>, vector<1x1x32xf32>
    %250 = vector.shape_cast %249 : vector<1x1x32xf32> to vector<1x32xf32>
    %c1_111 = arith.constant 1 : index
    %c0_112 = arith.constant 0 : index
    %c0_113 = arith.constant 0 : index
    %251 = vector.load %arg14[%c1_111, %c0_112, %c0_113] : memref<2x1x32xf32, #tpu.memory_space<vmem>>, vector<1x1x32xf32>
    %252 = vector.shape_cast %251 : vector<1x1x32xf32> to vector<1x32xf32>
    %c1_114 = arith.constant 1 : index
    %c0_115 = arith.constant 0 : index
    %c0_116 = arith.constant 0 : index
    %253 = vector.load %arg15[%c1_114, %c0_115, %c0_116] : memref<2x1x32xf32, #tpu.memory_space<vmem>>, vector<1x1x32xf32>
    %254 = vector.shape_cast %253 : vector<1x1x32xf32> to vector<1x32xf32>
    %c1_117 = arith.constant 1 : index
    %c0_118 = arith.constant 0 : index
    %c0_119 = arith.constant 0 : index
    %255 = vector.load %arg16[%c1_117, %c0_118, %c0_119] : memref<2x32x128xf32, #tpu.memory_space<vmem>>, vector<1x32x128xf32>
    %256 = vector.shape_cast %255 : vector<1x32x128xf32> to vector<32x128xf32>
    %c1_120 = arith.constant 1 : index
    %c0_121 = arith.constant 0 : index
    %c0_122 = arith.constant 0 : index
    %257 = vector.load %arg17[%c1_120, %c0_121, %c0_122] : memref<2x1x128xf32, #tpu.memory_space<vmem>>, vector<1x1x128xf32>
    %258 = vector.shape_cast %257 : vector<1x1x128xf32> to vector<1x128xf32>
    %c1_123 = arith.constant 1 : index
    %c0_124 = arith.constant 0 : index
    %c0_125 = arith.constant 0 : index
    %259 = vector.load %arg18[%c1_123, %c0_124, %c0_125] : memref<2x128x32xf32, #tpu.memory_space<vmem>>, vector<1x128x32xf32>
    %260 = vector.shape_cast %259 : vector<1x128x32xf32> to vector<128x32xf32>
    %c1_126 = arith.constant 1 : index
    %c0_127 = arith.constant 0 : index
    %c0_128 = arith.constant 0 : index
    %261 = vector.load %arg19[%c1_126, %c0_127, %c0_128] : memref<2x1x32xf32, #tpu.memory_space<vmem>>, vector<1x1x32xf32>
    %262 = vector.shape_cast %261 : vector<1x1x32xf32> to vector<1x32xf32>
    %cst_129 = arith.constant dense<0.000000e+00> : vector<10xf32>
    %263 = vector.multi_reduction <add>, %238, %cst_129 [1] : vector<10x32xf32> to vector<10xf32>
    %264 = vector.shape_cast %263 : vector<10xf32> to vector<10x1xf32>
    %cst_130 = arith.constant 3.200000e+01 : f32
    %265 = vector.broadcast %cst_130 : f32 to vector<10x1xf32>
    %266 = arith.divf %264, %265 : vector<10x1xf32>
    %267 = vector.broadcast %266 : vector<10x1xf32> to vector<10x32xf32>
    %268 = arith.subf %238, %267 : vector<10x32xf32>
    %269 = arith.mulf %268, %268 : vector<10x32xf32>
    %cst_131 = arith.constant dense<0.000000e+00> : vector<10xf32>
    %270 = vector.multi_reduction <add>, %269, %cst_131 [1] : vector<10x32xf32> to vector<10xf32>
    %271 = vector.shape_cast %270 : vector<10xf32> to vector<10x1xf32>
    %cst_132 = arith.constant 3.200000e+01 : f32
    %272 = vector.broadcast %cst_132 : f32 to vector<10x1xf32>
    %273 = arith.divf %271, %272 : vector<10x1xf32>
    %274 = vector.broadcast %266 : vector<10x1xf32> to vector<10x32xf32>
    %275 = arith.subf %238, %274 : vector<10x32xf32>
    %cst_133 = arith.constant 9.99999974E-6 : f32
    %276 = vector.broadcast %cst_133 : f32 to vector<10x1xf32>
    %277 = arith.addf %273, %276 : vector<10x1xf32>
    %278 = math.rsqrt %277 : vector<10x1xf32>
    %279 = vector.broadcast %278 : vector<10x1xf32> to vector<10x32xf32>
    %280 = arith.mulf %275, %279 : vector<10x32xf32>
    %281 = vector.broadcast %240 : vector<1x32xf32> to vector<10x32xf32>
    %282 = arith.mulf %280, %281 : vector<10x32xf32>
    %283 = vector.broadcast %242 : vector<1x32xf32> to vector<10x32xf32>
    %284 = arith.addf %282, %283 : vector<10x32xf32>
    %285 = arith.truncf %284 : vector<10x32xf32> to vector<10x32xbf16>
    %286 = arith.truncf %244 : vector<32x96xf32> to vector<32x96xbf16>
    %cst_134 = arith.constant dense<0.000000e+00> : vector<10x96xf32>
    %287 = tpu.matmul %285, %286, %cst_134 {dimension_numbers = #tpu.dot_dimension_numbers<[1], [0], [0], [1], [0, 0, 1, 1], [], []>} : vector<10x32xbf16>, vector<32x96xbf16>, vector<10x96xf32> -> vector<10x96xf32>
    %288 = vector.broadcast %246 : vector<1x96xf32> to vector<10x96xf32>
    %289 = arith.addf %287, %288 : vector<10x96xf32>
    %290 = vector.extract_strided_slice %289 {offsets = [0, 0], sizes = [10, 8], strides = [1, 1]} : vector<10x96xf32> to vector<10x8xf32>
    %291 = vector.extract_strided_slice %289 {offsets = [0, 32], sizes = [10, 8], strides = [1, 1]} : vector<10x96xf32> to vector<10x8xf32>
    %292 = vector.extract_strided_slice %289 {offsets = [0, 64], sizes = [10, 8], strides = [1, 1]} : vector<10x96xf32> to vector<10x8xf32>
    %293 = arith.truncf %290 : vector<10x8xf32> to vector<10x8xbf16>
    %294 = arith.truncf %291 : vector<10x8xf32> to vector<10x8xbf16>
    %cst_135 = arith.constant dense<0.000000e+00> : vector<10x10xf32>
    %295 = tpu.matmul %293, %294, %cst_135 {dimension_numbers = #tpu.dot_dimension_numbers<[1], [1], [0], [0], [0, 0, 1, 0], [], []>} : vector<10x8xbf16>, vector<10x8xbf16>, vector<10x10xf32> -> vector<10x10xf32>
    %cst_136 = arith.constant 0.353553385 : f32
    %296 = vector.broadcast %cst_136 : f32 to vector<10x10xf32>
    %297 = arith.mulf %295, %296 : vector<10x10xf32>
    %298 = arith.addf %297, %36 : vector<10x10xf32>
    %cst_137 = arith.constant dense<0xFF800000> : vector<10xf32>
    %299 = vector.multi_reduction <maximumf>, %298, %cst_137 [1] : vector<10x10xf32> to vector<10xf32>
    %300 = vector.shape_cast %299 : vector<10xf32> to vector<10x1xf32>
    %301 = vector.broadcast %300 : vector<10x1xf32> to vector<10x10xf32>
    %302 = arith.subf %298, %301 : vector<10x10xf32>
    %303 = math.exp %302 : vector<10x10xf32>
    %cst_138 = arith.constant dense<0.000000e+00> : vector<10xf32>
    %304 = vector.multi_reduction <add>, %303, %cst_138 [1] : vector<10x10xf32> to vector<10xf32>
    %305 = vector.shape_cast %304 : vector<10xf32> to vector<10x1xf32>
    %306 = tpu.reciprocal %305 {approx = true} : vector<10x1xf32> -> vector<10x1xf32>
    %307 = vector.broadcast %306 : vector<10x1xf32> to vector<10x10xf32>
    %308 = arith.mulf %303, %307 : vector<10x10xf32>
    %309 = arith.truncf %308 : vector<10x10xf32> to vector<10x10xbf16>
    %310 = arith.truncf %292 : vector<10x8xf32> to vector<10x8xbf16>
    %cst_139 = arith.constant dense<0.000000e+00> : vector<10x8xf32>
    %311 = tpu.matmul %309, %310, %cst_139 {dimension_numbers = #tpu.dot_dimension_numbers<[1], [0], [0], [1], [0, 0, 1, 1], [], []>} : vector<10x10xbf16>, vector<10x8xbf16>, vector<10x8xf32> -> vector<10x8xf32>
    %312 = vector.extract_strided_slice %248 {offsets = [0, 0], sizes = [8, 32], strides = [1, 1]} : vector<32x32xf32> to vector<8x32xf32>
    %313 = arith.truncf %311 : vector<10x8xf32> to vector<10x8xbf16>
    %314 = arith.truncf %312 : vector<8x32xf32> to vector<8x32xbf16>
    %cst_140 = arith.constant dense<0.000000e+00> : vector<10x32xf32>
    %315 = tpu.matmul %313, %314, %cst_140 {dimension_numbers = #tpu.dot_dimension_numbers<[1], [0], [0], [1], [0, 0, 1, 1], [], []>} : vector<10x8xbf16>, vector<8x32xbf16>, vector<10x32xf32> -> vector<10x32xf32>
    %316 = vector.extract_strided_slice %289 {offsets = [0, 8], sizes = [10, 8], strides = [1, 1]} : vector<10x96xf32> to vector<10x8xf32>
    %317 = vector.extract_strided_slice %289 {offsets = [0, 40], sizes = [10, 8], strides = [1, 1]} : vector<10x96xf32> to vector<10x8xf32>
    %318 = vector.extract_strided_slice %289 {offsets = [0, 72], sizes = [10, 8], strides = [1, 1]} : vector<10x96xf32> to vector<10x8xf32>
    %319 = arith.truncf %316 : vector<10x8xf32> to vector<10x8xbf16>
    %320 = arith.truncf %317 : vector<10x8xf32> to vector<10x8xbf16>
    %cst_141 = arith.constant dense<0.000000e+00> : vector<10x10xf32>
    %321 = tpu.matmul %319, %320, %cst_141 {dimension_numbers = #tpu.dot_dimension_numbers<[1], [1], [0], [0], [0, 0, 1, 0], [], []>} : vector<10x8xbf16>, vector<10x8xbf16>, vector<10x10xf32> -> vector<10x10xf32>
    %cst_142 = arith.constant 0.353553385 : f32
    %322 = vector.broadcast %cst_142 : f32 to vector<10x10xf32>
    %323 = arith.mulf %321, %322 : vector<10x10xf32>
    %324 = arith.addf %323, %36 : vector<10x10xf32>
    %cst_143 = arith.constant dense<0xFF800000> : vector<10xf32>
    %325 = vector.multi_reduction <maximumf>, %324, %cst_143 [1] : vector<10x10xf32> to vector<10xf32>
    %326 = vector.shape_cast %325 : vector<10xf32> to vector<10x1xf32>
    %327 = vector.broadcast %326 : vector<10x1xf32> to vector<10x10xf32>
    %328 = arith.subf %324, %327 : vector<10x10xf32>
    %329 = math.exp %328 : vector<10x10xf32>
    %cst_144 = arith.constant dense<0.000000e+00> : vector<10xf32>
    %330 = vector.multi_reduction <add>, %329, %cst_144 [1] : vector<10x10xf32> to vector<10xf32>
    %331 = vector.shape_cast %330 : vector<10xf32> to vector<10x1xf32>
    %332 = tpu.reciprocal %331 {approx = true} : vector<10x1xf32> -> vector<10x1xf32>
    %333 = vector.broadcast %332 : vector<10x1xf32> to vector<10x10xf32>
    %334 = arith.mulf %329, %333 : vector<10x10xf32>
    %335 = arith.truncf %334 : vector<10x10xf32> to vector<10x10xbf16>
    %336 = arith.truncf %318 : vector<10x8xf32> to vector<10x8xbf16>
    %cst_145 = arith.constant dense<0.000000e+00> : vector<10x8xf32>
    %337 = tpu.matmul %335, %336, %cst_145 {dimension_numbers = #tpu.dot_dimension_numbers<[1], [0], [0], [1], [0, 0, 1, 1], [], []>} : vector<10x10xbf16>, vector<10x8xbf16>, vector<10x8xf32> -> vector<10x8xf32>
    %338 = vector.extract_strided_slice %248 {offsets = [8, 0], sizes = [8, 32], strides = [1, 1]} : vector<32x32xf32> to vector<8x32xf32>
    %339 = arith.truncf %337 : vector<10x8xf32> to vector<10x8xbf16>
    %340 = arith.truncf %338 : vector<8x32xf32> to vector<8x32xbf16>
    %cst_146 = arith.constant dense<0.000000e+00> : vector<10x32xf32>
    %341 = tpu.matmul %339, %340, %cst_146 {dimension_numbers = #tpu.dot_dimension_numbers<[1], [0], [0], [1], [0, 0, 1, 1], [], []>} : vector<10x8xbf16>, vector<8x32xbf16>, vector<10x32xf32> -> vector<10x32xf32>
    %342 = arith.addf %315, %341 : vector<10x32xf32>
    %343 = vector.extract_strided_slice %289 {offsets = [0, 16], sizes = [10, 8], strides = [1, 1]} : vector<10x96xf32> to vector<10x8xf32>
    %344 = vector.extract_strided_slice %289 {offsets = [0, 48], sizes = [10, 8], strides = [1, 1]} : vector<10x96xf32> to vector<10x8xf32>
    %345 = vector.extract_strided_slice %289 {offsets = [0, 80], sizes = [10, 8], strides = [1, 1]} : vector<10x96xf32> to vector<10x8xf32>
    %346 = arith.truncf %343 : vector<10x8xf32> to vector<10x8xbf16>
    %347 = arith.truncf %344 : vector<10x8xf32> to vector<10x8xbf16>
    %cst_147 = arith.constant dense<0.000000e+00> : vector<10x10xf32>
    %348 = tpu.matmul %346, %347, %cst_147 {dimension_numbers = #tpu.dot_dimension_numbers<[1], [1], [0], [0], [0, 0, 1, 0], [], []>} : vector<10x8xbf16>, vector<10x8xbf16>, vector<10x10xf32> -> vector<10x10xf32>
    %cst_148 = arith.constant 0.353553385 : f32
    %349 = vector.broadcast %cst_148 : f32 to vector<10x10xf32>
    %350 = arith.mulf %348, %349 : vector<10x10xf32>
    %351 = arith.addf %350, %36 : vector<10x10xf32>
    %cst_149 = arith.constant dense<0xFF800000> : vector<10xf32>
    %352 = vector.multi_reduction <maximumf>, %351, %cst_149 [1] : vector<10x10xf32> to vector<10xf32>
    %353 = vector.shape_cast %352 : vector<10xf32> to vector<10x1xf32>
    %354 = vector.broadcast %353 : vector<10x1xf32> to vector<10x10xf32>
    %355 = arith.subf %351, %354 : vector<10x10xf32>
    %356 = math.exp %355 : vector<10x10xf32>
    %cst_150 = arith.constant dense<0.000000e+00> : vector<10xf32>
    %357 = vector.multi_reduction <add>, %356, %cst_150 [1] : vector<10x10xf32> to vector<10xf32>
    %358 = vector.shape_cast %357 : vector<10xf32> to vector<10x1xf32>
    %359 = tpu.reciprocal %358 {approx = true} : vector<10x1xf32> -> vector<10x1xf32>
    %360 = vector.broadcast %359 : vector<10x1xf32> to vector<10x10xf32>
    %361 = arith.mulf %356, %360 : vector<10x10xf32>
    %362 = arith.truncf %361 : vector<10x10xf32> to vector<10x10xbf16>
    %363 = arith.truncf %345 : vector<10x8xf32> to vector<10x8xbf16>
    %cst_151 = arith.constant dense<0.000000e+00> : vector<10x8xf32>
    %364 = tpu.matmul %362, %363, %cst_151 {dimension_numbers = #tpu.dot_dimension_numbers<[1], [0], [0], [1], [0, 0, 1, 1], [], []>} : vector<10x10xbf16>, vector<10x8xbf16>, vector<10x8xf32> -> vector<10x8xf32>
    %365 = vector.extract_strided_slice %248 {offsets = [16, 0], sizes = [8, 32], strides = [1, 1]} : vector<32x32xf32> to vector<8x32xf32>
    %366 = arith.truncf %364 : vector<10x8xf32> to vector<10x8xbf16>
    %367 = arith.truncf %365 : vector<8x32xf32> to vector<8x32xbf16>
    %cst_152 = arith.constant dense<0.000000e+00> : vector<10x32xf32>
    %368 = tpu.matmul %366, %367, %cst_152 {dimension_numbers = #tpu.dot_dimension_numbers<[1], [0], [0], [1], [0, 0, 1, 1], [], []>} : vector<10x8xbf16>, vector<8x32xbf16>, vector<10x32xf32> -> vector<10x32xf32>
    %369 = arith.addf %342, %368 : vector<10x32xf32>
    %370 = vector.extract_strided_slice %289 {offsets = [0, 24], sizes = [10, 8], strides = [1, 1]} : vector<10x96xf32> to vector<10x8xf32>
    %371 = vector.extract_strided_slice %289 {offsets = [0, 56], sizes = [10, 8], strides = [1, 1]} : vector<10x96xf32> to vector<10x8xf32>
    %372 = vector.extract_strided_slice %289 {offsets = [0, 88], sizes = [10, 8], strides = [1, 1]} : vector<10x96xf32> to vector<10x8xf32>
    %373 = arith.truncf %370 : vector<10x8xf32> to vector<10x8xbf16>
    %374 = arith.truncf %371 : vector<10x8xf32> to vector<10x8xbf16>
    %cst_153 = arith.constant dense<0.000000e+00> : vector<10x10xf32>
    %375 = tpu.matmul %373, %374, %cst_153 {dimension_numbers = #tpu.dot_dimension_numbers<[1], [1], [0], [0], [0, 0, 1, 0], [], []>} : vector<10x8xbf16>, vector<10x8xbf16>, vector<10x10xf32> -> vector<10x10xf32>
    %cst_154 = arith.constant 0.353553385 : f32
    %376 = vector.broadcast %cst_154 : f32 to vector<10x10xf32>
    %377 = arith.mulf %375, %376 : vector<10x10xf32>
    %378 = arith.addf %377, %36 : vector<10x10xf32>
    %cst_155 = arith.constant dense<0xFF800000> : vector<10xf32>
    %379 = vector.multi_reduction <maximumf>, %378, %cst_155 [1] : vector<10x10xf32> to vector<10xf32>
    %380 = vector.shape_cast %379 : vector<10xf32> to vector<10x1xf32>
    %381 = vector.broadcast %380 : vector<10x1xf32> to vector<10x10xf32>
    %382 = arith.subf %378, %381 : vector<10x10xf32>
    %383 = math.exp %382 : vector<10x10xf32>
    %cst_156 = arith.constant dense<0.000000e+00> : vector<10xf32>
    %384 = vector.multi_reduction <add>, %383, %cst_156 [1] : vector<10x10xf32> to vector<10xf32>
    %385 = vector.shape_cast %384 : vector<10xf32> to vector<10x1xf32>
    %386 = tpu.reciprocal %385 {approx = true} : vector<10x1xf32> -> vector<10x1xf32>
    %387 = vector.broadcast %386 : vector<10x1xf32> to vector<10x10xf32>
    %388 = arith.mulf %383, %387 : vector<10x10xf32>
    %389 = arith.truncf %388 : vector<10x10xf32> to vector<10x10xbf16>
    %390 = arith.truncf %372 : vector<10x8xf32> to vector<10x8xbf16>
    %cst_157 = arith.constant dense<0.000000e+00> : vector<10x8xf32>
    %391 = tpu.matmul %389, %390, %cst_157 {dimension_numbers = #tpu.dot_dimension_numbers<[1], [0], [0], [1], [0, 0, 1, 1], [], []>} : vector<10x10xbf16>, vector<10x8xbf16>, vector<10x8xf32> -> vector<10x8xf32>
    %392 = vector.extract_strided_slice %248 {offsets = [24, 0], sizes = [8, 32], strides = [1, 1]} : vector<32x32xf32> to vector<8x32xf32>
    %393 = arith.truncf %391 : vector<10x8xf32> to vector<10x8xbf16>
    %394 = arith.truncf %392 : vector<8x32xf32> to vector<8x32xbf16>
    %cst_158 = arith.constant dense<0.000000e+00> : vector<10x32xf32>
    %395 = tpu.matmul %393, %394, %cst_158 {dimension_numbers = #tpu.dot_dimension_numbers<[1], [0], [0], [1], [0, 0, 1, 1], [], []>} : vector<10x8xbf16>, vector<8x32xbf16>, vector<10x32xf32> -> vector<10x32xf32>
    %396 = arith.addf %369, %395 : vector<10x32xf32>
    %397 = arith.addf %238, %396 : vector<10x32xf32>
    %398 = vector.broadcast %250 : vector<1x32xf32> to vector<10x32xf32>
    %399 = arith.addf %397, %398 : vector<10x32xf32>
    %cst_159 = arith.constant dense<0.000000e+00> : vector<10xf32>
    %400 = vector.multi_reduction <add>, %399, %cst_159 [1] : vector<10x32xf32> to vector<10xf32>
    %401 = vector.shape_cast %400 : vector<10xf32> to vector<10x1xf32>
    %cst_160 = arith.constant 3.200000e+01 : f32
    %402 = vector.broadcast %cst_160 : f32 to vector<10x1xf32>
    %403 = arith.divf %401, %402 : vector<10x1xf32>
    %404 = vector.broadcast %403 : vector<10x1xf32> to vector<10x32xf32>
    %405 = arith.subf %399, %404 : vector<10x32xf32>
    %406 = arith.mulf %405, %405 : vector<10x32xf32>
    %cst_161 = arith.constant dense<0.000000e+00> : vector<10xf32>
    %407 = vector.multi_reduction <add>, %406, %cst_161 [1] : vector<10x32xf32> to vector<10xf32>
    %408 = vector.shape_cast %407 : vector<10xf32> to vector<10x1xf32>
    %cst_162 = arith.constant 3.200000e+01 : f32
    %409 = vector.broadcast %cst_162 : f32 to vector<10x1xf32>
    %410 = arith.divf %408, %409 : vector<10x1xf32>
    %411 = vector.broadcast %403 : vector<10x1xf32> to vector<10x32xf32>
    %412 = arith.subf %399, %411 : vector<10x32xf32>
    %cst_163 = arith.constant 9.99999974E-6 : f32
    %413 = vector.broadcast %cst_163 : f32 to vector<10x1xf32>
    %414 = arith.addf %410, %413 : vector<10x1xf32>
    %415 = math.rsqrt %414 : vector<10x1xf32>
    %416 = vector.broadcast %415 : vector<10x1xf32> to vector<10x32xf32>
    %417 = arith.mulf %412, %416 : vector<10x32xf32>
    %418 = vector.broadcast %252 : vector<1x32xf32> to vector<10x32xf32>
    %419 = arith.mulf %417, %418 : vector<10x32xf32>
    %420 = vector.broadcast %254 : vector<1x32xf32> to vector<10x32xf32>
    %421 = arith.addf %419, %420 : vector<10x32xf32>
    %422 = arith.truncf %421 : vector<10x32xf32> to vector<10x32xbf16>
    %423 = arith.truncf %256 : vector<32x128xf32> to vector<32x128xbf16>
    %cst_164 = arith.constant dense<0.000000e+00> : vector<10x128xf32>
    %424 = tpu.matmul %422, %423, %cst_164 {dimension_numbers = #tpu.dot_dimension_numbers<[1], [0], [0], [1], [0, 0, 1, 1], [], []>} : vector<10x32xbf16>, vector<32x128xbf16>, vector<10x128xf32> -> vector<10x128xf32>
    %425 = vector.broadcast %258 : vector<1x128xf32> to vector<10x128xf32>
    %426 = arith.addf %424, %425 : vector<10x128xf32>
    %cst_165 = arith.constant 1.702000e+00 : f32
    %427 = vector.broadcast %cst_165 : f32 to vector<10x128xf32>
    %428 = arith.mulf %427, %426 : vector<10x128xf32>
    %429 = arith.negf %428 : vector<10x128xf32>
    %430 = math.exp %429 : vector<10x128xf32>
    %cst_166 = arith.constant 1.000000e+00 : f32
    %431 = vector.broadcast %cst_166 : f32 to vector<10x128xf32>
    %432 = arith.addf %431, %430 : vector<10x128xf32>
    %433 = arith.divf %431, %432 : vector<10x128xf32>
    %434 = arith.mulf %426, %433 : vector<10x128xf32>
    %435 = arith.truncf %434 : vector<10x128xf32> to vector<10x128xbf16>
    %436 = arith.truncf %260 : vector<128x32xf32> to vector<128x32xbf16>
    %cst_167 = arith.constant dense<0.000000e+00> : vector<10x32xf32>
    %437 = tpu.matmul %435, %436, %cst_167 {dimension_numbers = #tpu.dot_dimension_numbers<[1], [0], [0], [1], [0, 0, 1, 1], [], []>} : vector<10x128xbf16>, vector<128x32xbf16>, vector<10x32xf32> -> vector<10x32xf32>
    %438 = arith.addf %399, %437 : vector<10x32xf32>
    %439 = vector.broadcast %262 : vector<1x32xf32> to vector<10x32xf32>
    %440 = arith.addf %438, %439 : vector<10x32xf32>
    %c0_168 = arith.constant 0 : index
    %c0_169 = arith.constant 0 : index
    %441 = vector.load %arg22[%c0_168, %c0_169] : memref<2x10xf32, #tpu.memory_space<vmem>>, vector<2x10xf32>
    %442 = arith.truncf %441 : vector<2x10xf32> to vector<2x10xbf16>
    %443 = arith.truncf %440 : vector<10x32xf32> to vector<10x32xbf16>
    %cst_170 = arith.constant dense<0.000000e+00> : vector<2x32xf32>
    %444 = tpu.matmul %442, %443, %cst_170 {dimension_numbers = #tpu.dot_dimension_numbers<[1], [0], [0], [1], [0, 0, 1, 1], [], []>} : vector<2x10xbf16>, vector<10x32xbf16>, vector<2x32xf32> -> vector<2x32xf32>
    %c0_171 = arith.constant 0 : index
    %c0_172 = arith.constant 0 : index
    %445 = vector.load %arg20[%c0_171, %c0_172] : memref<1x32xf32, #tpu.memory_space<vmem>>, vector<1x32xf32>
    %c0_173 = arith.constant 0 : index
    %c0_174 = arith.constant 0 : index
    %446 = vector.load %arg21[%c0_173, %c0_174] : memref<1x32xf32, #tpu.memory_space<vmem>>, vector<1x32xf32>
    %cst_175 = arith.constant dense<0.000000e+00> : vector<2xf32>
    %447 = vector.multi_reduction <add>, %444, %cst_175 [1] : vector<2x32xf32> to vector<2xf32>
    %448 = vector.shape_cast %447 : vector<2xf32> to vector<2x1xf32>
    %cst_176 = arith.constant 3.200000e+01 : f32
    %449 = vector.broadcast %cst_176 : f32 to vector<2x1xf32>
    %450 = arith.divf %448, %449 : vector<2x1xf32>
    %451 = vector.broadcast %450 : vector<2x1xf32> to vector<2x32xf32>
    %452 = arith.subf %444, %451 : vector<2x32xf32>
    %453 = arith.mulf %452, %452 : vector<2x32xf32>
    %cst_177 = arith.constant dense<0.000000e+00> : vector<2xf32>
    %454 = vector.multi_reduction <add>, %453, %cst_177 [1] : vector<2x32xf32> to vector<2xf32>
    %455 = vector.shape_cast %454 : vector<2xf32> to vector<2x1xf32>
    %cst_178 = arith.constant 3.200000e+01 : f32
    %456 = vector.broadcast %cst_178 : f32 to vector<2x1xf32>
    %457 = arith.divf %455, %456 : vector<2x1xf32>
    %458 = vector.broadcast %450 : vector<2x1xf32> to vector<2x32xf32>
    %459 = arith.subf %444, %458 : vector<2x32xf32>
    %cst_179 = arith.constant 9.99999974E-6 : f32
    %460 = vector.broadcast %cst_179 : f32 to vector<2x1xf32>
    %461 = arith.addf %457, %460 : vector<2x1xf32>
    %462 = math.rsqrt %461 : vector<2x1xf32>
    %463 = vector.broadcast %462 : vector<2x1xf32> to vector<2x32xf32>
    %464 = arith.mulf %459, %463 : vector<2x32xf32>
    %465 = vector.broadcast %445 : vector<1x32xf32> to vector<2x32xf32>
    %466 = arith.mulf %464, %465 : vector<2x32xf32>
    %467 = vector.broadcast %446 : vector<1x32xf32> to vector<2x32xf32>
    %468 = arith.addf %466, %467 : vector<2x32xf32>
    %c0_180 = arith.constant 0 : index
    %c0_181 = arith.constant 0 : index
    %469 = vector.load %arg23[%c0_180, %c0_181] : memref<32x32xf32, #tpu.memory_space<vmem>>, vector<32x32xf32>
    %470 = arith.truncf %468 : vector<2x32xf32> to vector<2x32xbf16>
    %471 = arith.truncf %469 : vector<32x32xf32> to vector<32x32xbf16>
    %cst_182 = arith.constant dense<0.000000e+00> : vector<2x32xf32>
    %472 = tpu.matmul %470, %471, %cst_182 {dimension_numbers = #tpu.dot_dimension_numbers<[1], [0], [0], [1], [0, 0, 1, 1], [], []>} : vector<2x32xbf16>, vector<32x32xbf16>, vector<2x32xf32> -> vector<2x32xf32>
    %c0_183 = arith.constant 0 : index
    %c0_184 = arith.constant 0 : index
    %473 = vector.load %arg24[%c0_183, %c0_184] : memref<2x32xf32, #tpu.memory_space<vmem>>, vector<2x32xf32>
    tpu.vector_store %arg24[%c0_183, %c0_184], %472 {strides = array<i32>} : memref<2x32xf32, #tpu.memory_space<vmem>>, vector<2x32xf32>,
    return
  }
  func.func @transform_0(%arg0: i32) -> (i32, i32) {
    %c0_i32 = arith.constant 0 : i32
    %c0_i32_0 = arith.constant 0 : i32
    %c0_i32_1 = arith.constant 0 : i32
    return %c0_i32, %c0_i32_0 : i32, i32
  }
  func.func @transform_1(%arg0: i32) -> (i32, i32) {
    %c0_i32 = arith.constant 0 : i32
    %c0_i32_0 = arith.constant 0 : i32
    %c0_i32_1 = arith.constant 0 : i32
    return %c0_i32, %c0_i32_0 : i32, i32
  }
  func.func @transform_2(%arg0: i32) -> (i32, i32) {
    %c0_i32 = arith.constant 0 : i32
    %c0_i32_0 = arith.constant 0 : i32
    %c0_i32_1 = arith.constant 0 : i32
    return %c0_i32, %c0_i32_0 : i32, i32
  }
  func.func @transform_3(%arg0: i32) -> (i32, i32) {
    %c0_i32 = arith.constant 0 : i32
    %c0_i32_0 = arith.constant 0 : i32
    %c0_i32_1 = arith.constant 0 : i32
    return %c0_i32, %c0_i32_0 : i32, i32
  }
  func.func @transform_4(%arg0: i32) -> (i32, i32) {
    %c0_i32 = arith.constant 0 : i32
    %c0_i32_0 = arith.constant 0 : i32
    %c0_i32_1 = arith.constant 0 : i32
    return %c0_i32, %c0_i32_0 : i32, i32
  }
  func.func @transform_5(%arg0: i32) -> (i32, i32) {
    %c0_i32 = arith.constant 0 : i32
    %c0_i32_0 = arith.constant 0 : i32
    %c0_i32_1 = arith.constant 0 : i32
    return %c0_i32, %c0_i32_0 : i32, i32
  }
  func.func @transform_6(%arg0: i32) -> (i32, i32) {
    %c0_i32 = arith.constant 0 : i32
    %c0_i32_0 = arith.constant 0 : i32
    %c0_i32_1 = arith.constant 0 : i32
    return %c0_i32, %c0_i32_0 : i32, i32
  }
  func.func @transform_7(%arg0: i32) -> (i32, i32, i32) {
    %c0_i32 = arith.constant 0 : i32
    %c0_i32_0 = arith.constant 0 : i32
    %c0_i32_1 = arith.constant 0 : i32
    %c0_i32_2 = arith.constant 0 : i32
    return %c0_i32, %c0_i32_0, %c0_i32_1 : i32, i32, i32
  }
  func.func @transform_8(%arg0: i32) -> (i32, i32, i32) {
    %c0_i32 = arith.constant 0 : i32
    %c0_i32_0 = arith.constant 0 : i32
    %c0_i32_1 = arith.constant 0 : i32
    %c0_i32_2 = arith.constant 0 : i32
    return %c0_i32, %c0_i32_0, %c0_i32_1 : i32, i32, i32
  }
  func.func @transform_9(%arg0: i32) -> (i32, i32, i32) {
    %c0_i32 = arith.constant 0 : i32
    %c0_i32_0 = arith.constant 0 : i32
    %c0_i32_1 = arith.constant 0 : i32
    %c0_i32_2 = arith.constant 0 : i32
    return %c0_i32, %c0_i32_0, %c0_i32_1 : i32, i32, i32
  }
  func.func @transform_10(%arg0: i32) -> (i32, i32, i32) {
    %c0_i32 = arith.constant 0 : i32
    %c0_i32_0 = arith.constant 0 : i32
    %c0_i32_1 = arith.constant 0 : i32
    %c0_i32_2 = arith.constant 0 : i32
    return %c0_i32, %c0_i32_0, %c0_i32_1 : i32, i32, i32
  }
  func.func @transform_11(%arg0: i32) -> (i32, i32, i32) {
    %c0_i32 = arith.constant 0 : i32
    %c0_i32_0 = arith.constant 0 : i32
    %c0_i32_1 = arith.constant 0 : i32
    %c0_i32_2 = arith.constant 0 : i32
    return %c0_i32, %c0_i32_0, %c0_i32_1 : i32, i32, i32
  }
  func.func @transform_12(%arg0: i32) -> (i32, i32, i32) {
    %c0_i32 = arith.constant 0 : i32
    %c0_i32_0 = arith.constant 0 : i32
    %c0_i32_1 = arith.constant 0 : i32
    %c0_i32_2 = arith.constant 0 : i32
    return %c0_i32, %c0_i32_0, %c0_i32_1 : i32, i32, i32
  }
  func.func @transform_13(%arg0: i32) -> (i32, i32, i32) {
    %c0_i32 = arith.constant 0 : i32
    %c0_i32_0 = arith.constant 0 : i32
    %c0_i32_1 = arith.constant 0 : i32
    %c0_i32_2 = arith.constant 0 : i32
    return %c0_i32, %c0_i32_0, %c0_i32_1 : i32, i32, i32
  }
  func.func @transform_14(%arg0: i32) -> (i32, i32, i32) {
    %c0_i32 = arith.constant 0 : i32
    %c0_i32_0 = arith.constant 0 : i32
    %c0_i32_1 = arith.constant 0 : i32
    %c0_i32_2 = arith.constant 0 : i32
    return %c0_i32, %c0_i32_0, %c0_i32_1 : i32, i32, i32
  }
  func.func @transform_15(%arg0: i32) -> (i32, i32, i32) {
    %c0_i32 = arith.constant 0 : i32
    %c0_i32_0 = arith.constant 0 : i32
    %c0_i32_1 = arith.constant 0 : i32
    %c0_i32_2 = arith.constant 0 : i32
    return %c0_i32, %c0_i32_0, %c0_i32_1 : i32, i32, i32
  }
  func.func @transform_16(%arg0: i32) -> (i32, i32, i32) {
    %c0_i32 = arith.constant 0 : i32
    %c0_i32_0 = arith.constant 0 : i32
    %c0_i32_1 = arith.constant 0 : i32
    %c0_i32_2 = arith.constant 0 : i32
    return %c0_i32, %c0_i32_0, %c0_i32_1 : i32, i32, i32
  }
  func.func @transform_17(%arg0: i32) -> (i32, i32, i32) {
    %c0_i32 = arith.constant 0 : i32
    %c0_i32_0 = arith.constant 0 : i32
    %c0_i32_1 = arith.constant 0 : i32
    %c0_i32_2 = arith.constant 0 : i32
    return %c0_i32, %c0_i32_0, %c0_i32_1 : i32, i32, i32
  }
  func.func @transform_18(%arg0: i32) -> (i32, i32, i32) {
    %c0_i32 = arith.constant 0 : i32
    %c0_i32_0 = arith.constant 0 : i32
    %c0_i32_1 = arith.constant 0 : i32
    %c0_i32_2 = arith.constant 0 : i32
    return %c0_i32, %c0_i32_0, %c0_i32_1 : i32, i32, i32
  }
  func.func @transform_19(%arg0: i32) -> (i32, i32) {
    %c0_i32 = arith.constant 0 : i32
    %c0_i32_0 = arith.constant 0 : i32
    %c0_i32_1 = arith.constant 0 : i32
    return %c0_i32, %c0_i32_0 : i32, i32
  }
  func.func @transform_20(%arg0: i32) -> (i32, i32) {
    %c0_i32 = arith.constant 0 : i32
    %c0_i32_0 = arith.constant 0 : i32
    %c0_i32_1 = arith.constant 0 : i32
    return %c0_i32, %c0_i32_0 : i32, i32
  }
  func.func @transform_21(%arg0: i32) -> (i32, i32) {
    %c0_i32 = arith.constant 0 : i32
    %c0_i32_0 = arith.constant 0 : i32
    %c0_i32_1 = arith.constant 0 : i32
    return %c0_i32, %c0_i32_0 : i32, i32
  }
  func.func @transform_22(%arg0: i32) -> (i32, i32) {
    %c0_i32 = arith.constant 0 : i32
    %c0_i32_0 = arith.constant 0 : i32
    %c0_i32_1 = arith.constant 0 : i32
    return %c0_i32, %c0_i32_0 : i32, i32
  }
  func.func @transform_23(%arg0: i32) -> (i32, i32) {
    %c0_i32 = arith.constant 0 : i32
    %c0_i32_0 = arith.constant 0 : i32
    %c0_i32_1 = arith.constant 0 : i32
    return %c0_i32, %c0_i32_0 : i32, i32
  }
}

module attributes {stable_mosaic.version = 11 : i64} {
  func.func @_clip_logits_kernel(%arg0: i32, %arg1: memref<2x32xf32, #tpu.memory_space<vmem>>, %arg2: memref<4x32xf32, #tpu.memory_space<vmem>>, %arg3: memref<1x1xf32, #tpu.memory_space<smem>>, %arg4: memref<2x32xf32, #tpu.memory_space<vmem>>, %arg5: memref<4x32xf32, #tpu.memory_space<vmem>>, %arg6: memref<2x4xf32, #tpu.memory_space<vmem>>) attributes {dimension_semantics = [#tpu.dimension_semantics<arbitrary>], iteration_bounds = array<i64: 1>, scalar_prefetch = 0 : i64, scratch_operands = 0 : i64, tpu.core_type = #tpu.core_type<tc>, window_params = [{pipeline_mode = #tpu.pipeline_mode<synchronous>, transform_indices = @transform_0, window_bounds = array<i64: 2, 32>}, {pipeline_mode = #tpu.pipeline_mode<synchronous>, transform_indices = @transform_1, window_bounds = array<i64: 4, 32>}, {transform_indices = @transform_2, window_bounds = array<i64: 1, 1>}, {pipeline_mode = #tpu.pipeline_mode<synchronous>, transform_indices = @transform_3, window_bounds = array<i64: 2, 32>}, {pipeline_mode = #tpu.pipeline_mode<synchronous>, transform_indices = @transform_4, window_bounds = array<i64: 4, 32>}, {pipeline_mode = #tpu.pipeline_mode<synchronous>, transform_indices = @transform_5, window_bounds = array<i64: 2, 4>}]} {
    %c0 = arith.constant 0 : index
    %c0_0 = arith.constant 0 : index
    %0 = vector.load %arg1[%c0, %c0_0] : memref<2x32xf32, #tpu.memory_space<vmem>>, vector<2x32xf32>
    %c0_1 = arith.constant 0 : index
    %c0_2 = arith.constant 0 : index
    %1 = vector.load %arg2[%c0_1, %c0_2] : memref<4x32xf32, #tpu.memory_space<vmem>>, vector<4x32xf32>
    %2 = arith.mulf %0, %0 : vector<2x32xf32>
    %cst = arith.constant dense<0.000000e+00> : vector<2xf32>
    %3 = vector.multi_reduction <add>, %2, %cst [1] : vector<2x32xf32> to vector<2xf32>
    %4 = vector.shape_cast %3 : vector<2xf32> to vector<2x1xf32>
    %5 = math.rsqrt %4 : vector<2x1xf32>
    %6 = vector.broadcast %5 : vector<2x1xf32> to vector<2x32xf32>
    %7 = arith.mulf %0, %6 : vector<2x32xf32>
    %8 = arith.mulf %1, %1 : vector<4x32xf32>
    %cst_3 = arith.constant dense<0.000000e+00> : vector<4xf32>
    %9 = vector.multi_reduction <add>, %8, %cst_3 [1] : vector<4x32xf32> to vector<4xf32>
    %10 = vector.shape_cast %9 : vector<4xf32> to vector<4x1xf32>
    %11 = math.rsqrt %10 : vector<4x1xf32>
    %12 = vector.broadcast %11 : vector<4x1xf32> to vector<4x32xf32>
    %13 = arith.mulf %1, %12 : vector<4x32xf32>
    %c0_4 = arith.constant 0 : index
    %c0_5 = arith.constant 0 : index
    %14 = memref.load %arg3[%c0_4, %c0_5] : memref<1x1xf32, #tpu.memory_space<smem>>
    %15 = math.exp %14 : f32
    %c0_6 = arith.constant 0 : index
    %c0_7 = arith.constant 0 : index
    %16 = vector.load %arg4[%c0_6, %c0_7] : memref<2x32xf32, #tpu.memory_space<vmem>>, vector<2x32xf32>
    tpu.vector_store %arg4[%c0_6, %c0_7], %7 {strides = array<i32>} : memref<2x32xf32, #tpu.memory_space<vmem>>, vector<2x32xf32>,
    %c0_8 = arith.constant 0 : index
    %c0_9 = arith.constant 0 : index
    %17 = vector.load %arg5[%c0_8, %c0_9] : memref<4x32xf32, #tpu.memory_space<vmem>>, vector<4x32xf32>
    tpu.vector_store %arg5[%c0_8, %c0_9], %13 {strides = array<i32>} : memref<4x32xf32, #tpu.memory_space<vmem>>, vector<4x32xf32>,
    %cst_10 = arith.constant dense<0.000000e+00> : vector<2x4xf32>
    %18 = tpu.matmul %7, %13, %cst_10 {dimension_numbers = #tpu.dot_dimension_numbers<[1], [1], [0], [0], [0, 0, 1, 0], [], []>} : vector<2x32xf32>, vector<4x32xf32>, vector<2x4xf32> -> vector<2x4xf32>
    %19 = vector.broadcast %15 : f32 to vector<2x4xf32>
    %20 = arith.mulf %19, %18 : vector<2x4xf32>
    %c0_11 = arith.constant 0 : index
    %c0_12 = arith.constant 0 : index
    %21 = vector.load %arg6[%c0_11, %c0_12] : memref<2x4xf32, #tpu.memory_space<vmem>>, vector<2x4xf32>
    tpu.vector_store %arg6[%c0_11, %c0_12], %20 {strides = array<i32>} : memref<2x4xf32, #tpu.memory_space<vmem>>, vector<2x4xf32>,
    return
  }
  func.func @transform_0(%arg0: i32) -> (i32, i32) {
    %c0_i32 = arith.constant 0 : i32
    %c0_i32_0 = arith.constant 0 : i32
    %c0_i32_1 = arith.constant 0 : i32
    return %c0_i32, %c0_i32_0 : i32, i32
  }
  func.func @transform_1(%arg0: i32) -> (i32, i32) {
    %c0_i32 = arith.constant 0 : i32
    %c0_i32_0 = arith.constant 0 : i32
    %c0_i32_1 = arith.constant 0 : i32
    return %c0_i32, %c0_i32_0 : i32, i32
  }
  func.func @transform_2(%arg0: i32) -> (i32, i32) {
    %c0_i32 = arith.constant 0 : i32
    %c0_i32_0 = arith.constant 0 : i32
    %c0_i32_1 = arith.constant 0 : i32
    return %c0_i32, %c0_i32_0 : i32, i32
  }
  func.func @transform_3(%arg0: i32) -> (i32, i32) {
    %c0_i32 = arith.constant 0 : i32
    %c0_i32_0 = arith.constant 0 : i32
    %c0_i32_1 = arith.constant 0 : i32
    return %c0_i32, %c0_i32_0 : i32, i32
  }
  func.func @transform_4(%arg0: i32) -> (i32, i32) {
    %c0_i32 = arith.constant 0 : i32
    %c0_i32_0 = arith.constant 0 : i32
    %c0_i32_1 = arith.constant 0 : i32
    return %c0_i32, %c0_i32_0 : i32, i32
  }
  func.func @transform_5(%arg0: i32) -> (i32, i32) {
    %c0_i32 = arith.constant 0 : i32
    %c0_i32_0 = arith.constant 0 : i32
    %c0_i32_1 = arith.constant 0 : i32
    return %c0_i32, %c0_i32_0 : i32, i32
  }
}

module attributes {stable_mosaic.version = 11 : i64} {
  func.func @_text_encoder_kernel(%arg0: i32, %arg1: memref<32x32xf32, #tpu.memory_space<vmem>>, %arg2: memref<32x32xf32, #tpu.memory_space<vmem>>, %arg3: memref<4x32xf32, #tpu.memory_space<vmem>>, %arg4: memref<2x1x32xf32, #tpu.memory_space<vmem>>, %arg5: memref<2x1x32xf32, #tpu.memory_space<vmem>>, %arg6: memref<2x32x96xf32, #tpu.memory_space<vmem>>, %arg7: memref<2x1x96xf32, #tpu.memory_space<vmem>>, %arg8: memref<2x32x32xf32, #tpu.memory_space<vmem>>, %arg9: memref<2x1x32xf32, #tpu.memory_space<vmem>>, %arg10: memref<2x1x32xf32, #tpu.memory_space<vmem>>, %arg11: memref<2x1x32xf32, #tpu.memory_space<vmem>>, %arg12: memref<2x32x128xf32, #tpu.memory_space<vmem>>, %arg13: memref<2x1x128xf32, #tpu.memory_space<vmem>>, %arg14: memref<2x128x32xf32, #tpu.memory_space<vmem>>, %arg15: memref<2x1x32xf32, #tpu.memory_space<vmem>>, %arg16: memref<1x32xf32, #tpu.memory_space<vmem>>, %arg17: memref<1x32xf32, #tpu.memory_space<vmem>>, %arg18: memref<32x32xf32, #tpu.memory_space<vmem>>, %arg19: memref<4x32xf32, #tpu.memory_space<vmem>>) attributes {dimension_semantics = [#tpu.dimension_semantics<arbitrary>], iteration_bounds = array<i64: 1>, scalar_prefetch = 0 : i64, scratch_operands = 0 : i64, tpu.core_type = #tpu.core_type<tc>, window_params = [{pipeline_mode = #tpu.pipeline_mode<synchronous>, transform_indices = @transform_0, window_bounds = array<i64: 32, 32>}, {pipeline_mode = #tpu.pipeline_mode<synchronous>, transform_indices = @transform_1, window_bounds = array<i64: 32, 32>}, {pipeline_mode = #tpu.pipeline_mode<synchronous>, transform_indices = @transform_2, window_bounds = array<i64: 4, 32>}, {pipeline_mode = #tpu.pipeline_mode<synchronous>, transform_indices = @transform_3, window_bounds = array<i64: 2, 1, 32>}, {pipeline_mode = #tpu.pipeline_mode<synchronous>, transform_indices = @transform_4, window_bounds = array<i64: 2, 1, 32>}, {pipeline_mode = #tpu.pipeline_mode<synchronous>, transform_indices = @transform_5, window_bounds = array<i64: 2, 32, 96>}, {pipeline_mode = #tpu.pipeline_mode<synchronous>, transform_indices = @transform_6, window_bounds = array<i64: 2, 1, 96>}, {pipeline_mode = #tpu.pipeline_mode<synchronous>, transform_indices = @transform_7, window_bounds = array<i64: 2, 32, 32>}, {pipeline_mode = #tpu.pipeline_mode<synchronous>, transform_indices = @transform_8, window_bounds = array<i64: 2, 1, 32>}, {pipeline_mode = #tpu.pipeline_mode<synchronous>, transform_indices = @transform_9, window_bounds = array<i64: 2, 1, 32>}, {pipeline_mode = #tpu.pipeline_mode<synchronous>, transform_indices = @transform_10, window_bounds = array<i64: 2, 1, 32>}, {pipeline_mode = #tpu.pipeline_mode<synchronous>, transform_indices = @transform_11, window_bounds = array<i64: 2, 32, 128>}, {pipeline_mode = #tpu.pipeline_mode<synchronous>, transform_indices = @transform_12, window_bounds = array<i64: 2, 1, 128>}, {pipeline_mode = #tpu.pipeline_mode<synchronous>, transform_indices = @transform_13, window_bounds = array<i64: 2, 128, 32>}, {pipeline_mode = #tpu.pipeline_mode<synchronous>, transform_indices = @transform_14, window_bounds = array<i64: 2, 1, 32>}, {pipeline_mode = #tpu.pipeline_mode<synchronous>, transform_indices = @transform_15, window_bounds = array<i64: 1, 32>}, {pipeline_mode = #tpu.pipeline_mode<synchronous>, transform_indices = @transform_16, window_bounds = array<i64: 1, 32>}, {pipeline_mode = #tpu.pipeline_mode<synchronous>, transform_indices = @transform_17, window_bounds = array<i64: 32, 32>}, {pipeline_mode = #tpu.pipeline_mode<synchronous>, transform_indices = @transform_18, window_bounds = array<i64: 4, 32>}]} {
    %c0 = arith.constant 0 : index
    %c0_0 = arith.constant 0 : index
    %0 = vector.load %arg1[%c0, %c0_0] : memref<32x32xf32, #tpu.memory_space<vmem>>, vector<32x32xf32>
    %c0_1 = arith.constant 0 : index
    %c0_2 = arith.constant 0 : index
    %1 = vector.load %arg2[%c0_1, %c0_2] : memref<32x32xf32, #tpu.memory_space<vmem>>, vector<32x32xf32>
    %2 = vector.shape_cast %1 : vector<32x32xf32> to vector<32x32xf32>
    %c0_3 = arith.constant 0 : index
    %c0_4 = arith.constant 0 : index
    %c0_5 = arith.constant 0 : index
    %3 = vector.load %arg4[%c0_3, %c0_4, %c0_5] : memref<2x1x32xf32, #tpu.memory_space<vmem>>, vector<1x1x32xf32>
    %4 = vector.shape_cast %3 : vector<1x1x32xf32> to vector<1x32xf32>
    %c0_6 = arith.constant 0 : index
    %c0_7 = arith.constant 0 : index
    %c0_8 = arith.constant 0 : index
    %5 = vector.load %arg5[%c0_6, %c0_7, %c0_8] : memref<2x1x32xf32, #tpu.memory_space<vmem>>, vector<1x1x32xf32>
    %6 = vector.shape_cast %5 : vector<1x1x32xf32> to vector<1x32xf32>
    %c0_9 = arith.constant 0 : index
    %c0_10 = arith.constant 0 : index
    %c0_11 = arith.constant 0 : index
    %7 = vector.load %arg6[%c0_9, %c0_10, %c0_11] : memref<2x32x96xf32, #tpu.memory_space<vmem>>, vector<1x32x96xf32>
    %8 = vector.shape_cast %7 : vector<1x32x96xf32> to vector<32x96xf32>
    %c0_12 = arith.constant 0 : index
    %c0_13 = arith.constant 0 : index
    %c0_14 = arith.constant 0 : index
    %9 = vector.load %arg7[%c0_12, %c0_13, %c0_14] : memref<2x1x96xf32, #tpu.memory_space<vmem>>, vector<1x1x96xf32>
    %10 = vector.shape_cast %9 : vector<1x1x96xf32> to vector<1x96xf32>
    %c0_15 = arith.constant 0 : index
    %c0_16 = arith.constant 0 : index
    %c0_17 = arith.constant 0 : index
    %11 = vector.load %arg8[%c0_15, %c0_16, %c0_17] : memref<2x32x32xf32, #tpu.memory_space<vmem>>, vector<1x32x32xf32>
    %12 = vector.shape_cast %11 : vector<1x32x32xf32> to vector<32x32xf32>
    %c0_18 = arith.constant 0 : index
    %c0_19 = arith.constant 0 : index
    %c0_20 = arith.constant 0 : index
    %13 = vector.load %arg9[%c0_18, %c0_19, %c0_20] : memref<2x1x32xf32, #tpu.memory_space<vmem>>, vector<1x1x32xf32>
    %14 = vector.shape_cast %13 : vector<1x1x32xf32> to vector<1x32xf32>
    %c0_21 = arith.constant 0 : index
    %c0_22 = arith.constant 0 : index
    %c0_23 = arith.constant 0 : index
    %15 = vector.load %arg10[%c0_21, %c0_22, %c0_23] : memref<2x1x32xf32, #tpu.memory_space<vmem>>, vector<1x1x32xf32>
    %16 = vector.shape_cast %15 : vector<1x1x32xf32> to vector<1x32xf32>
    %c0_24 = arith.constant 0 : index
    %c0_25 = arith.constant 0 : index
    %c0_26 = arith.constant 0 : index
    %17 = vector.load %arg11[%c0_24, %c0_25, %c0_26] : memref<2x1x32xf32, #tpu.memory_space<vmem>>, vector<1x1x32xf32>
    %18 = vector.shape_cast %17 : vector<1x1x32xf32> to vector<1x32xf32>
    %c0_27 = arith.constant 0 : index
    %c0_28 = arith.constant 0 : index
    %c0_29 = arith.constant 0 : index
    %19 = vector.load %arg12[%c0_27, %c0_28, %c0_29] : memref<2x32x128xf32, #tpu.memory_space<vmem>>, vector<1x32x128xf32>
    %20 = vector.shape_cast %19 : vector<1x32x128xf32> to vector<32x128xf32>
    %c0_30 = arith.constant 0 : index
    %c0_31 = arith.constant 0 : index
    %c0_32 = arith.constant 0 : index
    %21 = vector.load %arg13[%c0_30, %c0_31, %c0_32] : memref<2x1x128xf32, #tpu.memory_space<vmem>>, vector<1x1x128xf32>
    %22 = vector.shape_cast %21 : vector<1x1x128xf32> to vector<1x128xf32>
    %c0_33 = arith.constant 0 : index
    %c0_34 = arith.constant 0 : index
    %c0_35 = arith.constant 0 : index
    %23 = vector.load %arg14[%c0_33, %c0_34, %c0_35] : memref<2x128x32xf32, #tpu.memory_space<vmem>>, vector<1x128x32xf32>
    %24 = vector.shape_cast %23 : vector<1x128x32xf32> to vector<128x32xf32>
    %c0_36 = arith.constant 0 : index
    %c0_37 = arith.constant 0 : index
    %c0_38 = arith.constant 0 : index
    %25 = vector.load %arg15[%c0_36, %c0_37, %c0_38] : memref<2x1x32xf32, #tpu.memory_space<vmem>>, vector<1x1x32xf32>
    %26 = vector.shape_cast %25 : vector<1x1x32xf32> to vector<1x32xf32>
    %cst = arith.constant dense<0.000000e+00> : vector<32xf32>
    %27 = vector.multi_reduction <add>, %0, %cst [1] : vector<32x32xf32> to vector<32xf32>
    %28 = vector.shape_cast %27 : vector<32xf32> to vector<32x1xf32>
    %cst_39 = arith.constant 3.200000e+01 : f32
    %29 = vector.broadcast %cst_39 : f32 to vector<32x1xf32>
    %30 = arith.divf %28, %29 : vector<32x1xf32>
    %31 = vector.broadcast %30 : vector<32x1xf32> to vector<32x32xf32>
    %32 = arith.subf %0, %31 : vector<32x32xf32>
    %33 = arith.mulf %32, %32 : vector<32x32xf32>
    %cst_40 = arith.constant dense<0.000000e+00> : vector<32xf32>
    %34 = vector.multi_reduction <add>, %33, %cst_40 [1] : vector<32x32xf32> to vector<32xf32>
    %35 = vector.shape_cast %34 : vector<32xf32> to vector<32x1xf32>
    %cst_41 = arith.constant 3.200000e+01 : f32
    %36 = vector.broadcast %cst_41 : f32 to vector<32x1xf32>
    %37 = arith.divf %35, %36 : vector<32x1xf32>
    %38 = vector.broadcast %30 : vector<32x1xf32> to vector<32x32xf32>
    %39 = arith.subf %0, %38 : vector<32x32xf32>
    %cst_42 = arith.constant 9.99999974E-6 : f32
    %40 = vector.broadcast %cst_42 : f32 to vector<32x1xf32>
    %41 = arith.addf %37, %40 : vector<32x1xf32>
    %42 = math.rsqrt %41 : vector<32x1xf32>
    %43 = vector.broadcast %42 : vector<32x1xf32> to vector<32x32xf32>
    %44 = arith.mulf %39, %43 : vector<32x32xf32>
    %45 = vector.broadcast %4 : vector<1x32xf32> to vector<32x32xf32>
    %46 = arith.mulf %44, %45 : vector<32x32xf32>
    %47 = vector.broadcast %6 : vector<1x32xf32> to vector<32x32xf32>
    %48 = arith.addf %46, %47 : vector<32x32xf32>
    %49 = arith.truncf %48 : vector<32x32xf32> to vector<32x32xbf16>
    %50 = arith.truncf %8 : vector<32x96xf32> to vector<32x96xbf16>
    %cst_43 = arith.constant dense<0.000000e+00> : vector<32x96xf32>
    %51 = tpu.matmul %49, %50, %cst_43 {dimension_numbers = #tpu.dot_dimension_numbers<[1], [0], [0], [1], [0, 0, 1, 1], [], []>} : vector<32x32xbf16>, vector<32x96xbf16>, vector<32x96xf32> -> vector<32x96xf32>
    %52 = vector.broadcast %10 : vector<1x96xf32> to vector<32x96xf32>
    %53 = arith.addf %51, %52 : vector<32x96xf32>
    %54 = vector.extract_strided_slice %53 {offsets = [0, 0], sizes = [32, 8], strides = [1, 1]} : vector<32x96xf32> to vector<32x8xf32>
    %55 = vector.extract_strided_slice %53 {offsets = [0, 32], sizes = [32, 8], strides = [1, 1]} : vector<32x96xf32> to vector<32x8xf32>
    %56 = vector.extract_strided_slice %53 {offsets = [0, 64], sizes = [32, 8], strides = [1, 1]} : vector<32x96xf32> to vector<32x8xf32>
    %57 = arith.truncf %54 : vector<32x8xf32> to vector<32x8xbf16>
    %58 = arith.truncf %55 : vector<32x8xf32> to vector<32x8xbf16>
    %cst_44 = arith.constant dense<0.000000e+00> : vector<32x32xf32>
    %59 = tpu.matmul %57, %58, %cst_44 {dimension_numbers = #tpu.dot_dimension_numbers<[1], [1], [0], [0], [0, 0, 1, 0], [], []>} : vector<32x8xbf16>, vector<32x8xbf16>, vector<32x32xf32> -> vector<32x32xf32>
    %cst_45 = arith.constant 0.353553385 : f32
    %60 = vector.broadcast %cst_45 : f32 to vector<32x32xf32>
    %61 = arith.mulf %59, %60 : vector<32x32xf32>
    %62 = arith.addf %61, %2 : vector<32x32xf32>
    %cst_46 = arith.constant dense<0xFF800000> : vector<32xf32>
    %63 = vector.multi_reduction <maximumf>, %62, %cst_46 [1] : vector<32x32xf32> to vector<32xf32>
    %64 = vector.shape_cast %63 : vector<32xf32> to vector<32x1xf32>
    %65 = vector.broadcast %64 : vector<32x1xf32> to vector<32x32xf32>
    %66 = arith.subf %62, %65 : vector<32x32xf32>
    %67 = math.exp %66 : vector<32x32xf32>
    %cst_47 = arith.constant dense<0.000000e+00> : vector<32xf32>
    %68 = vector.multi_reduction <add>, %67, %cst_47 [1] : vector<32x32xf32> to vector<32xf32>
    %69 = vector.shape_cast %68 : vector<32xf32> to vector<32x1xf32>
    %70 = tpu.reciprocal %69 {approx = true} : vector<32x1xf32> -> vector<32x1xf32>
    %71 = vector.broadcast %70 : vector<32x1xf32> to vector<32x32xf32>
    %72 = arith.mulf %67, %71 : vector<32x32xf32>
    %73 = arith.truncf %72 : vector<32x32xf32> to vector<32x32xbf16>
    %74 = arith.truncf %56 : vector<32x8xf32> to vector<32x8xbf16>
    %cst_48 = arith.constant dense<0.000000e+00> : vector<32x8xf32>
    %75 = tpu.matmul %73, %74, %cst_48 {dimension_numbers = #tpu.dot_dimension_numbers<[1], [0], [0], [1], [0, 0, 1, 1], [], []>} : vector<32x32xbf16>, vector<32x8xbf16>, vector<32x8xf32> -> vector<32x8xf32>
    %76 = vector.extract_strided_slice %12 {offsets = [0, 0], sizes = [8, 32], strides = [1, 1]} : vector<32x32xf32> to vector<8x32xf32>
    %77 = arith.truncf %75 : vector<32x8xf32> to vector<32x8xbf16>
    %78 = arith.truncf %76 : vector<8x32xf32> to vector<8x32xbf16>
    %cst_49 = arith.constant dense<0.000000e+00> : vector<32x32xf32>
    %79 = tpu.matmul %77, %78, %cst_49 {dimension_numbers = #tpu.dot_dimension_numbers<[1], [0], [0], [1], [0, 0, 1, 1], [], []>} : vector<32x8xbf16>, vector<8x32xbf16>, vector<32x32xf32> -> vector<32x32xf32>
    %80 = vector.extract_strided_slice %53 {offsets = [0, 8], sizes = [32, 8], strides = [1, 1]} : vector<32x96xf32> to vector<32x8xf32>
    %81 = vector.extract_strided_slice %53 {offsets = [0, 40], sizes = [32, 8], strides = [1, 1]} : vector<32x96xf32> to vector<32x8xf32>
    %82 = vector.extract_strided_slice %53 {offsets = [0, 72], sizes = [32, 8], strides = [1, 1]} : vector<32x96xf32> to vector<32x8xf32>
    %83 = arith.truncf %80 : vector<32x8xf32> to vector<32x8xbf16>
    %84 = arith.truncf %81 : vector<32x8xf32> to vector<32x8xbf16>
    %cst_50 = arith.constant dense<0.000000e+00> : vector<32x32xf32>
    %85 = tpu.matmul %83, %84, %cst_50 {dimension_numbers = #tpu.dot_dimension_numbers<[1], [1], [0], [0], [0, 0, 1, 0], [], []>} : vector<32x8xbf16>, vector<32x8xbf16>, vector<32x32xf32> -> vector<32x32xf32>
    %cst_51 = arith.constant 0.353553385 : f32
    %86 = vector.broadcast %cst_51 : f32 to vector<32x32xf32>
    %87 = arith.mulf %85, %86 : vector<32x32xf32>
    %88 = arith.addf %87, %2 : vector<32x32xf32>
    %cst_52 = arith.constant dense<0xFF800000> : vector<32xf32>
    %89 = vector.multi_reduction <maximumf>, %88, %cst_52 [1] : vector<32x32xf32> to vector<32xf32>
    %90 = vector.shape_cast %89 : vector<32xf32> to vector<32x1xf32>
    %91 = vector.broadcast %90 : vector<32x1xf32> to vector<32x32xf32>
    %92 = arith.subf %88, %91 : vector<32x32xf32>
    %93 = math.exp %92 : vector<32x32xf32>
    %cst_53 = arith.constant dense<0.000000e+00> : vector<32xf32>
    %94 = vector.multi_reduction <add>, %93, %cst_53 [1] : vector<32x32xf32> to vector<32xf32>
    %95 = vector.shape_cast %94 : vector<32xf32> to vector<32x1xf32>
    %96 = tpu.reciprocal %95 {approx = true} : vector<32x1xf32> -> vector<32x1xf32>
    %97 = vector.broadcast %96 : vector<32x1xf32> to vector<32x32xf32>
    %98 = arith.mulf %93, %97 : vector<32x32xf32>
    %99 = arith.truncf %98 : vector<32x32xf32> to vector<32x32xbf16>
    %100 = arith.truncf %82 : vector<32x8xf32> to vector<32x8xbf16>
    %cst_54 = arith.constant dense<0.000000e+00> : vector<32x8xf32>
    %101 = tpu.matmul %99, %100, %cst_54 {dimension_numbers = #tpu.dot_dimension_numbers<[1], [0], [0], [1], [0, 0, 1, 1], [], []>} : vector<32x32xbf16>, vector<32x8xbf16>, vector<32x8xf32> -> vector<32x8xf32>
    %102 = vector.extract_strided_slice %12 {offsets = [8, 0], sizes = [8, 32], strides = [1, 1]} : vector<32x32xf32> to vector<8x32xf32>
    %103 = arith.truncf %101 : vector<32x8xf32> to vector<32x8xbf16>
    %104 = arith.truncf %102 : vector<8x32xf32> to vector<8x32xbf16>
    %cst_55 = arith.constant dense<0.000000e+00> : vector<32x32xf32>
    %105 = tpu.matmul %103, %104, %cst_55 {dimension_numbers = #tpu.dot_dimension_numbers<[1], [0], [0], [1], [0, 0, 1, 1], [], []>} : vector<32x8xbf16>, vector<8x32xbf16>, vector<32x32xf32> -> vector<32x32xf32>
    %106 = arith.addf %79, %105 : vector<32x32xf32>
    %107 = vector.extract_strided_slice %53 {offsets = [0, 16], sizes = [32, 8], strides = [1, 1]} : vector<32x96xf32> to vector<32x8xf32>
    %108 = vector.extract_strided_slice %53 {offsets = [0, 48], sizes = [32, 8], strides = [1, 1]} : vector<32x96xf32> to vector<32x8xf32>
    %109 = vector.extract_strided_slice %53 {offsets = [0, 80], sizes = [32, 8], strides = [1, 1]} : vector<32x96xf32> to vector<32x8xf32>
    %110 = arith.truncf %107 : vector<32x8xf32> to vector<32x8xbf16>
    %111 = arith.truncf %108 : vector<32x8xf32> to vector<32x8xbf16>
    %cst_56 = arith.constant dense<0.000000e+00> : vector<32x32xf32>
    %112 = tpu.matmul %110, %111, %cst_56 {dimension_numbers = #tpu.dot_dimension_numbers<[1], [1], [0], [0], [0, 0, 1, 0], [], []>} : vector<32x8xbf16>, vector<32x8xbf16>, vector<32x32xf32> -> vector<32x32xf32>
    %cst_57 = arith.constant 0.353553385 : f32
    %113 = vector.broadcast %cst_57 : f32 to vector<32x32xf32>
    %114 = arith.mulf %112, %113 : vector<32x32xf32>
    %115 = arith.addf %114, %2 : vector<32x32xf32>
    %cst_58 = arith.constant dense<0xFF800000> : vector<32xf32>
    %116 = vector.multi_reduction <maximumf>, %115, %cst_58 [1] : vector<32x32xf32> to vector<32xf32>
    %117 = vector.shape_cast %116 : vector<32xf32> to vector<32x1xf32>
    %118 = vector.broadcast %117 : vector<32x1xf32> to vector<32x32xf32>
    %119 = arith.subf %115, %118 : vector<32x32xf32>
    %120 = math.exp %119 : vector<32x32xf32>
    %cst_59 = arith.constant dense<0.000000e+00> : vector<32xf32>
    %121 = vector.multi_reduction <add>, %120, %cst_59 [1] : vector<32x32xf32> to vector<32xf32>
    %122 = vector.shape_cast %121 : vector<32xf32> to vector<32x1xf32>
    %123 = tpu.reciprocal %122 {approx = true} : vector<32x1xf32> -> vector<32x1xf32>
    %124 = vector.broadcast %123 : vector<32x1xf32> to vector<32x32xf32>
    %125 = arith.mulf %120, %124 : vector<32x32xf32>
    %126 = arith.truncf %125 : vector<32x32xf32> to vector<32x32xbf16>
    %127 = arith.truncf %109 : vector<32x8xf32> to vector<32x8xbf16>
    %cst_60 = arith.constant dense<0.000000e+00> : vector<32x8xf32>
    %128 = tpu.matmul %126, %127, %cst_60 {dimension_numbers = #tpu.dot_dimension_numbers<[1], [0], [0], [1], [0, 0, 1, 1], [], []>} : vector<32x32xbf16>, vector<32x8xbf16>, vector<32x8xf32> -> vector<32x8xf32>
    %129 = vector.extract_strided_slice %12 {offsets = [16, 0], sizes = [8, 32], strides = [1, 1]} : vector<32x32xf32> to vector<8x32xf32>
    %130 = arith.truncf %128 : vector<32x8xf32> to vector<32x8xbf16>
    %131 = arith.truncf %129 : vector<8x32xf32> to vector<8x32xbf16>
    %cst_61 = arith.constant dense<0.000000e+00> : vector<32x32xf32>
    %132 = tpu.matmul %130, %131, %cst_61 {dimension_numbers = #tpu.dot_dimension_numbers<[1], [0], [0], [1], [0, 0, 1, 1], [], []>} : vector<32x8xbf16>, vector<8x32xbf16>, vector<32x32xf32> -> vector<32x32xf32>
    %133 = arith.addf %106, %132 : vector<32x32xf32>
    %134 = vector.extract_strided_slice %53 {offsets = [0, 24], sizes = [32, 8], strides = [1, 1]} : vector<32x96xf32> to vector<32x8xf32>
    %135 = vector.extract_strided_slice %53 {offsets = [0, 56], sizes = [32, 8], strides = [1, 1]} : vector<32x96xf32> to vector<32x8xf32>
    %136 = vector.extract_strided_slice %53 {offsets = [0, 88], sizes = [32, 8], strides = [1, 1]} : vector<32x96xf32> to vector<32x8xf32>
    %137 = arith.truncf %134 : vector<32x8xf32> to vector<32x8xbf16>
    %138 = arith.truncf %135 : vector<32x8xf32> to vector<32x8xbf16>
    %cst_62 = arith.constant dense<0.000000e+00> : vector<32x32xf32>
    %139 = tpu.matmul %137, %138, %cst_62 {dimension_numbers = #tpu.dot_dimension_numbers<[1], [1], [0], [0], [0, 0, 1, 0], [], []>} : vector<32x8xbf16>, vector<32x8xbf16>, vector<32x32xf32> -> vector<32x32xf32>
    %cst_63 = arith.constant 0.353553385 : f32
    %140 = vector.broadcast %cst_63 : f32 to vector<32x32xf32>
    %141 = arith.mulf %139, %140 : vector<32x32xf32>
    %142 = arith.addf %141, %2 : vector<32x32xf32>
    %cst_64 = arith.constant dense<0xFF800000> : vector<32xf32>
    %143 = vector.multi_reduction <maximumf>, %142, %cst_64 [1] : vector<32x32xf32> to vector<32xf32>
    %144 = vector.shape_cast %143 : vector<32xf32> to vector<32x1xf32>
    %145 = vector.broadcast %144 : vector<32x1xf32> to vector<32x32xf32>
    %146 = arith.subf %142, %145 : vector<32x32xf32>
    %147 = math.exp %146 : vector<32x32xf32>
    %cst_65 = arith.constant dense<0.000000e+00> : vector<32xf32>
    %148 = vector.multi_reduction <add>, %147, %cst_65 [1] : vector<32x32xf32> to vector<32xf32>
    %149 = vector.shape_cast %148 : vector<32xf32> to vector<32x1xf32>
    %150 = tpu.reciprocal %149 {approx = true} : vector<32x1xf32> -> vector<32x1xf32>
    %151 = vector.broadcast %150 : vector<32x1xf32> to vector<32x32xf32>
    %152 = arith.mulf %147, %151 : vector<32x32xf32>
    %153 = arith.truncf %152 : vector<32x32xf32> to vector<32x32xbf16>
    %154 = arith.truncf %136 : vector<32x8xf32> to vector<32x8xbf16>
    %cst_66 = arith.constant dense<0.000000e+00> : vector<32x8xf32>
    %155 = tpu.matmul %153, %154, %cst_66 {dimension_numbers = #tpu.dot_dimension_numbers<[1], [0], [0], [1], [0, 0, 1, 1], [], []>} : vector<32x32xbf16>, vector<32x8xbf16>, vector<32x8xf32> -> vector<32x8xf32>
    %156 = vector.extract_strided_slice %12 {offsets = [24, 0], sizes = [8, 32], strides = [1, 1]} : vector<32x32xf32> to vector<8x32xf32>
    %157 = arith.truncf %155 : vector<32x8xf32> to vector<32x8xbf16>
    %158 = arith.truncf %156 : vector<8x32xf32> to vector<8x32xbf16>
    %cst_67 = arith.constant dense<0.000000e+00> : vector<32x32xf32>
    %159 = tpu.matmul %157, %158, %cst_67 {dimension_numbers = #tpu.dot_dimension_numbers<[1], [0], [0], [1], [0, 0, 1, 1], [], []>} : vector<32x8xbf16>, vector<8x32xbf16>, vector<32x32xf32> -> vector<32x32xf32>
    %160 = arith.addf %133, %159 : vector<32x32xf32>
    %161 = arith.addf %0, %160 : vector<32x32xf32>
    %162 = vector.broadcast %14 : vector<1x32xf32> to vector<32x32xf32>
    %163 = arith.addf %161, %162 : vector<32x32xf32>
    %cst_68 = arith.constant dense<0.000000e+00> : vector<32xf32>
    %164 = vector.multi_reduction <add>, %163, %cst_68 [1] : vector<32x32xf32> to vector<32xf32>
    %165 = vector.shape_cast %164 : vector<32xf32> to vector<32x1xf32>
    %cst_69 = arith.constant 3.200000e+01 : f32
    %166 = vector.broadcast %cst_69 : f32 to vector<32x1xf32>
    %167 = arith.divf %165, %166 : vector<32x1xf32>
    %168 = vector.broadcast %167 : vector<32x1xf32> to vector<32x32xf32>
    %169 = arith.subf %163, %168 : vector<32x32xf32>
    %170 = arith.mulf %169, %169 : vector<32x32xf32>
    %cst_70 = arith.constant dense<0.000000e+00> : vector<32xf32>
    %171 = vector.multi_reduction <add>, %170, %cst_70 [1] : vector<32x32xf32> to vector<32xf32>
    %172 = vector.shape_cast %171 : vector<32xf32> to vector<32x1xf32>
    %cst_71 = arith.constant 3.200000e+01 : f32
    %173 = vector.broadcast %cst_71 : f32 to vector<32x1xf32>
    %174 = arith.divf %172, %173 : vector<32x1xf32>
    %175 = vector.broadcast %167 : vector<32x1xf32> to vector<32x32xf32>
    %176 = arith.subf %163, %175 : vector<32x32xf32>
    %cst_72 = arith.constant 9.99999974E-6 : f32
    %177 = vector.broadcast %cst_72 : f32 to vector<32x1xf32>
    %178 = arith.addf %174, %177 : vector<32x1xf32>
    %179 = math.rsqrt %178 : vector<32x1xf32>
    %180 = vector.broadcast %179 : vector<32x1xf32> to vector<32x32xf32>
    %181 = arith.mulf %176, %180 : vector<32x32xf32>
    %182 = vector.broadcast %16 : vector<1x32xf32> to vector<32x32xf32>
    %183 = arith.mulf %181, %182 : vector<32x32xf32>
    %184 = vector.broadcast %18 : vector<1x32xf32> to vector<32x32xf32>
    %185 = arith.addf %183, %184 : vector<32x32xf32>
    %186 = arith.truncf %185 : vector<32x32xf32> to vector<32x32xbf16>
    %187 = arith.truncf %20 : vector<32x128xf32> to vector<32x128xbf16>
    %cst_73 = arith.constant dense<0.000000e+00> : vector<32x128xf32>
    %188 = tpu.matmul %186, %187, %cst_73 {dimension_numbers = #tpu.dot_dimension_numbers<[1], [0], [0], [1], [0, 0, 1, 1], [], []>} : vector<32x32xbf16>, vector<32x128xbf16>, vector<32x128xf32> -> vector<32x128xf32>
    %189 = vector.broadcast %22 : vector<1x128xf32> to vector<32x128xf32>
    %190 = arith.addf %188, %189 : vector<32x128xf32>
    %cst_74 = arith.constant 1.702000e+00 : f32
    %191 = vector.broadcast %cst_74 : f32 to vector<32x128xf32>
    %192 = arith.mulf %191, %190 : vector<32x128xf32>
    %193 = arith.negf %192 : vector<32x128xf32>
    %194 = math.exp %193 : vector<32x128xf32>
    %cst_75 = arith.constant 1.000000e+00 : f32
    %195 = vector.broadcast %cst_75 : f32 to vector<32x128xf32>
    %196 = arith.addf %195, %194 : vector<32x128xf32>
    %197 = arith.divf %195, %196 : vector<32x128xf32>
    %198 = arith.mulf %190, %197 : vector<32x128xf32>
    %199 = arith.truncf %198 : vector<32x128xf32> to vector<32x128xbf16>
    %200 = arith.truncf %24 : vector<128x32xf32> to vector<128x32xbf16>
    %cst_76 = arith.constant dense<0.000000e+00> : vector<32x32xf32>
    %201 = tpu.matmul %199, %200, %cst_76 {dimension_numbers = #tpu.dot_dimension_numbers<[1], [0], [0], [1], [0, 0, 1, 1], [], []>} : vector<32x128xbf16>, vector<128x32xbf16>, vector<32x32xf32> -> vector<32x32xf32>
    %202 = arith.addf %163, %201 : vector<32x32xf32>
    %203 = vector.broadcast %26 : vector<1x32xf32> to vector<32x32xf32>
    %204 = arith.addf %202, %203 : vector<32x32xf32>
    %c1 = arith.constant 1 : index
    %c0_77 = arith.constant 0 : index
    %c0_78 = arith.constant 0 : index
    %205 = vector.load %arg4[%c1, %c0_77, %c0_78] : memref<2x1x32xf32, #tpu.memory_space<vmem>>, vector<1x1x32xf32>
    %206 = vector.shape_cast %205 : vector<1x1x32xf32> to vector<1x32xf32>
    %c1_79 = arith.constant 1 : index
    %c0_80 = arith.constant 0 : index
    %c0_81 = arith.constant 0 : index
    %207 = vector.load %arg5[%c1_79, %c0_80, %c0_81] : memref<2x1x32xf32, #tpu.memory_space<vmem>>, vector<1x1x32xf32>
    %208 = vector.shape_cast %207 : vector<1x1x32xf32> to vector<1x32xf32>
    %c1_82 = arith.constant 1 : index
    %c0_83 = arith.constant 0 : index
    %c0_84 = arith.constant 0 : index
    %209 = vector.load %arg6[%c1_82, %c0_83, %c0_84] : memref<2x32x96xf32, #tpu.memory_space<vmem>>, vector<1x32x96xf32>
    %210 = vector.shape_cast %209 : vector<1x32x96xf32> to vector<32x96xf32>
    %c1_85 = arith.constant 1 : index
    %c0_86 = arith.constant 0 : index
    %c0_87 = arith.constant 0 : index
    %211 = vector.load %arg7[%c1_85, %c0_86, %c0_87] : memref<2x1x96xf32, #tpu.memory_space<vmem>>, vector<1x1x96xf32>
    %212 = vector.shape_cast %211 : vector<1x1x96xf32> to vector<1x96xf32>
    %c1_88 = arith.constant 1 : index
    %c0_89 = arith.constant 0 : index
    %c0_90 = arith.constant 0 : index
    %213 = vector.load %arg8[%c1_88, %c0_89, %c0_90] : memref<2x32x32xf32, #tpu.memory_space<vmem>>, vector<1x32x32xf32>
    %214 = vector.shape_cast %213 : vector<1x32x32xf32> to vector<32x32xf32>
    %c1_91 = arith.constant 1 : index
    %c0_92 = arith.constant 0 : index
    %c0_93 = arith.constant 0 : index
    %215 = vector.load %arg9[%c1_91, %c0_92, %c0_93] : memref<2x1x32xf32, #tpu.memory_space<vmem>>, vector<1x1x32xf32>
    %216 = vector.shape_cast %215 : vector<1x1x32xf32> to vector<1x32xf32>
    %c1_94 = arith.constant 1 : index
    %c0_95 = arith.constant 0 : index
    %c0_96 = arith.constant 0 : index
    %217 = vector.load %arg10[%c1_94, %c0_95, %c0_96] : memref<2x1x32xf32, #tpu.memory_space<vmem>>, vector<1x1x32xf32>
    %218 = vector.shape_cast %217 : vector<1x1x32xf32> to vector<1x32xf32>
    %c1_97 = arith.constant 1 : index
    %c0_98 = arith.constant 0 : index
    %c0_99 = arith.constant 0 : index
    %219 = vector.load %arg11[%c1_97, %c0_98, %c0_99] : memref<2x1x32xf32, #tpu.memory_space<vmem>>, vector<1x1x32xf32>
    %220 = vector.shape_cast %219 : vector<1x1x32xf32> to vector<1x32xf32>
    %c1_100 = arith.constant 1 : index
    %c0_101 = arith.constant 0 : index
    %c0_102 = arith.constant 0 : index
    %221 = vector.load %arg12[%c1_100, %c0_101, %c0_102] : memref<2x32x128xf32, #tpu.memory_space<vmem>>, vector<1x32x128xf32>
    %222 = vector.shape_cast %221 : vector<1x32x128xf32> to vector<32x128xf32>
    %c1_103 = arith.constant 1 : index
    %c0_104 = arith.constant 0 : index
    %c0_105 = arith.constant 0 : index
    %223 = vector.load %arg13[%c1_103, %c0_104, %c0_105] : memref<2x1x128xf32, #tpu.memory_space<vmem>>, vector<1x1x128xf32>
    %224 = vector.shape_cast %223 : vector<1x1x128xf32> to vector<1x128xf32>
    %c1_106 = arith.constant 1 : index
    %c0_107 = arith.constant 0 : index
    %c0_108 = arith.constant 0 : index
    %225 = vector.load %arg14[%c1_106, %c0_107, %c0_108] : memref<2x128x32xf32, #tpu.memory_space<vmem>>, vector<1x128x32xf32>
    %226 = vector.shape_cast %225 : vector<1x128x32xf32> to vector<128x32xf32>
    %c1_109 = arith.constant 1 : index
    %c0_110 = arith.constant 0 : index
    %c0_111 = arith.constant 0 : index
    %227 = vector.load %arg15[%c1_109, %c0_110, %c0_111] : memref<2x1x32xf32, #tpu.memory_space<vmem>>, vector<1x1x32xf32>
    %228 = vector.shape_cast %227 : vector<1x1x32xf32> to vector<1x32xf32>
    %cst_112 = arith.constant dense<0.000000e+00> : vector<32xf32>
    %229 = vector.multi_reduction <add>, %204, %cst_112 [1] : vector<32x32xf32> to vector<32xf32>
    %230 = vector.shape_cast %229 : vector<32xf32> to vector<32x1xf32>
    %cst_113 = arith.constant 3.200000e+01 : f32
    %231 = vector.broadcast %cst_113 : f32 to vector<32x1xf32>
    %232 = arith.divf %230, %231 : vector<32x1xf32>
    %233 = vector.broadcast %232 : vector<32x1xf32> to vector<32x32xf32>
    %234 = arith.subf %204, %233 : vector<32x32xf32>
    %235 = arith.mulf %234, %234 : vector<32x32xf32>
    %cst_114 = arith.constant dense<0.000000e+00> : vector<32xf32>
    %236 = vector.multi_reduction <add>, %235, %cst_114 [1] : vector<32x32xf32> to vector<32xf32>
    %237 = vector.shape_cast %236 : vector<32xf32> to vector<32x1xf32>
    %cst_115 = arith.constant 3.200000e+01 : f32
    %238 = vector.broadcast %cst_115 : f32 to vector<32x1xf32>
    %239 = arith.divf %237, %238 : vector<32x1xf32>
    %240 = vector.broadcast %232 : vector<32x1xf32> to vector<32x32xf32>
    %241 = arith.subf %204, %240 : vector<32x32xf32>
    %cst_116 = arith.constant 9.99999974E-6 : f32
    %242 = vector.broadcast %cst_116 : f32 to vector<32x1xf32>
    %243 = arith.addf %239, %242 : vector<32x1xf32>
    %244 = math.rsqrt %243 : vector<32x1xf32>
    %245 = vector.broadcast %244 : vector<32x1xf32> to vector<32x32xf32>
    %246 = arith.mulf %241, %245 : vector<32x32xf32>
    %247 = vector.broadcast %206 : vector<1x32xf32> to vector<32x32xf32>
    %248 = arith.mulf %246, %247 : vector<32x32xf32>
    %249 = vector.broadcast %208 : vector<1x32xf32> to vector<32x32xf32>
    %250 = arith.addf %248, %249 : vector<32x32xf32>
    %251 = arith.truncf %250 : vector<32x32xf32> to vector<32x32xbf16>
    %252 = arith.truncf %210 : vector<32x96xf32> to vector<32x96xbf16>
    %cst_117 = arith.constant dense<0.000000e+00> : vector<32x96xf32>
    %253 = tpu.matmul %251, %252, %cst_117 {dimension_numbers = #tpu.dot_dimension_numbers<[1], [0], [0], [1], [0, 0, 1, 1], [], []>} : vector<32x32xbf16>, vector<32x96xbf16>, vector<32x96xf32> -> vector<32x96xf32>
    %254 = vector.broadcast %212 : vector<1x96xf32> to vector<32x96xf32>
    %255 = arith.addf %253, %254 : vector<32x96xf32>
    %256 = vector.extract_strided_slice %255 {offsets = [0, 0], sizes = [32, 8], strides = [1, 1]} : vector<32x96xf32> to vector<32x8xf32>
    %257 = vector.extract_strided_slice %255 {offsets = [0, 32], sizes = [32, 8], strides = [1, 1]} : vector<32x96xf32> to vector<32x8xf32>
    %258 = vector.extract_strided_slice %255 {offsets = [0, 64], sizes = [32, 8], strides = [1, 1]} : vector<32x96xf32> to vector<32x8xf32>
    %259 = arith.truncf %256 : vector<32x8xf32> to vector<32x8xbf16>
    %260 = arith.truncf %257 : vector<32x8xf32> to vector<32x8xbf16>
    %cst_118 = arith.constant dense<0.000000e+00> : vector<32x32xf32>
    %261 = tpu.matmul %259, %260, %cst_118 {dimension_numbers = #tpu.dot_dimension_numbers<[1], [1], [0], [0], [0, 0, 1, 0], [], []>} : vector<32x8xbf16>, vector<32x8xbf16>, vector<32x32xf32> -> vector<32x32xf32>
    %cst_119 = arith.constant 0.353553385 : f32
    %262 = vector.broadcast %cst_119 : f32 to vector<32x32xf32>
    %263 = arith.mulf %261, %262 : vector<32x32xf32>
    %264 = arith.addf %263, %2 : vector<32x32xf32>
    %cst_120 = arith.constant dense<0xFF800000> : vector<32xf32>
    %265 = vector.multi_reduction <maximumf>, %264, %cst_120 [1] : vector<32x32xf32> to vector<32xf32>
    %266 = vector.shape_cast %265 : vector<32xf32> to vector<32x1xf32>
    %267 = vector.broadcast %266 : vector<32x1xf32> to vector<32x32xf32>
    %268 = arith.subf %264, %267 : vector<32x32xf32>
    %269 = math.exp %268 : vector<32x32xf32>
    %cst_121 = arith.constant dense<0.000000e+00> : vector<32xf32>
    %270 = vector.multi_reduction <add>, %269, %cst_121 [1] : vector<32x32xf32> to vector<32xf32>
    %271 = vector.shape_cast %270 : vector<32xf32> to vector<32x1xf32>
    %272 = tpu.reciprocal %271 {approx = true} : vector<32x1xf32> -> vector<32x1xf32>
    %273 = vector.broadcast %272 : vector<32x1xf32> to vector<32x32xf32>
    %274 = arith.mulf %269, %273 : vector<32x32xf32>
    %275 = arith.truncf %274 : vector<32x32xf32> to vector<32x32xbf16>
    %276 = arith.truncf %258 : vector<32x8xf32> to vector<32x8xbf16>
    %cst_122 = arith.constant dense<0.000000e+00> : vector<32x8xf32>
    %277 = tpu.matmul %275, %276, %cst_122 {dimension_numbers = #tpu.dot_dimension_numbers<[1], [0], [0], [1], [0, 0, 1, 1], [], []>} : vector<32x32xbf16>, vector<32x8xbf16>, vector<32x8xf32> -> vector<32x8xf32>
    %278 = vector.extract_strided_slice %214 {offsets = [0, 0], sizes = [8, 32], strides = [1, 1]} : vector<32x32xf32> to vector<8x32xf32>
    %279 = arith.truncf %277 : vector<32x8xf32> to vector<32x8xbf16>
    %280 = arith.truncf %278 : vector<8x32xf32> to vector<8x32xbf16>
    %cst_123 = arith.constant dense<0.000000e+00> : vector<32x32xf32>
    %281 = tpu.matmul %279, %280, %cst_123 {dimension_numbers = #tpu.dot_dimension_numbers<[1], [0], [0], [1], [0, 0, 1, 1], [], []>} : vector<32x8xbf16>, vector<8x32xbf16>, vector<32x32xf32> -> vector<32x32xf32>
    %282 = vector.extract_strided_slice %255 {offsets = [0, 8], sizes = [32, 8], strides = [1, 1]} : vector<32x96xf32> to vector<32x8xf32>
    %283 = vector.extract_strided_slice %255 {offsets = [0, 40], sizes = [32, 8], strides = [1, 1]} : vector<32x96xf32> to vector<32x8xf32>
    %284 = vector.extract_strided_slice %255 {offsets = [0, 72], sizes = [32, 8], strides = [1, 1]} : vector<32x96xf32> to vector<32x8xf32>
    %285 = arith.truncf %282 : vector<32x8xf32> to vector<32x8xbf16>
    %286 = arith.truncf %283 : vector<32x8xf32> to vector<32x8xbf16>
    %cst_124 = arith.constant dense<0.000000e+00> : vector<32x32xf32>
    %287 = tpu.matmul %285, %286, %cst_124 {dimension_numbers = #tpu.dot_dimension_numbers<[1], [1], [0], [0], [0, 0, 1, 0], [], []>} : vector<32x8xbf16>, vector<32x8xbf16>, vector<32x32xf32> -> vector<32x32xf32>
    %cst_125 = arith.constant 0.353553385 : f32
    %288 = vector.broadcast %cst_125 : f32 to vector<32x32xf32>
    %289 = arith.mulf %287, %288 : vector<32x32xf32>
    %290 = arith.addf %289, %2 : vector<32x32xf32>
    %cst_126 = arith.constant dense<0xFF800000> : vector<32xf32>
    %291 = vector.multi_reduction <maximumf>, %290, %cst_126 [1] : vector<32x32xf32> to vector<32xf32>
    %292 = vector.shape_cast %291 : vector<32xf32> to vector<32x1xf32>
    %293 = vector.broadcast %292 : vector<32x1xf32> to vector<32x32xf32>
    %294 = arith.subf %290, %293 : vector<32x32xf32>
    %295 = math.exp %294 : vector<32x32xf32>
    %cst_127 = arith.constant dense<0.000000e+00> : vector<32xf32>
    %296 = vector.multi_reduction <add>, %295, %cst_127 [1] : vector<32x32xf32> to vector<32xf32>
    %297 = vector.shape_cast %296 : vector<32xf32> to vector<32x1xf32>
    %298 = tpu.reciprocal %297 {approx = true} : vector<32x1xf32> -> vector<32x1xf32>
    %299 = vector.broadcast %298 : vector<32x1xf32> to vector<32x32xf32>
    %300 = arith.mulf %295, %299 : vector<32x32xf32>
    %301 = arith.truncf %300 : vector<32x32xf32> to vector<32x32xbf16>
    %302 = arith.truncf %284 : vector<32x8xf32> to vector<32x8xbf16>
    %cst_128 = arith.constant dense<0.000000e+00> : vector<32x8xf32>
    %303 = tpu.matmul %301, %302, %cst_128 {dimension_numbers = #tpu.dot_dimension_numbers<[1], [0], [0], [1], [0, 0, 1, 1], [], []>} : vector<32x32xbf16>, vector<32x8xbf16>, vector<32x8xf32> -> vector<32x8xf32>
    %304 = vector.extract_strided_slice %214 {offsets = [8, 0], sizes = [8, 32], strides = [1, 1]} : vector<32x32xf32> to vector<8x32xf32>
    %305 = arith.truncf %303 : vector<32x8xf32> to vector<32x8xbf16>
    %306 = arith.truncf %304 : vector<8x32xf32> to vector<8x32xbf16>
    %cst_129 = arith.constant dense<0.000000e+00> : vector<32x32xf32>
    %307 = tpu.matmul %305, %306, %cst_129 {dimension_numbers = #tpu.dot_dimension_numbers<[1], [0], [0], [1], [0, 0, 1, 1], [], []>} : vector<32x8xbf16>, vector<8x32xbf16>, vector<32x32xf32> -> vector<32x32xf32>
    %308 = arith.addf %281, %307 : vector<32x32xf32>
    %309 = vector.extract_strided_slice %255 {offsets = [0, 16], sizes = [32, 8], strides = [1, 1]} : vector<32x96xf32> to vector<32x8xf32>
    %310 = vector.extract_strided_slice %255 {offsets = [0, 48], sizes = [32, 8], strides = [1, 1]} : vector<32x96xf32> to vector<32x8xf32>
    %311 = vector.extract_strided_slice %255 {offsets = [0, 80], sizes = [32, 8], strides = [1, 1]} : vector<32x96xf32> to vector<32x8xf32>
    %312 = arith.truncf %309 : vector<32x8xf32> to vector<32x8xbf16>
    %313 = arith.truncf %310 : vector<32x8xf32> to vector<32x8xbf16>
    %cst_130 = arith.constant dense<0.000000e+00> : vector<32x32xf32>
    %314 = tpu.matmul %312, %313, %cst_130 {dimension_numbers = #tpu.dot_dimension_numbers<[1], [1], [0], [0], [0, 0, 1, 0], [], []>} : vector<32x8xbf16>, vector<32x8xbf16>, vector<32x32xf32> -> vector<32x32xf32>
    %cst_131 = arith.constant 0.353553385 : f32
    %315 = vector.broadcast %cst_131 : f32 to vector<32x32xf32>
    %316 = arith.mulf %314, %315 : vector<32x32xf32>
    %317 = arith.addf %316, %2 : vector<32x32xf32>
    %cst_132 = arith.constant dense<0xFF800000> : vector<32xf32>
    %318 = vector.multi_reduction <maximumf>, %317, %cst_132 [1] : vector<32x32xf32> to vector<32xf32>
    %319 = vector.shape_cast %318 : vector<32xf32> to vector<32x1xf32>
    %320 = vector.broadcast %319 : vector<32x1xf32> to vector<32x32xf32>
    %321 = arith.subf %317, %320 : vector<32x32xf32>
    %322 = math.exp %321 : vector<32x32xf32>
    %cst_133 = arith.constant dense<0.000000e+00> : vector<32xf32>
    %323 = vector.multi_reduction <add>, %322, %cst_133 [1] : vector<32x32xf32> to vector<32xf32>
    %324 = vector.shape_cast %323 : vector<32xf32> to vector<32x1xf32>
    %325 = tpu.reciprocal %324 {approx = true} : vector<32x1xf32> -> vector<32x1xf32>
    %326 = vector.broadcast %325 : vector<32x1xf32> to vector<32x32xf32>
    %327 = arith.mulf %322, %326 : vector<32x32xf32>
    %328 = arith.truncf %327 : vector<32x32xf32> to vector<32x32xbf16>
    %329 = arith.truncf %311 : vector<32x8xf32> to vector<32x8xbf16>
    %cst_134 = arith.constant dense<0.000000e+00> : vector<32x8xf32>
    %330 = tpu.matmul %328, %329, %cst_134 {dimension_numbers = #tpu.dot_dimension_numbers<[1], [0], [0], [1], [0, 0, 1, 1], [], []>} : vector<32x32xbf16>, vector<32x8xbf16>, vector<32x8xf32> -> vector<32x8xf32>
    %331 = vector.extract_strided_slice %214 {offsets = [16, 0], sizes = [8, 32], strides = [1, 1]} : vector<32x32xf32> to vector<8x32xf32>
    %332 = arith.truncf %330 : vector<32x8xf32> to vector<32x8xbf16>
    %333 = arith.truncf %331 : vector<8x32xf32> to vector<8x32xbf16>
    %cst_135 = arith.constant dense<0.000000e+00> : vector<32x32xf32>
    %334 = tpu.matmul %332, %333, %cst_135 {dimension_numbers = #tpu.dot_dimension_numbers<[1], [0], [0], [1], [0, 0, 1, 1], [], []>} : vector<32x8xbf16>, vector<8x32xbf16>, vector<32x32xf32> -> vector<32x32xf32>
    %335 = arith.addf %308, %334 : vector<32x32xf32>
    %336 = vector.extract_strided_slice %255 {offsets = [0, 24], sizes = [32, 8], strides = [1, 1]} : vector<32x96xf32> to vector<32x8xf32>
    %337 = vector.extract_strided_slice %255 {offsets = [0, 56], sizes = [32, 8], strides = [1, 1]} : vector<32x96xf32> to vector<32x8xf32>
    %338 = vector.extract_strided_slice %255 {offsets = [0, 88], sizes = [32, 8], strides = [1, 1]} : vector<32x96xf32> to vector<32x8xf32>
    %339 = arith.truncf %336 : vector<32x8xf32> to vector<32x8xbf16>
    %340 = arith.truncf %337 : vector<32x8xf32> to vector<32x8xbf16>
    %cst_136 = arith.constant dense<0.000000e+00> : vector<32x32xf32>
    %341 = tpu.matmul %339, %340, %cst_136 {dimension_numbers = #tpu.dot_dimension_numbers<[1], [1], [0], [0], [0, 0, 1, 0], [], []>} : vector<32x8xbf16>, vector<32x8xbf16>, vector<32x32xf32> -> vector<32x32xf32>
    %cst_137 = arith.constant 0.353553385 : f32
    %342 = vector.broadcast %cst_137 : f32 to vector<32x32xf32>
    %343 = arith.mulf %341, %342 : vector<32x32xf32>
    %344 = arith.addf %343, %2 : vector<32x32xf32>
    %cst_138 = arith.constant dense<0xFF800000> : vector<32xf32>
    %345 = vector.multi_reduction <maximumf>, %344, %cst_138 [1] : vector<32x32xf32> to vector<32xf32>
    %346 = vector.shape_cast %345 : vector<32xf32> to vector<32x1xf32>
    %347 = vector.broadcast %346 : vector<32x1xf32> to vector<32x32xf32>
    %348 = arith.subf %344, %347 : vector<32x32xf32>
    %349 = math.exp %348 : vector<32x32xf32>
    %cst_139 = arith.constant dense<0.000000e+00> : vector<32xf32>
    %350 = vector.multi_reduction <add>, %349, %cst_139 [1] : vector<32x32xf32> to vector<32xf32>
    %351 = vector.shape_cast %350 : vector<32xf32> to vector<32x1xf32>
    %352 = tpu.reciprocal %351 {approx = true} : vector<32x1xf32> -> vector<32x1xf32>
    %353 = vector.broadcast %352 : vector<32x1xf32> to vector<32x32xf32>
    %354 = arith.mulf %349, %353 : vector<32x32xf32>
    %355 = arith.truncf %354 : vector<32x32xf32> to vector<32x32xbf16>
    %356 = arith.truncf %338 : vector<32x8xf32> to vector<32x8xbf16>
    %cst_140 = arith.constant dense<0.000000e+00> : vector<32x8xf32>
    %357 = tpu.matmul %355, %356, %cst_140 {dimension_numbers = #tpu.dot_dimension_numbers<[1], [0], [0], [1], [0, 0, 1, 1], [], []>} : vector<32x32xbf16>, vector<32x8xbf16>, vector<32x8xf32> -> vector<32x8xf32>
    %358 = vector.extract_strided_slice %214 {offsets = [24, 0], sizes = [8, 32], strides = [1, 1]} : vector<32x32xf32> to vector<8x32xf32>
    %359 = arith.truncf %357 : vector<32x8xf32> to vector<32x8xbf16>
    %360 = arith.truncf %358 : vector<8x32xf32> to vector<8x32xbf16>
    %cst_141 = arith.constant dense<0.000000e+00> : vector<32x32xf32>
    %361 = tpu.matmul %359, %360, %cst_141 {dimension_numbers = #tpu.dot_dimension_numbers<[1], [0], [0], [1], [0, 0, 1, 1], [], []>} : vector<32x8xbf16>, vector<8x32xbf16>, vector<32x32xf32> -> vector<32x32xf32>
    %362 = arith.addf %335, %361 : vector<32x32xf32>
    %363 = arith.addf %204, %362 : vector<32x32xf32>
    %364 = vector.broadcast %216 : vector<1x32xf32> to vector<32x32xf32>
    %365 = arith.addf %363, %364 : vector<32x32xf32>
    %cst_142 = arith.constant dense<0.000000e+00> : vector<32xf32>
    %366 = vector.multi_reduction <add>, %365, %cst_142 [1] : vector<32x32xf32> to vector<32xf32>
    %367 = vector.shape_cast %366 : vector<32xf32> to vector<32x1xf32>
    %cst_143 = arith.constant 3.200000e+01 : f32
    %368 = vector.broadcast %cst_143 : f32 to vector<32x1xf32>
    %369 = arith.divf %367, %368 : vector<32x1xf32>
    %370 = vector.broadcast %369 : vector<32x1xf32> to vector<32x32xf32>
    %371 = arith.subf %365, %370 : vector<32x32xf32>
    %372 = arith.mulf %371, %371 : vector<32x32xf32>
    %cst_144 = arith.constant dense<0.000000e+00> : vector<32xf32>
    %373 = vector.multi_reduction <add>, %372, %cst_144 [1] : vector<32x32xf32> to vector<32xf32>
    %374 = vector.shape_cast %373 : vector<32xf32> to vector<32x1xf32>
    %cst_145 = arith.constant 3.200000e+01 : f32
    %375 = vector.broadcast %cst_145 : f32 to vector<32x1xf32>
    %376 = arith.divf %374, %375 : vector<32x1xf32>
    %377 = vector.broadcast %369 : vector<32x1xf32> to vector<32x32xf32>
    %378 = arith.subf %365, %377 : vector<32x32xf32>
    %cst_146 = arith.constant 9.99999974E-6 : f32
    %379 = vector.broadcast %cst_146 : f32 to vector<32x1xf32>
    %380 = arith.addf %376, %379 : vector<32x1xf32>
    %381 = math.rsqrt %380 : vector<32x1xf32>
    %382 = vector.broadcast %381 : vector<32x1xf32> to vector<32x32xf32>
    %383 = arith.mulf %378, %382 : vector<32x32xf32>
    %384 = vector.broadcast %218 : vector<1x32xf32> to vector<32x32xf32>
    %385 = arith.mulf %383, %384 : vector<32x32xf32>
    %386 = vector.broadcast %220 : vector<1x32xf32> to vector<32x32xf32>
    %387 = arith.addf %385, %386 : vector<32x32xf32>
    %388 = arith.truncf %387 : vector<32x32xf32> to vector<32x32xbf16>
    %389 = arith.truncf %222 : vector<32x128xf32> to vector<32x128xbf16>
    %cst_147 = arith.constant dense<0.000000e+00> : vector<32x128xf32>
    %390 = tpu.matmul %388, %389, %cst_147 {dimension_numbers = #tpu.dot_dimension_numbers<[1], [0], [0], [1], [0, 0, 1, 1], [], []>} : vector<32x32xbf16>, vector<32x128xbf16>, vector<32x128xf32> -> vector<32x128xf32>
    %391 = vector.broadcast %224 : vector<1x128xf32> to vector<32x128xf32>
    %392 = arith.addf %390, %391 : vector<32x128xf32>
    %cst_148 = arith.constant 1.702000e+00 : f32
    %393 = vector.broadcast %cst_148 : f32 to vector<32x128xf32>
    %394 = arith.mulf %393, %392 : vector<32x128xf32>
    %395 = arith.negf %394 : vector<32x128xf32>
    %396 = math.exp %395 : vector<32x128xf32>
    %cst_149 = arith.constant 1.000000e+00 : f32
    %397 = vector.broadcast %cst_149 : f32 to vector<32x128xf32>
    %398 = arith.addf %397, %396 : vector<32x128xf32>
    %399 = arith.divf %397, %398 : vector<32x128xf32>
    %400 = arith.mulf %392, %399 : vector<32x128xf32>
    %401 = arith.truncf %400 : vector<32x128xf32> to vector<32x128xbf16>
    %402 = arith.truncf %226 : vector<128x32xf32> to vector<128x32xbf16>
    %cst_150 = arith.constant dense<0.000000e+00> : vector<32x32xf32>
    %403 = tpu.matmul %401, %402, %cst_150 {dimension_numbers = #tpu.dot_dimension_numbers<[1], [0], [0], [1], [0, 0, 1, 1], [], []>} : vector<32x128xbf16>, vector<128x32xbf16>, vector<32x32xf32> -> vector<32x32xf32>
    %404 = arith.addf %365, %403 : vector<32x32xf32>
    %405 = vector.broadcast %228 : vector<1x32xf32> to vector<32x32xf32>
    %406 = arith.addf %404, %405 : vector<32x32xf32>
    %c0_151 = arith.constant 0 : index
    %c0_152 = arith.constant 0 : index
    %407 = vector.load %arg16[%c0_151, %c0_152] : memref<1x32xf32, #tpu.memory_space<vmem>>, vector<1x32xf32>
    %c0_153 = arith.constant 0 : index
    %c0_154 = arith.constant 0 : index
    %408 = vector.load %arg17[%c0_153, %c0_154] : memref<1x32xf32, #tpu.memory_space<vmem>>, vector<1x32xf32>
    %cst_155 = arith.constant dense<0.000000e+00> : vector<32xf32>
    %409 = vector.multi_reduction <add>, %406, %cst_155 [1] : vector<32x32xf32> to vector<32xf32>
    %410 = vector.shape_cast %409 : vector<32xf32> to vector<32x1xf32>
    %cst_156 = arith.constant 3.200000e+01 : f32
    %411 = vector.broadcast %cst_156 : f32 to vector<32x1xf32>
    %412 = arith.divf %410, %411 : vector<32x1xf32>
    %413 = vector.broadcast %412 : vector<32x1xf32> to vector<32x32xf32>
    %414 = arith.subf %406, %413 : vector<32x32xf32>
    %415 = arith.mulf %414, %414 : vector<32x32xf32>
    %cst_157 = arith.constant dense<0.000000e+00> : vector<32xf32>
    %416 = vector.multi_reduction <add>, %415, %cst_157 [1] : vector<32x32xf32> to vector<32xf32>
    %417 = vector.shape_cast %416 : vector<32xf32> to vector<32x1xf32>
    %cst_158 = arith.constant 3.200000e+01 : f32
    %418 = vector.broadcast %cst_158 : f32 to vector<32x1xf32>
    %419 = arith.divf %417, %418 : vector<32x1xf32>
    %420 = vector.broadcast %412 : vector<32x1xf32> to vector<32x32xf32>
    %421 = arith.subf %406, %420 : vector<32x32xf32>
    %cst_159 = arith.constant 9.99999974E-6 : f32
    %422 = vector.broadcast %cst_159 : f32 to vector<32x1xf32>
    %423 = arith.addf %419, %422 : vector<32x1xf32>
    %424 = math.rsqrt %423 : vector<32x1xf32>
    %425 = vector.broadcast %424 : vector<32x1xf32> to vector<32x32xf32>
    %426 = arith.mulf %421, %425 : vector<32x32xf32>
    %427 = vector.broadcast %407 : vector<1x32xf32> to vector<32x32xf32>
    %428 = arith.mulf %426, %427 : vector<32x32xf32>
    %429 = vector.broadcast %408 : vector<1x32xf32> to vector<32x32xf32>
    %430 = arith.addf %428, %429 : vector<32x32xf32>
    %c0_160 = arith.constant 0 : index
    %c0_161 = arith.constant 0 : index
    %431 = vector.load %arg3[%c0_160, %c0_161] : memref<4x32xf32, #tpu.memory_space<vmem>>, vector<4x32xf32>
    %432 = arith.truncf %431 : vector<4x32xf32> to vector<4x32xbf16>
    %433 = arith.truncf %430 : vector<32x32xf32> to vector<32x32xbf16>
    %cst_162 = arith.constant dense<0.000000e+00> : vector<4x32xf32>
    %434 = tpu.matmul %432, %433, %cst_162 {dimension_numbers = #tpu.dot_dimension_numbers<[1], [0], [0], [1], [0, 0, 1, 1], [], []>} : vector<4x32xbf16>, vector<32x32xbf16>, vector<4x32xf32> -> vector<4x32xf32>
    %c0_163 = arith.constant 0 : index
    %c0_164 = arith.constant 0 : index
    %435 = vector.load %arg18[%c0_163, %c0_164] : memref<32x32xf32, #tpu.memory_space<vmem>>, vector<32x32xf32>
    %436 = arith.truncf %434 : vector<4x32xf32> to vector<4x32xbf16>
    %437 = arith.truncf %435 : vector<32x32xf32> to vector<32x32xbf16>
    %cst_165 = arith.constant dense<0.000000e+00> : vector<4x32xf32>
    %438 = tpu.matmul %436, %437, %cst_165 {dimension_numbers = #tpu.dot_dimension_numbers<[1], [0], [0], [1], [0, 0, 1, 1], [], []>} : vector<4x32xbf16>, vector<32x32xbf16>, vector<4x32xf32> -> vector<4x32xf32>
    %c0_166 = arith.constant 0 : index
    %c0_167 = arith.constant 0 : index
    %439 = vector.load %arg19[%c0_166, %c0_167] : memref<4x32xf32, #tpu.memory_space<vmem>>, vector<4x32xf32>
    tpu.vector_store %arg19[%c0_166, %c0_167], %438 {strides = array<i32>} : memref<4x32xf32, #tpu.memory_space<vmem>>, vector<4x32xf32>,
    return
  }
  func.func @transform_0(%arg0: i32) -> (i32, i32) {
    %c0_i32 = arith.constant 0 : i32
    %c0_i32_0 = arith.constant 0 : i32
    %c0_i32_1 = arith.constant 0 : i32
    return %c0_i32, %c0_i32_0 : i32, i32
  }
  func.func @transform_1(%arg0: i32) -> (i32, i32) {
    %c0_i32 = arith.constant 0 : i32
    %c0_i32_0 = arith.constant 0 : i32
    %c0_i32_1 = arith.constant 0 : i32
    return %c0_i32, %c0_i32_0 : i32, i32
  }
  func.func @transform_2(%arg0: i32) -> (i32, i32) {
    %c0_i32 = arith.constant 0 : i32
    %c0_i32_0 = arith.constant 0 : i32
    %c0_i32_1 = arith.constant 0 : i32
    return %c0_i32, %c0_i32_0 : i32, i32
  }
  func.func @transform_3(%arg0: i32) -> (i32, i32, i32) {
    %c0_i32 = arith.constant 0 : i32
    %c0_i32_0 = arith.constant 0 : i32
    %c0_i32_1 = arith.constant 0 : i32
    %c0_i32_2 = arith.constant 0 : i32
    return %c0_i32, %c0_i32_0, %c0_i32_1 : i32, i32, i32
  }
  func.func @transform_4(%arg0: i32) -> (i32, i32, i32) {
    %c0_i32 = arith.constant 0 : i32
    %c0_i32_0 = arith.constant 0 : i32
    %c0_i32_1 = arith.constant 0 : i32
    %c0_i32_2 = arith.constant 0 : i32
    return %c0_i32, %c0_i32_0, %c0_i32_1 : i32, i32, i32
  }
  func.func @transform_5(%arg0: i32) -> (i32, i32, i32) {
    %c0_i32 = arith.constant 0 : i32
    %c0_i32_0 = arith.constant 0 : i32
    %c0_i32_1 = arith.constant 0 : i32
    %c0_i32_2 = arith.constant 0 : i32
    return %c0_i32, %c0_i32_0, %c0_i32_1 : i32, i32, i32
  }
  func.func @transform_6(%arg0: i32) -> (i32, i32, i32) {
    %c0_i32 = arith.constant 0 : i32
    %c0_i32_0 = arith.constant 0 : i32
    %c0_i32_1 = arith.constant 0 : i32
    %c0_i32_2 = arith.constant 0 : i32
    return %c0_i32, %c0_i32_0, %c0_i32_1 : i32, i32, i32
  }
  func.func @transform_7(%arg0: i32) -> (i32, i32, i32) {
    %c0_i32 = arith.constant 0 : i32
    %c0_i32_0 = arith.constant 0 : i32
    %c0_i32_1 = arith.constant 0 : i32
    %c0_i32_2 = arith.constant 0 : i32
    return %c0_i32, %c0_i32_0, %c0_i32_1 : i32, i32, i32
  }
  func.func @transform_8(%arg0: i32) -> (i32, i32, i32) {
    %c0_i32 = arith.constant 0 : i32
    %c0_i32_0 = arith.constant 0 : i32
    %c0_i32_1 = arith.constant 0 : i32
    %c0_i32_2 = arith.constant 0 : i32
    return %c0_i32, %c0_i32_0, %c0_i32_1 : i32, i32, i32
  }
  func.func @transform_9(%arg0: i32) -> (i32, i32, i32) {
    %c0_i32 = arith.constant 0 : i32
    %c0_i32_0 = arith.constant 0 : i32
    %c0_i32_1 = arith.constant 0 : i32
    %c0_i32_2 = arith.constant 0 : i32
    return %c0_i32, %c0_i32_0, %c0_i32_1 : i32, i32, i32
  }
  func.func @transform_10(%arg0: i32) -> (i32, i32, i32) {
    %c0_i32 = arith.constant 0 : i32
    %c0_i32_0 = arith.constant 0 : i32
    %c0_i32_1 = arith.constant 0 : i32
    %c0_i32_2 = arith.constant 0 : i32
    return %c0_i32, %c0_i32_0, %c0_i32_1 : i32, i32, i32
  }
  func.func @transform_11(%arg0: i32) -> (i32, i32, i32) {
    %c0_i32 = arith.constant 0 : i32
    %c0_i32_0 = arith.constant 0 : i32
    %c0_i32_1 = arith.constant 0 : i32
    %c0_i32_2 = arith.constant 0 : i32
    return %c0_i32, %c0_i32_0, %c0_i32_1 : i32, i32, i32
  }
  func.func @transform_12(%arg0: i32) -> (i32, i32, i32) {
    %c0_i32 = arith.constant 0 : i32
    %c0_i32_0 = arith.constant 0 : i32
    %c0_i32_1 = arith.constant 0 : i32
    %c0_i32_2 = arith.constant 0 : i32
    return %c0_i32, %c0_i32_0, %c0_i32_1 : i32, i32, i32
  }
  func.func @transform_13(%arg0: i32) -> (i32, i32, i32) {
    %c0_i32 = arith.constant 0 : i32
    %c0_i32_0 = arith.constant 0 : i32
    %c0_i32_1 = arith.constant 0 : i32
    %c0_i32_2 = arith.constant 0 : i32
    return %c0_i32, %c0_i32_0, %c0_i32_1 : i32, i32, i32
  }
  func.func @transform_14(%arg0: i32) -> (i32, i32, i32) {
    %c0_i32 = arith.constant 0 : i32
    %c0_i32_0 = arith.constant 0 : i32
    %c0_i32_1 = arith.constant 0 : i32
    %c0_i32_2 = arith.constant 0 : i32
    return %c0_i32, %c0_i32_0, %c0_i32_1 : i32, i32, i32
  }
  func.func @transform_15(%arg0: i32) -> (i32, i32) {
    %c0_i32 = arith.constant 0 : i32
    %c0_i32_0 = arith.constant 0 : i32
    %c0_i32_1 = arith.constant 0 : i32
    return %c0_i32, %c0_i32_0 : i32, i32
  }
  func.func @transform_16(%arg0: i32) -> (i32, i32) {
    %c0_i32 = arith.constant 0 : i32
    %c0_i32_0 = arith.constant 0 : i32
    %c0_i32_1 = arith.constant 0 : i32
    return %c0_i32, %c0_i32_0 : i32, i32
  }
  func.func @transform_17(%arg0: i32) -> (i32, i32) {
    %c0_i32 = arith.constant 0 : i32
    %c0_i32_0 = arith.constant 0 : i32
    %c0_i32_1 = arith.constant 0 : i32
    return %c0_i32, %c0_i32_0 : i32, i32
  }
  func.func @transform_18(%arg0: i32) -> (i32, i32) {
    %c0_i32 = arith.constant 0 : i32
    %c0_i32_0 = arith.constant 0 : i32
    %c0_i32_1 = arith.constant 0 : i32
    return %c0_i32, %c0_i32_0 : i32, i32
  }
}

</mosaic_0001>

<bundles_post_ra>
// kernel: tile.9
= control target key start
LH: loop header
LB: loop body
LE: loop exit
PB: predicated region body
PF: predicated region fallthrough
CT: control target
= control target key end

     0   :  { %vm3_vm0 = vcmask 261120   ;;  %s34_s0 = inlined_call_operand.vmem [shape: f32[2,5,32], index: 0, kind: input, shape index: {}]   ;;  %s35_s1 = inlined_call_operand.vmem [shape: f32[10,32], index: 1, kind: output, shape index: {}]  }
   0x1   :  { %v2_v0 = vld [vmem:[%s34_s0] sm:$0x1f]   ;;  %v10_v1 = vld [vmem:[%s34_s0 + $0x8] sm:$0x1f]  }
   0x2   :  { %4 = vst.msk [vmem:[%s35_s1] sm:$0x1f] %vm3_vm0, %v2_v0   ;;  %11 = vst.msk [vmem:[%s35_s1 + $0x5] sm:$0x1f] %vm3_vm0, %v10_v1  }

// kernel: custom_clip_teacher_forward.5
= control target key start
LH: loop header
LB: loop body
LE: loop exit
PB: predicated region body
PF: predicated region fallthrough
CT: control target
= control target key end

     0   :  { %12 = vsyncpa [#allocation4], 0  ;;  %vm30_vm0 = vcmask 257024   ;;  %s308_s0 = inlined_call_operand.vmem [shape: f32[2,32], index: 0, kind: input, shape index: {}]   ;;  %s309_s1 = inlined_call_operand.vmem [shape: f32[4,32], index: 1, kind: input, shape index: {}]   ;;  %s310_s2 = inlined_call_operand.<no memory space> [shape: f32[1,1], index: 2, kind: input, shape index: {}]   ;;  %s311_s3 = inlined_call_operand.hbm [shape: f32[2,32], index: 3, kind: output, shape index: {0}]   ;;  %s312_s4 = inlined_call_operand.hbm [shape: f32[4,32], index: 4, kind: output, shape index: {1}]   ;;  %s313_s5 = inlined_call_operand.hbm [shape: f32[2,4], index: 5, kind: output, shape index: {2}]  }
   0x1   :  { %v21_v0 = vld [vmem:[%s309_s1] sm:$0xf] }
   0x2   :  { %v20_v1 = vld [vmem:[%s308_s0] sm:$0x3]  ;;  %v29_v2 = vmul.f32 %v21_v0, %v21_v0 }
   0x3   :  { %v22_v3 = vmul.f32 %v20_v1, %v20_v1 }
   0x4   :  { %13 = vsyncpa [#allocation6], 0  ;;  %vm23_vm1 = vcmask 254976   ;;  %v31_v4 = vsel %vm30_vm0, %v29_v2, 0.0  ;;  %v251_v6 = vmov 0.0   ;;  %vm252_vm2 = vmmov 0  }
   0x5   :  { %32 = vadd.xlane.f32.xlu0 %v31_v4  ;;  %v24_v5 = vsel %vm23_vm1, %v22_v3, 0.0  ;;  %169 = vmatprep.subr.mxu0 %v251_v6  ;;  %v37_v7 = vstv %s310_s2  ;;  %vm43_vm3 = vcmask 261120   ;;  %s253_s0 = smov [#allocation5]   ;;  %s254_s23 = smov [#allocation3]  }
   0x6   :  { %171 = vmatprep.mubr.msk.f32.mxu0 %vm252_vm2, %v251_v6  ;;  %v38_v8 = vmul.f32 1.442695, %v37_v7  ;;  %s140_s2 = sshll.u32 %s253_s0, 4  ;;  %s130_s24 = sshll.u32 %s254_s23, 4  ;;  %s141_s2 = int_to_ptr.vmem [resolvable:$true] %s140_s2  ;;  %s131_s24 = int_to_ptr.vmem [resolvable:$true] %s130_s24 }
   0x7   :  { %s187_s25 = scalar_lea.vmem %s141_s2, 64  ;;  %p192_p1 = scmp.lt.s32.totalorder %s141_s2, %s141_s2 }
   0x8   :  { %181 = vpow2.f32 %v38_v8  ;;  %p188_p0 = scmp.ne.s32.totalorder %s141_s2, %s187_s25  ;;  %p193_p2 = scmp.lt.s32.totalorder %s187_s25, %s187_s25 }
   0x9   :  { %25 = vadd.xlane.f32.xlu0 %v24_v5 }
   0xa   :  { %p194_p3 = por %p193_p2, %p192_p1 }
   0xc   :  { %p195_p4 = pnand %p194_p3, %p188_p0 }
  0x15   :  { %v182_v9 = vpop.eup %181 }
  0x16   :  { %174 = vpush %v182_v9 }
  0x8e   :  { %v33_v10 = vpop.xlane.xlu0 %32 }
  0x8f   :  { %183 = vrsqrt.f32 %v33_v10 }
  0x92   :  { %v26_v11 = vpop.xlane.xlu0 %25 }
  0x93   :  { %185 = vrsqrt.f32 %v26_v11 }
  0x9c   :  { %v184_v12 = vpop.eup %183 }
  0x9d   :  { %v35_v13 = vmul.f32 %v184_v12, %v21_v0 }
  0x9f   :  { %170 = vmatpush3.xpose.msk.msra.mxu0 %vm43_vm3, %v35_v13  ;;  %42 = vst.msk [vmem:[#allocation5] sm:$0xf] %vm30_vm0, %v35_v13 }
  0xa0   :  { %v186_v14 = vpop.eup %185 }
  0xa1   :  { %v28_v15 = vmul.f32 %v186_v14, %v20_v1 }
  0xa3   :  { %172 = vmatmul.mubr.msk.f32.vlgmr.msra.gmra.mxu0 %vm43_vm3, %v28_v15  ;;  %41 = vst.msk [vmem:[#allocation3] sm:$0x3] %vm23_vm1, %v28_v15 }
  0xa4   :  { %198 = shalt.err (!%p195_p4)
}
  0xa5   :  { %143 = dma.vmem_to_hbm [thread:$0]  %s141_s2, 64, %s312_s4, [#allocation6]  }
  0xa6   :  { %s207_s28 = scalar_lea.vmem %s131_s24, 32  ;;  %p212_p6 = scmp.lt.s32.totalorder %s131_s24, %s131_s24 }
  0xa7   :  { %p208_p5 = scmp.ne.s32.totalorder %s131_s24, %s207_s28  ;;  %p213_p7 = scmp.lt.s32.totalorder %s207_s28, %s207_s28 }
  0xa9   :  { %p214_p8 = por %p213_p7, %p212_p6 }
  0xab   :  { %p215_p9 = pnand %p214_p8, %p208_p5 }
  0xad   :  { %218 = shalt.err (!%p215_p9)
}
  0xae   :  { %133 = dma.vmem_to_hbm [thread:$0]  %s131_s24, 32, %s311_s3, [#allocation4]   ;;  %vm122_vm4 = vcmask 25600  }
  0xaf   :  { %s175_s6 = spop %174  ;;  %s255_s7 = smov [#allocation7]  }
  0xb0   :  { %v120_v16 = vstv %s175_s6  ;;  %s150_s8 = sshll.u32 %s255_s7, 4  ;;  %s151_s8 = int_to_ptr.vmem [resolvable:$true] %s150_s8 }
  0xb1   :  { %s227_s4 = scalar_lea.vmem %s151_s8, 32  ;;  %p232_p11 = scmp.lt.s32.totalorder %s151_s8, %s151_s8 }
  0xb2   :  { %p228_p10 = scmp.ne.s32.totalorder %s151_s8, %s227_s4  ;;  %p233_p12 = scmp.lt.s32.totalorder %s227_s4, %s227_s4 }
  0xb4   :  { %p234_p13 = por %p233_p12, %p232_p11 }
  0xb6   :  { %p235_p0 = pnand %p234_p13, %p228_p10 }
 0x163   :  { %v116_v17 = vpop.f32.mrf.mxu0 }
 0x164   :  { %v121_v18 = vmul.f32 %v120_v16, %v116_v17 }
 0x165   :  { %v173_v19 = vpop.f32.mrf.mxu0 }
 0x166   :  { %123 = vst.msk [vmem:[#allocation7] sm:$0x3] %vm122_vm4, %v121_v18 }
 0x167   :  { %238 = shalt.err (!%p235_p0)
}
 0x168   :  { %153 = dma.vmem_to_hbm [thread:$0]  %s151_s8, 32, %s313_s5, [#allocation6]  }
 0x169   :  { %247 = dma.done.wait [#allocation4], 32  }
 0x16a   :  { %248 = vsyncadd [#allocation4], 4294967264 }
 0x16b   :  { %249 = dma.done.wait [#allocation6], 96  }
 0x16c   :  { %250 = vsyncadd [#allocation6], 4294967200 }
 0x16d   :  { %163 = vsyncpa [#allocation4], 1 }
 0x16e   :  { %164 = vsyncpa [#allocation6], 1 }

// kernel: custom_clip_teacher_forward.3
= control target key start
LH: loop header
LB: loop body
LE: loop exit
PB: predicated region body
PF: predicated region fallthrough
CT: control target
= control target key end

     0   :  { %vm104_vm0 = vcmask 261120   ;;  %vm251_vm1 = vcmask 64512   ;;  %s3854_s24 = smov 96   ;;  %s3855_s21 = smov 64   ;;  %vm624_vm2 = vcmask 1043456   ;;  %vm3866_vm3 = vmmov 0   ;;  %s4706_s0 = inlined_call_operand.vmem [shape: f32[32,32], index: 0, kind: input, shape index: {}]   ;;  %s4707_s5 = inlined_call_operand.vmem [shape: f32[2,32,96], index: 5, kind: input, shape index: {}]   ;;  %s4708_s3 = inlined_call_operand.vmem [shape: f32[2,1,32], index: 3, kind: input, shape index: {}]   ;;  %s4709_s4 = inlined_call_operand.vmem [shape: f32[2,1,32], index: 4, kind: input, shape index: {}]   ;;  %s4710_s6 = inlined_call_operand.vmem [shape: f32[2,1,96], index: 6, kind: input, shape index: {}]   ;;  %s4711_s1 = inlined_call_operand.vmem [shape: f32[32,32], index: 1, kind: input, shape index: {}]   ;;  %s4712_s7 = inlined_call_operand.vmem [shape: f32[2,32,32], index: 7, kind: input, shape index: {}]   ;;  %s4713_s8 = inlined_call_operand.vmem [shape: f32[2,1,32], index: 8, kind: input, shape index: {}]   ;;  %s4714_s11 = inlined_call_operand.vmem [shape: f32[2,32,128], index: 11, kind: input, shape index: {}]   ;;  %s4715_s9 = inlined_call_operand.vmem [shape: f32[2,1,32], index: 9, kind: input, shape index: {}]   ;;  %s4716_s10 = inlined_call_operand.vmem [shape: f32[2,1,32], index: 10, kind: input, shape index: {}]   ;;  %s4717_s13 = inlined_call_operand.vmem [shape: f32[2,128,32], index: 13, kind: input, shape index: {}]   ;;  %s4718_s12 = inlined_call_operand.vmem [shape: f32[2,1,128], index: 12, kind: input, shape index: {}]   ;;  %s4719_s14 = inlined_call_operand.vmem [shape: f32[2,1,32], index: 14, kind: input, shape index: {}]   ;;  %s4720_s15 = inlined_call_operand.vmem [shape: f32[1,32], index: 15, kind: input, shape index: {}]   ;;  %s4721_s16 = inlined_call_operand.vmem [shape: f32[1,32], index: 16, kind: input, shape index: {}]   ;;  %s4722_s2 = inlined_call_operand.vmem [shape: f32[4,32], index: 2, kind: input, shape index: {}]   ;;  %s4723_s17 = inlined_call_operand.vmem [shape: f32[32,32], index: 17, kind: input, shape index: {}]   ;;  %s4724_s18 = inlined_call_operand.vmem [shape: f32[4,32], index: 18, kind: output, shape index: {}]  }
   0x1   :  { %4742 = sst [smem:[#allocation2_spill]] %s4706_s0  ;;  %v3096_v53 = vld [vmem:[%s4709_s4] ss:$0 sm:$0xff]  ;;  %s3856_s22 = smov 88   ;;  %vm3089_vm4 = vcmask 257024  }
   0x2   :  { %4743 = sst [smem:[#allocation3_spill]] %s4707_s5  ;;  %s4740_s27 = smov 56  }
   0x3   :  { %4744 = sst [smem:[#allocation4_spill]] %s4708_s3  ;;  %s3857_s3 = smov 120  }
   0x4   :  { %s4745_s29 = sld [smem:[#allocation2_spill]]  ;;  %s4738_s28 = smov 80  }
   0x5   :  { %s4746_s23 = sld [smem:[#allocation3_spill]]  ;;  %s4736_s30 = smov 112  }
   0x6   :  { %s4747_s5 = sld [smem:[#allocation4_spill]]  ;;  %s4734_s0 = smov 72  }
   0x7   :  { %s4732_s19 = smov 104   ;;  %s4728_s26 = smov 48  }
   0xa   :  { %v60_v0 = vld [vmem:[%s4745_s29] sm:$0xff]  ;;  %v62_v1 = vld [vmem:[%s4745_s29 + $0x10] sm:$0xff]  ;;  %v61_v2 = vld [vmem:[%s4745_s29 + $0x8] sm:$0xff] }
   0xb   :  { %v105_v3 = vsel %vm104_vm0, %v60_v0, 0.0  ;;  %v111_v4 = vsel %vm104_vm0, %v62_v1, 0.0  ;;  %v63_v5 = vld [vmem:[%s4745_s29 + $0x18] sm:$0xff]  ;;  %v108_v6 = vsel %vm104_vm0, %v61_v2, 0.0  ;;  %v72_v28 = vld [vmem:[%s4746_s23 + $0x10] sm:$0xff]  ;;  %v70_v30 = vld [vmem:[%s4746_s23] sm:$0xff] }
   0xc   :  { %106 = vadd.xlane.f32.xlu0 %v105_v3  ;;  %112 = vadd.xlane.f32.xlu1 %v111_v4  ;;  %v114_v7 = vsel %vm104_vm0, %v63_v5, 0.0  ;;  %v73_v29 = vld [vmem:[%s4746_s23 + $0x18] sm:$0xff]  ;;  %v71_v32 = vld [vmem:[%s4746_s23 + $0x8] sm:$0xff]  ;;  %v3095_v48 = vld [vmem:[%s4747_s5] ss:$0 sm:$0xff] }
   0xd   :  { %v181_v31 = vpack.c.bf16 %v73_v29, %v72_v28  ;;  %v180_v33 = vpack.c.bf16 %v71_v32, %v70_v30  ;;  %v3097_v3 = vld [vmem:[%s4710_s6] ss:$0 sm:$0xff] }
   0xf   :  { %3345 = vmatprep.subr.bf16.mxu1 %v181_v31 }
  0x10   :  { %109 = vadd.xlane.f32.xlu0 %v108_v6  ;;  %115 = vadd.xlane.f32.xlu1 %v114_v7 }
  0x11   :  { %3346 = vmatpush3.bf16.msra.mxu1 %v181_v31  ;;  %v4042_v31 = vld [vmem:[%s4711_s1 + $0x10] sm:$0xff] }
  0x12   :  { %3347 = vmatprep.subr.bf16.mxu1 %v180_v33 }
  0x15   :  { %3348 = vmatpush3.bf16.msra.mxu1 %v180_v33 }
  0x95   :  { %v107_v8 = vpop.xlane.xlu0 %106  ;;  %v113_v9 = vpop.xlane.xlu1 %112 }
  0x96   :  { %v118_v10 = vmul.f32 0.03125, %v107_v8  ;;  %v120_v11 = vmul.f32 0.03125, %v113_v9 }
  0x98   :  { %v122_v12 = vsub.f32 %v60_v0, %v118_v10  ;;  %v124_v13 = vsub.f32 %v62_v1, %v120_v11 }
  0x99   :  { %v110_v14 = vpop.xlane.xlu0 %109  ;;  %v116_v15 = vpop.xlane.xlu1 %115 }
  0x9a   :  { %v119_v16 = vmul.f32 0.03125, %v110_v14  ;;  %v121_v17 = vmul.f32 0.03125, %v116_v15  ;;  %v126_v18 = vmul.f32 %v122_v12, %v122_v12  ;;  %v128_v19 = vmul.f32 %v124_v13, %v124_v13 }
  0x9c   :  { %v123_v20 = vsub.f32 %v61_v2, %v119_v16  ;;  %v125_v21 = vsub.f32 %v63_v5, %v121_v17  ;;  %v130_v22 = vsel %vm104_vm0, %v126_v18, 0.0  ;;  %v136_v23 = vsel %vm104_vm0, %v128_v19, 0.0  ;;  %v4024_v19 = vld [vmem:[%s4711_s1] sm:$0xff] }
  0x9d   :  { %131 = vadd.xlane.f32.xlu0 %v130_v22  ;;  %v4029_v22 = vld [vmem:[%s4711_s1 + $0x18] sm:$0xff] }
  0x9e   :  { %v127_v24 = vmul.f32 %v123_v20, %v123_v20  ;;  %v129_v25 = vmul.f32 %v125_v21, %v125_v21 }
  0xa0   :  { %v133_v26 = vsel %vm104_vm0, %v127_v24, 0.0  ;;  %v139_v27 = vsel %vm104_vm0, %v129_v25, 0.0 }
  0xa1   :  { %137 = vadd.xlane.f32.xlu0 %v136_v23  ;;  %134 = vadd.xlane.f32.xlu1 %v133_v26  ;;  %v4035_v26 = vld [vmem:[%s4711_s1 + $0x8] sm:$0xff] }
  0xa5   :  { %140 = vadd.xlane.f32.xlu1 %v139_v27 }
 0x126   :  { %v132_v34 = vpop.xlane.xlu0 %131 }
 0x127   :  { %v142_v35 = vmul.f32 0.03125, %v132_v34 }
 0x129   :  { %v146_v36 = vadd.f32 1e-05, %v142_v35 }
 0x12a   :  { %v135_v37 = vpop.xlane.xlu1 %134  ;;  %v138_v38 = vpop.xlane.xlu0 %137 }
 0x12b   :  { %3646 = vrsqrt.f32 %v146_v36  ;;  %v143_v39 = vmul.f32 0.03125, %v135_v37  ;;  %v144_v40 = vmul.f32 0.03125, %v138_v38 }
 0x12d   :  { %v147_v41 = vadd.f32 1e-05, %v143_v39  ;;  %v148_v42 = vadd.f32 1e-05, %v144_v40 }
 0x12e   :  { %v141_v43 = vpop.xlane.xlu1 %140 }
 0x12f   :  { %3648 = vrsqrt.f32 %v147_v41  ;;  %v145_v44 = vmul.f32 0.03125, %v141_v43 }
 0x130   :  { %3650 = vrsqrt.f32 %v148_v42 }
 0x131   :  { %v149_v45 = vadd.f32 1e-05, %v145_v44 }
 0x133   :  { %3652 = vrsqrt.f32 %v149_v45 }
 0x138   :  { %v3647_v46 = vpop.eup %3646 }
 0x139   :  { %v154_v47 = vmul.f32 %v3647_v46, %v122_v12 }
 0x13b   :  { %v164_v52 = vmul.f32 %v3095_v48, %v154_v47 }
 0x13c   :  { %v3649_v49 = vpop.eup %3648 }
 0x13d   :  { %v3651_v50 = vpop.eup %3650  ;;  %v155_v51 = vmul.f32 %v3649_v49, %v123_v20  ;;  %v174_v57 = vadd.f32 %v3096_v53, %v164_v52 }
 0x13e   :  { %v156_v54 = vmul.f32 %v3651_v50, %v124_v13 }
 0x13f   :  { %v165_v55 = vmul.f32 %v3095_v48, %v155_v51 }
 0x140   :  { %v3653_v56 = vpop.eup %3652  ;;  %v166_v60 = vmul.f32 %v3095_v48, %v156_v54 }
 0x141   :  { %v175_v58 = vadd.f32 %v3096_v53, %v165_v55  ;;  %v157_v59 = vmul.f32 %v3653_v56, %v125_v21 }
 0x142   :  { %v176_v63 = vadd.f32 %v3096_v53, %v166_v60 }
 0x143   :  { %v178_v61 = vpack.c.bf16 %v175_v58, %v174_v57  ;;  %v167_v62 = vmul.f32 %v3095_v48, %v157_v59 }
 0x145   :  { %3349 = vmatprep.mubr.msk.bf16.mxu1 %vm104_vm0, %v178_v61  ;;  %v177_v0 = vadd.f32 %v3096_v53, %v167_v62 }
 0x147   :  { %v179_v1 = vpack.c.bf16 %v177_v0, %v176_v63 }
 0x149   :  { %3350 = vmatmul.mubr.msk.bf16.vlgmr.msra.gmra.mxu1 %vm104_vm0, %v179_v1 }
 0x209   :  { %v3351_v2 = vpop.f32.mrf.mxu1 }
 0x20a   :  { %v237_v6 = vadd.f32 %v3351_v2, %v3097_v3 }
 0x20b   :  { %v228_v4 = vpop.f32.mrf.mxu1 }
 0x20c   :  { %v229_v9 = vadd.f32 %v3097_v3, %v228_v4 }
 0x20d   :  { %v3352_v5 = vpop.f32.mrf.mxu1 }
 0x20e   :  { %v240_v7 = vadd.f32 %v3352_v5, %v3097_v3 }
 0x20f   :  { %v231_v8 = vpop.f32.mrf.mxu1 }
 0x210   :  { %v4005_v10 = vpack.c.bf16 %v240_v7, %v237_v6  ;;  %v232_v11 = vadd.f32 %v3097_v3, %v231_v8 }
 0x212   :  { %v4007_v12 = vpack.c.bf16 %v232_v11, %v229_v9  ;;  %249 = vrot.lane.b32.xlu0 %v4005_v10, %s3854_s24 }
 0x214   :  { %247 = vrot.lane.b32.xlu1 %v4007_v12, %s3854_s24  ;;  %3357 = vmatprep.mubr.msk.bf16.mxu1 %vm251_vm1, %v4007_v12 }
 0x284   :  { %v250_v13 = vpop.permute.xlu0 %249 }
 0x285   :  { %3609 = vmatprep.subr.msk.bf16.mxu1 %vm251_vm1, %v250_v13  ;;  %v262_v14 = vsel %vm251_vm1, %v250_v13, 0 }
 0x286   :  { %3354 = vmatpush3.bf16.xpose.msra.mxu1 %v262_v14  ;;  %v248_v15 = vpop.permute.xlu1 %247 }
 0x287   :  { %3610 = vmatprep.subr.msk.bf16.mxu1 %vm251_vm1, %v248_v15  ;;  %v259_v16 = vsel %vm251_vm1, %v248_v15, 0 }
 0x28e   :  { %3356 = vmatpush3.bf16.xpose.msra.mxu1 %v259_v16 }
 0x295   :  { %3358 = vmatmul.mubr.msk.bf16.vlgmr.msra.gmra.mxu1 %vm251_vm1, %v4005_v10 }
 0x355   :  { %v3359_v17 = vpop.f32.mrf.mxu1 }
 0x356   :  { %v315_v27 = vmul.f32 0.35355338, %v3359_v17  ;;  %v75_v17 = vld [vmem:[%s4712_s7] sm:$0xff] }
 0x357   :  { %v298_v18 = vpop.f32.mrf.mxu1 }
 0x358   :  { %v313_v20 = vmul.f32 0.35355338, %v298_v18  ;;  %v319_v35 = vadd.f32 %v315_v27, %v4042_v31  ;;  %v430_v18 = vpack.c.bf16 %v75_v17, %v75_v17 }
 0x359   :  { %v3360_v21 = vpop.f32.mrf.mxu1 }
 0x35a   :  { %v316_v23 = vmul.f32 0.35355338, %v3360_v21  ;;  %v317_v24 = vadd.f32 %v313_v20, %v4024_v19  ;;  %v327_v36 = vsel %vm104_vm0, %v319_v35, -inf  ;;  %v684_v20 = vsel %vm624_vm2, %v430_v18, 0 }
 0x35b   :  { %v301_v25 = vpop.f32.mrf.mxu1 }
 0x35c   :  { %v314_v28 = vmul.f32 0.35355338, %v301_v25  ;;  %v321_v29 = vsel %vm104_vm0, %v317_v24, -inf  ;;  %v320_v30 = vadd.f32 %v316_v23, %v4029_v22 }
 0x35d   :  { %322 = vmax.xlane.f32.xlu1 %v321_v29 }
 0x35e   :  { %v318_v32 = vadd.f32 %v314_v28, %v4035_v26  ;;  %v330_v33 = vsel %vm104_vm0, %v320_v30, -inf }
 0x360   :  { %v324_v34 = vsel %vm104_vm0, %v318_v32, -inf }
 0x361   :  { %331 = vmax.xlane.f32.xlu1 %v330_v33  ;;  %325 = vmax.xlane.f32.xlu0 %v324_v34 }
 0x365   :  { %328 = vmax.xlane.f32.xlu0 %v327_v36 }
 0x372   :  { %367 = vrot.lane.b32.xlu1 %v4007_v12, %s3855_s21 }
 0x3e6   :  { %v323_v37 = vpop.xlane.xlu1 %322 }
 0x3e7   :  { %v333_v42 = vsub.f32 %v317_v24, %v323_v37 }
 0x3e9   :  { %v337_v47 = vmul.f32 1.442695, %v333_v42 }
 0x3ea   :  { %v332_v38 = vpop.xlane.xlu1 %331  ;;  %v326_v39 = vpop.xlane.xlu0 %325 }
 0x3eb   :  { %v336_v40 = vsub.f32 %v320_v30, %v332_v38  ;;  %v334_v41 = vsub.f32 %v318_v32, %v326_v39 }
 0x3ed   :  { %v343_v43 = vmul.f32 1.442695, %v336_v40  ;;  %v339_v44 = vmul.f32 1.442695, %v334_v41 }
 0x3ee   :  { %v329_v45 = vpop.xlane.xlu0 %328  ;;  %v368_v57 = vpop.permute.xlu1 %367 }
 0x3ef   :  { %3654 = vpow2.f32 %v343_v43  ;;  %v335_v46 = vsub.f32 %v319_v35, %v329_v45 }
 0x3f0   :  { %3656 = vpow2.f32 %v339_v44 }
 0x3f1   :  { %v341_v48 = vmul.f32 1.442695, %v335_v46 }
 0x3f3   :  { %3658 = vpow2.f32 %v341_v48 }
 0x3f4   :  { %3660 = vpow2.f32 %v337_v47 }
 0x3fc   :  { %v3655_v49 = vpop.eup %3654 }
 0x3fd   :  { %v354_v50 = vsel %vm104_vm0, %v3655_v49, 0.0  ;;  %v3657_v51 = vpop.eup %3656 }
 0x3fe   :  { %355 = vadd.xlane.f32.xlu1 %v354_v50  ;;  %v348_v53 = vsel %vm104_vm0, %v3657_v51, 0.0 }
 0x400   :  { %v3659_v52 = vpop.eup %3658 }
 0x401   :  { %v351_v54 = vsel %vm104_vm0, %v3659_v52, 0.0  ;;  %v3661_v55 = vpop.eup %3660 }
 0x402   :  { %349 = vadd.xlane.f32.xlu1 %v348_v53  ;;  %352 = vadd.xlane.f32.xlu0 %v351_v54  ;;  %v345_v56 = vsel %vm104_vm0, %v3661_v55, 0.0 }
 0x406   :  { %346 = vadd.xlane.f32.xlu0 %v345_v56 }
 0x413   :  { %437 = vrot.lane.b32.xlu1 %v4005_v10, %s3856_s22 }
 0x417   :  { %435 = vrot.lane.b32.xlu1 %v4007_v12, %s3856_s22 }
 0x41b   :  { %433 = vrot.lane.b32.xlu1 %v4005_v10, %s3857_s3 }
 0x41c   :  { %369 = vrot.lane.b32.xlu0 %v4005_v10, %s3855_s21 }
 0x420   :  { %431 = vrot.lane.b32.xlu0 %v4007_v12, %s3857_s3 }
 0x487   :  { %v356_v58 = vpop.xlane.xlu1 %355 }
 0x48b   :  { %v350_v59 = vpop.xlane.xlu1 %349  ;;  %v353_v60 = vpop.xlane.xlu0 %352 }
 0x48c   :  { %3662 = vrcp.f32 %v353_v60 }
 0x48d   :  { %3664 = vrcp.f32 %v350_v59 }
 0x48e   :  { %3666 = vrcp.f32 %v356_v58 }
 0x48f   :  { %v347_v61 = vpop.xlane.xlu0 %346  ;;  %v438_v63 = vpop.permute.xlu1 %437 }
 0x490   :  { %3668 = vrcp.f32 %v347_v61  ;;  %v449_v13 = vsel %vm251_vm1, %v438_v63, 0 }
 0x493   :  { %v370_v62 = vpop.permute.xlu0 %369  ;;  %v436_v14 = vpop.permute.xlu1 %435 }
 0x494   :  { %3361 = vmatprep.subr.bf16.mxu0 %v370_v62  ;;  %v446_v15 = vsel %vm251_vm1, %v436_v14, 0 }
 0x495   :  { %3362 = vmatpush3.bf16.msra.mxu0 %v370_v62 }
 0x496   :  { %3363 = vmatprep.subr.bf16.mxu0 %v368_v57 }
 0x497   :  { %v432_v11 = vpop.permute.xlu0 %431  ;;  %v434_v16 = vpop.permute.xlu1 %433 }
 0x499   :  { %3364 = vmatpush3.bf16.msra.mxu0 %v368_v57  ;;  %v3663_v0 = vpop.eup %3662 }
 0x49a   :  { %3611 = vmatprep.subr.msk.bf16.mxu0 %vm251_vm1, %v438_v63  ;;  %v3665_v1 = vpop.eup %3664  ;;  %v363_v4 = vmul.f32 %v3663_v0, %v3659_v52 }
 0x49b   :  { %v3667_v2 = vpop.eup %3666  ;;  %v362_v6 = vmul.f32 %v3665_v1, %v3657_v51 }
 0x49c   :  { %v364_v7 = vmul.f32 %v3667_v2, %v3655_v49 }
 0x49d   :  { %v3669_v3 = vpop.eup %3668 }
 0x49e   :  { %v361_v5 = vmul.f32 %v3669_v3, %v3661_v55  ;;  %v366_v9 = vpack.c.bf16 %v364_v7, %v363_v4  ;;  %v76_v7 = vld [vmem:[%s4712_s7 + $0x8] sm:$0xff] }
 0x4a0   :  { %v365_v8 = vpack.c.bf16 %v362_v6, %v361_v5 }
 0x4a2   :  { %3365 = vmatprep.mubr.msk.bf16.mxu0 %vm104_vm0, %v365_v8  ;;  %v617_v8 = vpack.c.bf16 %v76_v7, %v76_v7 }
 0x4a3   :  { %3366 = vmatmul.mubr.msk.bf16.vlgmr.msra.gmra.mxu0 %vm104_vm0, %v366_v9 }
 0x4a4   :  { %3370 = vmatpush3.bf16.xpose.msra.mxu0 %v449_v13  ;;  %3373 = vmatprep.mubr.msk.bf16.mxu0 %vm251_vm1, %v432_v11 }
 0x4a5   :  { %3612 = vmatprep.subr.msk.bf16.mxu0 %vm251_vm1, %v436_v14 }
 0x4ac   :  { %3372 = vmatpush3.bf16.xpose.msra.mxu0 %v446_v15 }
 0x4ad   :  { %3614 = vmatprep.subr.msk.bf16.mxu0 %vm624_vm2, %v430_v18 }
 0x4b3   :  { %3374 = vmatmul.mubr.msk.bf16.vlgmr.msra.gmra.mxu0 %vm251_vm1, %v434_v16 }
 0x4b4   :  { %3392 = vmatpush3.bf16.msra.mxu0 %v684_v20 }
 0x563   :  { %v3367_v21 = vpop.f32.mrf.mxu0 }
 0x565   :  { %v413_v23 = vpop.f32.mrf.mxu0 }
 0x567   :  { %v3368_v24 = vpop.f32.mrf.mxu0 }
 0x568   :  { %v429_v28 = vpack.c.bf16 %v3368_v24, %v3367_v21  ;;  %v626_v24 = vsel %vm624_vm2, %v617_v8, 0 }
 0x569   :  { %v416_v25 = vpop.f32.mrf.mxu0 }
 0x56a   :  { %v428_v27 = vpack.c.bf16 %v416_v25, %v413_v23 }
 0x56c   :  { %3393 = vmatprep.mubr.msk.bf16.mxu0 %vm251_vm1, %v428_v27 }
 0x56d   :  { %3394 = vmatmul.mubr.msk.bf16.vlgmr.msra.gmra.mxu0 %vm251_vm1, %v429_v28 }
 0x573   :  { %v3375_v29 = vpop.f32.mrf.mxu0 }
 0x574   :  { %v502_v32 = vmul.f32 0.35355338, %v3375_v29 }
 0x575   :  { %v485_v30 = vpop.f32.mrf.mxu0 }
 0x576   :  { %v500_v33 = vmul.f32 0.35355338, %v485_v30  ;;  %v506_v40 = vadd.f32 %v502_v32, %v4042_v31 }
 0x577   :  { %v3376_v34 = vpop.f32.mrf.mxu0 }
 0x578   :  { %v504_v35 = vadd.f32 %v500_v33, %v4024_v19  ;;  %v503_v37 = vmul.f32 0.35355338, %v3376_v34  ;;  %v514_v42 = vsel %vm104_vm0, %v506_v40, -inf }
 0x579   :  { %v488_v36 = vpop.f32.mrf.mxu0 }
 0x57a   :  { %v501_v38 = vmul.f32 0.35355338, %v488_v36  ;;  %v508_v39 = vsel %vm104_vm0, %v504_v35, -inf  ;;  %v507_v44 = vadd.f32 %v503_v37, %v4029_v22 }
 0x57b   :  { %509 = vmax.xlane.f32.xlu0 %v508_v39 }
 0x57c   :  { %v505_v41 = vadd.f32 %v501_v38, %v4035_v26  ;;  %v517_v45 = vsel %vm104_vm0, %v507_v44, -inf }
 0x57e   :  { %v511_v43 = vsel %vm104_vm0, %v505_v41, -inf }
 0x57f   :  { %515 = vmax.xlane.f32.xlu0 %v514_v42  ;;  %512 = vmax.xlane.f32.xlu1 %v511_v43 }
 0x583   :  { %518 = vmax.xlane.f32.xlu0 %v517_v45 }
 0x604   :  { %v510_v46 = vpop.xlane.xlu0 %509 }
 0x605   :  { %v520_v47 = vsub.f32 %v504_v35, %v510_v46 }
 0x607   :  { %v524_v51 = vmul.f32 1.442695, %v520_v47 }
 0x608   :  { %v516_v48 = vpop.xlane.xlu0 %515  ;;  %v513_v49 = vpop.xlane.xlu1 %512 }
 0x609   :  { %v522_v50 = vsub.f32 %v506_v40, %v516_v48  ;;  %v521_v53 = vsub.f32 %v505_v41, %v513_v49 }
 0x60b   :  { %v528_v52 = vmul.f32 1.442695, %v522_v50  ;;  %v526_v56 = vmul.f32 1.442695, %v521_v53 }
 0x60c   :  { %v519_v54 = vpop.xlane.xlu0 %518 }
 0x60d   :  { %3670 = vpow2.f32 %v528_v52  ;;  %v523_v55 = vsub.f32 %v507_v44, %v519_v54 }
 0x60e   :  { %3672 = vpow2.f32 %v524_v51 }
 0x60f   :  { %v530_v57 = vmul.f32 1.442695, %v523_v55 }
 0x611   :  { %3674 = vpow2.f32 %v530_v57 }
 0x612   :  { %3676 = vpow2.f32 %v526_v56 }
 0x61a   :  { %v3671_v58 = vpop.eup %3670 }
 0x61b   :  { %v538_v59 = vsel %vm104_vm0, %v3671_v58, 0.0  ;;  %v3673_v60 = vpop.eup %3672 }
 0x61c   :  { %539 = vadd.xlane.f32.xlu0 %v538_v59  ;;  %v532_v62 = vsel %vm104_vm0, %v3673_v60, 0.0 }
 0x61e   :  { %v3675_v61 = vpop.eup %3674 }
 0x61f   :  { %v541_v63 = vsel %vm104_vm0, %v3675_v61, 0.0  ;;  %v3677_v0 = vpop.eup %3676 }
 0x620   :  { %533 = vadd.xlane.f32.xlu0 %v532_v62  ;;  %542 = vadd.xlane.f32.xlu1 %v541_v63  ;;  %v535_v1 = vsel %vm104_vm0, %v3677_v0, 0.0 }
 0x624   :  { %536 = vadd.xlane.f32.xlu1 %v535_v1 }
 0x635   :  { %554 = vrot.lane.b32.xlu1 %v4007_v12, %s4740_s27 }
 0x636   :  { %556 = vrot.lane.b32.xlu0 %v4005_v10, %s4740_s27  ;;  %s4750_s27 = smov 112  }
 0x639   :  { %741 = vrot.lane.b32.xlu1 %v4005_v10, %s4738_s28 }
 0x63a   :  { %735 = vrot.lane.b32.xlu0 %v4007_v12, %s4736_s30 }
 0x63d   :  { %739 = vrot.lane.b32.xlu1 %v4007_v12, %s4738_s28  ;;  %s4752_s28 = smov 104  }
 0x63e   :  { %990 = vrot.lane.b32.xlu0 %v4005_v10, %s4734_s0 }
 0x641   :  { %737 = vrot.lane.b32.xlu1 %v4005_v10, %s4736_s30 }
 0x642   :  { %984 = vrot.lane.b32.xlu0 %v4007_v12, %s4732_s19 }
 0x645   :  { %988 = vrot.lane.b32.xlu1 %v4007_v12, %s4734_s0 }
 0x649   :  { %986 = vrot.lane.b32.xlu1 %v4005_v10, %s4732_s19 }
 0x6a5   :  { %v540_v2 = vpop.xlane.xlu0 %539 }
 0x6a9   :  { %v534_v3 = vpop.xlane.xlu0 %533  ;;  %v543_v4 = vpop.xlane.xlu1 %542 }
 0x6aa   :  { %3678 = vrcp.f32 %v543_v4 }
 0x6ab   :  { %3680 = vrcp.f32 %v534_v3 }
 0x6ac   :  { %3682 = vrcp.f32 %v540_v2 }
 0x6ad   :  { %v557_v5 = vpop.permute.xlu0 %556  ;;  %v537_v6 = vpop.xlane.xlu1 %536 }
 0x6ae   :  { %3684 = vrcp.f32 %v537_v6  ;;  %3377 = vmatprep.subr.bf16.mxu1 %v557_v5 }
 0x6af   :  { %3378 = vmatpush3.bf16.msra.mxu1 %v557_v5 }
 0x6b1   :  { %v555_v9 = vpop.permute.xlu1 %554  ;;  %v736_v34 = vpop.permute.xlu0 %735 }
 0x6b2   :  { %3379 = vmatprep.subr.bf16.mxu1 %v555_v9 }
 0x6b3   :  { %3380 = vmatpush3.bf16.msra.mxu1 %v555_v9 }
 0x6b4   :  { %3613 = vmatprep.subr.msk.bf16.mxu1 %vm624_vm2, %v617_v8 }
 0x6b5   :  { %v742_v25 = vpop.permute.xlu1 %741  ;;  %v991_v38 = vpop.permute.xlu0 %990 }
 0x6b6   :  { %v753_v35 = vsel %vm251_vm1, %v742_v25, 0  ;;  %v1002_v41 = vsel %vm251_vm1, %v991_v38, 0 }
 0x6b7   :  { %v3679_v11 = vpop.eup %3678 }
 0x6b8   :  { %v3681_v13 = vpop.eup %3680  ;;  %v551_v16 = vmul.f32 %v3679_v11, %v3675_v61 }
 0x6b9   :  { %v3683_v14 = vpop.eup %3682  ;;  %v548_v17 = vmul.f32 %v3681_v13, %v3673_v60  ;;  %v740_v36 = vpop.permute.xlu1 %739 }
 0x6ba   :  { %v550_v20 = vmul.f32 %v3683_v14, %v3671_v58  ;;  %v750_v37 = vsel %vm251_vm1, %v740_v36, 0  ;;  %v985_v40 = vpop.permute.xlu0 %984 }
 0x6bb   :  { %v3685_v15 = vpop.eup %3684 }
 0x6bc   :  { %v549_v18 = vmul.f32 %v3685_v15, %v3677_v0  ;;  %v553_v23 = vpack.c.bf16 %v551_v16, %v550_v20 }
 0x6bd   :  { %v738_v39 = vpop.permute.xlu1 %737 }
 0x6be   :  { %v552_v21 = vpack.c.bf16 %v549_v18, %v548_v17 }
 0x6c0   :  { %3381 = vmatprep.mubr.msk.bf16.mxu1 %vm104_vm0, %v552_v21 }
 0x6c1   :  { %3382 = vmatmul.mubr.msk.bf16.vlgmr.msra.gmra.mxu1 %vm104_vm0, %v553_v23  ;;  %v989_v42 = vpop.permute.xlu1 %988 }
 0x6c2   :  { %3386 = vmatpush3.bf16.msra.mxu1 %v626_v24  ;;  %v999_v43 = vsel %vm251_vm1, %v989_v42, 0 }
 0x6c3   :  { %3615 = vmatprep.subr.msk.bf16.mxu1 %vm251_vm1, %v742_v25 }
 0x6c5   :  { %v987_v44 = vpop.permute.xlu1 %986 }
 0x781   :  { %v3383_v27 = vpop.f32.mrf.mxu1 }
 0x783   :  { %v600_v28 = vpop.f32.mrf.mxu1 }
 0x785   :  { %v3384_v29 = vpop.f32.mrf.mxu1 }
 0x786   :  { %v616_v33 = vpack.c.bf16 %v3384_v29, %v3383_v27 }
 0x787   :  { %v603_v30 = vpop.f32.mrf.mxu1 }
 0x788   :  { %v615_v32 = vpack.c.bf16 %v603_v30, %v600_v28 }
 0x78a   :  { %3387 = vmatprep.mubr.msk.bf16.mxu1 %vm251_vm1, %v615_v32 }
 0x78b   :  { %3388 = vmatmul.mubr.msk.bf16.vlgmr.msra.gmra.mxu1 %vm251_vm1, %v616_v33 }
 0x78c   :  { %3398 = vmatpush3.bf16.xpose.msra.mxu1 %v753_v35  ;;  %3401 = vmatprep.mubr.msk.bf16.mxu1 %vm251_vm1, %v736_v34 }
 0x78d   :  { %3616 = vmatprep.subr.msk.bf16.mxu1 %vm251_vm1, %v740_v36 }
 0x794   :  { %3400 = vmatpush3.bf16.xpose.msra.mxu1 %v750_v37 }
 0x795   :  { %3618 = vmatprep.subr.msk.bf16.mxu1 %vm251_vm1, %v991_v38 }
 0x79b   :  { %3402 = vmatmul.mubr.msk.bf16.vlgmr.msra.gmra.mxu1 %vm251_vm1, %v738_v39 }
 0x79c   :  { %3420 = vmatpush3.bf16.xpose.msra.mxu1 %v1002_v41  ;;  %3423 = vmatprep.mubr.msk.bf16.mxu1 %vm251_vm1, %v985_v40 }
 0x79d   :  { %3619 = vmatprep.subr.msk.bf16.mxu1 %vm251_vm1, %v989_v42 }
 0x7a4   :  { %3422 = vmatpush3.bf16.xpose.msra.mxu1 %v999_v43 }
 0x7ab   :  { %3424 = vmatmul.mubr.msk.bf16.vlgmr.msra.gmra.mxu1 %vm251_vm1, %v987_v44 }
 0x84b   :  { %v4133_v45 = vpop.f32.mrf.mxu1 }
 0x84d   :  { %v4135_v46 = vpop.f32.mrf.mxu1 }
 0x84f   :  { %v4137_v47 = vpop.f32.mrf.mxu1 }
 0x851   :  { %v4139_v48 = vpop.f32.mrf.mxu1 }
 0x85b   :  { %v3403_v49 = vpop.f32.mrf.mxu1 }
 0x85c   :  { %v806_v51 = vmul.f32 0.35355338, %v3403_v49 }
 0x85d   :  { %v789_v50 = vpop.f32.mrf.mxu1 }
 0x85e   :  { %v804_v52 = vmul.f32 0.35355338, %v789_v50  ;;  %v810_v59 = vadd.f32 %v806_v51, %v4042_v31 }
 0x85f   :  { %v3404_v53 = vpop.f32.mrf.mxu1 }
 0x860   :  { %v808_v54 = vadd.f32 %v804_v52, %v4024_v19  ;;  %v807_v56 = vmul.f32 0.35355338, %v3404_v53  ;;  %v818_v61 = vsel %vm104_vm0, %v810_v59, -inf }
 0x861   :  { %v792_v55 = vpop.f32.mrf.mxu1 }
 0x862   :  { %v805_v57 = vmul.f32 0.35355338, %v792_v55  ;;  %v812_v58 = vsel %vm104_vm0, %v808_v54, -inf  ;;  %v811_v63 = vadd.f32 %v807_v56, %v4029_v22 }
 0x863   :  { %813 = vmax.xlane.f32.xlu0 %v812_v58 }
 0x864   :  { %v809_v60 = vadd.f32 %v805_v57, %v4035_v26  ;;  %v821_v0 = vsel %vm104_vm0, %v811_v63, -inf }
 0x866   :  { %v815_v62 = vsel %vm104_vm0, %v809_v60, -inf }
 0x867   :  { %819 = vmax.xlane.f32.xlu0 %v818_v61  ;;  %816 = vmax.xlane.f32.xlu1 %v815_v62 }
 0x86b   :  { %822 = vmax.xlane.f32.xlu0 %v821_v0  ;;  %v3425_v25 = vpop.f32.mrf.mxu1 }
 0x86c   :  { %v1055_v32 = vmul.f32 0.35355338, %v3425_v25 }
 0x86d   :  { %v1038_v27 = vpop.f32.mrf.mxu1 }
 0x86e   :  { %v1053_v33 = vmul.f32 0.35355338, %v1038_v27  ;;  %v1059_v37 = vadd.f32 %v1055_v32, %v4042_v31 }
 0x86f   :  { %v3426_v28 = vpop.f32.mrf.mxu1 }
 0x870   :  { %v1056_v35 = vmul.f32 0.35355338, %v3426_v28  ;;  %v1057_v38 = vadd.f32 %v1053_v33, %v4024_v19  ;;  %v1067_v39 = vsel %vm104_vm0, %v1059_v37, -inf }
 0x871   :  { %v1041_v29 = vpop.f32.mrf.mxu1 }
 0x872   :  { %v1054_v30 = vmul.f32 0.35355338, %v1041_v29  ;;  %v1061_v40 = vsel %vm104_vm0, %v1057_v38, -inf  ;;  %v1060_v41 = vadd.f32 %v1056_v35, %v4029_v22 }
 0x874   :  { %v1058_v34 = vadd.f32 %v1054_v30, %v4035_v26  ;;  %v1070_v42 = vsel %vm104_vm0, %v1060_v41, -inf }
 0x876   :  { %v1064_v36 = vsel %vm104_vm0, %v1058_v34, -inf }
 0x8ec   :  { %v814_v1 = vpop.xlane.xlu0 %813 }
 0x8ed   :  { %v824_v2 = vsub.f32 %v808_v54, %v814_v1 }
 0x8ef   :  { %v828_v6 = vmul.f32 1.442695, %v824_v2 }
 0x8f0   :  { %v820_v3 = vpop.xlane.xlu0 %819  ;;  %v817_v4 = vpop.xlane.xlu1 %816 }
 0x8f1   :  { %v826_v5 = vsub.f32 %v810_v59, %v820_v3  ;;  %v825_v8 = vsub.f32 %v809_v60, %v817_v4 }
 0x8f3   :  { %v832_v7 = vmul.f32 1.442695, %v826_v5  ;;  %v830_v13 = vmul.f32 1.442695, %v825_v8 }
 0x8f4   :  { %v823_v9 = vpop.xlane.xlu0 %822 }
 0x8f5   :  { %3686 = vpow2.f32 %v832_v7  ;;  %v827_v11 = vsub.f32 %v811_v63, %v823_v9 }
 0x8f6   :  { %3688 = vpow2.f32 %v828_v6 }
 0x8f7   :  { %v834_v14 = vmul.f32 1.442695, %v827_v11 }
 0x8f9   :  { %3690 = vpow2.f32 %v834_v14 }
 0x8fa   :  { %3692 = vpow2.f32 %v830_v13 }
 0x902   :  { %v3687_v15 = vpop.eup %3686 }
 0x903   :  { %v842_v16 = vsel %vm104_vm0, %v3687_v15, 0.0  ;;  %v3689_v17 = vpop.eup %3688 }
 0x904   :  { %843 = vadd.xlane.f32.xlu0 %v842_v16  ;;  %v836_v20 = vsel %vm104_vm0, %v3689_v17, 0.0 }
 0x906   :  { %v3691_v18 = vpop.eup %3690 }
 0x907   :  { %v845_v21 = vsel %vm104_vm0, %v3691_v18, 0.0  ;;  %v3693_v23 = vpop.eup %3692 }
 0x908   :  { %837 = vadd.xlane.f32.xlu0 %v836_v20  ;;  %846 = vadd.xlane.f32.xlu1 %v845_v21  ;;  %v839_v24 = vsel %vm104_vm0, %v3693_v23, 0.0  ;;  %v3395_v21 = vpop.f32.mrf.mxu0 }
 0x90c   :  { %840 = vadd.xlane.f32.xlu1 %v839_v24 }
 0x91d   :  { %858 = vrot.lane.b32.xlu1 %v4007_v12, %s4728_s26 }
 0x91e   :  { %860 = vrot.lane.b32.xlu0 %v4005_v10, %s4728_s26  ;;  %s4730_s26 = smov 40  }
 0x93d   :  { %1065 = vmax.xlane.f32.xlu0 %v1064_v36 }
 0x941   :  { %1068 = vmax.xlane.f32.xlu0 %v1067_v39  ;;  %1062 = vmax.xlane.f32.xlu1 %v1061_v40 }
 0x945   :  { %1071 = vmax.xlane.f32.xlu1 %v1070_v42 }
 0x98d   :  { %v844_v26 = vpop.xlane.xlu0 %843 }
 0x991   :  { %v838_v43 = vpop.xlane.xlu0 %837  ;;  %v847_v44 = vpop.xlane.xlu1 %846 }
 0x992   :  { %3694 = vrcp.f32 %v847_v44 }
 0x993   :  { %3696 = vrcp.f32 %v838_v43 }
 0x994   :  { %3698 = vrcp.f32 %v844_v26 }
 0x995   :  { %v861_v31 = vpop.permute.xlu0 %860  ;;  %v841_v19 = vpop.xlane.xlu1 %840 }
 0x996   :  { %3700 = vrcp.f32 %v841_v19  ;;  %3405 = vmatprep.subr.bf16.mxu0 %v861_v31 }
 0x997   :  { %3406 = vmatpush3.bf16.msra.mxu0 %v861_v31 }
 0x999   :  { %v859_v49 = vpop.permute.xlu1 %858 }
 0x99a   :  { %3407 = vmatprep.subr.bf16.mxu0 %v859_v49 }
 0x99b   :  { %3408 = vmatpush3.bf16.msra.mxu0 %v859_v49  ;;  %v78_v49 = vld [vmem:[%s4712_s7 + $0x18] sm:$0xff] }
 0x99f   :  { %v3695_v22 = vpop.eup %3694 }
 0x9a0   :  { %v3697_v50 = vpop.eup %3696  ;;  %v855_v53 = vmul.f32 %v3695_v22, %v3691_v18  ;;  %v1170_v22 = vpack.c.bf16 %v78_v49, %v78_v49 }
 0x9a1   :  { %v3699_v51 = vpop.eup %3698  ;;  %v852_v54 = vmul.f32 %v3697_v50, %v3689_v17  ;;  %v77_v17 = vld [vmem:[%s4712_s7 + $0x10] sm:$0xff] }
 0x9a2   :  { %v854_v56 = vmul.f32 %v3699_v51, %v3687_v15  ;;  %v921_v18 = vpack.c.bf16 %v77_v17, %v77_v17  ;;  %v1178_v50 = vsel %vm624_vm2, %v1170_v22, 0  ;;  %v729_v51 = vadd.f32 %v3395_v21, %v4133_v45  ;;  %v3848_v17 = vld [vmem:[%s4745_s29 + $0x10] sm:$0xff]  ;;  %v3849_v21 = vld [vmem:[%s4745_s29 + $0x8] sm:$0xff] }
 0x9a3   :  { %v3701_v52 = vpop.eup %3700 }
 0x9a4   :  { %v853_v55 = vmul.f32 %v3701_v52, %v3693_v23  ;;  %v857_v58 = vpack.c.bf16 %v855_v53, %v854_v56  ;;  %3617 = vmatprep.subr.msk.bf16.mxu0 %vm624_vm2, %v921_v18  ;;  %v929_v20 = vsel %vm624_vm2, %v921_v18, 0  ;;  %v720_v23 = vpop.f32.mrf.mxu0 }
 0x9a5   :  { %v721_v53 = vadd.f32 %v720_v23, %v4135_v46 }
 0x9a6   :  { %v856_v57 = vpack.c.bf16 %v853_v55, %v852_v54  ;;  %v3396_v24 = vpop.f32.mrf.mxu0 }
 0x9a7   :  { %v732_v56 = vadd.f32 %v3396_v24, %v4137_v47 }
 0x9a8   :  { %3409 = vmatprep.mubr.msk.bf16.mxu0 %vm104_vm0, %v856_v57  ;;  %v723_v25 = vpop.f32.mrf.mxu0 }
 0x9a9   :  { %3410 = vmatmul.mubr.msk.bf16.vlgmr.msra.gmra.mxu0 %vm104_vm0, %v857_v58 }
 0x9aa   :  { %3414 = vmatpush3.bf16.msra.mxu0 %v929_v20 }
 0x9c6   :  { %v1066_v59 = vpop.xlane.xlu0 %1065 }
 0x9c7   :  { %v1074_v0 = vsub.f32 %v1058_v34, %v1066_v59  ;;  %v724_v59 = vadd.f32 %v723_v25, %v4139_v48  ;;  %v3846_v48 = vld [vmem:[%s4745_s29] sm:$0xff] }
 0x9c9   :  { %v1079_v5 = vmul.f32 1.442695, %v1074_v0 }
 0x9ca   :  { %v1069_v60 = vpop.xlane.xlu0 %1068  ;;  %v1063_v61 = vpop.xlane.xlu1 %1062 }
 0x9cb   :  { %v1075_v62 = vsub.f32 %v1059_v37, %v1069_v60  ;;  %v1073_v63 = vsub.f32 %v1057_v38, %v1063_v61 }
 0x9cd   :  { %v1081_v1 = vmul.f32 1.442695, %v1075_v62  ;;  %v1077_v2 = vmul.f32 1.442695, %v1073_v63 }
 0x9ce   :  { %v1072_v3 = vpop.xlane.xlu1 %1071 }
 0x9cf   :  { %3702 = vpow2.f32 %v1081_v1  ;;  %v1076_v4 = vsub.f32 %v1060_v41, %v1072_v3 }
 0x9d0   :  { %3704 = vpow2.f32 %v1077_v2 }
 0x9d1   :  { %v1083_v6 = vmul.f32 1.442695, %v1076_v4 }
 0x9d3   :  { %3706 = vpow2.f32 %v1083_v6 }
 0x9d4   :  { %3708 = vpow2.f32 %v1079_v5 }
 0x9dc   :  { %v3703_v7 = vpop.eup %3702 }
 0x9dd   :  { %v1091_v8 = vsel %vm104_vm0, %v3703_v7, 0.0  ;;  %v3705_v9 = vpop.eup %3704 }
 0x9de   :  { %1092 = vadd.xlane.f32.xlu0 %v1091_v8  ;;  %v1085_v13 = vsel %vm104_vm0, %v3705_v9, 0.0 }
 0x9e0   :  { %v3707_v11 = vpop.eup %3706 }
 0x9e1   :  { %v1094_v14 = vsel %vm104_vm0, %v3707_v11, 0.0  ;;  %v3709_v15 = vpop.eup %3708 }
 0x9e2   :  { %1086 = vadd.xlane.f32.xlu0 %v1085_v13  ;;  %1095 = vadd.xlane.f32.xlu1 %v1094_v14  ;;  %v1088_v16 = vsel %vm104_vm0, %v3709_v15, 0.0  ;;  %v3847_v14 = vld [vmem:[%s4745_s29 + $0x18] sm:$0xff]  ;;  %s4749_s29 = smov 80  }
 0x9e6   :  { %1089 = vadd.xlane.f32.xlu1 %v1088_v16 }
 0x9f7   :  { %1107 = vrot.lane.b32.xlu1 %v4007_v12, %s4730_s26 }
 0x9f8   :  { %1109 = vrot.lane.b32.xlu0 %v4005_v10, %s4730_s26 }
 0xa67   :  { %v1093_v27 = vpop.xlane.xlu0 %1092 }
 0xa69   :  { %v3411_v28 = vpop.f32.mrf.mxu0 }
 0xa6b   :  { %v904_v29 = vpop.f32.mrf.mxu0  ;;  %v1087_v30 = vpop.xlane.xlu0 %1086 }
 0xa6c   :  { %v1096_v32 = vpop.xlane.xlu1 %1095 }
 0xa6d   :  { %v3412_v33 = vpop.f32.mrf.mxu0  ;;  %3710 = vrcp.f32 %v1096_v32 }
 0xa6e   :  { %3712 = vrcp.f32 %v1087_v30  ;;  %v920_v37 = vpack.c.bf16 %v3412_v33, %v3411_v28 }
 0xa6f   :  { %v907_v34 = vpop.f32.mrf.mxu0  ;;  %v1110_v35 = vpop.permute.xlu0 %1109  ;;  %3714 = vrcp.f32 %v1093_v27 }
 0xa70   :  { %v919_v36 = vpack.c.bf16 %v907_v34, %v904_v29  ;;  %v1090_v12 = vpop.xlane.xlu1 %1089  ;;  %3427 = vmatprep.subr.bf16.mxu0 %v1110_v35 }
 0xa71   :  { %3716 = vrcp.f32 %v1090_v12 }
 0xa72   :  { %3415 = vmatprep.mubr.msk.bf16.mxu0 %vm251_vm1, %v919_v36 }
 0xa73   :  { %3416 = vmatmul.mubr.msk.bf16.vlgmr.msra.gmra.mxu0 %vm251_vm1, %v920_v37 }
 0xa74   :  { %3428 = vmatpush3.bf16.msra.mxu0 %v1110_v35  ;;  %v1108_v10 = vpop.permute.xlu1 %1107 }
 0xa75   :  { %3429 = vmatprep.subr.bf16.mxu0 %v1108_v10 }
 0xa78   :  { %3430 = vmatpush3.bf16.msra.mxu0 %v1108_v10 }
 0xa79   :  { %3620 = vmatprep.subr.msk.bf16.mxu0 %vm624_vm2, %v1170_v22 }
 0xa7a   :  { %v3711_v38 = vpop.eup %3710 }
 0xa7b   :  { %v3713_v39 = vpop.eup %3712  ;;  %v1104_v42 = vmul.f32 %v3711_v38, %v3707_v11 }
 0xa7c   :  { %v3715_v40 = vpop.eup %3714  ;;  %v1101_v26 = vmul.f32 %v3713_v39, %v3705_v9  ;;  %v3124_v9 = vld [vmem:[%s4713_s8] ss:$0 sm:$0xff] }
 0xa7d   :  { %v1103_v44 = vmul.f32 %v3715_v40, %v3703_v7 }
 0xa7e   :  { %v3717_v41 = vpop.eup %3716 }
 0xa7f   :  { %v1102_v43 = vmul.f32 %v3717_v41, %v3709_v15  ;;  %v1106_v19 = vpack.c.bf16 %v1104_v42, %v1103_v44 }
 0xa81   :  { %v1105_v31 = vpack.c.bf16 %v1102_v43, %v1101_v26 }
 0xa83   :  { %3431 = vmatprep.mubr.msk.bf16.mxu0 %vm104_vm0, %v1105_v31 }
 0xa84   :  { %3432 = vmatmul.mubr.msk.bf16.vlgmr.msra.gmra.mxu0 %vm104_vm0, %v1106_v19 }
 0xa85   :  { %3436 = vmatpush3.bf16.msra.mxu0 %v1178_v50  ;;  %v84_v50 = vld [vmem:[%s4714_s11 + $0x10] sm:$0xff] }
 0xb33   :  { %v3417_v52 = vpop.f32.mrf.mxu0 }
 0xb34   :  { %v982_v54 = vadd.f32 %v3417_v52, %v729_v51  ;;  %v85_v51 = vld [vmem:[%s4714_s11 + $0x18] sm:$0xff] }
 0xb35   :  { %v965_v55 = vpop.f32.mrf.mxu0  ;;  %v1322_v52 = vpack.c.bf16 %v85_v51, %v84_v50  ;;  %v88_v50 = vld [vmem:[%s4717_s13 + $0x8] sm:$0xff] }
 0xb36   :  { %v980_v57 = vadd.f32 %v965_v55, %v721_v53  ;;  %v82_v53 = vld [vmem:[%s4714_s11] sm:$0xff] }
 0xb37   :  { %v3418_v58 = vpop.f32.mrf.mxu0  ;;  %3441 = vmatprep.subr.bf16.mxu1 %v1322_v52 }
 0xb38   :  { %v983_v60 = vadd.f32 %v3418_v58, %v732_v56  ;;  %3442 = vmatpush3.bf16.msra.mxu1 %v1322_v52  ;;  %v3127_v52 = vld [vmem:[%s4718_s12] ss:$0 sm:$0xff] }
 0xb39   :  { %v968_v61 = vpop.f32.mrf.mxu0 }
 0xb3a   :  { %v981_v62 = vadd.f32 %v968_v61, %v724_v59 }
 0xb44   :  { %v3433_v63 = vpop.f32.mrf.mxu0 }
 0xb46   :  { %v1153_v0 = vpop.f32.mrf.mxu0 }
 0xb48   :  { %v3434_v1 = vpop.f32.mrf.mxu0 }
 0xb49   :  { %v1169_v45 = vpack.c.bf16 %v3434_v1, %v3433_v63 }
 0xb4a   :  { %v1156_v2 = vpop.f32.mrf.mxu0 }
 0xb4b   :  { %v1168_v3 = vpack.c.bf16 %v1156_v2, %v1153_v0 }
 0xb4d   :  { %3437 = vmatprep.mubr.msk.bf16.mxu0 %vm251_vm1, %v1168_v3 }
 0xb4e   :  { %3438 = vmatmul.mubr.msk.bf16.vlgmr.msra.gmra.mxu0 %vm251_vm1, %v1169_v45 }
 0xc0e   :  { %v3439_v46 = vpop.f32.mrf.mxu0 }
 0xc0f   :  { %v1231_v6 = vadd.f32 %v3439_v46, %v982_v54  ;;  %v83_v54 = vld [vmem:[%s4714_s11 + $0x8] sm:$0xff] }
 0xc10   :  { %v1214_v4 = vpop.f32.mrf.mxu0  ;;  %v1321_v55 = vpack.c.bf16 %v83_v54, %v82_v53 }
 0xc11   :  { %v1229_v47 = vadd.f32 %v1214_v4, %v980_v57  ;;  %v1235_v18 = vadd.f32 %v3848_v17, %v1231_v6  ;;  %v3125_v4 = vld [vmem:[%s4715_s9] ss:$0 sm:$0xff] }
 0xc12   :  { %v3440_v5 = vpop.f32.mrf.mxu0  ;;  %3443 = vmatprep.subr.bf16.mxu1 %v1321_v55 }
 0xc13   :  { %v1233_v7 = vadd.f32 %v3846_v48, %v1229_v47  ;;  %v1232_v8 = vadd.f32 %v3440_v5, %v983_v60  ;;  %v4218_v27 = vadd.f32 %v3124_v9, %v1235_v18  ;;  %3444 = vmatpush3.bf16.msra.mxu1 %v1321_v55  ;;  %v3126_v48 = vld [vmem:[%s4716_s10] ss:$0 sm:$0xff] }
 0xc14   :  { %v1217_v11 = vpop.f32.mrf.mxu0 }
 0xc15   :  { %v4201_v13 = vadd.f32 %v3124_v9, %v1233_v7  ;;  %v1236_v15 = vadd.f32 %v3847_v14, %v1232_v8  ;;  %v1230_v16 = vadd.f32 %v1217_v11, %v981_v62  ;;  %v1253_v30 = vsel %vm104_vm0, %v4218_v27, 0.0 }
 0xc17   :  { %v4209_v20 = vadd.f32 %v3124_v9, %v1236_v15  ;;  %v1234_v23 = vadd.f32 %v3849_v21, %v1230_v16  ;;  %v1247_v24 = vsel %vm104_vm0, %v4201_v13, 0.0 }
 0xc18   :  { %1248 = vadd.xlane.f32.xlu1 %v1247_v24 }
 0xc19   :  { %v4216_v25 = vadd.f32 %v3124_v9, %v1234_v23  ;;  %v1256_v28 = vsel %vm104_vm0, %v4209_v20, 0.0 }
 0xc1b   :  { %v1250_v29 = vsel %vm104_vm0, %v4216_v25, 0.0 }
 0xc1c   :  { %1257 = vadd.xlane.f32.xlu1 %v1256_v28  ;;  %1251 = vadd.xlane.f32.xlu0 %v1250_v29  ;;  %v101_v29 = vld [vmem:[%s4717_s13 + $0x70] sm:$0xff] }
 0xc20   :  { %1254 = vadd.xlane.f32.xlu0 %v1253_v30  ;;  %v102_v30 = vld [vmem:[%s4717_s13 + $0x78] sm:$0xff] }
 0xca1   :  { %v1249_v32 = vpop.xlane.xlu1 %1248 }
 0xca2   :  { %v1259_v33 = vmul.f32 0.03125, %v1249_v32  ;;  %v1425_v32 = vpack.c.bf16 %v102_v30, %v101_v29 }
 0xca4   :  { %v1263_v34 = vsub.f32 %v4201_v13, %v1259_v33  ;;  %3449 = vmatprep.subr.bf16.mxu0 %v1425_v32  ;;  %v99_v33 = vld [vmem:[%s4717_s13 + $0x60] sm:$0xff] }
 0xca5   :  { %v1258_v35 = vpop.xlane.xlu1 %1257  ;;  %v1252_v36 = vpop.xlane.xlu0 %1251  ;;  %3450 = vmatpush3.bf16.msra.mxu0 %v1425_v32 }
 0xca6   :  { %v1262_v12 = vmul.f32 0.03125, %v1258_v35  ;;  %v1260_v37 = vmul.f32 0.03125, %v1252_v36  ;;  %v1267_v10 = vmul.f32 %v1263_v34, %v1263_v34  ;;  %v97_v36 = vld [vmem:[%s4717_s13 + $0x50] sm:$0xff] }
 0xca8   :  { %v1266_v38 = vsub.f32 %v4209_v20, %v1262_v12  ;;  %v1264_v39 = vsub.f32 %v4216_v25, %v1260_v37  ;;  %v1271_v40 = vsel %vm104_vm0, %v1267_v10, 0.0  ;;  %v98_v12 = vld [vmem:[%s4717_s13 + $0x58] sm:$0xff]  ;;  %v95_v10 = vld [vmem:[%s4717_s13 + $0x40] sm:$0xff] }
 0xca9   :  { %1272 = vadd.xlane.f32.xlu0 %v1271_v40  ;;  %v1255_v41 = vpop.xlane.xlu0 %1254  ;;  %v1423_v37 = vpack.c.bf16 %v98_v12, %v97_v36  ;;  %v93_v40 = vld [vmem:[%s4717_s13 + $0x30] sm:$0xff] }
 0xcaa   :  { %v1261_v42 = vmul.f32 0.03125, %v1255_v41  ;;  %v1268_v26 = vmul.f32 %v1264_v39, %v1264_v39  ;;  %v1270_v31 = vmul.f32 %v1266_v38, %v1266_v38  ;;  %v94_v41 = vld [vmem:[%s4717_s13 + $0x38] sm:$0xff] }
 0xcac   :  { %v1265_v43 = vsub.f32 %v4218_v27, %v1261_v42  ;;  %v1274_v44 = vsel %vm104_vm0, %v1268_v26, 0.0  ;;  %v1280_v49 = vsel %vm104_vm0, %v1270_v31, 0.0  ;;  %v1421_v42 = vpack.c.bf16 %v94_v41, %v93_v40  ;;  %v91_v26 = vld [vmem:[%s4717_s13 + $0x20] sm:$0xff]  ;;  %v89_v31 = vld [vmem:[%s4717_s13 + $0x10] sm:$0xff] }
 0xcad   :  { %1275 = vadd.xlane.f32.xlu1 %v1274_v44 }
 0xcae   :  { %v1269_v19 = vmul.f32 %v1265_v43, %v1265_v43 }
 0xcb0   :  { %v1277_v22 = vsel %vm104_vm0, %v1269_v19, 0.0  ;;  %v90_v19 = vld [vmem:[%s4717_s13 + $0x18] sm:$0xff] }
 0xcb1   :  { %1281 = vadd.xlane.f32.xlu1 %v1280_v49  ;;  %1278 = vadd.xlane.f32.xlu0 %v1277_v22  ;;  %v1419_v49 = vpack.c.bf16 %v90_v19, %v89_v31  ;;  %v87_v22 = vld [vmem:[%s4717_s13] sm:$0xff] }
 0xcb2   :  { %v1418_v51 = vpack.c.bf16 %v88_v50, %v87_v22 }
 0xd32   :  { %v1273_v56 = vpop.xlane.xlu0 %1272 }
 0xd33   :  { %v1283_v57 = vmul.f32 0.03125, %v1273_v56 }
 0xd35   :  { %v1287_v58 = vadd.f32 1e-05, %v1283_v57 }
 0xd36   :  { %v1276_v59 = vpop.xlane.xlu1 %1275 }
 0xd37   :  { %3718 = vrsqrt.f32 %v1287_v58  ;;  %v1284_v60 = vmul.f32 0.03125, %v1276_v59 }
 0xd39   :  { %v1288_v61 = vadd.f32 1e-05, %v1284_v60 }
 0xd3a   :  { %v1282_v62 = vpop.xlane.xlu1 %1281  ;;  %v1279_v63 = vpop.xlane.xlu0 %1278 }
 0xd3b   :  { %3720 = vrsqrt.f32 %v1288_v61  ;;  %v1286_v0 = vmul.f32 0.03125, %v1282_v62  ;;  %v1285_v1 = vmul.f32 0.03125, %v1279_v63 }
 0xd3d   :  { %v1290_v2 = vadd.f32 1e-05, %v1286_v0  ;;  %v1289_v3 = vadd.f32 1e-05, %v1285_v1 }
 0xd3f   :  { %3722 = vrsqrt.f32 %v1290_v2 }
 0xd40   :  { %3724 = vrsqrt.f32 %v1289_v3 }
 0xd44   :  { %v3719_v45 = vpop.eup %3718 }
 0xd45   :  { %v1295_v46 = vmul.f32 %v3719_v45, %v1263_v34  ;;  %v100_v34 = vld [vmem:[%s4717_s13 + $0x68] sm:$0xff] }
 0xd46   :  { %v1424_v35 = vpack.c.bf16 %v100_v34, %v99_v33  ;;  %v3134_v33 = vld [vmem:[%s4719_s14] ss:$0 sm:$0xff] }
 0xd47   :  { %v1305_v6 = vmul.f32 %v3125_v4, %v1295_v46 }
 0xd48   :  { %v3721_v47 = vpop.eup %3720  ;;  %3451 = vmatprep.subr.bf16.mxu0 %v1424_v35 }
 0xd49   :  { %v1296_v5 = vmul.f32 %v3721_v47, %v1264_v39  ;;  %v1315_v14 = vadd.f32 %v3126_v48, %v1305_v6  ;;  %3452 = vmatpush3.bf16.msra.mxu0 %v1424_v35 }
 0xd4a   :  { %3453 = vmatprep.subr.bf16.mxu0 %v1423_v37 }
 0xd4b   :  { %v1306_v7 = vmul.f32 %v3125_v4, %v1296_v5 }
 0xd4c   :  { %v3723_v8 = vpop.eup %3722 }
 0xd4d   :  { %v3725_v9 = vpop.eup %3724  ;;  %v1298_v11 = vmul.f32 %v3723_v8, %v1266_v38  ;;  %v1316_v15 = vadd.f32 %v3126_v48, %v1306_v7  ;;  %3454 = vmatpush3.bf16.msra.mxu0 %v1423_v37  ;;  %v96_v38 = vld [vmem:[%s4717_s13 + $0x48] sm:$0xff] }
 0xd4e   :  { %v1297_v16 = vmul.f32 %v3725_v9, %v1265_v43  ;;  %v1422_v39 = vpack.c.bf16 %v96_v38, %v95_v10  ;;  %v92_v43 = vld [vmem:[%s4717_s13 + $0x28] sm:$0xff] }
 0xd4f   :  { %v1319_v17 = vpack.c.bf16 %v1316_v15, %v1315_v14  ;;  %v1308_v18 = vmul.f32 %v3125_v4, %v1298_v11  ;;  %v1420_v44 = vpack.c.bf16 %v92_v43, %v91_v26 }
 0xd50   :  { %v1307_v21 = vmul.f32 %v3125_v4, %v1297_v16  ;;  %3455 = vmatprep.subr.bf16.mxu0 %v1422_v39 }
 0xd51   :  { %3445 = vmatprep.mubr.msk.bf16.mxu1 %vm104_vm0, %v1319_v17  ;;  %v1318_v23 = vadd.f32 %v3126_v48, %v1308_v18  ;;  %3456 = vmatpush3.bf16.msra.mxu0 %v1422_v39 }
 0xd52   :  { %v1317_v24 = vadd.f32 %v3126_v48, %v1307_v21  ;;  %3457 = vmatprep.subr.bf16.mxu0 %v1421_v42 }
 0xd54   :  { %v1320_v28 = vpack.c.bf16 %v1318_v23, %v1317_v24 }
 0xd55   :  { %3458 = vmatpush3.bf16.msra.mxu0 %v1421_v42 }
 0xd56   :  { %3446 = vmatmul.mubr.msk.bf16.vlgmr.msra.gmra.mxu1 %vm104_vm0, %v1320_v28  ;;  %3459 = vmatprep.subr.bf16.mxu0 %v1420_v44 }
 0xd59   :  { %3460 = vmatpush3.bf16.msra.mxu0 %v1420_v44 }
 0xd5a   :  { %3461 = vmatprep.subr.bf16.mxu0 %v1419_v49 }
 0xd5d   :  { %3462 = vmatpush3.bf16.msra.mxu0 %v1419_v49 }
 0xd5e   :  { %3463 = vmatprep.subr.bf16.mxu0 %v1418_v51 }
 0xd61   :  { %3464 = vmatpush3.bf16.msra.mxu0 %v1418_v51 }
 0xe16   :  { %v3447_v53 = vpop.f32.mrf.mxu1 }
 0xe17   :  { %v1378_v54 = vadd.f32 %v3447_v53, %v3127_v52 }
 0xe18   :  { %v1369_v55 = vpop.f32.mrf.mxu1 }
 0xe19   :  { %v3132_v56 = vmul.f32 -1.702, %v1378_v54  ;;  %v1370_v57 = vadd.f32 %v3127_v52, %v1369_v55 }
 0xe1a   :  { %v3448_v58 = vpop.f32.mrf.mxu1 }
 0xe1b   :  { %v1396_v59 = vmul.f32 1.442695, %v3132_v56  ;;  %v3130_v60 = vmul.f32 -1.702, %v1370_v57  ;;  %v1381_v61 = vadd.f32 %v3448_v58, %v3127_v52 }
 0xe1c   :  { %v1372_v62 = vpop.f32.mrf.mxu1 }
 0xe1d   :  { %v1392_v63 = vmul.f32 1.442695, %v3130_v60  ;;  %v3133_v0 = vmul.f32 -1.702, %v1381_v61  ;;  %v1373_v1 = vadd.f32 %v3127_v52, %v1372_v62  ;;  %3726 = vpow2.f32 %v1396_v59  ;;  %v3139_v60 = vld [vmem:[%s4746_s23 + $0x30] sm:$0xff] }
 0xe1f   :  { %3728 = vpow2.f32 %v1392_v63  ;;  %v1398_v2 = vmul.f32 1.442695, %v3133_v0  ;;  %v3131_v3 = vmul.f32 -1.702, %v1373_v1  ;;  %v3137_v63 = vld [vmem:[%s4746_s23 + $0x20] sm:$0xff]  ;;  %v3138_v0 = vld [vmem:[%s4746_s23 + $0x28] sm:$0xff] }
 0xe21   :  { %3730 = vpow2.f32 %v1398_v2  ;;  %v1394_v45 = vmul.f32 1.442695, %v3131_v3 }
 0xe23   :  { %3732 = vpow2.f32 %v1394_v45 }
 0xe2a   :  { %v3727_v46 = vpop.eup %3726 }
 0xe2b   :  { %v1402_v6 = vadd.f32 1.0, %v3727_v46 }
 0xe2c   :  { %v3729_v4 = vpop.eup %3728 }
 0xe2d   :  { %v1400_v47 = vadd.f32 1.0, %v3729_v4 }
 0xe2e   :  { %v3731_v5 = vpop.eup %3730 }
 0xe2f   :  { %v1403_v48 = vadd.f32 1.0, %v3731_v5  ;;  %3734 = vrcp.f32 %v1400_v47 }
 0xe30   :  { %v3733_v7 = vpop.eup %3732 }
 0xe31   :  { %3736 = vrcp.f32 %v1403_v48  ;;  %v1401_v8 = vadd.f32 1.0, %v3733_v7 }
 0xe32   :  { %3738 = vrcp.f32 %v1402_v6 }
 0xe33   :  { %3740 = vrcp.f32 %v1401_v8 }
 0xe3c   :  { %v3735_v9 = vpop.eup %3734 }
 0xe3d   :  { %v1412_v17 = vmul.f32 %v3735_v9, %v1370_v57 }
 0xe3e   :  { %v3737_v11 = vpop.eup %3736 }
 0xe3f   :  { %v3739_v14 = vpop.eup %3738  ;;  %v1415_v16 = vmul.f32 %v3737_v11, %v1381_v61  ;;  %v3140_v61 = vld [vmem:[%s4746_s23 + $0x38] sm:$0xff]  ;;  %s4751_s23 = smov 72  }
 0xe40   :  { %v3741_v15 = vpop.eup %3740  ;;  %v1414_v21 = vmul.f32 %v3739_v14, %v1378_v54  ;;  %v1612_v62 = vpack.c.bf16 %v3140_v61, %v3139_v60  ;;  %v3171_v14 = vld [vmem:[%s4747_s5 + $0x1] ss:$0 sm:$0xff]  ;;  %s4753_s5 = smov 48  }
 0xe41   :  { %v1413_v18 = vmul.f32 %v3741_v15, %v1373_v1  ;;  %v1611_v1 = vpack.c.bf16 %v3138_v0, %v3137_v63  ;;  %v4392_v0 = vld [vmem:[%s4711_s1] sm:$0xff] }
 0xe42   :  { %v1417_v24 = vpack.c.bf16 %v1415_v16, %v1414_v21  ;;  %3469 = vmatprep.subr.bf16.mxu1 %v1612_v62  ;;  %v3172_v16 = vld [vmem:[%s4709_s4 + $0x1] ss:$0 sm:$0xff] }
 0xe43   :  { %v1416_v23 = vpack.c.bf16 %v1413_v18, %v1412_v17  ;;  %3470 = vmatpush3.bf16.msra.mxu1 %v1612_v62 }
 0xe44   :  { %3471 = vmatprep.subr.bf16.mxu1 %v1611_v1 }
 0xe45   :  { %3465 = vmatprep.mubr.bf16.mxu0 %v1416_v23 }
 0xe46   :  { %3466 = vmatmul.mubr.bf16.vlgmr.msra.gmra.mxu0 %v1417_v24 }
 0xe47   :  { %3472 = vmatpush3.bf16.msra.mxu1 %v1611_v1 }
 0xf06   :  { %v3467_v28 = vpop.f32.mrf.mxu0 }
 0xf07   :  { %v1477_v30 = vadd.f32 %v3467_v28, %v4218_v27 }
 0xf08   :  { %v1460_v29 = vpop.f32.mrf.mxu0 }
 0xf09   :  { %v1475_v32 = vadd.f32 %v1460_v29, %v4201_v13  ;;  %v4312_v12 = vadd.f32 %v3134_v33, %v1477_v30 }
 0xf0a   :  { %v3468_v34 = vpop.f32.mrf.mxu0 }
 0xf0b   :  { %v4310_v35 = vadd.f32 %v3134_v33, %v1475_v32  ;;  %v1478_v37 = vadd.f32 %v3468_v34, %v4209_v20  ;;  %v1543_v39 = vsel %vm104_vm0, %v4312_v12, 0.0 }
 0xf0c   :  { %v1463_v36 = vpop.f32.mrf.mxu0 }
 0xf0d   :  { %v1476_v10 = vadd.f32 %v1463_v36, %v4216_v25  ;;  %v1537_v38 = vsel %vm104_vm0, %v4310_v35, 0.0  ;;  %v4320_v13 = vadd.f32 %v3134_v33, %v1478_v37 }
 0xf0e   :  { %1538 = vadd.xlane.f32.xlu0 %v1537_v38 }
 0xf0f   :  { %v4318_v27 = vadd.f32 %v3134_v33, %v1476_v10  ;;  %v1546_v20 = vsel %vm104_vm0, %v4320_v13, 0.0 }
 0xf11   :  { %v1540_v40 = vsel %vm104_vm0, %v4318_v27, 0.0 }
 0xf12   :  { %1544 = vadd.xlane.f32.xlu0 %v1543_v39  ;;  %1541 = vadd.xlane.f32.xlu1 %v1540_v40 }
 0xf16   :  { %1547 = vadd.xlane.f32.xlu1 %v1546_v20  ;;  %v3173_v20 = vld [vmem:[%s4710_s6 + $0x1] ss:$0 sm:$0xff] }
 0xf97   :  { %v1539_v25 = vpop.xlane.xlu0 %1538 }
 0xf98   :  { %v1549_v41 = vmul.f32 0.03125, %v1539_v25 }
 0xf9a   :  { %v1553_v42 = vsub.f32 %v4310_v35, %v1549_v41 }
 0xf9b   :  { %v1545_v26 = vpop.xlane.xlu0 %1544  ;;  %v1542_v43 = vpop.xlane.xlu1 %1541 }
 0xf9c   :  { %v1551_v44 = vmul.f32 0.03125, %v1545_v26  ;;  %v1550_v31 = vmul.f32 0.03125, %v1542_v43  ;;  %v1557_v19 = vmul.f32 %v1553_v42, %v1553_v42 }
 0xf9e   :  { %v1555_v49 = vsub.f32 %v4312_v12, %v1551_v44  ;;  %v1554_v22 = vsub.f32 %v4318_v27, %v1550_v31  ;;  %v1561_v50 = vsel %vm104_vm0, %v1557_v19, 0.0 }
 0xf9f   :  { %1562 = vadd.xlane.f32.xlu0 %v1561_v50  ;;  %v1548_v51 = vpop.xlane.xlu1 %1547 }
 0xfa0   :  { %v1552_v52 = vmul.f32 0.03125, %v1548_v51  ;;  %v1559_v53 = vmul.f32 %v1555_v49, %v1555_v49  ;;  %v1558_v54 = vmul.f32 %v1554_v22, %v1554_v22 }
 0xfa2   :  { %v1556_v55 = vsub.f32 %v4320_v13, %v1552_v52  ;;  %v1567_v56 = vsel %vm104_vm0, %v1559_v53, 0.0  ;;  %v1564_v57 = vsel %vm104_vm0, %v1558_v54, 0.0 }
 0xfa3   :  { %1568 = vadd.xlane.f32.xlu0 %v1567_v56  ;;  %1565 = vadd.xlane.f32.xlu1 %v1564_v57 }
 0xfa4   :  { %v1560_v58 = vmul.f32 %v1556_v55, %v1556_v55 }
 0xfa6   :  { %v1570_v59 = vsel %vm104_vm0, %v1560_v58, 0.0 }
 0xfa7   :  { %1571 = vadd.xlane.f32.xlu1 %v1570_v59 }
0x1028   :  { %v1563_v2 = vpop.xlane.xlu0 %1562 }
0x1029   :  { %v1573_v3 = vmul.f32 0.03125, %v1563_v2 }
0x102b   :  { %v1577_v45 = vadd.f32 1e-05, %v1573_v3 }
0x102c   :  { %v1569_v46 = vpop.xlane.xlu0 %1568  ;;  %v1566_v4 = vpop.xlane.xlu1 %1565 }
0x102d   :  { %3742 = vrsqrt.f32 %v1577_v45  ;;  %v1575_v47 = vmul.f32 0.03125, %v1569_v46  ;;  %v1574_v5 = vmul.f32 0.03125, %v1566_v4 }
0x102f   :  { %v1579_v6 = vadd.f32 1e-05, %v1575_v47  ;;  %v1578_v48 = vadd.f32 1e-05, %v1574_v5  ;;  %v4399_v47 = vld [vmem:[%s4711_s1 + $0x10] sm:$0xff] }
0x1030   :  { %v1572_v7 = vpop.xlane.xlu1 %1571 }
0x1031   :  { %3744 = vrsqrt.f32 %v1579_v6  ;;  %v1576_v8 = vmul.f32 0.03125, %v1572_v7 }
0x1032   :  { %3746 = vrsqrt.f32 %v1578_v48  ;;  %v4405_v48 = vld [vmem:[%s4711_s1 + $0x8] sm:$0xff] }
0x1033   :  { %v1580_v9 = vadd.f32 1e-05, %v1576_v8 }
0x1035   :  { %3748 = vrsqrt.f32 %v1580_v9 }
0x103a   :  { %v3743_v11 = vpop.eup %3742 }
0x103b   :  { %v1585_v15 = vmul.f32 %v3743_v11, %v1553_v42 }
0x103d   :  { %v1595_v17 = vmul.f32 %v3171_v14, %v1585_v15  ;;  %v4413_v15 = vld [vmem:[%s4711_s1 + $0x18] sm:$0xff]  ;;  %s4748_s1 = smov 56  }
0x103e   :  { %v3745_v18 = vpop.eup %3744 }
0x103f   :  { %v3747_v21 = vpop.eup %3746  ;;  %v1587_v23 = vmul.f32 %v3745_v18, %v1555_v49  ;;  %v1605_v24 = vadd.f32 %v3172_v16, %v1595_v17 }
0x1040   :  { %v1586_v28 = vmul.f32 %v3747_v21, %v1554_v22 }
0x1041   :  { %v1597_v29 = vmul.f32 %v3171_v14, %v1587_v23 }
0x1042   :  { %v3749_v30 = vpop.eup %3748  ;;  %v1596_v32 = vmul.f32 %v3171_v14, %v1586_v28 }
0x1043   :  { %v1588_v33 = vmul.f32 %v3749_v30, %v1556_v55  ;;  %v1607_v34 = vadd.f32 %v3172_v16, %v1597_v29 }
0x1044   :  { %v1606_v36 = vadd.f32 %v3172_v16, %v1596_v32 }
0x1045   :  { %v1598_v37 = vmul.f32 %v3171_v14, %v1588_v33 }
0x1046   :  { %v1609_v10 = vpack.c.bf16 %v1606_v36, %v1605_v24 }
0x1047   :  { %v1608_v38 = vadd.f32 %v3172_v16, %v1598_v37 }
0x1048   :  { %3473 = vmatprep.mubr.msk.bf16.mxu1 %vm104_vm0, %v1609_v10 }
0x1049   :  { %v1610_v39 = vpack.c.bf16 %v1608_v38, %v1607_v34 }
0x104b   :  { %3474 = vmatmul.mubr.msk.bf16.vlgmr.msra.gmra.mxu1 %vm104_vm0, %v1610_v39 }
0x110b   :  { %v3475_v40 = vpop.f32.mrf.mxu1 }
0x110c   :  { %v1668_v42 = vadd.f32 %v3475_v40, %v3173_v20 }
0x110d   :  { %v1659_v25 = vpop.f32.mrf.mxu1 }
0x110e   :  { %v1660_v44 = vadd.f32 %v3173_v20, %v1659_v25 }
0x110f   :  { %v3476_v41 = vpop.f32.mrf.mxu1 }
0x1110   :  { %v1671_v26 = vadd.f32 %v3476_v41, %v3173_v20 }
0x1111   :  { %v1662_v43 = vpop.f32.mrf.mxu1 }
0x1112   :  { %v4359_v31 = vpack.c.bf16 %v1671_v26, %v1668_v42  ;;  %v1663_v19 = vadd.f32 %v3173_v20, %v1662_v43 }
0x1114   :  { %v4361_v49 = vpack.c.bf16 %v1663_v19, %v1660_v44  ;;  %1680 = vrot.lane.b32.xlu0 %v4359_v31, %s3854_s24 }
0x1116   :  { %1678 = vrot.lane.b32.xlu1 %v4361_v49, %s3854_s24  ;;  %3481 = vmatprep.mubr.msk.bf16.mxu1 %vm251_vm1, %v4361_v49 }
0x1118   :  { %1861 = vrot.lane.b32.xlu0 %v4361_v49, %s3857_s3 }
0x111a   :  { %1867 = vrot.lane.b32.xlu1 %v4359_v31, %s3856_s22 }
0x111e   :  { %1865 = vrot.lane.b32.xlu1 %v4361_v49, %s3856_s22  ;;  %s4754_s22 = smov 40  }
0x1122   :  { %1863 = vrot.lane.b32.xlu1 %v4359_v31, %s3857_s3 }
0x1186   :  { %v1681_v22 = vpop.permute.xlu0 %1680 }
0x1187   :  { %v1692_v50 = vsel %vm251_vm1, %v1681_v22, 0  ;;  %3621 = vmatprep.subr.msk.bf16.mxu1 %vm251_vm1, %v1681_v22 }
0x1188   :  { %3478 = vmatpush3.bf16.xpose.msra.mxu1 %v1692_v50  ;;  %v1679_v51 = vpop.permute.xlu1 %1678 }
0x1189   :  { %3622 = vmatprep.subr.msk.bf16.mxu1 %vm251_vm1, %v1679_v51  ;;  %v1689_v55 = vsel %vm251_vm1, %v1679_v51, 0 }
0x118a   :  { %v1862_v52 = vpop.permute.xlu0 %1861 }
0x118b   :  { %3497 = vmatprep.mubr.msk.bf16.mxu0 %vm251_vm1, %v1862_v52 }
0x118c   :  { %v1868_v53 = vpop.permute.xlu1 %1867 }
0x118d   :  { %v1879_v54 = vsel %vm251_vm1, %v1868_v53, 0  ;;  %3623 = vmatprep.subr.msk.bf16.mxu0 %vm251_vm1, %v1868_v53 }
0x118e   :  { %3494 = vmatpush3.bf16.xpose.msra.mxu0 %v1879_v54 }
0x1190   :  { %3480 = vmatpush3.bf16.xpose.msra.mxu1 %v1689_v55  ;;  %v1866_v56 = vpop.permute.xlu1 %1865 }
0x1191   :  { %3624 = vmatprep.subr.msk.bf16.mxu0 %vm251_vm1, %v1866_v56  ;;  %v1876_v57 = vsel %vm251_vm1, %v1866_v56, 0 }
0x1194   :  { %v1864_v58 = vpop.permute.xlu1 %1863 }
0x1196   :  { %3496 = vmatpush3.bf16.xpose.msra.mxu0 %v1876_v57 }
0x1197   :  { %3482 = vmatmul.mubr.msk.bf16.vlgmr.msra.gmra.mxu1 %vm251_vm1, %v4359_v31 }
0x119d   :  { %3498 = vmatmul.mubr.msk.bf16.vlgmr.msra.gmra.mxu0 %vm251_vm1, %v1864_v58 }
0x1257   :  { %v3483_v59 = vpop.f32.mrf.mxu1 }
0x1258   :  { %v1745_v61 = vmul.f32 0.35355338, %v3483_v59 }
0x1259   :  { %v1728_v60 = vpop.f32.mrf.mxu1 }
0x125a   :  { %v1743_v62 = vmul.f32 0.35355338, %v1728_v60  ;;  %v1749_v5 = vadd.f32 %v4399_v47, %v1745_v61 }
0x125b   :  { %v3484_v63 = vpop.f32.mrf.mxu1 }
0x125c   :  { %v1747_v1 = vadd.f32 %v4392_v0, %v1743_v62  ;;  %v1746_v45 = vmul.f32 0.35355338, %v3484_v63  ;;  %v1757_v11 = vsel %vm104_vm0, %v1749_v5, -inf }
0x125d   :  { %v1731_v2 = vpop.f32.mrf.mxu1  ;;  %v3499_v3 = vpop.f32.mrf.mxu0 }
0x125e   :  { %v1744_v46 = vmul.f32 0.35355338, %v1731_v2  ;;  %v1751_v4 = vsel %vm104_vm0, %v1747_v1, -inf  ;;  %v1750_v16 = vadd.f32 %v4413_v15, %v1746_v45  ;;  %v1932_v23 = vmul.f32 0.35355338, %v3499_v3 }
0x125f   :  { %v1915_v6 = vpop.f32.mrf.mxu0  ;;  %1752 = vmax.xlane.f32.xlu0 %v1751_v4 }
0x1260   :  { %v1748_v7 = vadd.f32 %v4405_v48, %v1744_v46  ;;  %v1930_v9 = vmul.f32 0.35355338, %v1915_v6  ;;  %v1760_v24 = vsel %vm104_vm0, %v1750_v16, -inf  ;;  %v1936_v34 = vadd.f32 %v4399_v47, %v1932_v23 }
0x1261   :  { %v3500_v8 = vpop.f32.mrf.mxu0 }
0x1262   :  { %v1754_v14 = vsel %vm104_vm0, %v1748_v7, -inf  ;;  %v1933_v18 = vmul.f32 0.35355338, %v3500_v8  ;;  %v1934_v29 = vadd.f32 %v4392_v0, %v1930_v9  ;;  %v1944_v37 = vsel %vm104_vm0, %v1936_v34, -inf }
0x1263   :  { %v1918_v17 = vpop.f32.mrf.mxu0  ;;  %1758 = vmax.xlane.f32.xlu0 %v1757_v11  ;;  %1755 = vmax.xlane.f32.xlu1 %v1754_v14 }
0x1264   :  { %v1931_v21 = vmul.f32 0.35355338, %v1918_v17  ;;  %v1937_v32 = vadd.f32 %v4413_v15, %v1933_v18  ;;  %v1938_v33 = vsel %vm104_vm0, %v1934_v29, -inf }
0x1266   :  { %v1935_v28 = vadd.f32 %v4405_v48, %v1931_v21  ;;  %v1947_v36 = vsel %vm104_vm0, %v1937_v32, -inf }
0x1267   :  { %1761 = vmax.xlane.f32.xlu0 %v1760_v24 }
0x1268   :  { %v1941_v30 = vsel %vm104_vm0, %v1935_v28, -inf }
0x1269   :  { %1942 = vmax.xlane.f32.xlu1 %v1941_v30 }
0x126b   :  { %1939 = vmax.xlane.f32.xlu0 %v1938_v33 }
0x126d   :  { %1948 = vmax.xlane.f32.xlu1 %v1947_v36 }
0x126f   :  { %1945 = vmax.xlane.f32.xlu0 %v1944_v37 }
0x127e   :  { %1797 = vrot.lane.b32.xlu1 %v4361_v49, %s3855_s21 }
0x1282   :  { %1986 = vrot.lane.b32.xlu1 %v4359_v31, %s4748_s1 }
0x12e8   :  { %v1753_v10 = vpop.xlane.xlu0 %1752 }
0x12e9   :  { %v1763_v22 = vsub.f32 %v1747_v1, %v1753_v10 }
0x12eb   :  { %v1767_v56 = vmul.f32 1.442695, %v1763_v22  ;;  %v3143_v22 = vld [vmem:[%s4712_s7 + $0x28] sm:$0xff] }
0x12ec   :  { %v1759_v38 = vpop.xlane.xlu0 %1758  ;;  %v1756_v40 = vpop.xlane.xlu1 %1755 }
0x12ed   :  { %v1765_v39 = vsub.f32 %v1749_v5, %v1759_v38  ;;  %v1764_v43 = vsub.f32 %v1748_v7, %v1756_v40 }
0x12ef   :  { %v1771_v20 = vmul.f32 1.442695, %v1765_v39  ;;  %v1769_v51 = vmul.f32 1.442695, %v1764_v43 }
0x12f0   :  { %v1762_v25 = vpop.xlane.xlu0 %1761 }
0x12f1   :  { %3750 = vpow2.f32 %v1771_v20  ;;  %v1766_v41 = vsub.f32 %v1750_v16, %v1762_v25 }
0x12f2   :  { %v1943_v42 = vpop.xlane.xlu1 %1942 }
0x12f3   :  { %v1773_v26 = vmul.f32 1.442695, %v1766_v41  ;;  %v1951_v53 = vsub.f32 %v1935_v28, %v1943_v42 }
0x12f4   :  { %v1940_v44 = vpop.xlane.xlu0 %1939 }
0x12f5   :  { %3752 = vpow2.f32 %v1773_v26  ;;  %v1950_v57 = vsub.f32 %v1934_v29, %v1940_v44  ;;  %v1956_v59 = vmul.f32 1.442695, %v1951_v53  ;;  %v2047_v53 = vpack.c.bf16 %v3143_v22, %v3143_v22 }
0x12f6   :  { %v1949_v19 = vpop.xlane.xlu1 %1948 }
0x12f7   :  { %v1953_v50 = vsub.f32 %v1937_v32, %v1949_v19  ;;  %v1954_v61 = vmul.f32 1.442695, %v1950_v57  ;;  %v2055_v57 = vsel %vm624_vm2, %v2047_v53, 0 }
0x12f8   :  { %v1946_v52 = vpop.xlane.xlu0 %1945 }
0x12f9   :  { %v1960_v54 = vmul.f32 1.442695, %v1953_v50  ;;  %v1952_v55 = vsub.f32 %v1936_v34, %v1946_v52 }
0x12fa   :  { %v1798_v16 = vpop.permute.xlu1 %1797 }
0x12fb   :  { %3754 = vpow2.f32 %v1960_v54  ;;  %v1958_v58 = vmul.f32 1.442695, %v1952_v55 }
0x12fc   :  { %3756 = vpow2.f32 %v1769_v51 }
0x12fd   :  { %3758 = vpow2.f32 %v1958_v58 }
0x12fe   :  { %v4429_v60 = vpop.eup %3750  ;;  %3760 = vpow2.f32 %v1767_v56  ;;  %v1987_v17 = vpop.permute.xlu1 %1986 }
0x12ff   :  { %v1781_v62 = vsel %vm104_vm0, %v4429_v60, 0.0  ;;  %3762 = vpow2.f32 %v1956_v59  ;;  %v3142_v59 = vld [vmem:[%s4712_s7 + $0x20] sm:$0xff] }
0x1300   :  { %1782 = vadd.xlane.f32.xlu0 %v1781_v62  ;;  %3764 = vpow2.f32 %v1954_v61 }
0x1302   :  { %v3753_v63 = vpop.eup %3752 }
0x1303   :  { %v1784_v1 = vsel %vm104_vm0, %v3753_v63, 0.0 }
0x1304   :  { %1785 = vadd.xlane.f32.xlu1 %v1784_v1 }
0x1308   :  { %v4434_v2 = vpop.eup %3754 }
0x1309   :  { %v3757_v3 = vpop.eup %3756  ;;  %v1971_v45 = vsel %vm104_vm0, %v4434_v2, 0.0 }
0x130a   :  { %v4438_v46 = vpop.eup %3758  ;;  %1972 = vadd.xlane.f32.xlu1 %v1971_v45  ;;  %v1778_v6 = vsel %vm104_vm0, %v3757_v3, 0.0 }
0x130b   :  { %v1968_v4 = vsel %vm104_vm0, %v4438_v46, 0.0  ;;  %v3761_v5 = vpop.eup %3760 }
0x130c   :  { %1969 = vadd.xlane.f32.xlu0 %v1968_v4  ;;  %v3763_v7 = vpop.eup %3762  ;;  %v1775_v8 = vsel %vm104_vm0, %v3761_v5, 0.0 }
0x130d   :  { %v3765_v9 = vpop.eup %3764  ;;  %v1965_v11 = vsel %vm104_vm0, %v3763_v7, 0.0 }
0x130e   :  { %1779 = vadd.xlane.f32.xlu1 %v1778_v6  ;;  %v1962_v14 = vsel %vm104_vm0, %v3765_v9, 0.0 }
0x1310   :  { %1776 = vadd.xlane.f32.xlu0 %v1775_v8 }
0x1312   :  { %1966 = vadd.xlane.f32.xlu1 %v1965_v11 }
0x1314   :  { %1963 = vadd.xlane.f32.xlu0 %v1962_v14 }
0x1323   :  { %1984 = vrot.lane.b32.xlu1 %v4361_v49, %s4748_s1 }
0x1327   :  { %2168 = vrot.lane.b32.xlu1 %v4361_v49, %s4749_s29 }
0x132a   :  { %1799 = vrot.lane.b32.xlu0 %v4359_v31, %s3855_s21 }
0x132b   :  { %2166 = vrot.lane.b32.xlu1 %v4359_v31, %s4750_s27 }
0x132e   :  { %2170 = vrot.lane.b32.xlu0 %v4359_v31, %s4749_s29 }
0x132f   :  { %2417 = vrot.lane.b32.xlu1 %v4361_v49, %s4751_s23 }
0x1332   :  { %2164 = vrot.lane.b32.xlu0 %v4361_v49, %s4750_s27 }
0x1333   :  { %2415 = vrot.lane.b32.xlu1 %v4359_v31, %s4752_s28 }
0x1336   :  { %2419 = vrot.lane.b32.xlu0 %v4359_v31, %s4751_s23 }
0x133a   :  { %2413 = vrot.lane.b32.xlu0 %v4361_v49, %s4752_s28 }
0x1389   :  { %v1783_v21 = vpop.xlane.xlu0 %1782 }
0x138d   :  { %v1786_v18 = vpop.xlane.xlu1 %1785 }
0x138e   :  { %3766 = vrcp.f32 %v1786_v18 }
0x1393   :  { %v1973_v23 = vpop.xlane.xlu1 %1972 }
0x1395   :  { %v1970_v24 = vpop.xlane.xlu0 %1969 }
0x1397   :  { %v1780_v28 = vpop.xlane.xlu1 %1779 }
0x1398   :  { %3768 = vrcp.f32 %v1780_v28 }
0x1399   :  { %3770 = vrcp.f32 %v1783_v21  ;;  %v1777_v29 = vpop.xlane.xlu0 %1776 }
0x139a   :  { %3772 = vrcp.f32 %v1777_v29 }
0x139b   :  { %v1967_v30 = vpop.xlane.xlu1 %1966  ;;  %v3767_v34 = vpop.eup %3766 }
0x139c   :  { %3774 = vrcp.f32 %v1967_v30  ;;  %v1794_v38 = vmul.f32 %v3767_v34, %v3753_v63 }
0x139d   :  { %v1964_v32 = vpop.xlane.xlu0 %1963 }
0x139e   :  { %3776 = vrcp.f32 %v1964_v32 }
0x139f   :  { %3778 = vrcp.f32 %v1970_v24  ;;  %v1985_v51 = vpop.permute.xlu1 %1984 }
0x13a0   :  { %3780 = vrcp.f32 %v1973_v23 }
0x13a1   :  { %v1800_v33 = vpop.permute.xlu0 %1799 }
0x13a2   :  { %3485 = vmatprep.subr.bf16.mxu1 %v1800_v33 }
0x13a3   :  { %3486 = vmatpush3.bf16.msra.mxu1 %v1800_v33  ;;  %v2169_v14 = vpop.permute.xlu1 %2168 }
0x13a4   :  { %3487 = vmatprep.subr.bf16.mxu1 %v1798_v16 }
0x13a5   :  { %v3769_v36 = vpop.eup %3768  ;;  %v2171_v58 = vpop.permute.xlu0 %2170 }
0x13a6   :  { %v3771_v37 = vpop.eup %3770  ;;  %v1792_v40 = vmul.f32 %v3769_v36, %v3757_v3 }
0x13a7   :  { %v3773_v10 = vpop.eup %3772  ;;  %3488 = vmatpush3.bf16.msra.mxu1 %v1798_v16  ;;  %v1793_v25 = vmul.f32 %v3771_v37, %v4429_v60  ;;  %v1860_v60 = vpack.c.bf16 %v3142_v59, %v3142_v59  ;;  %v2179_v16 = vsel %vm251_vm1, %v2169_v14, 0  ;;  %v2167_v18 = vpop.permute.xlu1 %2166 }
0x13a8   :  { %3501 = vmatprep.subr.bf16.mxu1 %v1987_v17  ;;  %v1791_v39 = vmul.f32 %v3773_v10, %v3761_v5 }
0x13a9   :  { %v3775_v20 = vpop.eup %3774  ;;  %v1796_v26 = vpack.c.bf16 %v1794_v38, %v1793_v25  ;;  %3626 = vmatprep.subr.msk.bf16.mxu0 %vm624_vm2, %v1860_v60  ;;  %v2113_v61 = vsel %vm624_vm2, %v1860_v60, 0  ;;  %v2165_v11 = vpop.permute.xlu0 %2164 }
0x13aa   :  { %v1795_v41 = vpack.c.bf16 %v1792_v40, %v1791_v39  ;;  %v1979_v19 = vmul.f32 %v3775_v20, %v3763_v7  ;;  %3516 = vmatpush3.bf16.msra.mxu0 %v2113_v61 }
0x13ab   :  { %v3777_v42 = vpop.eup %3776  ;;  %v2418_v24 = vpop.permute.xlu1 %2417 }
0x13ac   :  { %v3779_v43 = vpop.eup %3778  ;;  %3489 = vmatprep.mubr.msk.bf16.mxu1 %vm104_vm0, %v1795_v41  ;;  %v1978_v44 = vmul.f32 %v3777_v42, %v3765_v9  ;;  %v2182_v9 = vsel %vm251_vm1, %v2171_v58, 0  ;;  %v2428_v28 = vsel %vm251_vm1, %v2418_v24, 0 }
0x13ad   :  { %3490 = vmatmul.mubr.msk.bf16.vlgmr.msra.gmra.mxu1 %vm104_vm0, %v1796_v26  ;;  %v3781_v50 = vpop.eup %3780  ;;  %v1980_v54 = vmul.f32 %v3779_v43, %v4438_v46 }
0x13ae   :  { %3502 = vmatpush3.bf16.msra.mxu1 %v1987_v17  ;;  %v1982_v52 = vpack.c.bf16 %v1979_v19, %v1978_v44  ;;  %v1981_v55 = vmul.f32 %v3781_v50, %v4434_v2  ;;  %v2420_v17 = vpop.permute.xlu0 %2419 }
0x13af   :  { %3503 = vmatprep.subr.bf16.mxu1 %v1985_v51  ;;  %v2431_v21 = vsel %vm251_vm1, %v2420_v17, 0  ;;  %v2416_v29 = vpop.permute.xlu1 %2415 }
0x13b0   :  { %3505 = vmatprep.mubr.msk.bf16.mxu1 %vm104_vm0, %v1982_v52  ;;  %v1983_v56 = vpack.c.bf16 %v1981_v55, %v1980_v54 }
0x13b2   :  { %3504 = vmatpush3.bf16.msra.mxu1 %v1985_v51  ;;  %v2414_v23 = vpop.permute.xlu0 %2413 }
0x13b3   :  { %3625 = vmatprep.subr.msk.bf16.mxu1 %vm624_vm2, %v2047_v53 }
0x13b5   :  { %3506 = vmatmul.mubr.msk.bf16.vlgmr.msra.gmra.mxu1 %vm104_vm0, %v1983_v56 }
0x13b6   :  { %3510 = vmatpush3.bf16.msra.mxu1 %v2055_v57 }
0x13b7   :  { %3627 = vmatprep.subr.msk.bf16.mxu1 %vm251_vm1, %v2171_v58 }
0x146d   :  { %v3491_v62 = vpop.f32.mrf.mxu1 }
0x146f   :  { %v1843_v63 = vpop.f32.mrf.mxu1 }
0x1471   :  { %v3492_v1 = vpop.f32.mrf.mxu1 }
0x1472   :  { %v1859_v45 = vpack.c.bf16 %v3492_v1, %v3491_v62 }
0x1473   :  { %v1846_v2 = vpop.f32.mrf.mxu1 }
0x1474   :  { %v1858_v3 = vpack.c.bf16 %v1846_v2, %v1843_v63 }
0x1475   :  { %v3507_v46 = vpop.f32.mrf.mxu1 }
0x1476   :  { %3517 = vmatprep.mubr.msk.bf16.mxu0 %vm251_vm1, %v1858_v3 }
0x1477   :  { %v2030_v4 = vpop.f32.mrf.mxu1  ;;  %3518 = vmatmul.mubr.msk.bf16.vlgmr.msra.gmra.mxu0 %vm251_vm1, %v1859_v45 }
0x1479   :  { %v3508_v5 = vpop.f32.mrf.mxu1 }
0x147a   :  { %v2046_v8 = vpack.c.bf16 %v3508_v5, %v3507_v46 }
0x147b   :  { %v2033_v6 = vpop.f32.mrf.mxu1 }
0x147c   :  { %v2045_v7 = vpack.c.bf16 %v2033_v6, %v2030_v4 }
0x147e   :  { %3511 = vmatprep.mubr.msk.bf16.mxu1 %vm251_vm1, %v2045_v7 }
0x147f   :  { %3512 = vmatmul.mubr.msk.bf16.vlgmr.msra.gmra.mxu1 %vm251_vm1, %v2046_v8 }
0x1480   :  { %3522 = vmatpush3.bf16.xpose.msra.mxu1 %v2182_v9  ;;  %3525 = vmatprep.mubr.msk.bf16.mxu1 %vm251_vm1, %v2165_v11 }
0x1481   :  { %3628 = vmatprep.subr.msk.bf16.mxu1 %vm251_vm1, %v2169_v14 }
0x1488   :  { %3524 = vmatpush3.bf16.xpose.msra.mxu1 %v2179_v16 }
0x1489   :  { %3630 = vmatprep.subr.msk.bf16.mxu1 %vm251_vm1, %v2420_v17 }
0x148f   :  { %3526 = vmatmul.mubr.msk.bf16.vlgmr.msra.gmra.mxu1 %vm251_vm1, %v2167_v18 }
0x1490   :  { %3544 = vmatpush3.bf16.xpose.msra.mxu1 %v2431_v21  ;;  %3547 = vmatprep.mubr.msk.bf16.mxu1 %vm251_vm1, %v2414_v23 }
0x1491   :  { %3631 = vmatprep.subr.msk.bf16.mxu1 %vm251_vm1, %v2418_v24 }
0x1498   :  { %3546 = vmatpush3.bf16.xpose.msra.mxu1 %v2428_v28 }
0x149f   :  { %3548 = vmatmul.mubr.msk.bf16.vlgmr.msra.gmra.mxu1 %vm251_vm1, %v2416_v29 }
0x1537   :  { %v3519_v30 = vpop.f32.mrf.mxu0 }
0x1539   :  { %v2149_v32 = vpop.f32.mrf.mxu0 }
0x153b   :  { %v3520_v10 = vpop.f32.mrf.mxu0 }
0x153f   :  { %v3513_v33 = vpop.f32.mrf.mxu1 }
0x1540   :  { %v4499_v34 = vadd.f32 %v3519_v30, %v3513_v33 }
0x1541   :  { %v2091_v36 = vpop.f32.mrf.mxu1 }
0x1542   :  { %v4501_v37 = vadd.f32 %v2149_v32, %v2091_v36 }
0x1543   :  { %v3514_v38 = vpop.f32.mrf.mxu1 }
0x1544   :  { %v4503_v39 = vadd.f32 %v3520_v10, %v3514_v38 }
0x1545   :  { %v4505_v40 = vpop.f32.mrf.mxu1 }
0x154f   :  { %v3527_v20 = vpop.f32.mrf.mxu1 }
0x1550   :  { %v2235_v41 = vmul.f32 0.35355338, %v3527_v20 }
0x1551   :  { %v2218_v25 = vpop.f32.mrf.mxu1 }
0x1552   :  { %v2233_v42 = vmul.f32 0.35355338, %v2218_v25  ;;  %v2239_v19 = vadd.f32 %v4399_v47, %v2235_v41 }
0x1553   :  { %v3528_v26 = vpop.f32.mrf.mxu1 }
0x1554   :  { %v2237_v43 = vadd.f32 %v4392_v0, %v2233_v42  ;;  %v2236_v22 = vmul.f32 0.35355338, %v3528_v26  ;;  %v2247_v54 = vsel %vm104_vm0, %v2239_v19, -inf }
0x1555   :  { %v2221_v44 = vpop.f32.mrf.mxu1 }
0x1556   :  { %v2234_v50 = vmul.f32 0.35355338, %v2221_v44  ;;  %v2241_v51 = vsel %vm104_vm0, %v2237_v43, -inf  ;;  %v2240_v53 = vadd.f32 %v4413_v15, %v2236_v22 }
0x1557   :  { %2242 = vmax.xlane.f32.xlu0 %v2241_v51 }
0x1558   :  { %v2238_v52 = vadd.f32 %v4405_v48, %v2234_v50  ;;  %v2250_v56 = vsel %vm104_vm0, %v2240_v53, -inf }
0x155a   :  { %v2244_v55 = vsel %vm104_vm0, %v2238_v52, -inf }
0x155b   :  { %2248 = vmax.xlane.f32.xlu0 %v2247_v54  ;;  %2245 = vmax.xlane.f32.xlu1 %v2244_v55 }
0x155f   :  { %2251 = vmax.xlane.f32.xlu0 %v2250_v56  ;;  %v3549_v16 = vpop.f32.mrf.mxu1 }
0x1560   :  { %v2484_v24 = vmul.f32 0.35355338, %v3549_v16 }
0x1561   :  { %v2467_v17 = vpop.f32.mrf.mxu1 }
0x1562   :  { %v2482_v28 = vmul.f32 0.35355338, %v2467_v17  ;;  %v2488_v30 = vadd.f32 %v4399_v47, %v2484_v24  ;;  %v2152_v17 = vpop.f32.mrf.mxu0 }
0x1563   :  { %v3550_v18 = vpop.f32.mrf.mxu1 }
0x1564   :  { %v2486_v32 = vadd.f32 %v4392_v0, %v2482_v28  ;;  %v2485_v33 = vmul.f32 0.35355338, %v3550_v18  ;;  %v2496_v38 = vsel %vm104_vm0, %v2488_v30, -inf }
0x1565   :  { %v2470_v21 = vpop.f32.mrf.mxu1 }
0x1566   :  { %v2483_v23 = vmul.f32 0.35355338, %v2470_v21  ;;  %v2489_v10 = vadd.f32 %v4413_v15, %v2485_v33  ;;  %v2490_v20 = vsel %vm104_vm0, %v2486_v32, -inf }
0x1568   :  { %v2487_v29 = vadd.f32 %v4405_v48, %v2483_v23  ;;  %v2499_v25 = vsel %vm104_vm0, %v2489_v10, -inf }
0x156a   :  { %v2493_v36 = vsel %vm104_vm0, %v2487_v29, -inf }
0x15e0   :  { %v2243_v57 = vpop.xlane.xlu0 %2242 }
0x15e1   :  { %v2253_v58 = vsub.f32 %v2237_v43, %v2243_v57 }
0x15e3   :  { %v2257_v62 = vmul.f32 1.442695, %v2253_v58 }
0x15e4   :  { %v2249_v59 = vpop.xlane.xlu0 %2248  ;;  %v2246_v60 = vpop.xlane.xlu1 %2245 }
0x15e5   :  { %v2255_v61 = vsub.f32 %v2239_v19, %v2249_v59  ;;  %v2254_v1 = vsub.f32 %v2238_v52, %v2246_v60 }
0x15e7   :  { %v2261_v63 = vmul.f32 1.442695, %v2255_v61  ;;  %v2259_v45 = vmul.f32 1.442695, %v2254_v1 }
0x15e8   :  { %v2252_v2 = vpop.xlane.xlu0 %2251 }
0x15e9   :  { %3782 = vpow2.f32 %v2261_v63  ;;  %v2256_v3 = vsub.f32 %v2240_v53, %v2252_v2 }
0x15ea   :  { %3784 = vpow2.f32 %v2257_v62 }
0x15eb   :  { %v2263_v46 = vmul.f32 1.442695, %v2256_v3 }
0x15ed   :  { %3786 = vpow2.f32 %v2263_v46 }
0x15ee   :  { %3788 = vpow2.f32 %v2259_v45 }
0x15f6   :  { %v3783_v4 = vpop.eup %3782 }
0x15f7   :  { %v2271_v5 = vsel %vm104_vm0, %v3783_v4, 0.0  ;;  %v3785_v6 = vpop.eup %3784 }
0x15f8   :  { %2272 = vadd.xlane.f32.xlu0 %v2271_v5  ;;  %v2265_v8 = vsel %vm104_vm0, %v3785_v6, 0.0 }
0x15fa   :  { %v3787_v7 = vpop.eup %3786 }
0x15fb   :  { %v2274_v9 = vsel %vm104_vm0, %v3787_v7, 0.0  ;;  %v3789_v11 = vpop.eup %3788 }
0x15fc   :  { %2266 = vadd.xlane.f32.xlu0 %v2265_v8  ;;  %2275 = vadd.xlane.f32.xlu1 %v2274_v9  ;;  %v2268_v14 = vsel %vm104_vm0, %v3789_v11, 0.0 }
0x1600   :  { %2269 = vadd.xlane.f32.xlu1 %v2268_v14 }
0x1611   :  { %2287 = vrot.lane.b32.xlu1 %v4361_v49, %s4753_s5 }
0x1612   :  { %2289 = vrot.lane.b32.xlu0 %v4359_v31, %s4753_s5 }
0x1631   :  { %2494 = vmax.xlane.f32.xlu0 %v2493_v36 }
0x1635   :  { %2497 = vmax.xlane.f32.xlu0 %v2496_v38  ;;  %2491 = vmax.xlane.f32.xlu1 %v2490_v20 }
0x1639   :  { %2500 = vmax.xlane.f32.xlu1 %v2499_v25 }
0x1681   :  { %v2273_v48 = vpop.xlane.xlu0 %2272 }
0x1685   :  { %v2267_v41 = vpop.xlane.xlu0 %2266  ;;  %v2276_v47 = vpop.xlane.xlu1 %2275 }
0x1686   :  { %3790 = vrcp.f32 %v2276_v47 }
0x1687   :  { %3792 = vrcp.f32 %v2267_v41 }
0x1688   :  { %3794 = vrcp.f32 %v2273_v48 }
0x1689   :  { %v2290_v0 = vpop.permute.xlu0 %2289  ;;  %v2270_v42 = vpop.xlane.xlu1 %2269 }
0x168a   :  { %3796 = vrcp.f32 %v2270_v42  ;;  %3529 = vmatprep.subr.bf16.mxu0 %v2290_v0 }
0x168b   :  { %3530 = vmatpush3.bf16.msra.mxu0 %v2290_v0 }
0x168d   :  { %v2288_v15 = vpop.permute.xlu1 %2287 }
0x168e   :  { %3531 = vmatprep.subr.bf16.mxu0 %v2288_v15 }
0x168f   :  { %3532 = vmatpush3.bf16.msra.mxu0 %v2288_v15 }
0x1693   :  { %v3791_v26 = vpop.eup %3790 }
0x1694   :  { %v3793_v43 = vpop.eup %3792  ;;  %v2284_v22 = vmul.f32 %v3791_v26, %v3787_v7  ;;  %v3145_v26 = vld [vmem:[%s4712_s7 + $0x38] sm:$0xff] }
0x1695   :  { %v3795_v44 = vpop.eup %3794  ;;  %v2281_v50 = vmul.f32 %v3793_v43, %v3785_v6  ;;  %v2599_v43 = vpack.c.bf16 %v3145_v26, %v3145_v26 }
0x1696   :  { %v2283_v52 = vmul.f32 %v3795_v44, %v3783_v4 }
0x1697   :  { %v3797_v19 = vpop.eup %3796  ;;  %v2607_v44 = vsel %vm624_vm2, %v2599_v43, 0 }
0x1698   :  { %v2282_v51 = vmul.f32 %v3797_v19, %v3789_v11  ;;  %v2286_v54 = vpack.c.bf16 %v2284_v22, %v2283_v52  ;;  %v3144_v11 = vld [vmem:[%s4712_s7 + $0x30] sm:$0xff] }
0x1699   :  { %v2350_v14 = vpack.c.bf16 %v3144_v11, %v3144_v11 }
0x169a   :  { %v2285_v53 = vpack.c.bf16 %v2282_v51, %v2281_v50 }
0x169b   :  { %3629 = vmatprep.subr.msk.bf16.mxu0 %vm624_vm2, %v2350_v14  ;;  %v2358_v16 = vsel %vm624_vm2, %v2350_v14, 0 }
0x169c   :  { %3533 = vmatprep.mubr.msk.bf16.mxu0 %vm104_vm0, %v2285_v53  ;;  %v2153_v53 = vadd.f32 %v2152_v17, %v4505_v40 }
0x169d   :  { %3534 = vmatmul.mubr.msk.bf16.vlgmr.msra.gmra.mxu0 %vm104_vm0, %v2286_v54 }
0x169e   :  { %3538 = vmatpush3.bf16.msra.mxu0 %v2358_v16 }
0x16ba   :  { %v2495_v55 = vpop.xlane.xlu0 %2494 }
0x16bb   :  { %v2503_v60 = vsub.f32 %v2487_v29, %v2495_v55 }
0x16bd   :  { %v2508_v2 = vmul.f32 1.442695, %v2503_v60 }
0x16be   :  { %v2498_v56 = vpop.xlane.xlu0 %2497  ;;  %v2492_v57 = vpop.xlane.xlu1 %2491 }
0x16bf   :  { %v2504_v58 = vsub.f32 %v2488_v30, %v2498_v56  ;;  %v2502_v59 = vsub.f32 %v2486_v32, %v2492_v57 }
0x16c1   :  { %v2510_v61 = vmul.f32 1.442695, %v2504_v58  ;;  %v2506_v62 = vmul.f32 1.442695, %v2502_v59 }
0x16c2   :  { %v2501_v63 = vpop.xlane.xlu1 %2500 }
0x16c3   :  { %3798 = vpow2.f32 %v2510_v61  ;;  %v2505_v1 = vsub.f32 %v2489_v10, %v2501_v63 }
0x16c4   :  { %3800 = vpow2.f32 %v2506_v62 }
0x16c5   :  { %v2512_v3 = vmul.f32 1.442695, %v2505_v1 }
0x16c7   :  { %3802 = vpow2.f32 %v2512_v3  ;;  %v3200_v3 = vld [vmem:[%s4713_s8 + $0x1] ss:$0 sm:$0xff] }
0x16c8   :  { %3804 = vpow2.f32 %v2508_v2 }
0x16d0   :  { %v3799_v45 = vpop.eup %3798 }
0x16d1   :  { %v2520_v46 = vsel %vm104_vm0, %v3799_v45, 0.0  ;;  %v3801_v4 = vpop.eup %3800 }
0x16d2   :  { %2521 = vadd.xlane.f32.xlu0 %v2520_v46  ;;  %v2514_v6 = vsel %vm104_vm0, %v3801_v4, 0.0 }
0x16d4   :  { %v3803_v5 = vpop.eup %3802 }
0x16d5   :  { %v2523_v7 = vsel %vm104_vm0, %v3803_v5, 0.0  ;;  %v3805_v8 = vpop.eup %3804 }
0x16d6   :  { %2515 = vadd.xlane.f32.xlu0 %v2514_v6  ;;  %2524 = vadd.xlane.f32.xlu1 %v2523_v7  ;;  %v2517_v9 = vsel %vm104_vm0, %v3805_v8, 0.0 }
0x16da   :  { %2518 = vadd.xlane.f32.xlu1 %v2517_v9 }
0x16eb   :  { %2536 = vrot.lane.b32.xlu1 %v4361_v49, %s4754_s22 }
0x16ec   :  { %2538 = vrot.lane.b32.xlu0 %v4359_v31, %s4754_s22 }
0x175b   :  { %v2522_v18 = vpop.xlane.xlu0 %2521 }
0x175d   :  { %v3535_v21 = vpop.f32.mrf.mxu0 }
0x175f   :  { %v2333_v23 = vpop.f32.mrf.mxu0  ;;  %v2516_v24 = vpop.xlane.xlu0 %2515 }
0x1760   :  { %v2525_v28 = vpop.xlane.xlu1 %2524 }
0x1761   :  { %v3536_v29 = vpop.f32.mrf.mxu0  ;;  %3806 = vrcp.f32 %v2525_v28 }
0x1762   :  { %3808 = vrcp.f32 %v2516_v24  ;;  %v2349_v10 = vpack.c.bf16 %v3536_v29, %v3535_v21 }
0x1763   :  { %v2336_v30 = vpop.f32.mrf.mxu0  ;;  %v2539_v32 = vpop.permute.xlu0 %2538  ;;  %3810 = vrcp.f32 %v2522_v18 }
0x1764   :  { %v2348_v33 = vpack.c.bf16 %v2336_v30, %v2333_v23  ;;  %v2519_v36 = vpop.xlane.xlu1 %2518  ;;  %3551 = vmatprep.subr.bf16.mxu0 %v2539_v32 }
0x1765   :  { %3812 = vrcp.f32 %v2519_v36 }
0x1766   :  { %3539 = vmatprep.mubr.msk.bf16.mxu0 %vm251_vm1, %v2348_v33 }
0x1767   :  { %3540 = vmatmul.mubr.msk.bf16.vlgmr.msra.gmra.mxu0 %vm251_vm1, %v2349_v10 }
0x1768   :  { %3552 = vmatpush3.bf16.msra.mxu0 %v2539_v32  ;;  %v2537_v31 = vpop.permute.xlu1 %2536 }
0x1769   :  { %3553 = vmatprep.subr.bf16.mxu0 %v2537_v31 }
0x176c   :  { %3554 = vmatpush3.bf16.msra.mxu0 %v2537_v31 }
0x176d   :  { %3632 = vmatprep.subr.msk.bf16.mxu0 %vm624_vm2, %v2599_v43 }
0x176e   :  { %v3807_v49 = vpop.eup %3806 }
0x176f   :  { %v3809_v38 = vpop.eup %3808  ;;  %v2533_v48 = vmul.f32 %v3807_v49, %v3803_v5 }
0x1770   :  { %v3811_v20 = vpop.eup %3810  ;;  %v2530_v41 = vmul.f32 %v3809_v38, %v3801_v4 }
0x1771   :  { %v2532_v0 = vmul.f32 %v3811_v20, %v3799_v45 }
0x1772   :  { %v3813_v25 = vpop.eup %3812 }
0x1773   :  { %v2531_v47 = vmul.f32 %v3813_v25, %v3805_v8  ;;  %v2535_v15 = vpack.c.bf16 %v2533_v48, %v2532_v0 }
0x1775   :  { %v2534_v42 = vpack.c.bf16 %v2531_v47, %v2530_v41  ;;  %v3151_v41 = vld [vmem:[%s4714_s11 + $0x30] sm:$0xff]  ;;  %v3152_v47 = vld [vmem:[%s4714_s11 + $0x38] sm:$0xff] }
0x1776   :  { %v2751_v0 = vpack.c.bf16 %v3152_v47, %v3151_v41  ;;  %v3155_v41 = vld [vmem:[%s4717_s13 + $0x88] sm:$0xff] }
0x1777   :  { %3555 = vmatprep.mubr.msk.bf16.mxu0 %vm104_vm0, %v2534_v42  ;;  %v3149_v42 = vld [vmem:[%s4714_s11 + $0x20] sm:$0xff] }
0x1778   :  { %3556 = vmatmul.mubr.msk.bf16.vlgmr.msra.gmra.mxu0 %vm104_vm0, %v2535_v15  ;;  %3565 = vmatprep.subr.bf16.mxu1 %v2751_v0  ;;  %v3150_v15 = vld [vmem:[%s4714_s11 + $0x28] sm:$0xff] }
0x1779   :  { %3560 = vmatpush3.bf16.msra.mxu0 %v2607_v44  ;;  %3566 = vmatpush3.bf16.msra.mxu1 %v2751_v0  ;;  %v2750_v26 = vpack.c.bf16 %v3150_v15, %v3149_v42  ;;  %v3203_v0 = vld [vmem:[%s4718_s12 + $0x1] ss:$0 sm:$0xff] }
0x177b   :  { %3567 = vmatprep.subr.bf16.mxu1 %v2750_v26 }
0x177d   :  { %3568 = vmatpush3.bf16.msra.mxu1 %v2750_v26 }
0x1827   :  { %v3541_v19 = vpop.f32.mrf.mxu0 }
0x1828   :  { %v2411_v22 = vadd.f32 %v3541_v19, %v4499_v34 }
0x1829   :  { %v2394_v50 = vpop.f32.mrf.mxu0 }
0x182a   :  { %v2409_v51 = vadd.f32 %v2394_v50, %v4501_v37 }
0x182b   :  { %v3542_v52 = vpop.f32.mrf.mxu0 }
0x182c   :  { %v2412_v54 = vadd.f32 %v3542_v52, %v4503_v39 }
0x182d   :  { %v2397_v55 = vpop.f32.mrf.mxu0 }
0x182e   :  { %v2410_v56 = vadd.f32 %v2397_v55, %v2153_v53 }
0x1838   :  { %v3557_v57 = vpop.f32.mrf.mxu0 }
0x183a   :  { %v2582_v58 = vpop.f32.mrf.mxu0 }
0x183c   :  { %v3558_v59 = vpop.f32.mrf.mxu0 }
0x183d   :  { %v2598_v62 = vpack.c.bf16 %v3558_v59, %v3557_v57 }
0x183e   :  { %v2585_v60 = vpop.f32.mrf.mxu0 }
0x183f   :  { %v2597_v61 = vpack.c.bf16 %v2585_v60, %v2582_v58  ;;  %v3201_v60 = vld [vmem:[%s4715_s9 + $0x1] ss:$0 sm:$0xff] }
0x1841   :  { %3561 = vmatprep.mubr.msk.bf16.mxu0 %vm251_vm1, %v2597_v61 }
0x1842   :  { %3562 = vmatmul.mubr.msk.bf16.vlgmr.msra.gmra.mxu0 %vm251_vm1, %v2598_v62 }
0x1902   :  { %v3563_v34 = vpop.f32.mrf.mxu0 }
0x1903   :  { %v2660_v2 = vadd.f32 %v3563_v34, %v2411_v22 }
0x1904   :  { %v2643_v63 = vpop.f32.mrf.mxu0 }
0x1905   :  { %v2658_v37 = vadd.f32 %v2643_v63, %v2409_v51  ;;  %v2664_v6 = vadd.f32 %v2660_v2, %v4312_v12  ;;  %v3202_v63 = vld [vmem:[%s4716_s10 + $0x1] ss:$0 sm:$0xff] }
0x1906   :  { %v3564_v1 = vpop.f32.mrf.mxu0 }
0x1907   :  { %v2662_v40 = vadd.f32 %v2658_v37, %v4310_v35  ;;  %v2661_v39 = vadd.f32 %v3564_v1, %v2412_v54  ;;  %v4576_v11 = vadd.f32 %v3200_v3, %v2664_v6 }
0x1908   :  { %v2646_v45 = vpop.f32.mrf.mxu0 }
0x1909   :  { %v4565_v46 = vadd.f32 %v3200_v3, %v2662_v40  ;;  %v2665_v4 = vadd.f32 %v2661_v39, %v4320_v13  ;;  %v2659_v5 = vadd.f32 %v2646_v45, %v2410_v56  ;;  %v2682_v12 = vsel %vm104_vm0, %v4576_v11, 0.0 }
0x190b   :  { %v4569_v7 = vadd.f32 %v3200_v3, %v2665_v4  ;;  %v2663_v8 = vadd.f32 %v2659_v5, %v4318_v27  ;;  %v2676_v35 = vsel %vm104_vm0, %v4565_v46, 0.0 }
0x190c   :  { %2677 = vadd.xlane.f32.xlu1 %v2676_v35 }
0x190d   :  { %v4574_v9 = vadd.f32 %v3200_v3, %v2663_v8  ;;  %v2685_v14 = vsel %vm104_vm0, %v4569_v7, 0.0 }
0x190f   :  { %v2679_v13 = vsel %vm104_vm0, %v4574_v9, 0.0 }
0x1910   :  { %2686 = vadd.xlane.f32.xlu1 %v2685_v14  ;;  %2680 = vadd.xlane.f32.xlu0 %v2679_v13  ;;  %v3168_v13 = vld [vmem:[%s4717_s13 + $0xf0] sm:$0xff] }
0x1914   :  { %2683 = vadd.xlane.f32.xlu0 %v2682_v12  ;;  %v3169_v12 = vld [vmem:[%s4717_s13 + $0xf8] sm:$0xff] }
0x1995   :  { %v2678_v27 = vpop.xlane.xlu1 %2677 }
0x1996   :  { %v2688_v16 = vmul.f32 0.03125, %v2678_v27  ;;  %v2854_v27 = vpack.c.bf16 %v3169_v12, %v3168_v13 }
0x1998   :  { %v2692_v17 = vsub.f32 %v4565_v46, %v2688_v16  ;;  %3573 = vmatprep.subr.bf16.mxu0 %v2854_v27  ;;  %v3166_v16 = vld [vmem:[%s4717_s13 + $0xe0] sm:$0xff] }
0x1999   :  { %v2687_v18 = vpop.xlane.xlu1 %2686  ;;  %v2681_v21 = vpop.xlane.xlu0 %2680  ;;  %3574 = vmatpush3.bf16.msra.mxu0 %v2854_v27 }
0x199a   :  { %v2691_v23 = vmul.f32 0.03125, %v2687_v18  ;;  %v2689_v24 = vmul.f32 0.03125, %v2681_v21  ;;  %v2696_v28 = vmul.f32 %v2692_v17, %v2692_v17  ;;  %v3164_v21 = vld [vmem:[%s4717_s13 + $0xd0] sm:$0xff] }
0x199c   :  { %v2695_v29 = vsub.f32 %v4569_v7, %v2691_v23  ;;  %v2693_v30 = vsub.f32 %v4574_v9, %v2689_v24  ;;  %v2700_v32 = vsel %vm104_vm0, %v2696_v28, 0.0  ;;  %v3165_v23 = vld [vmem:[%s4717_s13 + $0xd8] sm:$0xff]  ;;  %v3162_v28 = vld [vmem:[%s4717_s13 + $0xc0] sm:$0xff] }
0x199d   :  { %2701 = vadd.xlane.f32.xlu0 %v2700_v32  ;;  %v2684_v33 = vpop.xlane.xlu0 %2683  ;;  %v2852_v24 = vpack.c.bf16 %v3165_v23, %v3164_v21  ;;  %v3160_v32 = vld [vmem:[%s4717_s13 + $0xb0] sm:$0xff] }
0x199e   :  { %v2690_v36 = vmul.f32 0.03125, %v2684_v33  ;;  %v2697_v10 = vmul.f32 %v2693_v30, %v2693_v30  ;;  %v2699_v38 = vmul.f32 %v2695_v29, %v2695_v29  ;;  %v3161_v33 = vld [vmem:[%s4717_s13 + $0xb8] sm:$0xff] }
0x19a0   :  { %v2694_v31 = vsub.f32 %v4576_v11, %v2690_v36  ;;  %v2703_v49 = vsel %vm104_vm0, %v2697_v10, 0.0  ;;  %v2709_v25 = vsel %vm104_vm0, %v2699_v38, 0.0  ;;  %v2850_v36 = vpack.c.bf16 %v3161_v33, %v3160_v32  ;;  %v3158_v10 = vld [vmem:[%s4717_s13 + $0xa0] sm:$0xff]  ;;  %v3156_v38 = vld [vmem:[%s4717_s13 + $0x90] sm:$0xff] }
0x19a1   :  { %2704 = vadd.xlane.f32.xlu1 %v2703_v49 }
0x19a2   :  { %v2698_v20 = vmul.f32 %v2694_v31, %v2694_v31 }
0x19a4   :  { %v2706_v48 = vsel %vm104_vm0, %v2698_v20, 0.0  ;;  %v3157_v20 = vld [vmem:[%s4717_s13 + $0x98] sm:$0xff] }
0x19a5   :  { %2710 = vadd.xlane.f32.xlu1 %v2709_v25  ;;  %2707 = vadd.xlane.f32.xlu0 %v2706_v48  ;;  %v2848_v25 = vpack.c.bf16 %v3157_v20, %v3156_v38  ;;  %v3154_v48 = vld [vmem:[%s4717_s13 + $0x80] sm:$0xff] }
0x19a6   :  { %v2847_v47 = vpack.c.bf16 %v3155_v41, %v3154_v48 }
0x1a26   :  { %v2702_v43 = vpop.xlane.xlu0 %2701 }
0x1a27   :  { %v2712_v44 = vmul.f32 0.03125, %v2702_v43 }
0x1a29   :  { %v2716_v19 = vadd.f32 1e-05, %v2712_v44 }
0x1a2a   :  { %v2705_v22 = vpop.xlane.xlu1 %2704 }
0x1a2b   :  { %3814 = vrsqrt.f32 %v2716_v19  ;;  %v2713_v50 = vmul.f32 0.03125, %v2705_v22 }
0x1a2d   :  { %v2717_v51 = vadd.f32 1e-05, %v2713_v50 }
0x1a2e   :  { %v2711_v52 = vpop.xlane.xlu1 %2710  ;;  %v2708_v53 = vpop.xlane.xlu0 %2707 }
0x1a2f   :  { %3816 = vrsqrt.f32 %v2717_v51  ;;  %v2715_v54 = vmul.f32 0.03125, %v2711_v52  ;;  %v2714_v55 = vmul.f32 0.03125, %v2708_v53 }
0x1a31   :  { %v2719_v56 = vadd.f32 1e-05, %v2715_v54  ;;  %v2718_v57 = vadd.f32 1e-05, %v2714_v55 }
0x1a33   :  { %3818 = vrsqrt.f32 %v2719_v56 }
0x1a34   :  { %3820 = vrsqrt.f32 %v2718_v57 }
0x1a38   :  { %v3815_v58 = vpop.eup %3814 }
0x1a39   :  { %v2724_v59 = vmul.f32 %v3815_v58, %v2692_v17  ;;  %v3167_v17 = vld [vmem:[%s4717_s13 + $0xe8] sm:$0xff] }
0x1a3a   :  { %v2853_v18 = vpack.c.bf16 %v3167_v17, %v3166_v16 }
0x1a3b   :  { %v2734_v34 = vmul.f32 %v3201_v60, %v2724_v59 }
0x1a3c   :  { %v3817_v61 = vpop.eup %3816  ;;  %3575 = vmatprep.subr.bf16.mxu0 %v2853_v18 }
0x1a3d   :  { %v2725_v62 = vmul.f32 %v3817_v61, %v2693_v30  ;;  %v2744_v39 = vadd.f32 %v3202_v63, %v2734_v34  ;;  %3576 = vmatpush3.bf16.msra.mxu0 %v2853_v18 }
0x1a3e   :  { %3577 = vmatprep.subr.bf16.mxu0 %v2852_v24 }
0x1a3f   :  { %v2735_v37 = vmul.f32 %v3201_v60, %v2725_v62 }
0x1a40   :  { %v3819_v1 = vpop.eup %3818 }
0x1a41   :  { %v3821_v2 = vpop.eup %3820  ;;  %v2727_v40 = vmul.f32 %v3819_v1, %v2695_v29  ;;  %v2745_v3 = vadd.f32 %v3202_v63, %v2735_v37  ;;  %3578 = vmatpush3.bf16.msra.mxu0 %v2852_v24  ;;  %v3163_v29 = vld [vmem:[%s4717_s13 + $0xc8] sm:$0xff] }
0x1a42   :  { %v2726_v45 = vmul.f32 %v3821_v2, %v2694_v31  ;;  %v2851_v30 = vpack.c.bf16 %v3163_v29, %v3162_v28  ;;  %v3159_v31 = vld [vmem:[%s4717_s13 + $0xa8] sm:$0xff] }
0x1a43   :  { %v2748_v4 = vpack.c.bf16 %v2745_v3, %v2744_v39  ;;  %v2737_v5 = vmul.f32 %v3201_v60, %v2727_v40  ;;  %v2849_v49 = vpack.c.bf16 %v3159_v31, %v3158_v10 }
0x1a44   :  { %v2736_v6 = vmul.f32 %v3201_v60, %v2726_v45  ;;  %3579 = vmatprep.subr.bf16.mxu0 %v2851_v30 }
0x1a45   :  { %3569 = vmatprep.mubr.msk.bf16.mxu1 %vm104_vm0, %v2748_v4  ;;  %v2747_v8 = vadd.f32 %v3202_v63, %v2737_v5  ;;  %3580 = vmatpush3.bf16.msra.mxu0 %v2851_v30 }
0x1a46   :  { %v2746_v35 = vadd.f32 %v3202_v63, %v2736_v6  ;;  %3581 = vmatprep.subr.bf16.mxu0 %v2850_v36 }
0x1a48   :  { %v2749_v14 = vpack.c.bf16 %v2747_v8, %v2746_v35 }
0x1a49   :  { %3582 = vmatpush3.bf16.msra.mxu0 %v2850_v36 }
0x1a4a   :  { %3570 = vmatmul.mubr.msk.bf16.vlgmr.msra.gmra.mxu1 %vm104_vm0, %v2749_v14  ;;  %3583 = vmatprep.subr.bf16.mxu0 %v2849_v49  ;;  %v3210_v14 = vld [vmem:[%s4719_s14 + $0x1] ss:$0 sm:$0xff] }
0x1a4d   :  { %3584 = vmatpush3.bf16.msra.mxu0 %v2849_v49 }
0x1a4e   :  { %3585 = vmatprep.subr.bf16.mxu0 %v2848_v25 }
0x1a51   :  { %3586 = vmatpush3.bf16.msra.mxu0 %v2848_v25 }
0x1a52   :  { %3587 = vmatprep.subr.bf16.mxu0 %v2847_v47 }
0x1a55   :  { %3588 = vmatpush3.bf16.msra.mxu0 %v2847_v47 }
0x1b0a   :  { %v3571_v42 = vpop.f32.mrf.mxu1 }
0x1b0b   :  { %v2807_v15 = vadd.f32 %v3571_v42, %v3203_v0 }
0x1b0c   :  { %v2798_v26 = vpop.f32.mrf.mxu1 }
0x1b0d   :  { %v3208_v43 = vmul.f32 -1.702, %v2807_v15  ;;  %v2799_v44 = vadd.f32 %v3203_v0, %v2798_v26 }
0x1b0e   :  { %v3572_v19 = vpop.f32.mrf.mxu1 }
0x1b0f   :  { %v2825_v22 = vmul.f32 1.442695, %v3208_v43  ;;  %v3206_v50 = vmul.f32 -1.702, %v2799_v44  ;;  %v2810_v51 = vadd.f32 %v3572_v19, %v3203_v0 }
0x1b10   :  { %v2801_v52 = vpop.f32.mrf.mxu1 }
0x1b11   :  { %v2821_v53 = vmul.f32 1.442695, %v3206_v50  ;;  %v3209_v54 = vmul.f32 -1.702, %v2810_v51  ;;  %v2802_v55 = vadd.f32 %v3203_v0, %v2801_v52  ;;  %3822 = vpow2.f32 %v2825_v22 }
0x1b12   :  { %v3865_v50 = vmov 0.0  }
0x1b13   :  { %3824 = vpow2.f32 %v2821_v53  ;;  %v2827_v56 = vmul.f32 1.442695, %v3209_v54  ;;  %v3207_v57 = vmul.f32 -1.702, %v2802_v55  ;;  %3593 = vmatprep.subr.bf16.mxu1 %v3865_v50  ;;  %3597 = vmatprep.mubr.msk.bf16.mxu1 %vm3866_vm3, %v3865_v50 }
0x1b15   :  { %3826 = vpow2.f32 %v2827_v56  ;;  %v2823_v58 = vmul.f32 1.442695, %v3207_v57 }
0x1b17   :  { %3828 = vpow2.f32 %v2823_v58 }
0x1b1e   :  { %v3823_v59 = vpop.eup %3822 }
0x1b1f   :  { %v2831_v34 = vadd.f32 1.0, %v3823_v59 }
0x1b20   :  { %v3825_v60 = vpop.eup %3824 }
0x1b21   :  { %v2829_v61 = vadd.f32 1.0, %v3825_v60 }
0x1b22   :  { %v3827_v62 = vpop.eup %3826 }
0x1b23   :  { %v2832_v63 = vadd.f32 1.0, %v3827_v62  ;;  %3830 = vrcp.f32 %v2829_v61 }
0x1b24   :  { %v3829_v37 = vpop.eup %3828 }
0x1b25   :  { %3832 = vrcp.f32 %v2832_v63  ;;  %v2830_v1 = vadd.f32 1.0, %v3829_v37  ;;  %v3211_v37 = vld [vmem:[%s4720_s15] ss:$0 sm:$0xff] }
0x1b26   :  { %3834 = vrcp.f32 %v2831_v34 }
0x1b27   :  { %3836 = vrcp.f32 %v2830_v1 }
0x1b30   :  { %v3831_v2 = vpop.eup %3830 }
0x1b31   :  { %v2841_v4 = vmul.f32 %v3831_v2, %v2799_v44 }
0x1b32   :  { %v3833_v40 = vpop.eup %3832 }
0x1b33   :  { %v3835_v39 = vpop.eup %3834  ;;  %v2844_v45 = vmul.f32 %v3833_v40, %v2810_v51 }
0x1b34   :  { %v3837_v3 = vpop.eup %3836  ;;  %v2843_v6 = vmul.f32 %v3835_v39, %v2807_v15 }
0x1b35   :  { %v2842_v5 = vmul.f32 %v3837_v3, %v2802_v55 }
0x1b36   :  { %v2846_v35 = vpack.c.bf16 %v2844_v45, %v2843_v6  ;;  %v3212_v45 = vld [vmem:[%s4721_s16] ss:$0 sm:$0xff] }
0x1b37   :  { %v2845_v8 = vpack.c.bf16 %v2842_v5, %v2841_v4 }
0x1b39   :  { %3589 = vmatprep.mubr.bf16.mxu0 %v2845_v8 }
0x1b3a   :  { %3590 = vmatmul.mubr.bf16.vlgmr.msra.gmra.mxu0 %v2846_v35 }
0x1bfa   :  { %v3591_v13 = vpop.f32.mrf.mxu0 }
0x1bfb   :  { %v2906_v12 = vadd.f32 %v3591_v13, %v4576_v11 }
0x1bfc   :  { %v2889_v27 = vpop.f32.mrf.mxu0 }
0x1bfd   :  { %v2916_v16 = vadd.f32 %v3210_v14, %v2906_v12  ;;  %v2904_v17 = vadd.f32 %v2889_v27, %v4565_v46 }
0x1bfe   :  { %v3592_v18 = vpop.f32.mrf.mxu0 }
0x1bff   :  { %v2914_v21 = vadd.f32 %v3210_v14, %v2904_v17  ;;  %v2907_v23 = vadd.f32 %v3592_v18, %v4569_v7  ;;  %v2926_v24 = vsel %vm104_vm0, %v2916_v16, 0.0  ;;  %v2992_v17 = vld [vmem:[%s4722_s2] sm:$0xf] }
0x1c00   :  { %2927 = vadd.xlane.f32.xlu0 %v2926_v24  ;;  %v2892_v28 = vpop.f32.mrf.mxu0  ;;  %v2993_v24 = vpack.c.bf16 %v2992_v17, %v2992_v17 }
0x1c01   :  { %v2917_v29 = vadd.f32 %v3210_v14, %v2907_v23  ;;  %v2905_v30 = vadd.f32 %v2892_v28, %v4574_v9  ;;  %v2920_v33 = vsel %vm104_vm0, %v2914_v21, 0.0  ;;  %v3042_v23 = vld [vmem:[%s4723_s17 + $0x18] sm:$0xff] }
0x1c03   :  { %v2915_v32 = vadd.f32 %v3210_v14, %v2905_v30  ;;  %v2929_v11 = vsel %vm104_vm0, %v2917_v29, 0.0  ;;  %v3040_v30 = vld [vmem:[%s4723_s17 + $0x8] sm:$0xff] }
0x1c04   :  { %2921 = vadd.xlane.f32.xlu0 %v2920_v33  ;;  %2930 = vadd.xlane.f32.xlu1 %v2929_v11 }
0x1c05   :  { %v2923_v46 = vsel %vm104_vm0, %v2915_v32, 0.0 }
0x1c08   :  { %2924 = vadd.xlane.f32.xlu1 %v2923_v46 }
0x1c89   :  { %v2928_v36 = vpop.xlane.xlu0 %2927 }
0x1c8a   :  { %v2934_v10 = vmul.f32 0.03125, %v2928_v36 }
0x1c8c   :  { %v2938_v7 = vsub.f32 %v2916_v16, %v2934_v10 }
0x1c8d   :  { %v2922_v31 = vpop.xlane.xlu0 %2921  ;;  %v2931_v49 = vpop.xlane.xlu1 %2930 }
0x1c8e   :  { %v2932_v38 = vmul.f32 0.03125, %v2922_v31  ;;  %v2935_v20 = vmul.f32 0.03125, %v2931_v49  ;;  %v2942_v25 = vmul.f32 %v2938_v7, %v2938_v7 }
0x1c90   :  { %v2936_v48 = vsub.f32 %v2914_v21, %v2932_v38  ;;  %v2939_v9 = vsub.f32 %v2917_v29, %v2935_v20  ;;  %v2950_v41 = vsel %vm104_vm0, %v2942_v25, 0.0  ;;  %v3041_v21 = vld [vmem:[%s4723_s17 + $0x10] sm:$0xff]  ;;  %v3039_v29 = vld [vmem:[%s4723_s17] sm:$0xff] }
0x1c91   :  { %2951 = vadd.xlane.f32.xlu0 %v2950_v41  ;;  %v2925_v47 = vpop.xlane.xlu1 %2924  ;;  %v3045_v28 = vpack.c.bf16 %v3042_v23, %v3041_v21 }
0x1c92   :  { %v2933_v0 = vmul.f32 0.03125, %v2925_v47  ;;  %v2940_v42 = vmul.f32 %v2936_v48, %v2936_v48  ;;  %v2943_v15 = vmul.f32 %v2939_v9, %v2939_v9 }
0x1c94   :  { %v2937_v26 = vsub.f32 %v2915_v32, %v2933_v0  ;;  %v2944_v43 = vsel %vm104_vm0, %v2940_v42, 0.0  ;;  %v2953_v44 = vsel %vm104_vm0, %v2943_v15, 0.0  ;;  %v3044_v32 = vpack.c.bf16 %v3040_v30, %v3039_v29 }
0x1c95   :  { %2945 = vadd.xlane.f32.xlu0 %v2944_v43  ;;  %2954 = vadd.xlane.f32.xlu1 %v2953_v44 }
0x1c96   :  { %v2941_v19 = vmul.f32 %v2937_v26, %v2937_v26 }
0x1c98   :  { %v2947_v22 = vsel %vm104_vm0, %v2941_v19, 0.0 }
0x1c99   :  { %2948 = vadd.xlane.f32.xlu1 %v2947_v22 }
0x1d1a   :  { %v2952_v51 = vpop.xlane.xlu0 %2951 }
0x1d1b   :  { %v2958_v52 = vmul.f32 0.03125, %v2952_v51 }
0x1d1d   :  { %v2962_v53 = vadd.f32 1e-05, %v2958_v52 }
0x1d1e   :  { %v2946_v54 = vpop.xlane.xlu0 %2945  ;;  %v2955_v55 = vpop.xlane.xlu1 %2954 }
0x1d1f   :  { %3838 = vrsqrt.f32 %v2962_v53  ;;  %v2956_v56 = vmul.f32 0.03125, %v2946_v54  ;;  %v2959_v57 = vmul.f32 0.03125, %v2955_v55 }
0x1d21   :  { %v2960_v58 = vadd.f32 1e-05, %v2956_v56  ;;  %v2963_v59 = vadd.f32 1e-05, %v2959_v57 }
0x1d22   :  { %v2949_v60 = vpop.xlane.xlu1 %2948 }
0x1d23   :  { %3840 = vrsqrt.f32 %v2960_v58  ;;  %v2957_v61 = vmul.f32 0.03125, %v2949_v60 }
0x1d24   :  { %3842 = vrsqrt.f32 %v2963_v59 }
0x1d25   :  { %v2961_v62 = vadd.f32 1e-05, %v2957_v61 }
0x1d27   :  { %3844 = vrsqrt.f32 %v2961_v62 }
0x1d2c   :  { %v3839_v34 = vpop.eup %3838 }
0x1d2d   :  { %v2970_v63 = vmul.f32 %v3839_v34, %v2938_v7 }
0x1d2f   :  { %v2980_v3 = vmul.f32 %v3211_v37, %v2970_v63 }
0x1d30   :  { %v3841_v1 = vpop.eup %3840 }
0x1d31   :  { %v3843_v2 = vpop.eup %3842  ;;  %v2968_v40 = vmul.f32 %v3841_v1, %v2936_v48  ;;  %v2990_v35 = vadd.f32 %v3212_v45, %v2980_v3 }
0x1d32   :  { %v2971_v39 = vmul.f32 %v3843_v2, %v2939_v9 }
0x1d33   :  { %v2978_v8 = vmul.f32 %v3211_v37, %v2968_v40 }
0x1d34   :  { %v3845_v4 = vpop.eup %3844  ;;  %v2981_v5 = vmul.f32 %v3211_v37, %v2971_v39 }
0x1d35   :  { %v2969_v6 = vmul.f32 %v3845_v4, %v2937_v26  ;;  %v2988_v27 = vadd.f32 %v3212_v45, %v2978_v8 }
0x1d36   :  { %v2991_v14 = vadd.f32 %v3212_v45, %v2981_v5 }
0x1d37   :  { %v2979_v13 = vmul.f32 %v3211_v37, %v2969_v6 }
0x1d38   :  { %v2995_v12 = vpack.c.bf16 %v2991_v14, %v2990_v35 }
0x1d39   :  { %v2989_v16 = vadd.f32 %v3212_v45, %v2979_v13 }
0x1d3a   :  { %3594 = vmatpush3.bf16.msra.mxu1 %v2995_v12 }
0x1d3b   :  { %3595 = vmatprep.subr.bf16.mxu1 %v3865_v50  ;;  %v2994_v18 = vpack.c.bf16 %v2989_v16, %v2988_v27 }
0x1d3e   :  { %3596 = vmatpush3.bf16.msra.mxu1 %v2994_v18 }
0x1d3f   :  { %3601 = vmatprep.subr.bf16.mxu1 %v3865_v50 }
0x1d41   :  { %3598 = vmatmul.mubr.msk.bf16.vlgmr.msra.gmra.mxu1 %vm104_vm0, %v2993_v24 }
0x1d42   :  { %3602 = vmatpush3.bf16.msra.mxu1 %v3045_v28  ;;  %3605 = vmatprep.mubr.msk.bf16.mxu1 %vm3866_vm3, %v3865_v50 }
0x1d43   :  { %3603 = vmatprep.subr.bf16.mxu1 %v3865_v50 }
0x1d46   :  { %3604 = vmatpush3.bf16.msra.mxu1 %v3044_v32 }
0x1e01   :  { %v3033_v33 = vpop.f32.mrf.mxu1 }
0x1e02   :  { %v3043_v11 = vpack.c.bf16 %v3033_v33, %v3033_v33 }
0x1e03   :  { %v3599_v46 = vpop.f32.mrf.mxu1 }
0x1e04   :  { %3606 = vmatmul.mubr.msk.bf16.vlgmr.msra.gmra.mxu1 %vm104_vm0, %v3043_v11 }
0x1e05   :  { %v3036_v36 = vpop.f32.mrf.mxu1 }
0x1e07   :  { %v3600_v10 = vpop.f32.mrf.mxu1 }
0x1ec4   :  { %v3083_v7 = vpop.f32.mrf.mxu1 }
0x1ec5   :  { %3090 = vst.msk [vmem:[%s4724_s18] sm:$0xf] %vm3089_vm4, %v3083_v7 }
0x1ec6   :  { %v3607_v31 = vpop.f32.mrf.mxu1 }
0x1ec8   :  { %v3086_v49 = vpop.f32.mrf.mxu1 }
0x1eca   :  { %v3608_v38 = vpop.f32.mrf.mxu1 }

// kernel: custom_clip_teacher_forward.4
= control target key start
LH: loop header
LB: loop body
LE: loop exit
PB: predicated region body
PF: predicated region fallthrough
CT: control target
= control target key end

     0   :  { %v2984_v0 = vmov 0   ;;  %vm115_vm0 = vcmask 523264   ;;  %v2985_v41 = vmov 0.0   ;;  %vm2986_vm1 = vmmov 0   ;;  %s2988_s30 = smov 88   ;;  %s2989_s25 = smov 120   ;;  %s3849_s1 = inlined_call_operand.vmem [shape: f32[192,32], index: 1, kind: input, shape index: {}]   ;;  %s3850_s0 = inlined_call_operand.vmem [shape: f32[8,192], index: 0, kind: input, shape index: {}]   ;;  %s3851_s3 = inlined_call_operand.vmem [shape: f32[10,8], index: 3, kind: input, shape index: {}]   ;;  %s3852_s2 = inlined_call_operand.vmem [shape: f32[10,32], index: 2, kind: input, shape index: {}]   ;;  %s3853_s5 = inlined_call_operand.vmem [shape: f32[1,32], index: 5, kind: input, shape index: {}]   ;;  %s3854_s6 = inlined_call_operand.vmem [shape: f32[1,32], index: 6, kind: input, shape index: {}]   ;;  %s3855_s9 = inlined_call_operand.vmem [shape: f32[2,32,96], index: 9, kind: input, shape index: {}]   ;;  %s3856_s7 = inlined_call_operand.vmem [shape: f32[2,1,32], index: 7, kind: input, shape index: {}]   ;;  %s3857_s8 = inlined_call_operand.vmem [shape: f32[2,1,32], index: 8, kind: input, shape index: {}]   ;;  %s3858_s10 = inlined_call_operand.vmem [shape: f32[2,1,96], index: 10, kind: input, shape index: {}]   ;;  %s3859_s4 = inlined_call_operand.vmem [shape: f32[10,10], index: 4, kind: input, shape index: {}]   ;;  %s3860_s11 = inlined_call_operand.vmem [shape: f32[2,32,32], index: 11, kind: input, shape index: {}]   ;;  %s3861_s12 = inlined_call_operand.vmem [shape: f32[2,1,32], index: 12, kind: input, shape index: {}]   ;;  %s3862_s15 = inlined_call_operand.vmem [shape: f32[2,32,128], index: 15, kind: input, shape index: {}]   ;;  %s3863_s13 = inlined_call_operand.vmem [shape: f32[2,1,32], index: 13, kind: input, shape index: {}]   ;;  %s3864_s14 = inlined_call_operand.vmem [shape: f32[2,1,32], index: 14, kind: input, shape index: {}]   ;;  %s3865_s17 = inlined_call_operand.vmem [shape: f32[2,128,32], index: 17, kind: input, shape index: {}]   ;;  %s3866_s16 = inlined_call_operand.vmem [shape: f32[2,1,128], index: 16, kind: input, shape index: {}]   ;;  %s3867_s18 = inlined_call_operand.vmem [shape: f32[2,1,32], index: 18, kind: input, shape index: {}]   ;;  %s3868_s21 = inlined_call_operand.vmem [shape: f32[2,10], index: 21, kind: input, shape index: {}]   ;;  %s3869_s22 = inlined_call_operand.vmem [shape: f32[32,32], index: 22, kind: input, shape index: {}]   ;;  %s3870_s19 = inlined_call_operand.vmem [shape: f32[1,32], index: 19, kind: input, shape index: {}]   ;;  %s3871_s20 = inlined_call_operand.vmem [shape: f32[1,32], index: 20, kind: input, shape index: {}]   ;;  %s3872_s23 = inlined_call_operand.vmem [shape: f32[2,32], index: 23, kind: output, shape index: {}]  }
   0x1   :  { %3885 = sst [smem:[#allocation2_spill]] %s3849_s1  ;;  %119 = vmatprep.subr.bf16.mxu0 %v2984_v0  ;;  %2630 = vmatprep.subr.bf16.mxu1 %v2985_v41  ;;  %vm169_vm2 = vcmask 1043456   ;;  %vm165_vm3 = vcmask 64512   ;;  %vm218_vm4 = vcmask 261120   ;;  %vm222_vm5 = vcmask 254976   ;;  %s2990_s27 = smov 64  }
   0x2   :  { %3886 = sst [smem:[#allocation3_spill]] %s3850_s0  ;;  %2632 = vmatprep.mubr.msk.bf16.mxu1 %vm2986_vm1, %v2985_v41  ;;  %vm451_vm6 = vcmask 80896   ;;  %vm455_vm7 = vcmask 74752   ;;  %vm481_vm8 = vcmask 1044480   ;;  %s3884_s29 = smov 112  }
   0x3   :  { %3887 = sst [smem:[#allocation4_spill]] %s3851_s3  ;;  %s3880_s3 = smov 48  }
   0x4   :  { %3888 = sst [smem:[#allocation5_spill]] %s3852_s2  ;;  %s3883_s2 = smov 56  }
   0x5   :  { %3889 = sst [smem:[#allocation6_spill]] %s3853_s5 }
   0x6   :  { %3890 = sst [smem:[#allocation7_spill]] %s3854_s6  ;;  %s3904_s6 = smov 104  }
   0x7   :  { %3891 = sst [smem:[#allocation8_spill]] %s3855_s9  ;;  %s3881_s9 = smov 104  }
   0x8   :  { %3892 = sst [smem:[#allocation9_spill]] %s3856_s7  ;;  %s2991_s7 = smov 80  }
   0x9   :  { %s3893_s24 = sld [smem:[#allocation2_spill]] }
   0xa   :  { %s3894_s0 = sld [smem:[#allocation3_spill]] }
   0xb   :  { %s3895_s1 = sld [smem:[#allocation4_spill]] }
   0xc   :  { %s3896_s26 = sld [smem:[#allocation5_spill]] }
   0xd   :  { %s3897_s28 = sld [smem:[#allocation6_spill]] }
   0xe   :  { %s3899_s5 = sld [smem:[#allocation8_spill]] }
   0xf   :  { %v91_v1 = vld [vmem:[%s3893_s24 + $0x70] sm:$0xff]  ;;  %v92_v2 = vld [vmem:[%s3893_s24 + $0x78] sm:$0xff]  ;;  %v89_v3 = vld [vmem:[%s3893_s24 + $0x60] sm:$0xff] }
  0x10   :  { %v110_v4 = vpack.c.bf16 %v92_v2, %v91_v1  ;;  %v90_v5 = vld [vmem:[%s3893_s24 + $0x68] sm:$0xff]  ;;  %v87_v7 = vld [vmem:[%s3893_s24 + $0x50] sm:$0xff]  ;;  %v88_v8 = vld [vmem:[%s3893_s24 + $0x58] sm:$0xff] }
  0x11   :  { %v109_v6 = vpack.c.bf16 %v90_v5, %v89_v3  ;;  %v108_v9 = vpack.c.bf16 %v88_v8, %v87_v7  ;;  %v85_v10 = vld [vmem:[%s3893_s24 + $0x40] sm:$0xff]  ;;  %v86_v11 = vld [vmem:[%s3893_s24 + $0x48] sm:$0xff]  ;;  %v83_v15 = vld [vmem:[%s3893_s24 + $0x30] sm:$0xff] }
  0x12   :  { %120 = vmatpush1.bf16.msra.mxu0 %v110_v4  ;;  %v76_v12 = vld [vmem:[%s3894_s0 + $0x8] sm:$0xff]  ;;  %v107_v14 = vpack.c.bf16 %v86_v11, %v85_v10  ;;  %v84_v16 = vld [vmem:[%s3893_s24 + $0x38] sm:$0xff]  ;;  %v81_v18 = vld [vmem:[%s3893_s24 + $0x20] sm:$0xff] }
  0x13   :  { %121 = vmatprep.subr.bf16.mxu0 %v2984_v0  ;;  %v102_v13 = vpack.c.bf16 %v76_v12, %v76_v12  ;;  %v106_v17 = vpack.c.bf16 %v84_v16, %v83_v15  ;;  %v82_v19 = vld [vmem:[%s3893_s24 + $0x28] sm:$0xff]  ;;  %v79_v21 = vld [vmem:[%s3893_s24 + $0x10] sm:$0xff]  ;;  %v80_v22 = vld [vmem:[%s3893_s24 + $0x18] sm:$0xff] }
  0x14   :  { %v105_v20 = vpack.c.bf16 %v82_v19, %v81_v18  ;;  %v104_v23 = vpack.c.bf16 %v80_v22, %v79_v21  ;;  %v77_v24 = vld [vmem:[%s3893_s24] sm:$0xff]  ;;  %v78_v25 = vld [vmem:[%s3893_s24 + $0x8] sm:$0xff]  ;;  %v99_v27 = vld [vmem:[%s3893_s24 + $0xb0] sm:$0xff] }
  0x15   :  { %2453 = vmatprep.mubr.msk.bf16.mxu0 %vm115_vm0, %v102_v13  ;;  %v103_v26 = vpack.c.bf16 %v78_v25, %v77_v24  ;;  %v100_v28 = vld [vmem:[%s3893_s24 + $0xb8] sm:$0xff]  ;;  %v97_v30 = vld [vmem:[%s3893_s24 + $0xa0] sm:$0xff]  ;;  %v98_v31 = vld [vmem:[%s3893_s24 + $0xa8] sm:$0xff] }
  0x16   :  { %122 = vmatpush1.bf16.msra.mxu0 %v109_v6  ;;  %v114_v29 = vpack.c.bf16 %v100_v28, %v99_v27  ;;  %v113_v32 = vpack.c.bf16 %v98_v31, %v97_v30  ;;  %v95_v33 = vld [vmem:[%s3893_s24 + $0x90] sm:$0xff]  ;;  %v96_v34 = vld [vmem:[%s3893_s24 + $0x98] sm:$0xff]  ;;  %v93_v36 = vld [vmem:[%s3893_s24 + $0x80] sm:$0xff] }
  0x17   :  { %123 = vmatprep.subr.bf16.mxu0 %v2984_v0  ;;  %v112_v35 = vpack.c.bf16 %v96_v34, %v95_v33  ;;  %v94_v37 = vld [vmem:[%s3893_s24 + $0x88] sm:$0xff]  ;;  %v75_v39 = vld [vmem:[%s3894_s0] sm:$0xff]  ;;  %s3898_s24 = sld [smem:[#allocation7_spill]]  ;;  %s3903_s0 = smov 72  }
  0x18   :  { %v111_v38 = vpack.c.bf16 %v94_v37, %v93_v36  ;;  %v101_v40 = vpack.c.bf16 %v75_v39, %v75_v39  ;;  %v161_v43 = vld [vmem:[%s3895_s1] sm:$0xff]  ;;  %v162_v44 = vld [vmem:[%s3895_s1 + $0x8] sm:$0x3]  ;;  %v270_v36 = vld [vmem:[%s3899_s5 + $0x18] sm:$0xff]  ;;  %s2987_s1 = smov 96  }
  0x19   :  { %v163_v48 = vpack.c.bf16 %v162_v44, %v161_v43  ;;  %v159_v51 = vld [vmem:[%s3896_s26] sm:$0xff]  ;;  %v160_v55 = vld [vmem:[%s3896_s26 + $0x8] sm:$0x3]  ;;  %s3879_s26 = smov 40  }
  0x1a   :  { %124 = vmatpush1.bf16.msra.mxu0 %v108_v9  ;;  %v268_v39 = vld [vmem:[%s3899_s5 + $0x8] sm:$0xff] }
  0x1b   :  { %125 = vmatprep.subr.bf16.mxu0 %v2984_v0 }
  0x1d   :  { %v2456_v16 = vld [vmem:[%s3898_s24] ss:$0 sm:$0xff]  ;;  %s3882_s24 = smov 72  }
  0x1e   :  { %126 = vmatpush1.bf16.msra.mxu0 %v107_v14  ;;  %v2455_v14 = vld [vmem:[%s3897_s28] ss:$0 sm:$0xff]  ;;  %s3900_s28 = sld [smem:[#allocation9_spill]] }
  0x1f   :  { %127 = vmatprep.subr.bf16.mxu0 %v2984_v0 }
  0x22   :  { %128 = vmatpush1.bf16.msra.mxu0 %v106_v17 }
  0x23   :  { %129 = vmatprep.subr.bf16.mxu0 %v2984_v0 }
  0x26   :  { %130 = vmatpush1.bf16.msra.mxu0 %v105_v20 }
  0x27   :  { %131 = vmatprep.subr.bf16.mxu0 %v2984_v0 }
  0x2a   :  { %132 = vmatpush1.bf16.msra.mxu0 %v104_v23 }
  0x2b   :  { %133 = vmatprep.subr.bf16.mxu0 %v2984_v0 }
  0x2e   :  { %134 = vmatpush1.bf16.msra.mxu0 %v103_v26 }
  0x2f   :  { %143 = vmatprep.subr.bf16.mxu0 %v2984_v0 }
  0x32   :  { %144 = vmatpush2.bf16.msra.mxu0 %v114_v29 }
  0x33   :  { %145 = vmatprep.subr.bf16.mxu0 %v2984_v0 }
  0x36   :  { %146 = vmatpush2.bf16.msra.mxu0 %v113_v32 }
  0x37   :  { %147 = vmatprep.subr.bf16.mxu0 %v2984_v0 }
  0x3a   :  { %148 = vmatpush2.bf16.msra.mxu0 %v112_v35  ;;  %v269_v35 = vld [vmem:[%s3899_s5 + $0x10] sm:$0xff] }
  0x3b   :  { %149 = vmatprep.subr.bf16.mxu0 %v2984_v0  ;;  %v345_v37 = vpack.c.bf16 %v270_v36, %v269_v35 }
  0x3e   :  { %150 = vmatpush2.bf16.msra.mxu0 %v111_v38  ;;  %v267_v38 = vld [vmem:[%s3899_s5] sm:$0xff] }
  0x3f   :  { %2686 = vmatprep.subr.bf16.mxu0 %v2985_v41 }
  0x41   :  { %152 = vmatmul.mubr.bf16.vlgmr.msra.gmra.mxu0 %v101_v40  ;;  %v344_v40 = vpack.c.bf16 %v268_v39, %v267_v38 }
  0x42   :  { %2688 = vmatprep.mubr.msk.bf16.mxu0 %vm2986_vm1, %v2985_v41 }
 0x101   :  { %v153_v42 = vpop.f32.mrf.mxu0 }
 0x102   :  { %v164_v45 = vpack.c.bf16 %v153_v42, %v153_v42 }
 0x103   :  { %v155_v46 = vpop.f32.mrf.mxu0 }
 0x104   :  { %v171_v47 = vsel %vm169_vm2, %v164_v45, 0 }
 0x105   :  { %v156_v49 = vpop.f32.mrf.mxu0  ;;  %2631 = vmatpush3.bf16.msra.mxu1 %v171_v47 }
 0x106   :  { %2636 = vmatprep.subr.bf16.mxu1 %v2985_v41 }
 0x107   :  { %v157_v50 = vpop.f32.mrf.mxu0 }
 0x108   :  { %2633 = vmatmul.mubr.msk.bf16.vlgmr.msra.gmra.mxu1 %vm165_vm3, %v163_v48  ;;  %v2457_v50 = vld [vmem:[%s3900_s28] ss:$0 sm:$0xff] }
 0x109   :  { %2640 = vmatprep.mubr.msk.bf16.mxu1 %vm2986_vm1, %v2985_v41  ;;  %2637 = vmatpush3.bf16.msra.mxu1 %v345_v37 }
 0x10a   :  { %2638 = vmatprep.subr.bf16.mxu1 %v2985_v41 }
 0x10d   :  { %2639 = vmatpush3.bf16.msra.mxu1 %v344_v40 }
 0x10e   :  { %2644 = vmatprep.subr.bf16.mxu1 %v2985_v41 }
 0x1c8   :  { %v207_v52 = vpop.f32.mrf.mxu1 }
 0x1c9   :  { %v214_v53 = vadd.f32 %v207_v52, %v159_v51 }
 0x1ca   :  { %v2634_v54 = vpop.f32.mrf.mxu1 }
 0x1cb   :  { %v219_v56 = vsel %vm218_vm4, %v214_v53, 0.0  ;;  %v2458_v54 = vld [vmem:[%s3857_s8] ss:$0 sm:$0xff] }
 0x1cc   :  { %220 = vadd.xlane.f32.xlu0 %v219_v56  ;;  %v210_v57 = vpop.f32.mrf.mxu1 }
 0x1cd   :  { %v215_v58 = vadd.f32 %v210_v57, %v160_v55 }
 0x1ce   :  { %v2635_v59 = vpop.f32.mrf.mxu1 }
 0x1cf   :  { %v223_v60 = vsel %vm222_vm5, %v215_v58, 0.0 }
 0x1d0   :  { %224 = vadd.xlane.f32.xlu0 %v223_v60  ;;  %v2459_v60 = vld [vmem:[%s3858_s10] ss:$0 sm:$0xff] }
 0x255   :  { %v221_v61 = vpop.xlane.xlu0 %220 }
 0x256   :  { %v227_v62 = vmul.f32 0.03125, %v221_v61 }
 0x258   :  { %v229_v63 = vsub.f32 %v214_v53, %v227_v62 }
 0x259   :  { %v225_v0 = vpop.xlane.xlu0 %224 }
 0x25a   :  { %v228_v1 = vmul.f32 0.03125, %v225_v0  ;;  %v231_v2 = vmul.f32 %v229_v63, %v229_v63 }
 0x25c   :  { %v230_v3 = vsub.f32 %v215_v58, %v228_v1  ;;  %v233_v4 = vsel %vm218_vm4, %v231_v2, 0.0 }
 0x25d   :  { %234 = vadd.xlane.f32.xlu1 %v233_v4 }
 0x25e   :  { %v232_v5 = vmul.f32 %v230_v3, %v230_v3 }
 0x260   :  { %v236_v6 = vsel %vm222_vm5, %v232_v5, 0.0 }
 0x261   :  { %237 = vadd.xlane.f32.xlu1 %v236_v6  ;;  %v3296_v6 = vld [vmem:[%s3859_s4] sm:$0xff] }
 0x2e6   :  { %v235_v7 = vpop.xlane.xlu1 %234 }
 0x2e7   :  { %v239_v8 = vmul.f32 0.03125, %v235_v7 }
 0x2e9   :  { %v241_v9 = vadd.f32 1e-05, %v239_v8 }
 0x2ea   :  { %v238_v10 = vpop.xlane.xlu1 %237 }
 0x2eb   :  { %2880 = vrsqrt.f32 %v241_v9  ;;  %v240_v11 = vmul.f32 0.03125, %v238_v10 }
 0x2ed   :  { %v242_v12 = vadd.f32 1e-05, %v240_v11  ;;  %v3302_v11 = vld [vmem:[%s3859_s4 + $0x8] sm:$0x3] }
 0x2ef   :  { %2882 = vrsqrt.f32 %v242_v12 }
 0x2f8   :  { %v2881_v13 = vpop.eup %2880 }
 0x2f9   :  { %v245_v15 = vmul.f32 %v2881_v13, %v229_v63 }
 0x2fb   :  { %v253_v17 = vmul.f32 %v2455_v14, %v245_v15 }
 0x2fc   :  { %v2883_v18 = vpop.eup %2882 }
 0x2fd   :  { %v3241_v19 = vadd.f32 %v2456_v16, %v253_v17  ;;  %v246_v20 = vmul.f32 %v2883_v18, %v230_v3 }
 0x2ff   :  { %v301_v21 = vsel %vm218_vm4, %v3241_v19, 0.0  ;;  %v254_v22 = vmul.f32 %v2455_v14, %v246_v20 }
 0x300   :  { %302 = vadd.xlane.f32.xlu0 %v301_v21 }
 0x301   :  { %v3245_v23 = vadd.f32 %v2456_v16, %v254_v22 }
 0x303   :  { %v304_v24 = vsel %vm222_vm5, %v3245_v23, 0.0 }
 0x304   :  { %305 = vadd.xlane.f32.xlu1 %v304_v24 }
 0x389   :  { %v303_v25 = vpop.xlane.xlu0 %302 }
 0x38a   :  { %v307_v26 = vmul.f32 0.03125, %v303_v25 }
 0x38c   :  { %v309_v27 = vsub.f32 %v3241_v19, %v307_v26 }
 0x38d   :  { %v306_v28 = vpop.xlane.xlu1 %305 }
 0x38e   :  { %v308_v29 = vmul.f32 0.03125, %v306_v28  ;;  %v311_v30 = vmul.f32 %v309_v27, %v309_v27 }
 0x390   :  { %v310_v31 = vsub.f32 %v3245_v23, %v308_v29  ;;  %v313_v32 = vsel %vm218_vm4, %v311_v30, 0.0 }
 0x391   :  { %314 = vadd.xlane.f32.xlu0 %v313_v32 }
 0x392   :  { %v312_v33 = vmul.f32 %v310_v31, %v310_v31 }
 0x394   :  { %v316_v34 = vsel %vm222_vm5, %v312_v33, 0.0 }
 0x395   :  { %317 = vadd.xlane.f32.xlu1 %v316_v34 }
 0x41a   :  { %v315_v42 = vpop.xlane.xlu0 %314 }
 0x41b   :  { %v319_v43 = vmul.f32 0.03125, %v315_v42 }
 0x41d   :  { %v321_v44 = vadd.f32 1e-05, %v319_v43 }
 0x41e   :  { %v318_v45 = vpop.xlane.xlu1 %317 }
 0x41f   :  { %2884 = vrsqrt.f32 %v321_v44  ;;  %v320_v46 = vmul.f32 0.03125, %v318_v45 }
 0x421   :  { %v322_v47 = vadd.f32 1e-05, %v320_v46 }
 0x423   :  { %2886 = vrsqrt.f32 %v322_v47 }
 0x42c   :  { %v2885_v48 = vpop.eup %2884 }
 0x42d   :  { %v325_v49 = vmul.f32 %v2885_v48, %v309_v27 }
 0x42f   :  { %v333_v53 = vmul.f32 %v2457_v50, %v325_v49 }
 0x430   :  { %v2887_v51 = vpop.eup %2886 }
 0x431   :  { %v326_v52 = vmul.f32 %v2887_v51, %v310_v31  ;;  %v341_v56 = vadd.f32 %v2458_v54, %v333_v53 }
 0x433   :  { %v334_v55 = vmul.f32 %v2457_v50, %v326_v52 }
 0x435   :  { %v342_v57 = vadd.f32 %v2458_v54, %v334_v55 }
 0x437   :  { %v343_v58 = vpack.c.bf16 %v342_v57, %v341_v56 }
 0x439   :  { %2641 = vmatmul.mubr.msk.bf16.vlgmr.msra.gmra.mxu1 %vm218_vm4, %v343_v58 }
 0x43a   :  { %2646 = vmatprep.mubr.msk.bf16.mxu1 %vm2986_vm1, %v2985_v41 }
 0x4f9   :  { %v389_v59 = vpop.f32.mrf.mxu1 }
 0x4fa   :  { %v390_v63 = vadd.f32 %v2459_v60, %v389_v59 }
 0x4fb   :  { %v2642_v61 = vpop.f32.mrf.mxu1 }
 0x4fd   :  { %v392_v62 = vpop.f32.mrf.mxu1 }
 0x4fe   :  { %v393_v0 = vadd.f32 %v2459_v60, %v392_v62 }
 0x4ff   :  { %v2643_v1 = vpop.f32.mrf.mxu1 }
 0x500   :  { %v3279_v2 = vpack.c.bf16 %v393_v0, %v390_v63 }
 0x502   :  { %398 = vrot.lane.b32.xlu0 %v3279_v2, %s2987_s1 }
 0x506   :  { %530 = vrot.lane.b32.xlu0 %v3279_v2, %s2988_s30 }
 0x50a   :  { %528 = vrot.lane.b32.xlu0 %v3279_v2, %s2989_s25 }
 0x574   :  { %v399_v3 = vpop.permute.xlu0 %398 }
 0x575   :  { %v404_v4 = vsel %vm165_vm3, %v399_v3, 0 }
 0x576   :  { %2645 = vmatpush3.bf16.xpose.msra.mxu1 %v404_v4 }
 0x577   :  { %2650 = vmatprep.subr.bf16.mxu1 %v2985_v41 }
 0x578   :  { %v531_v37 = vpop.permute.xlu0 %530 }
 0x579   :  { %v536_v39 = vsel %vm165_vm3, %v531_v37, 0 }
 0x57c   :  { %v529_v40 = vpop.permute.xlu0 %528 }
 0x57d   :  { %2647 = vmatmul.mubr.msk.bf16.vlgmr.msra.gmra.mxu1 %vm165_vm3, %v3279_v2 }
 0x57e   :  { %2652 = vmatprep.mubr.msk.bf16.mxu1 %vm2986_vm1, %v2985_v41 }
 0x63d   :  { %v440_v5 = vpop.f32.mrf.mxu1 }
 0x63e   :  { %v447_v7 = vmul.f32 0.35355338, %v440_v5 }
 0x63f   :  { %v2648_v8 = vpop.f32.mrf.mxu1 }
 0x640   :  { %v449_v9 = vadd.f32 %v447_v7, %v3296_v6 }
 0x641   :  { %v443_v10 = vpop.f32.mrf.mxu1 }
 0x642   :  { %v448_v12 = vmul.f32 0.35355338, %v443_v10  ;;  %v452_v13 = vsel %vm451_vm6, %v449_v9, -inf }
 0x643   :  { %453 = vmax.xlane.f32.xlu1 %v452_v13  ;;  %v2649_v14 = vpop.f32.mrf.mxu1 }
 0x644   :  { %v450_v15 = vadd.f32 %v448_v12, %v3302_v11 }
 0x646   :  { %v456_v16 = vsel %vm455_vm7, %v450_v15, -inf }
 0x647   :  { %457 = vmax.xlane.f32.xlu1 %v456_v16 }
 0x6cc   :  { %v454_v17 = vpop.xlane.xlu1 %453 }
 0x6cd   :  { %v459_v18 = vsub.f32 %v449_v9, %v454_v17 }
 0x6cf   :  { %v461_v20 = vmul.f32 1.442695, %v459_v18  ;;  %v272_v18 = vld [vmem:[%s3860_s11] sm:$0xff] }
 0x6d0   :  { %v458_v21 = vpop.xlane.xlu1 %457 }
 0x6d1   :  { %2888 = vpow2.f32 %v461_v20  ;;  %v460_v22 = vsub.f32 %v450_v15, %v458_v21  ;;  %v273_v15 = vld [vmem:[%s3860_s11 + $0x8] sm:$0xff]  ;;  %v527_v21 = vpack.c.bf16 %v272_v18, %v272_v18 }
 0x6d2   :  { %v656_v16 = vpack.c.bf16 %v273_v15, %v273_v15 }
 0x6d3   :  { %v463_v24 = vmul.f32 1.442695, %v460_v22 }
 0x6d4   :  { %v661_v17 = vsel %vm169_vm2, %v656_v16, 0 }
 0x6d5   :  { %2890 = vpow2.f32 %v463_v24 }
 0x6de   :  { %v2889_v25 = vpop.eup %2888 }
 0x6df   :  { %v465_v26 = vsel %vm451_vm6, %v2889_v25, 0.0 }
 0x6e0   :  { %466 = vadd.xlane.f32.xlu1 %v465_v26  ;;  %v708_v26 = vsel %vm169_vm2, %v527_v21, 0 }
 0x6e2   :  { %v2891_v27 = vpop.eup %2890 }
 0x6e3   :  { %v468_v28 = vsel %vm455_vm7, %v2891_v27, 0.0 }
 0x6e4   :  { %469 = vadd.xlane.f32.xlu1 %v468_v28 }
 0x6f5   :  { %476 = vrot.lane.b32.xlu1 %v3279_v2, %s2990_s27 }
 0x769   :  { %v467_v29 = vpop.xlane.xlu1 %466 }
 0x76a   :  { %2892 = vrcp.f32 %v467_v29 }
 0x76d   :  { %v470_v30 = vpop.xlane.xlu1 %469 }
 0x76e   :  { %2894 = vrcp.f32 %v470_v30 }
 0x771   :  { %v477_v31 = vpop.permute.xlu1 %476 }
 0x772   :  { %v483_v32 = vsel %vm481_vm8, %v477_v31, 0 }
 0x773   :  { %2651 = vmatpush3.bf16.msra.mxu1 %v483_v32 }
 0x774   :  { %2656 = vmatprep.subr.bf16.mxu1 %v2985_v41 }
 0x777   :  { %v2893_v33 = vpop.eup %2892 }
 0x778   :  { %v473_v35 = vmul.f32 %v2893_v33, %v2889_v25 }
 0x77b   :  { %v2895_v34 = vpop.eup %2894 }
 0x77c   :  { %v474_v36 = vmul.f32 %v2895_v34, %v2891_v27 }
 0x77e   :  { %v475_v38 = vpack.c.bf16 %v474_v36, %v473_v35 }
 0x780   :  { %2653 = vmatmul.mubr.msk.bf16.vlgmr.msra.gmra.mxu1 %vm451_vm6, %v475_v38 }
 0x781   :  { %2657 = vmatpush3.bf16.xpose.msra.mxu1 %v536_v39  ;;  %2658 = vmatprep.mubr.msk.bf16.mxu1 %vm2986_vm1, %v2985_v41 }
 0x782   :  { %2662 = vmatprep.subr.bf16.mxu1 %v2985_v41 }
 0x788   :  { %2659 = vmatmul.mubr.msk.bf16.vlgmr.msra.gmra.mxu1 %vm165_vm3, %v529_v40 }
 0x789   :  { %2664 = vmatprep.mubr.msk.bf16.mxu1 %vm2986_vm1, %v2985_v41 }
 0x840   :  { %v3321_v42 = vpop.f32.mrf.mxu1 }
 0x842   :  { %v2654_v43 = vpop.f32.mrf.mxu1 }
 0x844   :  { %v3323_v44 = vpop.f32.mrf.mxu1 }
 0x845   :  { %v526_v45 = vpack.c.bf16 %v3323_v44, %v3321_v42 }
 0x846   :  { %v2655_v46 = vpop.f32.mrf.mxu1 }
 0x848   :  { %v572_v47 = vpop.f32.mrf.mxu1 }
 0x849   :  { %v579_v48 = vmul.f32 0.35355338, %v572_v47 }
 0x84a   :  { %v2660_v49 = vpop.f32.mrf.mxu1 }
 0x84b   :  { %v581_v50 = vadd.f32 %v579_v48, %v3296_v6 }
 0x84c   :  { %v575_v51 = vpop.f32.mrf.mxu1 }
 0x84d   :  { %v580_v52 = vmul.f32 0.35355338, %v575_v51  ;;  %v583_v53 = vsel %vm451_vm6, %v581_v50, -inf }
 0x84e   :  { %584 = vmax.xlane.f32.xlu0 %v583_v53  ;;  %v2661_v54 = vpop.f32.mrf.mxu1 }
 0x84f   :  { %v582_v55 = vadd.f32 %v580_v52, %v3302_v11 }
 0x851   :  { %v586_v56 = vsel %vm455_vm7, %v582_v55, -inf }
 0x852   :  { %587 = vmax.xlane.f32.xlu1 %v586_v56 }
 0x863   :  { %753 = vrot.lane.b32.xlu1 %v3279_v2, %s2991_s7 }
 0x867   :  { %751 = vrot.lane.b32.xlu1 %v3279_v2, %s3884_s29 }
 0x8d7   :  { %v585_v57 = vpop.xlane.xlu0 %584 }
 0x8d8   :  { %v589_v58 = vsub.f32 %v581_v50, %v585_v57 }
 0x8da   :  { %v591_v59 = vmul.f32 1.442695, %v589_v58 }
 0x8db   :  { %v588_v60 = vpop.xlane.xlu1 %587 }
 0x8dc   :  { %2896 = vpow2.f32 %v591_v59  ;;  %v590_v61 = vsub.f32 %v582_v55, %v588_v60 }
 0x8de   :  { %v593_v62 = vmul.f32 1.442695, %v590_v61 }
 0x8df   :  { %v754_v28 = vpop.permute.xlu1 %753 }
 0x8e0   :  { %2898 = vpow2.f32 %v593_v62  ;;  %v759_v29 = vsel %vm165_vm3, %v754_v28, 0 }
 0x8e3   :  { %v752_v30 = vpop.permute.xlu1 %751 }
 0x8e9   :  { %v2897_v63 = vpop.eup %2896 }
 0x8ea   :  { %v595_v0 = vsel %vm451_vm6, %v2897_v63, 0.0 }
 0x8eb   :  { %596 = vadd.xlane.f32.xlu0 %v595_v0 }
 0x8ed   :  { %v2899_v1 = vpop.eup %2898 }
 0x8ee   :  { %v598_v3 = vsel %vm455_vm7, %v2899_v1, 0.0 }
 0x8ef   :  { %599 = vadd.xlane.f32.xlu0 %v598_v3 }
 0x905   :  { %606 = vrot.lane.b32.xlu0 %v3279_v2, %s3883_s2  ;;  %s3906_s2 = smov 40  }
 0x974   :  { %v597_v4 = vpop.xlane.xlu0 %596 }
 0x975   :  { %2900 = vrcp.f32 %v597_v4 }
 0x978   :  { %v600_v5 = vpop.xlane.xlu0 %599 }
 0x979   :  { %2902 = vrcp.f32 %v600_v5 }
 0x97c   :  { %v607_v7 = vpop.permute.xlu0 %606 }
 0x97d   :  { %v612_v8 = vsel %vm481_vm8, %v607_v7, 0 }
 0x97e   :  { %2663 = vmatpush3.bf16.msra.mxu1 %v612_v8 }
 0x97f   :  { %2668 = vmatprep.subr.bf16.mxu1 %v2985_v41 }
 0x982   :  { %v2901_v9 = vpop.eup %2900 }
 0x983   :  { %v603_v12 = vmul.f32 %v2901_v9, %v2897_v63 }
 0x986   :  { %v2903_v10 = vpop.eup %2902 }
 0x987   :  { %v604_v13 = vmul.f32 %v2903_v10, %v2899_v1 }
 0x989   :  { %v605_v14 = vpack.c.bf16 %v604_v13, %v603_v12  ;;  %v274_v13 = vld [vmem:[%s3860_s11 + $0x10] sm:$0xff] }
 0x98b   :  { %2665 = vmatmul.mubr.msk.bf16.vlgmr.msra.gmra.mxu1 %vm451_vm6, %v605_v14  ;;  %v879_v14 = vpack.c.bf16 %v274_v13, %v274_v13 }
 0x98c   :  { %2670 = vmatprep.mubr.msk.bf16.mxu1 %vm2986_vm1, %v2985_v41  ;;  %2669 = vmatpush3.bf16.msra.mxu1 %v661_v17 }
 0x98d   :  { %2674 = vmatprep.subr.bf16.mxu1 %v2985_v41  ;;  %v884_v15 = vsel %vm169_vm2, %v879_v14, 0 }
 0xa4b   :  { %v648_v20 = vpop.f32.mrf.mxu1 }
 0xa4d   :  { %v2666_v22 = vpop.f32.mrf.mxu1 }
 0xa4f   :  { %v651_v24 = vpop.f32.mrf.mxu1 }
 0xa50   :  { %v655_v25 = vpack.c.bf16 %v651_v24, %v648_v20 }
 0xa51   :  { %v2667_v27 = vpop.f32.mrf.mxu1 }
 0xa52   :  { %2671 = vmatmul.mubr.msk.bf16.vlgmr.msra.gmra.mxu1 %vm165_vm3, %v655_v25 }
 0xa53   :  { %2675 = vmatpush3.bf16.msra.mxu1 %v708_v26  ;;  %2676 = vmatprep.mubr.msk.bf16.mxu1 %vm2986_vm1, %v2985_v41 }
 0xa54   :  { %2680 = vmatprep.subr.bf16.mxu1 %v2985_v41 }
 0xa5a   :  { %2677 = vmatmul.mubr.msk.bf16.vlgmr.msra.gmra.mxu1 %vm165_vm3, %v526_v45 }
 0xa5b   :  { %2681 = vmatpush3.bf16.xpose.msra.mxu1 %v759_v29  ;;  %2682 = vmatprep.mubr.msk.bf16.mxu1 %vm2986_vm1, %v2985_v41 }
 0xa5c   :  { %2692 = vmatprep.subr.bf16.mxu1 %v2985_v41 }
 0xa62   :  { %2683 = vmatmul.mubr.msk.bf16.vlgmr.msra.gmra.mxu1 %vm165_vm3, %v752_v30 }
 0xa63   :  { %2694 = vmatprep.mubr.msk.bf16.mxu1 %vm2986_vm1, %v2985_v41  ;;  %2693 = vmatpush3.bf16.msra.mxu1 %v884_v15 }
 0xa64   :  { %2704 = vmatprep.subr.bf16.mxu1 %v2985_v41 }
 0xb12   :  { %v697_v31 = vpop.f32.mrf.mxu1 }
 0xb14   :  { %v2672_v32 = vpop.f32.mrf.mxu1 }
 0xb16   :  { %v700_v33 = vpop.f32.mrf.mxu1 }
 0xb18   :  { %v2673_v34 = vpop.f32.mrf.mxu1 }
 0xb1a   :  { %v744_v35 = vpop.f32.mrf.mxu1 }
 0xb1b   :  { %v3368_v36 = vadd.f32 %v744_v35, %v697_v31 }
 0xb1c   :  { %v2678_v37 = vpop.f32.mrf.mxu1 }
 0xb1e   :  { %v747_v38 = vpop.f32.mrf.mxu1 }
 0xb1f   :  { %v3370_v39 = vadd.f32 %v747_v38, %v700_v33 }
 0xb20   :  { %v2679_v40 = vpop.f32.mrf.mxu1 }
 0xb22   :  { %v795_v42 = vpop.f32.mrf.mxu1 }
 0xb23   :  { %v802_v43 = vmul.f32 0.35355338, %v795_v42 }
 0xb24   :  { %v2684_v44 = vpop.f32.mrf.mxu1 }
 0xb25   :  { %v804_v45 = vadd.f32 %v802_v43, %v3296_v6 }
 0xb26   :  { %v798_v46 = vpop.f32.mrf.mxu1 }
 0xb27   :  { %v803_v47 = vmul.f32 0.35355338, %v798_v46  ;;  %v806_v48 = vsel %vm451_vm6, %v804_v45, -inf }
 0xb28   :  { %807 = vmax.xlane.f32.xlu1 %v806_v48  ;;  %v2685_v49 = vpop.f32.mrf.mxu1 }
 0xb29   :  { %v805_v50 = vadd.f32 %v803_v47, %v3302_v11 }
 0xb2b   :  { %v809_v51 = vsel %vm455_vm7, %v805_v50, -inf }
 0xb2c   :  { %810 = vmax.xlane.f32.xlu0 %v809_v51 }
 0xb39   :  { %829 = vrot.lane.b32.xlu1 %v3279_v2, %s3880_s3  ;;  %s3905_s3 = smov 48  }
 0xb3d   :  { %929 = vrot.lane.b32.xlu1 %v3279_v2, %s3881_s9 }
 0xbb1   :  { %v808_v52 = vpop.xlane.xlu1 %807 }
 0xbb2   :  { %v812_v53 = vsub.f32 %v804_v45, %v808_v52 }
 0xbb4   :  { %v814_v54 = vmul.f32 1.442695, %v812_v53 }
 0xbb5   :  { %v830_v55 = vpop.permute.xlu1 %829  ;;  %v811_v56 = vpop.xlane.xlu0 %810 }
 0xbb6   :  { %2904 = vpow2.f32 %v814_v54  ;;  %v835_v57 = vsel %vm481_vm8, %v830_v55, 0  ;;  %v813_v58 = vsub.f32 %v805_v50, %v811_v56 }
 0xbb7   :  { %2687 = vmatpush3.bf16.msra.mxu0 %v835_v57 }
 0xbb8   :  { %v816_v59 = vmul.f32 1.442695, %v813_v58  ;;  %2698 = vmatprep.subr.bf16.mxu0 %v2985_v41 }
 0xbb9   :  { %v930_v12 = vpop.permute.xlu1 %929 }
 0xbba   :  { %2906 = vpow2.f32 %v816_v59 }
 0xbc3   :  { %v2905_v60 = vpop.eup %2904 }
 0xbc4   :  { %v818_v61 = vsel %vm451_vm6, %v2905_v60, 0.0 }
 0xbc5   :  { %819 = vadd.xlane.f32.xlu0 %v818_v61 }
 0xbc7   :  { %v2907_v62 = vpop.eup %2906 }
 0xbc8   :  { %v821_v63 = vsel %vm455_vm7, %v2907_v62, 0.0 }
 0xbc9   :  { %822 = vadd.xlane.f32.xlu0 %v821_v63 }
 0xbdf   :  { %931 = vrot.lane.b32.xlu0 %v3279_v2, %s3882_s24 }
 0xc4e   :  { %v820_v0 = vpop.xlane.xlu0 %819 }
 0xc4f   :  { %2908 = vrcp.f32 %v820_v0 }
 0xc52   :  { %v823_v1 = vpop.xlane.xlu0 %822 }
 0xc53   :  { %2910 = vrcp.f32 %v823_v1 }
 0xc56   :  { %v932_v8 = vpop.permute.xlu0 %931 }
 0xc57   :  { %v937_v10 = vsel %vm165_vm3, %v932_v8, 0 }
 0xc5c   :  { %v2909_v3 = vpop.eup %2908 }
 0xc5d   :  { %v826_v5 = vmul.f32 %v2909_v3, %v2905_v60 }
 0xc60   :  { %v2911_v4 = vpop.eup %2910 }
 0xc61   :  { %v827_v7 = vmul.f32 %v2911_v4, %v2907_v62 }
 0xc63   :  { %v828_v9 = vpack.c.bf16 %v827_v7, %v826_v5  ;;  %v2473_v5 = vld [vmem:[%s3861_s12] ss:$0 sm:$0xff] }
 0xc65   :  { %2689 = vmatmul.mubr.msk.bf16.vlgmr.msra.gmra.mxu0 %vm451_vm6, %v828_v9 }
 0xc66   :  { %2699 = vmatpush3.bf16.xpose.msra.mxu0 %v937_v10  ;;  %2700 = vmatprep.mubr.msk.bf16.mxu0 %vm2986_vm1, %v2985_v41 }
 0xc67   :  { %2710 = vmatprep.subr.bf16.mxu0 %v2985_v41 }
 0xc6d   :  { %2701 = vmatmul.mubr.msk.bf16.vlgmr.msra.gmra.mxu0 %vm165_vm3, %v930_v12 }
 0xc6e   :  { %2712 = vmatprep.mubr.msk.bf16.mxu0 %vm2986_vm1, %v2985_v41 }
 0xd25   :  { %v871_v16 = vpop.f32.mrf.mxu0 }
 0xd27   :  { %v2690_v17 = vpop.f32.mrf.mxu0 }
 0xd29   :  { %v874_v18 = vpop.f32.mrf.mxu0 }
 0xd2a   :  { %v878_v20 = vpack.c.bf16 %v874_v18, %v871_v16 }
 0xd2b   :  { %v2691_v21 = vpop.f32.mrf.mxu0 }
 0xd2c   :  { %2695 = vmatmul.mubr.msk.bf16.vlgmr.msra.gmra.mxu1 %vm165_vm3, %v878_v20 }
 0xd2d   :  { %v973_v22 = vpop.f32.mrf.mxu0  ;;  %2706 = vmatprep.mubr.msk.bf16.mxu1 %vm2986_vm1, %v2985_v41 }
 0xd2e   :  { %v980_v24 = vmul.f32 0.35355338, %v973_v22 }
 0xd2f   :  { %v2702_v25 = vpop.f32.mrf.mxu0 }
 0xd30   :  { %v982_v26 = vadd.f32 %v980_v24, %v3296_v6 }
 0xd31   :  { %v976_v27 = vpop.f32.mrf.mxu0 }
 0xd32   :  { %v981_v28 = vmul.f32 0.35355338, %v976_v27  ;;  %v984_v29 = vsel %vm451_vm6, %v982_v26, -inf }
 0xd33   :  { %985 = vmax.xlane.f32.xlu1 %v984_v29  ;;  %v2703_v30 = vpop.f32.mrf.mxu0  ;;  %v282_v29 = vld [vmem:[%s3862_s15 + $0x18] sm:$0xff] }
 0xd34   :  { %v983_v31 = vadd.f32 %v981_v28, %v3302_v11  ;;  %v281_v28 = vld [vmem:[%s3862_s15 + $0x10] sm:$0xff] }
 0xd35   :  { %v1161_v30 = vpack.c.bf16 %v282_v29, %v281_v28 }
 0xd36   :  { %v987_v32 = vsel %vm455_vm7, %v983_v31, -inf }
 0xd37   :  { %988 = vmax.xlane.f32.xlu0 %v987_v32  ;;  %v280_v32 = vld [vmem:[%s3862_s15 + $0x8] sm:$0xff] }
 0xdbc   :  { %v986_v33 = vpop.xlane.xlu1 %985 }
 0xdbd   :  { %v990_v34 = vsub.f32 %v982_v26, %v986_v33 }
 0xdbf   :  { %v992_v35 = vmul.f32 1.442695, %v990_v34 }
 0xdc0   :  { %v989_v37 = vpop.xlane.xlu0 %988 }
 0xdc1   :  { %2912 = vpow2.f32 %v992_v35  ;;  %v991_v38 = vsub.f32 %v983_v31, %v989_v37  ;;  %v279_v31 = vld [vmem:[%s3862_s15] sm:$0xff] }
 0xdc2   :  { %v1160_v33 = vpack.c.bf16 %v280_v32, %v279_v31 }
 0xdc3   :  { %v994_v40 = vmul.f32 1.442695, %v991_v38 }
 0xdc5   :  { %2914 = vpow2.f32 %v994_v40 }
 0xdce   :  { %v2913_v42 = vpop.eup %2912 }
 0xdcf   :  { %v996_v43 = vsel %vm451_vm6, %v2913_v42, 0.0 }
 0xdd0   :  { %997 = vadd.xlane.f32.xlu0 %v996_v43 }
 0xdd2   :  { %v2915_v44 = vpop.eup %2914 }
 0xdd3   :  { %v999_v45 = vsel %vm455_vm7, %v2915_v44, 0.0 }
 0xdd4   :  { %1000 = vadd.xlane.f32.xlu1 %v999_v45  ;;  %v2474_v45 = vld [vmem:[%s3863_s13] ss:$0 sm:$0xff] }
 0xde6   :  { %1007 = vrot.lane.b32.xlu0 %v3279_v2, %s3879_s26 }
 0xdec   :  { %v920_v46 = vpop.f32.mrf.mxu1 }
 0xded   :  { %v927_v47 = vadd.f32 %v920_v46, %v3368_v36 }
 0xdee   :  { %v2696_v48 = vpop.f32.mrf.mxu1 }
 0xdf0   :  { %v923_v49 = vpop.f32.mrf.mxu1 }
 0xdf1   :  { %v928_v50 = vadd.f32 %v923_v49, %v3370_v39  ;;  %v275_v39 = vld [vmem:[%s3860_s11 + $0x18] sm:$0xff]  ;;  %v2475_v49 = vld [vmem:[%s3864_s14] ss:$0 sm:$0xff] }
 0xdf2   :  { %v2697_v51 = vpop.f32.mrf.mxu1  ;;  %v1057_v59 = vpack.c.bf16 %v275_v39, %v275_v39  ;;  %v295_v39 = vld [vmem:[%s3865_s17 + $0x58] sm:$0xff] }
 0xdf4   :  { %v1062_v60 = vsel %vm169_vm2, %v1057_v59, 0 }
 0xdf5   :  { %2711 = vmatpush3.bf16.msra.mxu0 %v1062_v60  ;;  %v292_v60 = vld [vmem:[%s3865_s17 + $0x40] sm:$0xff] }
 0xdf6   :  { %2724 = vmatprep.subr.bf16.mxu0 %v2985_v41 }
 0xe59   :  { %v998_v52 = vpop.xlane.xlu0 %997 }
 0xe5a   :  { %2916 = vrcp.f32 %v998_v52 }
 0xe5d   :  { %v1001_v53 = vpop.xlane.xlu1 %1000  ;;  %v1008_v54 = vpop.permute.xlu0 %1007 }
 0xe5e   :  { %2918 = vrcp.f32 %v1001_v53  ;;  %v1013_v55 = vsel %vm481_vm8, %v1008_v54, 0  ;;  %v298_v54 = vld [vmem:[%s3865_s17 + $0x70] sm:$0xff] }
 0xe5f   :  { %2705 = vmatpush3.bf16.msra.mxu1 %v1013_v55  ;;  %v299_v55 = vld [vmem:[%s3865_s17 + $0x78] sm:$0xff] }
 0xe60   :  { %2716 = vmatprep.subr.bf16.mxu1 %v2985_v41 }
 0xe67   :  { %v2917_v56 = vpop.eup %2916 }
 0xe68   :  { %v1004_v57 = vmul.f32 %v2917_v56, %v2913_v42  ;;  %v1236_v56 = vpack.c.bf16 %v299_v55, %v298_v54 }
 0xe6b   :  { %v2919_v2 = vpop.eup %2918 }
 0xe6c   :  { %v1005_v58 = vmul.f32 %v2919_v2, %v2915_v44  ;;  %v296_v2 = vld [vmem:[%s3865_s17 + $0x60] sm:$0xff] }
 0xe6e   :  { %v1006_v36 = vpack.c.bf16 %v1005_v58, %v1004_v57  ;;  %v297_v57 = vld [vmem:[%s3865_s17 + $0x68] sm:$0xff] }
 0xe6f   :  { %v1235_v58 = vpack.c.bf16 %v297_v57, %v296_v2  ;;  %v2485_v57 = vld [vmem:[%s3899_s5 + $0x30] sm:$0xff] }
 0xe70   :  { %2707 = vmatmul.mubr.msk.bf16.vlgmr.msra.gmra.mxu1 %vm451_vm6, %v1006_v36  ;;  %v294_v36 = vld [vmem:[%s3865_s17 + $0x50] sm:$0xff] }
 0xe71   :  { %2720 = vmatprep.mubr.msk.bf16.mxu1 %vm2986_vm1, %v2985_v41  ;;  %2717 = vmatpush3.bf16.msra.mxu1 %v1161_v30  ;;  %v1234_v59 = vpack.c.bf16 %v295_v39, %v294_v36  ;;  %v2483_v39 = vld [vmem:[%s3899_s5 + $0x20] sm:$0xff] }
 0xe72   :  { %2718 = vmatprep.subr.bf16.mxu1 %v2985_v41 }
 0xe75   :  { %2719 = vmatpush3.bf16.msra.mxu1 %v1160_v33 }
 0xe76   :  { %2744 = vmatprep.subr.bf16.mxu1 %v2985_v41 }
 0xf30   :  { %v1049_v61 = vpop.f32.mrf.mxu1 }
 0xf32   :  { %v2708_v62 = vpop.f32.mrf.mxu1 }
 0xf34   :  { %v1052_v63 = vpop.f32.mrf.mxu1 }
 0xf35   :  { %v1056_v0 = vpack.c.bf16 %v1052_v63, %v1049_v61  ;;  %v293_v61 = vld [vmem:[%s3865_s17 + $0x48] sm:$0xff]  ;;  %v290_v63 = vld [vmem:[%s3865_s17 + $0x30] sm:$0xff] }
 0xf36   :  { %v2709_v1 = vpop.f32.mrf.mxu1  ;;  %v1233_v62 = vpack.c.bf16 %v293_v61, %v292_v60 }
 0xf37   :  { %2713 = vmatmul.mubr.msk.bf16.vlgmr.msra.gmra.mxu0 %vm165_vm3, %v1056_v0  ;;  %v291_v0 = vld [vmem:[%s3865_s17 + $0x38] sm:$0xff] }
 0xf38   :  { %2740 = vmatprep.mubr.msk.bf16.mxu0 %vm2986_vm1, %v2985_v41  ;;  %2725 = vmatpush3.bf16.msra.mxu0 %v1236_v56  ;;  %v1232_v1 = vpack.c.bf16 %v291_v0, %v290_v63 }
 0xf39   :  { %2726 = vmatprep.subr.bf16.mxu0 %v2985_v41 }
 0xf3c   :  { %2727 = vmatpush3.bf16.msra.mxu0 %v1235_v58  ;;  %v2486_v58 = vld [vmem:[%s3899_s5 + $0x38] sm:$0xff] }
 0xf3d   :  { %2728 = vmatprep.subr.bf16.mxu0 %v2985_v41  ;;  %v1380_v36 = vpack.c.bf16 %v2486_v58, %v2485_v57 }
 0xf40   :  { %2729 = vmatpush3.bf16.msra.mxu0 %v1234_v59  ;;  %v2484_v59 = vld [vmem:[%s3899_s5 + $0x28] sm:$0xff] }
 0xf41   :  { %2730 = vmatprep.subr.bf16.mxu0 %v2985_v41  ;;  %v1379_v60 = vpack.c.bf16 %v2484_v59, %v2483_v39 }
 0xf44   :  { %2731 = vmatpush3.bf16.msra.mxu0 %v1233_v62 }
 0xf45   :  { %2732 = vmatprep.subr.bf16.mxu0 %v2985_v41 }
 0xf48   :  { %2733 = vmatpush3.bf16.msra.mxu0 %v1232_v1 }
 0xf49   :  { %2734 = vmatprep.subr.bf16.mxu0 %v2985_v41 }
 0xff7   :  { %v1098_v3 = vpop.f32.mrf.mxu0 }
 0xff8   :  { %v1105_v4 = vadd.f32 %v1098_v3, %v927_v47  ;;  %v288_v3 = vld [vmem:[%s3865_s17 + $0x20] sm:$0xff] }
 0xff9   :  { %v2714_v7 = vpop.f32.mrf.mxu0 }
 0xffa   :  { %v1107_v8 = vadd.f32 %v1105_v4, %v3241_v19  ;;  %v289_v4 = vld [vmem:[%s3865_s17 + $0x28] sm:$0xff]  ;;  %v286_v7 = vld [vmem:[%s3865_s17 + $0x10] sm:$0xff] }
 0xffb   :  { %v1101_v9 = vpop.f32.mrf.mxu0 }
 0xffc   :  { %v3429_v10 = vadd.f32 %v2473_v5, %v1107_v8  ;;  %v1106_v12 = vadd.f32 %v1101_v9, %v928_v50  ;;  %v287_v8 = vld [vmem:[%s3865_s17 + $0x18] sm:$0xff] }
 0xffd   :  { %v2715_v13 = vpop.f32.mrf.mxu0  ;;  %v1230_v9 = vpack.c.bf16 %v287_v8, %v286_v7  ;;  %v2517_v7 = vld [vmem:[%s3900_s28 + $0x1] ss:$0 sm:$0xff] }
 0xffe   :  { %v1108_v14 = vadd.f32 %v1106_v12, %v3245_v23  ;;  %v1117_v15 = vsel %vm218_vm4, %v3429_v10, 0.0  ;;  %v284_v12 = vld [vmem:[%s3865_s17] sm:$0xff]  ;;  %v285_v13 = vld [vmem:[%s3865_s17 + $0x8] sm:$0xff] }
 0xfff   :  { %1118 = vadd.xlane.f32.xlu1 %v1117_v15  ;;  %v2476_v15 = vld [vmem:[%s3866_s16] ss:$0 sm:$0xff] }
0x1000   :  { %v3434_v16 = vadd.f32 %v2473_v5, %v1108_v14  ;;  %v1231_v5 = vpack.c.bf16 %v289_v4, %v288_v3  ;;  %v1229_v14 = vpack.c.bf16 %v285_v13, %v284_v12  ;;  %v2518_v13 = vld [vmem:[%s3857_s8 + $0x1] ss:$0 sm:$0xff] }
0x1002   :  { %v1120_v17 = vsel %vm222_vm5, %v3434_v16, 0.0  ;;  %2735 = vmatpush3.bf16.msra.mxu0 %v1231_v5 }
0x1003   :  { %1121 = vadd.xlane.f32.xlu1 %v1120_v17  ;;  %2736 = vmatprep.subr.bf16.mxu0 %v2985_v41 }
0x1006   :  { %2737 = vmatpush3.bf16.msra.mxu0 %v1230_v9 }
0x1007   :  { %2738 = vmatprep.subr.bf16.mxu0 %v2985_v41 }
0x100a   :  { %2739 = vmatpush3.bf16.msra.mxu0 %v1229_v14 }
0x100b   :  { %2770 = vmatprep.subr.bf16.mxu0 %v2985_v41 }
0x1088   :  { %v1119_v18 = vpop.xlane.xlu1 %1118 }
0x1089   :  { %v1123_v20 = vmul.f32 0.03125, %v1119_v18 }
0x108b   :  { %v1125_v19 = vsub.f32 %v3429_v10, %v1123_v20 }
0x108c   :  { %v1122_v21 = vpop.xlane.xlu1 %1121 }
0x108d   :  { %v1124_v22 = vmul.f32 0.03125, %v1122_v21  ;;  %v1127_v24 = vmul.f32 %v1125_v19, %v1125_v19 }
0x108f   :  { %v1126_v25 = vsub.f32 %v3434_v16, %v1124_v22  ;;  %v1129_v23 = vsel %vm218_vm4, %v1127_v24, 0.0 }
0x1090   :  { %1130 = vadd.xlane.f32.xlu1 %v1129_v23 }
0x1091   :  { %v1128_v26 = vmul.f32 %v1126_v25, %v1126_v25 }
0x1093   :  { %v1132_v27 = vsel %vm222_vm5, %v1128_v26, 0.0 }
0x1094   :  { %1133 = vadd.xlane.f32.xlu1 %v1132_v27 }
0x1119   :  { %v1131_v34 = vpop.xlane.xlu1 %1130 }
0x111a   :  { %v1135_v35 = vmul.f32 0.03125, %v1131_v34 }
0x111c   :  { %v1137_v37 = vadd.f32 1e-05, %v1135_v35 }
0x111d   :  { %v1134_v38 = vpop.xlane.xlu1 %1133 }
0x111e   :  { %2920 = vrsqrt.f32 %v1137_v37  ;;  %v1136_v40 = vmul.f32 0.03125, %v1134_v38  ;;  %v2480_v37 = vld [vmem:[%s3867_s18] ss:$0 sm:$0xff] }
0x1120   :  { %v1138_v42 = vadd.f32 1e-05, %v1136_v40 }
0x1122   :  { %2922 = vrsqrt.f32 %v1138_v42 }
0x112b   :  { %v2921_v43 = vpop.eup %2920 }
0x112c   :  { %v1141_v44 = vmul.f32 %v2921_v43, %v1125_v19 }
0x112e   :  { %v1149_v48 = vmul.f32 %v2474_v45, %v1141_v44 }
0x112f   :  { %v2923_v46 = vpop.eup %2922 }
0x1130   :  { %v1142_v47 = vmul.f32 %v2923_v46, %v1126_v25  ;;  %v1157_v51 = vadd.f32 %v2475_v49, %v1149_v48 }
0x1132   :  { %v1150_v50 = vmul.f32 %v2474_v45, %v1142_v47 }
0x1134   :  { %v1158_v52 = vadd.f32 %v2475_v49, %v1150_v50 }
0x1136   :  { %v1159_v53 = vpack.c.bf16 %v1158_v52, %v1157_v51 }
0x1138   :  { %2721 = vmatmul.mubr.msk.bf16.vlgmr.msra.gmra.mxu1 %vm218_vm4, %v1159_v53 }
0x1139   :  { %2748 = vmatprep.mubr.msk.bf16.mxu1 %vm2986_vm1, %v2985_v41  ;;  %2745 = vmatpush3.bf16.msra.mxu1 %v1380_v36 }
0x113a   :  { %2746 = vmatprep.subr.bf16.mxu1 %v2985_v41 }
0x113d   :  { %2747 = vmatpush3.bf16.msra.mxu1 %v1379_v60 }
0x113e   :  { %2752 = vmatprep.subr.bf16.mxu1 %v2985_v41 }
0x11f8   :  { %v1205_v17 = vpop.f32.mrf.mxu1 }
0x11f9   :  { %v1206_v18 = vadd.f32 %v2476_v15, %v1205_v17 }
0x11fa   :  { %v2722_v20 = vpop.f32.mrf.mxu1 }
0x11fb   :  { %v2478_v19 = vmul.f32 -1.702, %v1206_v18 }
0x11fc   :  { %v1208_v21 = vpop.f32.mrf.mxu1 }
0x11fd   :  { %v1216_v22 = vmul.f32 1.442695, %v2478_v19  ;;  %v1209_v24 = vadd.f32 %v2476_v15, %v1208_v21  ;;  %v2519_v19 = vld [vmem:[%s3858_s10 + $0x1] ss:$0 sm:$0xff] }
0x11fe   :  { %v2723_v25 = vpop.f32.mrf.mxu1 }
0x11ff   :  { %2924 = vpow2.f32 %v1216_v22  ;;  %v2479_v23 = vmul.f32 -1.702, %v1209_v24 }
0x1201   :  { %v1218_v26 = vmul.f32 1.442695, %v2479_v23 }
0x1203   :  { %2926 = vpow2.f32 %v1218_v26 }
0x120c   :  { %v2925_v27 = vpop.eup %2924 }
0x120d   :  { %v1220_v28 = vadd.f32 1.0, %v2925_v27 }
0x120f   :  { %2928 = vrcp.f32 %v1220_v28 }
0x1210   :  { %v2927_v29 = vpop.eup %2926 }
0x1211   :  { %v1221_v30 = vadd.f32 1.0, %v2927_v29 }
0x1213   :  { %2930 = vrcp.f32 %v1221_v30 }
0x121c   :  { %v2929_v31 = vpop.eup %2928 }
0x121d   :  { %v1226_v33 = vmul.f32 %v2929_v31, %v1206_v18 }
0x1220   :  { %v2931_v32 = vpop.eup %2930 }
0x1221   :  { %v1227_v34 = vmul.f32 %v2931_v32, %v1209_v24 }
0x1223   :  { %v1228_v35 = vpack.c.bf16 %v1227_v34, %v1226_v33 }
0x1225   :  { %2741 = vmatmul.mubr.bf16.vlgmr.msra.gmra.mxu0 %v1228_v35 }
0x1226   :  { %2772 = vmatprep.mubr.msk.bf16.mxu0 %vm2986_vm1, %v2985_v41 }
0x12e5   :  { %v1271_v38 = vpop.f32.mrf.mxu0 }
0x12e6   :  { %v1278_v40 = vadd.f32 %v1271_v38, %v3429_v10 }
0x12e7   :  { %v2742_v42 = vpop.f32.mrf.mxu0 }
0x12e8   :  { %v3530_v43 = vadd.f32 %v2480_v37, %v1278_v40 }
0x12e9   :  { %v1274_v44 = vpop.f32.mrf.mxu0 }
0x12ea   :  { %v1279_v45 = vadd.f32 %v1274_v44, %v3434_v16  ;;  %v1336_v46 = vsel %vm218_vm4, %v3530_v43, 0.0 }
0x12eb   :  { %1337 = vadd.xlane.f32.xlu1 %v1336_v46  ;;  %v2743_v47 = vpop.f32.mrf.mxu0 }
0x12ec   :  { %v3535_v48 = vadd.f32 %v2480_v37, %v1279_v45 }
0x12ee   :  { %v1339_v49 = vsel %vm222_vm5, %v3535_v48, 0.0 }
0x12ef   :  { %1340 = vadd.xlane.f32.xlu1 %v1339_v49 }
0x1374   :  { %v1338_v50 = vpop.xlane.xlu1 %1337 }
0x1375   :  { %v1342_v51 = vmul.f32 0.03125, %v1338_v50 }
0x1377   :  { %v1344_v10 = vsub.f32 %v3530_v43, %v1342_v51 }
0x1378   :  { %v1341_v52 = vpop.xlane.xlu1 %1340 }
0x1379   :  { %v1343_v53 = vmul.f32 0.03125, %v1341_v52  ;;  %v1346_v54 = vmul.f32 %v1344_v10, %v1344_v10 }
0x137b   :  { %v1345_v16 = vsub.f32 %v3535_v48, %v1343_v53  ;;  %v1348_v55 = vsel %vm218_vm4, %v1346_v54, 0.0 }
0x137c   :  { %1349 = vadd.xlane.f32.xlu0 %v1348_v55 }
0x137d   :  { %v1347_v56 = vmul.f32 %v1345_v16, %v1345_v16 }
0x137f   :  { %v1351_v2 = vsel %vm222_vm5, %v1347_v56, 0.0 }
0x1380   :  { %1352 = vadd.xlane.f32.xlu1 %v1351_v2 }
0x1405   :  { %v1350_v61 = vpop.xlane.xlu0 %1349 }
0x1406   :  { %v1354_v62 = vmul.f32 0.03125, %v1350_v61 }
0x1408   :  { %v1356_v63 = vadd.f32 1e-05, %v1354_v62 }
0x1409   :  { %v1353_v0 = vpop.xlane.xlu1 %1352 }
0x140a   :  { %2932 = vrsqrt.f32 %v1356_v63  ;;  %v1355_v1 = vmul.f32 0.03125, %v1353_v0 }
0x140c   :  { %v1357_v3 = vadd.f32 1e-05, %v1355_v1 }
0x140e   :  { %2934 = vrsqrt.f32 %v1357_v3 }
0x1417   :  { %v2933_v4 = vpop.eup %2932 }
0x1418   :  { %v1360_v5 = vmul.f32 %v2933_v4, %v1344_v10  ;;  %v3604_v4 = vld [vmem:[%s3859_s4] sm:$0xff] }
0x141a   :  { %v1368_v12 = vmul.f32 %v2517_v7, %v1360_v5 }
0x141b   :  { %v2935_v8 = vpop.eup %2934 }
0x141c   :  { %v1361_v9 = vmul.f32 %v2935_v8, %v1345_v16  ;;  %v1376_v15 = vadd.f32 %v2518_v13, %v1368_v12 }
0x141e   :  { %v1369_v14 = vmul.f32 %v2517_v7, %v1361_v9 }
0x1420   :  { %v1377_v17 = vadd.f32 %v2518_v13, %v1369_v14  ;;  %v3611_v13 = vld [vmem:[%s3859_s4 + $0x8] sm:$0x3]  ;;  %s3902_s4 = smov 56  }
0x1422   :  { %v1378_v18 = vpack.c.bf16 %v1377_v17, %v1376_v15 }
0x1424   :  { %2749 = vmatmul.mubr.msk.bf16.vlgmr.msra.gmra.mxu1 %vm218_vm4, %v1378_v18 }
0x1425   :  { %2754 = vmatprep.mubr.msk.bf16.mxu1 %vm2986_vm1, %v2985_v41 }
0x14e4   :  { %v1424_v20 = vpop.f32.mrf.mxu1 }
0x14e5   :  { %v1425_v24 = vadd.f32 %v2519_v19, %v1424_v20 }
0x14e6   :  { %v2750_v21 = vpop.f32.mrf.mxu1 }
0x14e8   :  { %v1427_v22 = vpop.f32.mrf.mxu1 }
0x14e9   :  { %v1428_v25 = vadd.f32 %v2519_v19, %v1427_v22 }
0x14ea   :  { %v2751_v23 = vpop.f32.mrf.mxu1 }
0x14eb   :  { %v3569_v26 = vpack.c.bf16 %v1428_v25, %v1425_v24 }
0x14ed   :  { %1433 = vrot.lane.b32.xlu1 %v3569_v26, %s2987_s1 }
0x155f   :  { %v1434_v27 = vpop.permute.xlu1 %1433 }
0x1560   :  { %v1439_v28 = vsel %vm165_vm3, %v1434_v27, 0 }
0x1561   :  { %2753 = vmatpush3.bf16.xpose.msra.mxu1 %v1439_v28 }
0x1562   :  { %2758 = vmatprep.subr.bf16.mxu1 %v2985_v41 }
0x1568   :  { %2755 = vmatmul.mubr.msk.bf16.vlgmr.msra.gmra.mxu1 %vm165_vm3, %v3569_v26 }
0x1569   :  { %2760 = vmatprep.mubr.msk.bf16.mxu1 %vm2986_vm1, %v2985_v41 }
0x1628   :  { %v1475_v29 = vpop.f32.mrf.mxu1 }
0x1629   :  { %v1482_v30 = vmul.f32 0.35355338, %v1475_v29 }
0x162a   :  { %v2756_v31 = vpop.f32.mrf.mxu1 }
0x162b   :  { %v1484_v32 = vadd.f32 %v1482_v30, %v3296_v6 }
0x162c   :  { %v1478_v33 = vpop.f32.mrf.mxu1 }
0x162d   :  { %v1483_v34 = vmul.f32 0.35355338, %v1478_v33  ;;  %v1486_v35 = vsel %vm451_vm6, %v1484_v32, -inf }
0x162e   :  { %1487 = vmax.xlane.f32.xlu1 %v1486_v35  ;;  %v2757_v37 = vpop.f32.mrf.mxu1 }
0x162f   :  { %v1485_v38 = vadd.f32 %v1483_v34, %v3302_v11 }
0x1631   :  { %v1489_v40 = vsel %vm455_vm7, %v1485_v38, -inf }
0x1632   :  { %1490 = vmax.xlane.f32.xlu0 %v1489_v40 }
0x163f   :  { %1562 = vrot.lane.b32.xlu1 %v3569_v26, %s2988_s30  ;;  %s3901_s30 = smov 112  }
0x16b7   :  { %v1488_v42 = vpop.xlane.xlu1 %1487 }
0x16b8   :  { %v1492_v44 = vsub.f32 %v1484_v32, %v1488_v42  ;;  %v2488_v32 = vld [vmem:[%s3860_s11 + $0x20] sm:$0xff] }
0x16b9   :  { %v1559_v34 = vpack.c.bf16 %v2488_v32, %v2488_v32 }
0x16ba   :  { %v1494_v45 = vmul.f32 1.442695, %v1492_v44  ;;  %v2489_v44 = vld [vmem:[%s3860_s11 + $0x28] sm:$0xff] }
0x16bb   :  { %v1491_v46 = vpop.xlane.xlu0 %1490  ;;  %v1563_v57 = vpop.permute.xlu1 %1562  ;;  %v1740_v42 = vsel %vm169_vm2, %v1559_v34, 0 }
0x16bc   :  { %2936 = vpow2.f32 %v1494_v45  ;;  %v1493_v6 = vsub.f32 %v1485_v38, %v1491_v46  ;;  %v1568_v36 = vsel %vm165_vm3, %v1563_v57, 0  ;;  %v1688_v45 = vpack.c.bf16 %v2489_v44, %v2489_v44 }
0x16be   :  { %v1496_v47 = vmul.f32 1.442695, %v1493_v6  ;;  %v1693_v46 = vsel %vm169_vm2, %v1688_v45, 0 }
0x16c0   :  { %2938 = vpow2.f32 %v1496_v47 }
0x16c9   :  { %v2937_v49 = vpop.eup %2936 }
0x16ca   :  { %v1498_v50 = vsel %vm451_vm6, %v2937_v49, 0.0 }
0x16cb   :  { %1499 = vadd.xlane.f32.xlu0 %v1498_v50 }
0x16cd   :  { %v2939_v51 = vpop.eup %2938 }
0x16ce   :  { %v1501_v11 = vsel %vm455_vm7, %v2939_v51, 0.0 }
0x16cf   :  { %1502 = vadd.xlane.f32.xlu0 %v1501_v11 }
0x16e5   :  { %1509 = vrot.lane.b32.xlu0 %v3569_v26, %s2990_s27 }
0x16e9   :  { %1560 = vrot.lane.b32.xlu0 %v3569_v26, %s2989_s25 }
0x1754   :  { %v1500_v10 = vpop.xlane.xlu0 %1499 }
0x1755   :  { %2940 = vrcp.f32 %v1500_v10 }
0x1758   :  { %v1503_v52 = vpop.xlane.xlu0 %1502 }
0x1759   :  { %2942 = vrcp.f32 %v1503_v52 }
0x175c   :  { %v1510_v53 = vpop.permute.xlu0 %1509 }
0x175d   :  { %v1515_v54 = vsel %vm481_vm8, %v1510_v53, 0 }
0x175e   :  { %2759 = vmatpush3.bf16.msra.mxu1 %v1515_v54 }
0x175f   :  { %2764 = vmatprep.subr.bf16.mxu1 %v2985_v41 }
0x1760   :  { %v1561_v39 = vpop.permute.xlu0 %1560 }
0x1762   :  { %v2941_v16 = vpop.eup %2940 }
0x1763   :  { %v1506_v56 = vmul.f32 %v2941_v16, %v2937_v49 }
0x1766   :  { %v2943_v55 = vpop.eup %2942 }
0x1767   :  { %v1507_v2 = vmul.f32 %v2943_v55, %v2939_v51 }
0x1769   :  { %v1508_v58 = vpack.c.bf16 %v1507_v2, %v1506_v56 }
0x176b   :  { %2761 = vmatmul.mubr.msk.bf16.vlgmr.msra.gmra.mxu1 %vm451_vm6, %v1508_v58 }
0x176c   :  { %2765 = vmatpush3.bf16.xpose.msra.mxu1 %v1568_v36  ;;  %2766 = vmatprep.mubr.msk.bf16.mxu1 %vm2986_vm1, %v2985_v41 }
0x176d   :  { %2776 = vmatprep.subr.bf16.mxu1 %v2985_v41 }
0x1773   :  { %2767 = vmatmul.mubr.msk.bf16.vlgmr.msra.gmra.mxu1 %vm165_vm3, %v1561_v39 }
0x1774   :  { %2778 = vmatprep.mubr.msk.bf16.mxu1 %vm2986_vm1, %v2985_v41  ;;  %2777 = vmatpush3.bf16.msra.mxu1 %v1693_v46 }
0x1775   :  { %2788 = vmatprep.subr.bf16.mxu1 %v2985_v41 }
0x182b   :  { %v1551_v59 = vpop.f32.mrf.mxu1 }
0x182d   :  { %v2762_v60 = vpop.f32.mrf.mxu1 }
0x182f   :  { %v1554_v61 = vpop.f32.mrf.mxu1 }
0x1830   :  { %v1558_v62 = vpack.c.bf16 %v1554_v61, %v1551_v59 }
0x1831   :  { %v2763_v63 = vpop.f32.mrf.mxu1 }
0x1833   :  { %v1604_v0 = vpop.f32.mrf.mxu1 }
0x1834   :  { %v1611_v1 = vmul.f32 0.35355338, %v1604_v0 }
0x1835   :  { %v2768_v3 = vpop.f32.mrf.mxu1 }
0x1836   :  { %v1613_v5 = vadd.f32 %v3604_v4, %v1611_v1 }
0x1837   :  { %v1607_v7 = vpop.f32.mrf.mxu1 }
0x1838   :  { %v1612_v8 = vmul.f32 0.35355338, %v1607_v7  ;;  %v1615_v9 = vsel %vm451_vm6, %v1613_v5, -inf }
0x1839   :  { %1616 = vmax.xlane.f32.xlu0 %v1615_v9  ;;  %v2769_v12 = vpop.f32.mrf.mxu1 }
0x183a   :  { %v1614_v14 = vadd.f32 %v3611_v13, %v1612_v8 }
0x183c   :  { %v1618_v15 = vsel %vm455_vm7, %v1614_v14, -inf }
0x183d   :  { %1619 = vmax.xlane.f32.xlu1 %v1618_v15 }
0x184e   :  { %1785 = vrot.lane.b32.xlu1 %v3569_v26, %s2991_s7 }
0x1852   :  { %1783 = vrot.lane.b32.xlu1 %v3569_v26, %s3901_s30 }
0x18c2   :  { %v1617_v17 = vpop.xlane.xlu0 %1616 }
0x18c3   :  { %v1621_v18 = vsub.f32 %v1613_v5, %v1617_v17 }
0x18c5   :  { %v1623_v20 = vmul.f32 1.442695, %v1621_v18 }
0x18c6   :  { %v1620_v19 = vpop.xlane.xlu1 %1619 }
0x18c7   :  { %2944 = vpow2.f32 %v1623_v20  ;;  %v1622_v21 = vsub.f32 %v1614_v14, %v1620_v19 }
0x18c9   :  { %v1625_v22 = vmul.f32 1.442695, %v1622_v21 }
0x18ca   :  { %v1786_v49 = vpop.permute.xlu1 %1785 }
0x18cb   :  { %2946 = vpow2.f32 %v1625_v22  ;;  %v1791_v10 = vsel %vm165_vm3, %v1786_v49, 0 }
0x18ce   :  { %v1784_v16 = vpop.permute.xlu1 %1783 }
0x18d4   :  { %v2945_v24 = vpop.eup %2944 }
0x18d5   :  { %v1627_v25 = vsel %vm451_vm6, %v2945_v24, 0.0 }
0x18d6   :  { %1628 = vadd.xlane.f32.xlu0 %v1627_v25 }
0x18d8   :  { %v2947_v23 = vpop.eup %2946 }
0x18d9   :  { %v1630_v27 = vsel %vm455_vm7, %v2947_v23, 0.0 }
0x18da   :  { %1631 = vadd.xlane.f32.xlu0 %v1630_v27 }
0x18f0   :  { %1638 = vrot.lane.b32.xlu0 %v3569_v26, %s3902_s4 }
0x195f   :  { %v1629_v28 = vpop.xlane.xlu0 %1628 }
0x1960   :  { %2948 = vrcp.f32 %v1629_v28 }
0x1963   :  { %v1632_v29 = vpop.xlane.xlu0 %1631 }
0x1964   :  { %2950 = vrcp.f32 %v1632_v29 }
0x1967   :  { %v1639_v30 = vpop.permute.xlu0 %1638 }
0x1968   :  { %v1644_v31 = vsel %vm481_vm8, %v1639_v30, 0 }
0x1969   :  { %2771 = vmatpush3.bf16.msra.mxu0 %v1644_v31 }
0x196a   :  { %2782 = vmatprep.subr.bf16.mxu0 %v2985_v41 }
0x196d   :  { %v2949_v33 = vpop.eup %2948 }
0x196e   :  { %v1635_v37 = vmul.f32 %v2949_v33, %v2945_v24  ;;  %v2490_v33 = vld [vmem:[%s3860_s11 + $0x30] sm:$0xff] }
0x196f   :  { %v1911_v34 = vpack.c.bf16 %v2490_v33, %v2490_v33 }
0x1971   :  { %v2951_v35 = vpop.eup %2950 }
0x1972   :  { %v1636_v38 = vmul.f32 %v2951_v35, %v2947_v23  ;;  %v1916_v35 = vsel %vm169_vm2, %v1911_v34, 0 }
0x1974   :  { %v1637_v40 = vpack.c.bf16 %v1636_v38, %v1635_v37 }
0x1976   :  { %2773 = vmatmul.mubr.msk.bf16.vlgmr.msra.gmra.mxu0 %vm451_vm6, %v1637_v40 }
0x1977   :  { %2783 = vmatpush3.bf16.msra.mxu0 %v1740_v42  ;;  %2784 = vmatprep.mubr.msk.bf16.mxu0 %vm2986_vm1, %v2985_v41 }
0x1978   :  { %2794 = vmatprep.subr.bf16.mxu0 %v2985_v41 }
0x197e   :  { %2785 = vmatmul.mubr.msk.bf16.vlgmr.msra.gmra.mxu0 %vm165_vm3, %v1558_v62 }
0x197f   :  { %2796 = vmatprep.mubr.msk.bf16.mxu0 %vm2986_vm1, %v2985_v41 }
0x1a36   :  { %v1680_v6 = vpop.f32.mrf.mxu0 }
0x1a38   :  { %v2774_v47 = vpop.f32.mrf.mxu0 }
0x1a3a   :  { %v1683_v50 = vpop.f32.mrf.mxu0 }
0x1a3b   :  { %v1687_v51 = vpack.c.bf16 %v1683_v50, %v1680_v6 }
0x1a3c   :  { %v2775_v11 = vpop.f32.mrf.mxu0 }
0x1a3d   :  { %2779 = vmatmul.mubr.msk.bf16.vlgmr.msra.gmra.mxu1 %vm165_vm3, %v1687_v51 }
0x1a3e   :  { %2789 = vmatpush3.bf16.xpose.msra.mxu1 %v1791_v10  ;;  %v3643_v52 = vpop.f32.mrf.mxu0  ;;  %2790 = vmatprep.mubr.msk.bf16.mxu1 %vm2986_vm1, %v2985_v41 }
0x1a3f   :  { %2800 = vmatprep.subr.bf16.mxu1 %v2985_v41 }
0x1a40   :  { %v2786_v53 = vpop.f32.mrf.mxu0 }
0x1a42   :  { %v3648_v54 = vpop.f32.mrf.mxu0 }
0x1a44   :  { %v2787_v55 = vpop.f32.mrf.mxu0 }
0x1a45   :  { %2791 = vmatmul.mubr.msk.bf16.vlgmr.msra.gmra.mxu1 %vm165_vm3, %v1784_v16 }
0x1a46   :  { %2802 = vmatprep.mubr.msk.bf16.mxu1 %vm2986_vm1, %v2985_v41  ;;  %2801 = vmatpush3.bf16.msra.mxu1 %v1916_v35 }
0x1a47   :  { %2812 = vmatprep.subr.bf16.mxu1 %v2985_v41 }
0x1afd   :  { %v3653_v56 = vpop.f32.mrf.mxu1 }
0x1aff   :  { %v2780_v2 = vpop.f32.mrf.mxu1 }
0x1b01   :  { %v3655_v57 = vpop.f32.mrf.mxu1 }
0x1b03   :  { %v2781_v58 = vpop.f32.mrf.mxu1 }
0x1b05   :  { %v1827_v36 = vpop.f32.mrf.mxu1 }
0x1b06   :  { %v1834_v39 = vmul.f32 0.35355338, %v1827_v36 }
0x1b07   :  { %v2792_v59 = vpop.f32.mrf.mxu1 }
0x1b08   :  { %v1836_v60 = vadd.f32 %v3604_v4, %v1834_v39 }
0x1b09   :  { %v1830_v61 = vpop.f32.mrf.mxu1 }
0x1b0a   :  { %v1835_v62 = vmul.f32 0.35355338, %v1830_v61  ;;  %v1838_v63 = vsel %vm451_vm6, %v1836_v60, -inf }
0x1b0b   :  { %1839 = vmax.xlane.f32.xlu0 %v1838_v63  ;;  %v2793_v0 = vpop.f32.mrf.mxu1 }
0x1b0c   :  { %v1837_v1 = vadd.f32 %v3611_v13, %v1835_v62  ;;  %v1777_v62 = vadd.f32 %v3643_v52, %v3653_v56  ;;  %v2491_v52 = vld [vmem:[%s3860_s11 + $0x38] sm:$0xff] }
0x1b0e   :  { %v1841_v3 = vsel %vm455_vm7, %v1837_v1, -inf }
0x1b0f   :  { %1842 = vmax.xlane.f32.xlu1 %v1841_v3  ;;  %v1780_v3 = vadd.f32 %v3648_v54, %v3655_v57  ;;  %v2089_v54 = vpack.c.bf16 %v2491_v52, %v2491_v52  ;;  %v2508_v52 = vld [vmem:[%s3865_s17 + $0xc0] sm:$0xff] }
0x1b11   :  { %v2094_v56 = vsel %vm169_vm2, %v2089_v54, 0  ;;  %v2509_v54 = vld [vmem:[%s3865_s17 + $0xc8] sm:$0xff] }
0x1b20   :  { %1963 = vrot.lane.b32.xlu1 %v3569_v26, %s3903_s0 }
0x1b24   :  { %1961 = vrot.lane.b32.xlu1 %v3569_v26, %s3904_s6 }
0x1b94   :  { %v1840_v5 = vpop.xlane.xlu0 %1839 }
0x1b95   :  { %v1844_v7 = vsub.f32 %v1836_v60, %v1840_v5 }
0x1b97   :  { %v1846_v8 = vmul.f32 1.442695, %v1844_v7 }
0x1b98   :  { %v1843_v9 = vpop.xlane.xlu1 %1842 }
0x1b99   :  { %2952 = vpow2.f32 %v1846_v8  ;;  %v1845_v12 = vsub.f32 %v1837_v1, %v1843_v9 }
0x1b9b   :  { %v1848_v14 = vmul.f32 1.442695, %v1845_v12 }
0x1b9c   :  { %v1964_v29 = vpop.permute.xlu1 %1963 }
0x1b9d   :  { %2954 = vpow2.f32 %v1848_v14  ;;  %v1969_v31 = vsel %vm165_vm3, %v1964_v29, 0 }
0x1ba0   :  { %v1962_v32 = vpop.permute.xlu1 %1961 }
0x1ba6   :  { %v2953_v15 = vpop.eup %2952 }
0x1ba7   :  { %v1850_v17 = vsel %vm451_vm6, %v2953_v15, 0.0 }
0x1ba8   :  { %1851 = vadd.xlane.f32.xlu0 %v1850_v17 }
0x1baa   :  { %v2955_v18 = vpop.eup %2954 }
0x1bab   :  { %v1853_v20 = vsel %vm455_vm7, %v2955_v18, 0.0 }
0x1bac   :  { %1854 = vadd.xlane.f32.xlu0 %v1853_v20 }
0x1bc2   :  { %1861 = vrot.lane.b32.xlu0 %v3569_v26, %s3905_s3 }
0x1c31   :  { %v1852_v19 = vpop.xlane.xlu0 %1851 }
0x1c32   :  { %2956 = vrcp.f32 %v1852_v19 }
0x1c35   :  { %v1855_v21 = vpop.xlane.xlu0 %1854 }
0x1c36   :  { %2958 = vrcp.f32 %v1855_v21 }
0x1c39   :  { %v1862_v22 = vpop.permute.xlu0 %1861 }
0x1c3a   :  { %v1867_v24 = vsel %vm481_vm8, %v1862_v22, 0 }
0x1c3b   :  { %2795 = vmatpush3.bf16.msra.mxu0 %v1867_v24 }
0x1c3c   :  { %2806 = vmatprep.subr.bf16.mxu0 %v2985_v41 }
0x1c3f   :  { %v2957_v25 = vpop.eup %2956 }
0x1c40   :  { %v1858_v27 = vmul.f32 %v2957_v25, %v2953_v15 }
0x1c43   :  { %v2959_v23 = vpop.eup %2958 }
0x1c44   :  { %v1859_v28 = vmul.f32 %v2959_v23, %v2955_v18 }
0x1c46   :  { %v1860_v30 = vpack.c.bf16 %v1859_v28, %v1858_v27  ;;  %v2533_v27 = vld [vmem:[%s3861_s12 + $0x1] ss:$0 sm:$0xff] }
0x1c48   :  { %2797 = vmatmul.mubr.msk.bf16.vlgmr.msra.gmra.mxu0 %vm451_vm6, %v1860_v30 }
0x1c49   :  { %2807 = vmatpush3.bf16.xpose.msra.mxu0 %v1969_v31  ;;  %2808 = vmatprep.mubr.msk.bf16.mxu0 %vm2986_vm1, %v2985_v41 }
0x1c4a   :  { %2818 = vmatprep.subr.bf16.mxu0 %v2985_v41 }
0x1c50   :  { %2809 = vmatmul.mubr.msk.bf16.vlgmr.msra.gmra.mxu0 %vm165_vm3, %v1962_v32 }
0x1c51   :  { %2820 = vmatprep.mubr.msk.bf16.mxu0 %vm2986_vm1, %v2985_v41  ;;  %2819 = vmatpush3.bf16.msra.mxu0 %v2094_v56  ;;  %v2265_v56 = vpack.c.bf16 %v2509_v54, %v2508_v52 }
0x1c52   :  { %2832 = vmatprep.subr.bf16.mxu0 %v2985_v41 }
0x1d08   :  { %v1903_v37 = vpop.f32.mrf.mxu0 }
0x1d0a   :  { %v2798_v38 = vpop.f32.mrf.mxu0 }
0x1d0c   :  { %v1906_v40 = vpop.f32.mrf.mxu0 }
0x1d0d   :  { %v1910_v42 = vpack.c.bf16 %v1906_v40, %v1903_v37 }
0x1d0e   :  { %v2799_v44 = vpop.f32.mrf.mxu0 }
0x1d0f   :  { %2803 = vmatmul.mubr.msk.bf16.vlgmr.msra.gmra.mxu1 %vm165_vm3, %v1910_v42 }
0x1d10   :  { %v2005_v45 = vpop.f32.mrf.mxu0  ;;  %2814 = vmatprep.mubr.msk.bf16.mxu1 %vm2986_vm1, %v2985_v41 }
0x1d11   :  { %v2012_v46 = vmul.f32 0.35355338, %v2005_v45 }
0x1d12   :  { %v2810_v6 = vpop.f32.mrf.mxu0 }
0x1d13   :  { %v2014_v47 = vadd.f32 %v3604_v4, %v2012_v46 }
0x1d14   :  { %v2008_v49 = vpop.f32.mrf.mxu0 }
0x1d15   :  { %v2013_v50 = vmul.f32 0.35355338, %v2008_v49  ;;  %v2016_v51 = vsel %vm451_vm6, %v2014_v47, -inf }
0x1d16   :  { %2017 = vmax.xlane.f32.xlu1 %v2016_v51  ;;  %v2811_v11 = vpop.f32.mrf.mxu0  ;;  %v2498_v51 = vld [vmem:[%s3862_s15 + $0x38] sm:$0xff] }
0x1d17   :  { %v2015_v10 = vadd.f32 %v3611_v13, %v2013_v50  ;;  %v2497_v50 = vld [vmem:[%s3862_s15 + $0x30] sm:$0xff] }
0x1d18   :  { %v2193_v11 = vpack.c.bf16 %v2498_v51, %v2497_v50 }
0x1d19   :  { %v2019_v53 = vsel %vm455_vm7, %v2015_v10, -inf }
0x1d1a   :  { %2020 = vmax.xlane.f32.xlu0 %v2019_v53  ;;  %v2496_v53 = vld [vmem:[%s3862_s15 + $0x28] sm:$0xff] }
0x1d27   :  { %2039 = vrot.lane.b32.xlu1 %v3569_v26, %s3906_s2 }
0x1d9f   :  { %v2018_v16 = vpop.xlane.xlu1 %2017 }
0x1da0   :  { %v2022_v55 = vsub.f32 %v2014_v47, %v2018_v16 }
0x1da2   :  { %v2024_v2 = vmul.f32 1.442695, %v2022_v55 }
0x1da3   :  { %v2040_v58 = vpop.permute.xlu1 %2039  ;;  %v2021_v36 = vpop.xlane.xlu0 %2020 }
0x1da4   :  { %2960 = vpow2.f32 %v2024_v2  ;;  %v2045_v4 = vsel %vm481_vm8, %v2040_v58, 0  ;;  %v2023_v39 = vsub.f32 %v2015_v10, %v2021_v36  ;;  %v2495_v10 = vld [vmem:[%s3862_s15 + $0x20] sm:$0xff] }
0x1da5   :  { %2813 = vmatpush3.bf16.msra.mxu1 %v2045_v4  ;;  %v2192_v16 = vpack.c.bf16 %v2496_v53, %v2495_v10 }
0x1da6   :  { %v2026_v59 = vmul.f32 1.442695, %v2023_v39  ;;  %2824 = vmatprep.subr.bf16.mxu1 %v2985_v41 }
0x1da8   :  { %2962 = vpow2.f32 %v2026_v59 }
0x1db1   :  { %v2961_v13 = vpop.eup %2960 }
0x1db2   :  { %v2028_v60 = vsel %vm451_vm6, %v2961_v13, 0.0 }
0x1db3   :  { %2029 = vadd.xlane.f32.xlu0 %v2028_v60  ;;  %v2534_v60 = vld [vmem:[%s3863_s13 + $0x1] ss:$0 sm:$0xff] }
0x1db5   :  { %v2963_v61 = vpop.eup %2962 }
0x1db6   :  { %v2031_v26 = vsel %vm455_vm7, %v2963_v61, 0.0 }
0x1db7   :  { %2032 = vadd.xlane.f32.xlu0 %v2031_v26 }
0x1dcf   :  { %v1952_v63 = vpop.f32.mrf.mxu1 }
0x1dd0   :  { %v1959_v0 = vadd.f32 %v1952_v63, %v1777_v62  ;;  %v2535_v63 = vld [vmem:[%s3864_s14 + $0x1] ss:$0 sm:$0xff] }
0x1dd1   :  { %v2804_v1 = vpop.f32.mrf.mxu1 }
0x1dd3   :  { %v1955_v5 = vpop.f32.mrf.mxu1 }
0x1dd4   :  { %v1960_v7 = vadd.f32 %v1955_v5, %v1780_v3 }
0x1dd5   :  { %v2805_v8 = vpop.f32.mrf.mxu1 }
0x1dd6   :  { %v2515_v8 = vld [vmem:[%s3865_s17 + $0xf8] sm:$0xff] }
0x1e3c   :  { %v2030_v9 = vpop.xlane.xlu0 %2029 }
0x1e3d   :  { %2964 = vrcp.f32 %v2030_v9 }
0x1e40   :  { %v2033_v12 = vpop.xlane.xlu0 %2032 }
0x1e41   :  { %2966 = vrcp.f32 %v2033_v12  ;;  %v2512_v12 = vld [vmem:[%s3865_s17 + $0xe0] sm:$0xff] }
0x1e4a   :  { %v2965_v14 = vpop.eup %2964 }
0x1e4b   :  { %v2036_v17 = vmul.f32 %v2965_v14, %v2961_v13  ;;  %v2513_v14 = vld [vmem:[%s3865_s17 + $0xe8] sm:$0xff] }
0x1e4e   :  { %v2967_v15 = vpop.eup %2966 }
0x1e4f   :  { %v2037_v18 = vmul.f32 %v2967_v15, %v2963_v61  ;;  %v2267_v15 = vpack.c.bf16 %v2513_v14, %v2512_v12  ;;  %v2400_v14 = vld [vmem:[%s3869_s22 + $0x10] sm:$0xff] }
0x1e51   :  { %v2038_v20 = vpack.c.bf16 %v2037_v18, %v2036_v17  ;;  %v2510_v17 = vld [vmem:[%s3865_s17 + $0xd0] sm:$0xff]  ;;  %v2511_v18 = vld [vmem:[%s3865_s17 + $0xd8] sm:$0xff] }
0x1e53   :  { %2815 = vmatmul.mubr.msk.bf16.vlgmr.msra.gmra.mxu1 %vm451_vm6, %v2038_v20  ;;  %v2266_v20 = vpack.c.bf16 %v2511_v18, %v2510_v17  ;;  %v2398_v18 = vld [vmem:[%s3869_s22] sm:$0xff] }
0x1e54   :  { %2828 = vmatprep.mubr.msk.bf16.mxu1 %vm2986_vm1, %v2985_v41  ;;  %2825 = vmatpush3.bf16.msra.mxu1 %v2193_v11 }
0x1e55   :  { %2826 = vmatprep.subr.bf16.mxu1 %v2985_v41 }
0x1e58   :  { %2827 = vmatpush3.bf16.msra.mxu1 %v2192_v16 }
0x1e59   :  { %2852 = vmatprep.subr.bf16.mxu1 %v2985_v41 }
0x1f13   :  { %v2081_v57 = vpop.f32.mrf.mxu1 }
0x1f15   :  { %v2816_v19 = vpop.f32.mrf.mxu1 }
0x1f16   :  { %v2507_v19 = vld [vmem:[%s3865_s17 + $0xb8] sm:$0xff] }
0x1f17   :  { %v2084_v21 = vpop.f32.mrf.mxu1 }
0x1f18   :  { %v2088_v22 = vpack.c.bf16 %v2084_v21, %v2081_v57  ;;  %v2506_v57 = vld [vmem:[%s3865_s17 + $0xb0] sm:$0xff] }
0x1f19   :  { %v2817_v24 = vpop.f32.mrf.mxu1  ;;  %v2264_v21 = vpack.c.bf16 %v2507_v19, %v2506_v57 }
0x1f1a   :  { %2821 = vmatmul.mubr.msk.bf16.vlgmr.msra.gmra.mxu0 %vm165_vm3, %v2088_v22  ;;  %v2504_v22 = vld [vmem:[%s3865_s17 + $0xa0] sm:$0xff]  ;;  %v2505_v24 = vld [vmem:[%s3865_s17 + $0xa8] sm:$0xff] }
0x1f1b   :  { %2848 = vmatprep.mubr.msk.bf16.mxu0 %vm2986_vm1, %v2985_v41 }
0x1fda   :  { %v2130_v25 = vpop.f32.mrf.mxu0 }
0x1fdb   :  { %v2137_v23 = vadd.f32 %v2130_v25, %v1959_v0  ;;  %v2263_v25 = vpack.c.bf16 %v2505_v24, %v2504_v22  ;;  %v2543_v24 = vld [vmem:[%s3871_s20] ss:$0 sm:$0xff] }
0x1fdc   :  { %v2822_v28 = vpop.f32.mrf.mxu0 }
0x1fdd   :  { %v2139_v29 = vadd.f32 %v2137_v23, %v3530_v43  ;;  %v2502_v23 = vld [vmem:[%s3865_s17 + $0x90] sm:$0xff] }
0x1fde   :  { %v2133_v30 = vpop.f32.mrf.mxu0 }
0x1fdf   :  { %v3716_v31 = vadd.f32 %v2533_v27, %v2139_v29  ;;  %v2138_v32 = vadd.f32 %v2133_v30, %v1960_v7  ;;  %v2514_v7 = vld [vmem:[%s3865_s17 + $0xf0] sm:$0xff]  ;;  %v2500_v29 = vld [vmem:[%s3865_s17 + $0x80] sm:$0xff]  ;;  %v2501_v30 = vld [vmem:[%s3865_s17 + $0x88] sm:$0xff] }
0x1fe0   :  { %v2823_v33 = vpop.f32.mrf.mxu0  ;;  %v2268_v9 = vpack.c.bf16 %v2515_v8, %v2514_v7 }
0x1fe1   :  { %v2140_v34 = vadd.f32 %v2138_v32, %v3535_v48  ;;  %v2149_v35 = vsel %vm218_vm4, %v3716_v31, 0.0  ;;  %v2261_v32 = vpack.c.bf16 %v2501_v30, %v2500_v29  ;;  %v2536_v33 = vld [vmem:[%s3866_s16 + $0x1] ss:$0 sm:$0xff] }
0x1fe2   :  { %2150 = vadd.xlane.f32.xlu0 %v2149_v35  ;;  %2833 = vmatpush3.bf16.msra.mxu0 %v2268_v9 }
0x1fe3   :  { %v3721_v37 = vadd.f32 %v2533_v27, %v2140_v34  ;;  %2834 = vmatprep.subr.bf16.mxu0 %v2985_v41  ;;  %v2503_v27 = vld [vmem:[%s3865_s17 + $0x98] sm:$0xff] }
0x1fe4   :  { %v2262_v28 = vpack.c.bf16 %v2503_v27, %v2502_v23 }
0x1fe5   :  { %v2152_v38 = vsel %vm222_vm5, %v3721_v37, 0.0 }
0x1fe6   :  { %2153 = vadd.xlane.f32.xlu0 %v2152_v38  ;;  %2835 = vmatpush3.bf16.msra.mxu0 %v2267_v15  ;;  %v2401_v15 = vld [vmem:[%s3869_s22 + $0x18] sm:$0xff] }
0x1fe7   :  { %2836 = vmatprep.subr.bf16.mxu0 %v2985_v41  ;;  %v2404_v17 = vpack.c.bf16 %v2401_v15, %v2400_v14 }
0x1fea   :  { %2837 = vmatpush3.bf16.msra.mxu0 %v2266_v20  ;;  %v2399_v20 = vld [vmem:[%s3869_s22 + $0x8] sm:$0xff] }
0x1feb   :  { %2838 = vmatprep.subr.bf16.mxu0 %v2985_v41  ;;  %v2403_v52 = vpack.c.bf16 %v2399_v20, %v2398_v18 }
0x1fee   :  { %2839 = vmatpush3.bf16.msra.mxu0 %v2265_v56 }
0x1fef   :  { %2840 = vmatprep.subr.bf16.mxu0 %v2985_v41 }
0x1ff2   :  { %2841 = vmatpush3.bf16.msra.mxu0 %v2264_v21  ;;  %v2542_v21 = vld [vmem:[%s3870_s19] ss:$0 sm:$0xff] }
0x1ff3   :  { %2842 = vmatprep.subr.bf16.mxu0 %v2985_v41 }
0x1ff6   :  { %2843 = vmatpush3.bf16.msra.mxu0 %v2263_v25 }
0x1ff7   :  { %2844 = vmatprep.subr.bf16.mxu0 %v2985_v41 }
0x1ffa   :  { %2845 = vmatpush3.bf16.msra.mxu0 %v2262_v28 }
0x1ffb   :  { %2846 = vmatprep.subr.bf16.mxu0 %v2985_v41 }
0x1ffe   :  { %2847 = vmatpush3.bf16.msra.mxu0 %v2261_v32 }
0x206b   :  { %v2151_v40 = vpop.xlane.xlu0 %2150 }
0x206c   :  { %v2155_v42 = vmul.f32 0.03125, %v2151_v40 }
0x206e   :  { %v2157_v43 = vsub.f32 %v3716_v31, %v2155_v42 }
0x206f   :  { %v2154_v44 = vpop.xlane.xlu0 %2153 }
0x2070   :  { %v2156_v45 = vmul.f32 0.03125, %v2154_v44  ;;  %v2159_v46 = vmul.f32 %v2157_v43, %v2157_v43 }
0x2072   :  { %v2158_v6 = vsub.f32 %v3721_v37, %v2156_v45  ;;  %v2161_v48 = vsel %vm218_vm4, %v2159_v46, 0.0 }
0x2073   :  { %2162 = vadd.xlane.f32.xlu0 %v2161_v48 }
0x2074   :  { %v2160_v47 = vmul.f32 %v2158_v6, %v2158_v6 }
0x2076   :  { %v2164_v49 = vsel %vm222_vm5, %v2160_v47, 0.0 }
0x2077   :  { %2165 = vadd.xlane.f32.xlu0 %v2164_v49 }
0x20fc   :  { %v2163_v55 = vpop.xlane.xlu0 %2162 }
0x20fd   :  { %v2167_v2 = vmul.f32 0.03125, %v2163_v55 }
0x20ff   :  { %v2169_v58 = vadd.f32 1e-05, %v2167_v2 }
0x2100   :  { %v2166_v36 = vpop.xlane.xlu0 %2165 }
0x2101   :  { %2968 = vrsqrt.f32 %v2169_v58  ;;  %v2168_v4 = vmul.f32 0.03125, %v2166_v36  ;;  %v2540_v36 = vld [vmem:[%s3867_s18 + $0x1] ss:$0 sm:$0xff] }
0x2103   :  { %v2170_v39 = vadd.f32 1e-05, %v2168_v4 }
0x2105   :  { %2970 = vrsqrt.f32 %v2170_v39 }
0x210e   :  { %v2969_v59 = vpop.eup %2968 }
0x210f   :  { %v2173_v13 = vmul.f32 %v2969_v59, %v2157_v43 }
0x2111   :  { %v2181_v62 = vmul.f32 %v2534_v60, %v2173_v13 }
0x2112   :  { %v2971_v61 = vpop.eup %2970 }
0x2113   :  { %v2174_v26 = vmul.f32 %v2971_v61, %v2158_v6  ;;  %v2189_v1 = vadd.f32 %v2535_v63, %v2181_v62  ;;  %v2320_v61 = vld [vmem:[%s3868_s21] sm:$0x3] }
0x2115   :  { %v2182_v0 = vmul.f32 %v2534_v60, %v2174_v26 }
0x2117   :  { %v2190_v3 = vadd.f32 %v2535_v63, %v2182_v0  ;;  %v2321_v63 = vpack.c.bf16 %v2320_v61, %v2320_v61 }
0x2119   :  { %v2191_v5 = vpack.c.bf16 %v2190_v3, %v2189_v1 }
0x211b   :  { %2829 = vmatmul.mubr.msk.bf16.vlgmr.msra.gmra.mxu1 %vm218_vm4, %v2191_v5 }
0x211c   :  { %2854 = vmatprep.mubr.msk.bf16.mxu1 %vm2986_vm1, %v2985_v41 }
0x21db   :  { %v2237_v34 = vpop.f32.mrf.mxu1 }
0x21dc   :  { %v2238_v35 = vadd.f32 %v2536_v33, %v2237_v34 }
0x21dd   :  { %v2830_v38 = vpop.f32.mrf.mxu1 }
0x21de   :  { %v2538_v40 = vmul.f32 -1.702, %v2238_v35 }
0x21df   :  { %v2240_v42 = vpop.f32.mrf.mxu1 }
0x21e0   :  { %v2248_v43 = vmul.f32 1.442695, %v2538_v40  ;;  %v2241_v44 = vadd.f32 %v2536_v33, %v2240_v42 }
0x21e1   :  { %v2831_v45 = vpop.f32.mrf.mxu1 }
0x21e2   :  { %2972 = vpow2.f32 %v2248_v43  ;;  %v2539_v46 = vmul.f32 -1.702, %v2241_v44 }
0x21e4   :  { %v2250_v6 = vmul.f32 1.442695, %v2539_v46 }
0x21e6   :  { %2974 = vpow2.f32 %v2250_v6 }
0x21ef   :  { %v2973_v48 = vpop.eup %2972 }
0x21f0   :  { %v2252_v47 = vadd.f32 1.0, %v2973_v48 }
0x21f2   :  { %2976 = vrcp.f32 %v2252_v47 }
0x21f3   :  { %v2975_v49 = vpop.eup %2974 }
0x21f4   :  { %v2253_v50 = vadd.f32 1.0, %v2975_v49 }
0x21f6   :  { %2978 = vrcp.f32 %v2253_v50 }
0x21ff   :  { %v2977_v51 = vpop.eup %2976 }
0x2200   :  { %v2258_v10 = vmul.f32 %v2977_v51, %v2238_v35 }
0x2203   :  { %v2979_v11 = vpop.eup %2978 }
0x2204   :  { %v2259_v53 = vmul.f32 %v2979_v11, %v2241_v44 }
0x2206   :  { %v2260_v16 = vpack.c.bf16 %v2259_v53, %v2258_v10 }
0x2208   :  { %2849 = vmatmul.mubr.bf16.vlgmr.msra.gmra.mxu0 %v2260_v16 }
0x22c8   :  { %v2303_v55 = vpop.f32.mrf.mxu0 }
0x22c9   :  { %v2310_v58 = vadd.f32 %v2303_v55, %v3716_v31 }
0x22ca   :  { %v2850_v2 = vpop.f32.mrf.mxu0 }
0x22cb   :  { %v2318_v13 = vadd.f32 %v2540_v36, %v2310_v58 }
0x22cc   :  { %v2306_v4 = vpop.f32.mrf.mxu0 }
0x22cd   :  { %v2311_v39 = vadd.f32 %v2306_v4, %v3721_v37 }
0x22ce   :  { %v2851_v59 = vpop.f32.mrf.mxu0 }
0x22cf   :  { %v2319_v60 = vadd.f32 %v2540_v36, %v2311_v39 }
0x22d1   :  { %v2322_v26 = vpack.c.bf16 %v2319_v60, %v2318_v13 }
0x22d3   :  { %v2327_v62 = vsel %vm481_vm8, %v2322_v26, 0 }
0x22d4   :  { %2853 = vmatpush3.bf16.msra.mxu1 %v2327_v62 }
0x22d5   :  { %2858 = vmatprep.subr.bf16.mxu1 %v2985_v41 }
0x22d7   :  { %2855 = vmatmul.mubr.msk.bf16.vlgmr.msra.gmra.mxu1 %vm451_vm6, %v2321_v63 }
0x22d8   :  { %2862 = vmatprep.mubr.msk.bf16.mxu1 %vm2986_vm1, %v2985_v41  ;;  %2859 = vmatpush3.bf16.msra.mxu1 %v2404_v17 }
0x22d9   :  { %2860 = vmatprep.subr.bf16.mxu1 %v2985_v41 }
0x22dc   :  { %2861 = vmatpush3.bf16.msra.mxu1 %v2403_v52 }
0x2397   :  { %v2363_v31 = vpop.f32.mrf.mxu1 }
0x2398   :  { %v2371_v37 = vsel %vm222_vm5, %v2363_v31, 0.0 }
0x2399   :  { %2372 = vadd.xlane.f32.xlu1 %v2371_v37  ;;  %v2856_v0 = vpop.f32.mrf.mxu1 }
0x239b   :  { %v2366_v1 = vpop.f32.mrf.mxu1 }
0x239d   :  { %v2857_v3 = vpop.f32.mrf.mxu1 }
0x2422   :  { %v2373_v5 = vpop.xlane.xlu1 %2372 }
0x2423   :  { %v2374_v7 = vmul.f32 0.03125, %v2373_v5 }
0x2425   :  { %v2375_v8 = vsub.f32 %v2363_v31, %v2374_v7 }
0x2427   :  { %v2376_v9 = vmul.f32 %v2375_v8, %v2375_v8 }
0x2429   :  { %v2377_v12 = vsel %vm222_vm5, %v2376_v9, 0.0 }
0x242a   :  { %2378 = vadd.xlane.f32.xlu0 %v2377_v12 }
0x24b3   :  { %v2379_v54 = vpop.xlane.xlu0 %2378 }
0x24b4   :  { %v2380_v56 = vmul.f32 0.03125, %v2379_v54 }
0x24b6   :  { %v2381_v57 = vadd.f32 1e-05, %v2380_v56 }
0x24b8   :  { %2980 = vrsqrt.f32 %v2381_v57 }
0x24c5   :  { %v2981_v19 = vpop.eup %2980 }
0x24c6   :  { %v2383_v22 = vmul.f32 %v2981_v19, %v2375_v8 }
0x24c8   :  { %v2390_v25 = vmul.f32 %v2542_v21, %v2383_v22 }
0x24ca   :  { %v2397_v23 = vadd.f32 %v2543_v24, %v2390_v25 }
0x24cc   :  { %v2402_v27 = vpack.c.bf16 %v2397_v23, %v2397_v23 }
0x24ce   :  { %2863 = vmatmul.mubr.msk.bf16.vlgmr.msra.gmra.mxu1 %vm218_vm4, %v2402_v27 }
0x258e   :  { %v2442_v41 = vpop.f32.mrf.mxu1 }
0x258f   :  { %2448 = vst.msk [vmem:[%s3872_s23] sm:$0x3] %vm222_vm5, %v2442_v41 }
0x2590   :  { %v2864_v28 = vpop.f32.mrf.mxu1 }
0x2592   :  { %v2445_v29 = vpop.f32.mrf.mxu1 }
0x2594   :  { %v2865_v30 = vpop.f32.mrf.mxu1 }

</bundles_post_ra>
